<compile_context>
chip_gen: v7x
topology: tpu7x:2x2x1
jax: 0.10.0
libtpu: 0.0.40
codegen_flags: <defaults>
</compile_context>

<pallas_src>
import functools

import jax
import jax.numpy as jnp
from jax import lax
from jax.experimental import pallas as pl
from jax.experimental.pallas import tpu as pltpu

COMPUTE_DTYPE = jnp.bfloat16   # MXU input dtype; accumulation stays f32.
FC_CHUNKS = 4                  # K-chunks folded into the FC weight's lane dim (4*32 = 128 lanes).


def _ceil_to(x, m):
    return ((x + m - 1) // m) * m


# ----------------------------------------------------------------------------
# Pallas kernel: single-K-block fused GEMM:  out = act(x @ w [+ b]).
# Full K and N per grid step (all layers here have small K/N), so there is no
# accumulator / init / finalize structure: one dot, bias + LeakyReLU in f32 on
# the accumulator, store in the output dtype (bf16 for convs, f32 for the fc).
# ----------------------------------------------------------------------------
def _gemm_fused_kernel(*refs, apply_act, neg_slope, has_bias):
    if has_bias:
        x_ref, w_ref, b_ref, o_ref = refs
    else:
        x_ref, w_ref, o_ref = refs
    y = jnp.dot(x_ref[...], w_ref[...], preferred_element_type=jnp.float32)
    if has_bias:
        y = y + b_ref[...]
    if apply_act:
        y = jnp.where(y > 0, y, neg_slope * y)
    o_ref[...] = y.astype(o_ref.dtype)


def gemm_fused(x, w, b=None, *, apply_act=False, neg_slope=0.01, tm=None,
               out_dtype=jnp.float32):
    """out = act(x @ w [+ b]).  x:(M,K), w:(K,N), b:(1,N) f32.  Returns (M,N) out_dtype.

    Only M is tiled by the grid; K and N are whole blocks (no K/N padding at all).
    tm=None (or tm >= M) -> a single full-M block (full-dim blocks are exempt from
    the (8,128) divisibility rule, so e.g. M=8 for the fc needs no padding).
    """
    M, K = x.shape
    Kw, N = w.shape
    assert K == Kw
    if tm is None or tm >= M:
        tm = M
        Mp = M
    else:
        assert tm % 8 == 0
        Mp = _ceil_to(M, tm)
    if Mp != M:
        x = jnp.pad(x, ((0, Mp - M), (0, 0)))

    has_bias = b is not None
    in_specs = [pl.BlockSpec((tm, K), lambda i: (i, 0)),
                pl.BlockSpec((K, N), lambda i: (0, 0))]
    args = [x, w]
    if has_bias:
        in_specs.append(pl.BlockSpec((1, N), lambda i: (0, 0)))
        args.append(b)

    kernel = functools.partial(_gemm_fused_kernel, apply_act=apply_act,
                               neg_slope=neg_slope, has_bias=has_bias)
    out = pl.pallas_call(
        kernel,
        out_shape=jax.ShapeDtypeStruct((Mp, N), out_dtype),
        grid=(Mp // tm,),
        in_specs=in_specs,
        out_specs=pl.BlockSpec((tm, N), lambda i: (i, 0)),
        compiler_params=pltpu.CompilerParams(dimension_semantics=("parallel",)),
    )(*args)
    if Mp != M:
        out = out[:M]
    return out


# ----------------------------------------------------------------------------
# Conv2d (NHWC in/out, bf16) = im2col glue + fused Pallas GEMM (bias + LeakyReLU).
# ----------------------------------------------------------------------------
def conv2d_gemm_nhwc(x, wmat, b, *, kh, kw, stride, padding, tm):
    """x: (B,H,W,C) bf16 NHWC.  wmat: (kh*kw*C, OC) bf16.  Returns (B,OH,OW,OC) bf16."""
    B, H, W, C = x.shape
    OH = (H + 2 * padding - kh) // stride + 1
    OW = (W + 2 * padding - kw) // stride + 1
    xpad = jnp.pad(x, ((0, 0), (padding, padding), (padding, padding), (0, 0)))
    # im2col glue (tap-major, channel-minor to match the weight layout below).
    # TODO(synk): fold the kh*kw taps into the GEMM grid instead of materializing cols.
    patches = [
        xpad[:, i: i + stride * (OH - 1) + 1: stride,
                j: j + stride * (OW - 1) + 1: stride, :]
        for i in range(kh) for j in range(kw)
    ]
    cols = jnp.stack(patches, axis=3).reshape(B * OH * OW, kh * kw * C)
    out = gemm_fused(cols, wmat, b, apply_act=True, tm=tm, out_dtype=COMPUTE_DTYPE)
    return out.reshape(B, OH, OW, -1)


# ----------------------------------------------------------------------------
# One-time weight preparation (off the hot path).
# ----------------------------------------------------------------------------
def prepare_params(p):
    """Transpose / reshape / repack / cast all weights once."""
    def conv_wmat(w):  # (OC, IC, KH, KW) -> (KH*KW*IC, OC), compute dtype
        oc, ic, kh, kw = w.shape
        return (jnp.transpose(w, (2, 3, 1, 0))
                .reshape(kh * kw * ic, oc)
                .astype(COMPUTE_DTYPE))

    # FC weight: torch stores (z, 16*16*256) with columns in NCHW flatten order.
    z, kfc = p["wfc"].shape
    c3 = p["w3"].shape[0]                       # conv3 out channels (256)
    hw = int(round((kfc // c3) ** 0.5))         # spatial extent (16)
    assert hw * hw * c3 == kfc and kfc % FC_CHUNKS == 0
    # 1) permute rows to NHWC flatten order (kills the runtime NHWC->NCHW transpose),
    wfc_nhwc = (p["wfc"].reshape(z, c3, hw, hw)     # (z, c, h, w)
                .transpose(2, 3, 1, 0)              # (h, w, c, z)
                .reshape(kfc, z))
    # 2) repack 4 K-chunks side by side in the lane dim -> lane-dense (K/4, 4*z).
    kc = kfc // FC_CHUNKS
    wfc_rep = (wfc_nhwc.reshape(FC_CHUNKS, kc, z)
               .transpose(1, 0, 2)
               .reshape(kc, FC_CHUNKS * z)
               .astype(COMPUTE_DTYPE))

    return {
        "w1": conv_wmat(p["w1"]), "b1": p["b1"].astype(jnp.float32).reshape(1, -1),
        "w2": conv_wmat(p["w2"]), "b2": p["b2"].astype(jnp.float32).reshape(1, -1),
        "w3": conv_wmat(p["w3"]), "b3": p["b3"].astype(jnp.float32).reshape(1, -1),
        "wfc": wfc_rep,                                   # (16384, 128) bf16, lane-dense
        "bfc": p["bfc"].astype(jnp.float32).reshape(1, -1),
    }


# ----------------------------------------------------------------------------
# Descriptor forward
# ----------------------------------------------------------------------------
@jax.jit
def descriptor_forward(x_nchw, gp):
    x = jnp.transpose(x_nchw, (0, 2, 3, 1)).astype(COMPUTE_DTYPE)     # NHWC bf16, once
    # conv1: M=B*31*31=1922, K=75, N=64  -> grid (2,)  (2 parallel M steps for v7x)
    x = conv2d_gemm_nhwc(x, gp["w1"], gp["b1"], kh=5, kw=5, stride=2, padding=1, tm=1024)
    # conv2: M=512, K=576,  N=128 -> grid (1,)
    x = conv2d_gemm_nhwc(x, gp["w2"], gp["b2"], kh=3, kw=3, stride=2, padding=1, tm=512)
    # conv3: M=512, K=1152, N=256 -> grid (1,)
    x = conv2d_gemm_nhwc(x, gp["w3"], gp["b3"], kh=3, kw=3, stride=1, padding=1, tm=512)
    B = x.shape[0]
    z = gp["bfc"].shape[-1]
    # FC: flatten in NHWC order (weight rows were permuted to match) and fold the
    # 4 K-chunks into extra LHS rows -> (B*4, 16384); pure reshape, no transpose,
    # no M padding.  Single grid step: (8,16384)bf16 @ (16384,128)bf16 -> (8,128)f32.
    lhs = x.reshape(B * FC_CHUNKS, -1)
    out_big = gemm_fused(lhs, gp["wfc"], apply_act=False, out_dtype=jnp.float32)
    # Tiny XLA epilogue: chunk-diagonal reduce + bias on a (B,4,4,z) = 4 KB array.
    ob = out_big.reshape(B, FC_CHUNKS, FC_CHUNKS, z)
    return jnp.diagonal(ob, axis1=1, axis2=2).sum(axis=-1) + gp["bfc"]


def init_params(key, z_size):
    ks = jax.random.split(key, 8)

    def conv_w(k, oc, ic, kh, kw):
        fan_in = ic * kh * kw
        return jax.random.normal(k, (oc, ic, kh, kw), jnp.float32) / jnp.sqrt(fan_in)

    return {
        "w1": conv_w(ks[0], 64, 3, 5, 5),
        "b1": 0.01 * jax.random.normal(ks[1], (64,), jnp.float32),
        "w2": conv_w(ks[2], 128, 64, 3, 3),
        "b2": 0.01 * jax.random.normal(ks[3], (128,), jnp.float32),
        "w3": conv_w(ks[4], 256, 128, 3, 3),
        "b3": 0.01 * jax.random.normal(ks[5], (256,), jnp.float32),
        "wfc": jax.random.normal(ks[6], (z_size, 16 * 16 * 256), jnp.float32)
        / jnp.sqrt(16 * 16 * 256),
        "bfc": 0.01 * jax.random.normal(ks[7], (z_size,), jnp.float32),
    }


# ----------------------------------------------------------------------------
# Pure-JAX f32 reference (for correctness check)
# ----------------------------------------------------------------------------
def _ref_forward(x, p):
    def conv(x, w, b, stride, padding):
        y = lax.conv_general_dilated(
            x, w, window_strides=(stride, stride),
            padding=((padding, padding), (padding, padding)),
            dimension_numbers=("NCHW", "OIHW", "NCHW"),
            precision=lax.Precision.HIGHEST,
        )
        return y + b[None, :, None, None]

    lrelu = lambda t: jnp.where(t > 0, t, 0.01 * t)
    out = lrelu(conv(x, p["w1"], p["b1"], 2, 1))
    out = lrelu(conv(out, p["w2"], p["b2"], 2, 1))
    out = lrelu(conv(out, p["w3"], p["b3"], 1, 1))
    flat = out.reshape(out.shape[0], -1)
    return jnp.dot(flat, p["wfc"].T, precision=lax.Precision.HIGHEST) + p["bfc"]


if __name__ == "__main__":
    key = jax.random.PRNGKey(0)
    k_x, k_p = jax.random.split(key)

    # fc in_features = 16*16*256 hard-codes a 64x64 input; batch kept small.
    B, C, H, W = 2, 3, 64, 64
    z_size = 32
    x = jax.random.normal(k_x, (B, C, H, W), jnp.float32)
    params = init_params(k_p, z_size)
    gemm_params = prepare_params(params)   # one-time weight prep, off the hot path

    out = jax.block_until_ready(descriptor_forward(x, gemm_params))
    assert out.shape == (B, z_size), out.shape

    ref = jax.block_until_ready(_ref_forward(x, params))
    # bf16 MXU inputs with f32 accumulation vs. f32-HIGHEST reference.
    assert jnp.allclose(out, ref, rtol=2e-2, atol=2e-2), (
        float(jnp.max(jnp.abs(out - ref)))
    )

    print("KERNEL_OK")
</pallas_src>

<mosaic_0001>
module attributes {stable_mosaic.version = 11 : i64} {
  func.func @_gemm_fused_kernel(%arg0: i32, %arg1: memref<1024x75xbf16, #tpu.memory_space<vmem>>, %arg2: memref<75x64xbf16, #tpu.memory_space<vmem>>, %arg3: memref<1x64xf32, #tpu.memory_space<vmem>>, %arg4: memref<1024x64xbf16, #tpu.memory_space<vmem>>) attributes {dimension_semantics = [#tpu.dimension_semantics<parallel>], iteration_bounds = array<i64: 2>, scalar_prefetch = 0 : i64, scratch_operands = 0 : i64, tpu.core_type = #tpu.core_type<tc>, window_params = [{transform_indices = @transform_0, window_bounds = array<i64: 1024, 75>}, {pipeline_mode = #tpu.pipeline_mode<synchronous>, transform_indices = @transform_1, window_bounds = array<i64: 75, 64>}, {pipeline_mode = #tpu.pipeline_mode<synchronous>, transform_indices = @transform_2, window_bounds = array<i64: 1, 64>}, {transform_indices = @transform_3, window_bounds = array<i64: 1024, 64>}]} {
    %c0 = arith.constant 0 : index
    %c0_0 = arith.constant 0 : index
    %0 = vector.load %arg1[%c0, %c0_0] : memref<1024x75xbf16, #tpu.memory_space<vmem>>, vector<1024x75xbf16>
    %c0_1 = arith.constant 0 : index
    %c0_2 = arith.constant 0 : index
    %1 = vector.load %arg2[%c0_1, %c0_2] : memref<75x64xbf16, #tpu.memory_space<vmem>>, vector<75x64xbf16>
    %cst = arith.constant dense<0.000000e+00> : vector<1024x64xf32>
    %2 = tpu.matmul %0, %1, %cst {dimension_numbers = #tpu.dot_dimension_numbers<[1], [0], [0], [1], [0, 0, 1, 1], [], []>} : vector<1024x75xbf16>, vector<75x64xbf16>, vector<1024x64xf32> -> vector<1024x64xf32>
    %c0_3 = arith.constant 0 : index
    %c0_4 = arith.constant 0 : index
    %3 = vector.load %arg3[%c0_3, %c0_4] : memref<1x64xf32, #tpu.memory_space<vmem>>, vector<1x64xf32>
    %4 = vector.broadcast %3 : vector<1x64xf32> to vector<1024x64xf32>
    %5 = arith.addf %2, %4 : vector<1024x64xf32>
    %cst_5 = arith.constant 0.000000e+00 : f32
    %6 = vector.broadcast %cst_5 : f32 to vector<1024x64xf32>
    %7 = arith.cmpf ogt, %5, %6 : vector<1024x64xf32>
    %cst_6 = arith.constant 0.00999999977 : f32
    %8 = vector.broadcast %cst_6 : f32 to vector<1024x64xf32>
    %9 = arith.mulf %8, %5 : vector<1024x64xf32>
    %10 = arith.select %7, %5, %9 : vector<1024x64xi1>, vector<1024x64xf32>
    %11 = arith.truncf %10 : vector<1024x64xf32> to vector<1024x64xbf16>
    %c0_7 = arith.constant 0 : index
    %c0_8 = arith.constant 0 : index
    %12 = vector.load %arg4[%c0_7, %c0_8] : memref<1024x64xbf16, #tpu.memory_space<vmem>>, vector<1024x64xbf16>
    tpu.vector_store %arg4[%c0_7, %c0_8], %11 {strides = array<i32>} : memref<1024x64xbf16, #tpu.memory_space<vmem>>, vector<1024x64xbf16>,
    return
  }
  func.func @transform_0(%arg0: i32) -> (i32, i32) {
    %c0_i32 = arith.constant 0 : i32
    %c0_i32_0 = arith.constant 0 : i32
    return %arg0, %c0_i32 : i32, i32
  }
  func.func @transform_1(%arg0: i32) -> (i32, i32) {
    %c0_i32 = arith.constant 0 : i32
    %c0_i32_0 = arith.constant 0 : i32
    %c0_i32_1 = arith.constant 0 : i32
    return %c0_i32, %c0_i32_0 : i32, i32
  }
  func.func @transform_2(%arg0: i32) -> (i32, i32) {
    %c0_i32 = arith.constant 0 : i32
    %c0_i32_0 = arith.constant 0 : i32
    %c0_i32_1 = arith.constant 0 : i32
    return %c0_i32, %c0_i32_0 : i32, i32
  }
  func.func @transform_3(%arg0: i32) -> (i32, i32) {
    %c0_i32 = arith.constant 0 : i32
    %c0_i32_0 = arith.constant 0 : i32
    return %arg0, %c0_i32 : i32, i32
  }
}

module attributes {stable_mosaic.version = 11 : i64} {
  func.func @_gemm_fused_kernel(%arg0: i32, %arg1: memref<512x576xbf16, #tpu.memory_space<vmem>>, %arg2: memref<576x128xbf16, #tpu.memory_space<vmem>>, %arg3: memref<1x128xf32, #tpu.memory_space<vmem>>, %arg4: memref<512x128xbf16, #tpu.memory_space<vmem>>) attributes {dimension_semantics = [#tpu.dimension_semantics<parallel>], iteration_bounds = array<i64: 1>, scalar_prefetch = 0 : i64, scratch_operands = 0 : i64, tpu.core_type = #tpu.core_type<tc>, window_params = [{transform_indices = @transform_0, window_bounds = array<i64: 512, 576>}, {pipeline_mode = #tpu.pipeline_mode<synchronous>, transform_indices = @transform_1, window_bounds = array<i64: 576, 128>}, {pipeline_mode = #tpu.pipeline_mode<synchronous>, transform_indices = @transform_2, window_bounds = array<i64: 1, 128>}, {transform_indices = @transform_3, window_bounds = array<i64: 512, 128>}]} {
    %c0 = arith.constant 0 : index
    %c0_0 = arith.constant 0 : index
    %0 = vector.load %arg1[%c0, %c0_0] : memref<512x576xbf16, #tpu.memory_space<vmem>>, vector<512x576xbf16>
    %c0_1 = arith.constant 0 : index
    %c0_2 = arith.constant 0 : index
    %1 = vector.load %arg2[%c0_1, %c0_2] : memref<576x128xbf16, #tpu.memory_space<vmem>>, vector<576x128xbf16>
    %cst = arith.constant dense<0.000000e+00> : vector<512x128xf32>
    %2 = tpu.matmul %0, %1, %cst {dimension_numbers = #tpu.dot_dimension_numbers<[1], [0], [0], [1], [0, 0, 1, 1], [], []>} : vector<512x576xbf16>, vector<576x128xbf16>, vector<512x128xf32> -> vector<512x128xf32>
    %c0_3 = arith.constant 0 : index
    %c0_4 = arith.constant 0 : index
    %3 = vector.load %arg3[%c0_3, %c0_4] : memref<1x128xf32, #tpu.memory_space<vmem>>, vector<1x128xf32>
    %4 = vector.broadcast %3 : vector<1x128xf32> to vector<512x128xf32>
    %5 = arith.addf %2, %4 : vector<512x128xf32>
    %cst_5 = arith.constant 0.000000e+00 : f32
    %6 = vector.broadcast %cst_5 : f32 to vector<512x128xf32>
    %7 = arith.cmpf ogt, %5, %6 : vector<512x128xf32>
    %cst_6 = arith.constant 0.00999999977 : f32
    %8 = vector.broadcast %cst_6 : f32 to vector<512x128xf32>
    %9 = arith.mulf %8, %5 : vector<512x128xf32>
    %10 = arith.select %7, %5, %9 : vector<512x128xi1>, vector<512x128xf32>
    %11 = arith.truncf %10 : vector<512x128xf32> to vector<512x128xbf16>
    %c0_7 = arith.constant 0 : index
    %c0_8 = arith.constant 0 : index
    %12 = vector.load %arg4[%c0_7, %c0_8] : memref<512x128xbf16, #tpu.memory_space<vmem>>, vector<512x128xbf16>
    tpu.vector_store %arg4[%c0_7, %c0_8], %11 {strides = array<i32>} : memref<512x128xbf16, #tpu.memory_space<vmem>>, vector<512x128xbf16>,
    return
  }
  func.func @transform_0(%arg0: i32) -> (i32, i32) {
    %c0_i32 = arith.constant 0 : i32
    %c0_i32_0 = arith.constant 0 : i32
    return %arg0, %c0_i32 : i32, i32
  }
  func.func @transform_1(%arg0: i32) -> (i32, i32) {
    %c0_i32 = arith.constant 0 : i32
    %c0_i32_0 = arith.constant 0 : i32
    %c0_i32_1 = arith.constant 0 : i32
    return %c0_i32, %c0_i32_0 : i32, i32
  }
  func.func @transform_2(%arg0: i32) -> (i32, i32) {
    %c0_i32 = arith.constant 0 : i32
    %c0_i32_0 = arith.constant 0 : i32
    %c0_i32_1 = arith.constant 0 : i32
    return %c0_i32, %c0_i32_0 : i32, i32
  }
  func.func @transform_3(%arg0: i32) -> (i32, i32) {
    %c0_i32 = arith.constant 0 : i32
    %c0_i32_0 = arith.constant 0 : i32
    return %arg0, %c0_i32 : i32, i32
  }
}

module attributes {stable_mosaic.version = 11 : i64} {
  func.func @_gemm_fused_kernel(%arg0: i32, %arg1: memref<512x1152xbf16, #tpu.memory_space<vmem>>, %arg2: memref<1152x256xbf16, #tpu.memory_space<vmem>>, %arg3: memref<1x256xf32, #tpu.memory_space<vmem>>, %arg4: memref<512x256xbf16, #tpu.memory_space<vmem>>) attributes {dimension_semantics = [#tpu.dimension_semantics<parallel>], iteration_bounds = array<i64: 1>, scalar_prefetch = 0 : i64, scratch_operands = 0 : i64, tpu.core_type = #tpu.core_type<tc>, window_params = [{transform_indices = @transform_0, window_bounds = array<i64: 512, 1152>}, {pipeline_mode = #tpu.pipeline_mode<synchronous>, transform_indices = @transform_1, window_bounds = array<i64: 1152, 256>}, {pipeline_mode = #tpu.pipeline_mode<synchronous>, transform_indices = @transform_2, window_bounds = array<i64: 1, 256>}, {transform_indices = @transform_3, window_bounds = array<i64: 512, 256>}]} {
    %c0 = arith.constant 0 : index
    %c0_0 = arith.constant 0 : index
    %0 = vector.load %arg1[%c0, %c0_0] : memref<512x1152xbf16, #tpu.memory_space<vmem>>, vector<512x1152xbf16>
    %c0_1 = arith.constant 0 : index
    %c0_2 = arith.constant 0 : index
    %1 = vector.load %arg2[%c0_1, %c0_2] : memref<1152x256xbf16, #tpu.memory_space<vmem>>, vector<1152x256xbf16>
    %cst = arith.constant dense<0.000000e+00> : vector<512x256xf32>
    %2 = tpu.matmul %0, %1, %cst {dimension_numbers = #tpu.dot_dimension_numbers<[1], [0], [0], [1], [0, 0, 1, 1], [], []>} : vector<512x1152xbf16>, vector<1152x256xbf16>, vector<512x256xf32> -> vector<512x256xf32>
    %c0_3 = arith.constant 0 : index
    %c0_4 = arith.constant 0 : index
    %3 = vector.load %arg3[%c0_3, %c0_4] : memref<1x256xf32, #tpu.memory_space<vmem>>, vector<1x256xf32>
    %4 = vector.broadcast %3 : vector<1x256xf32> to vector<512x256xf32>
    %5 = arith.addf %2, %4 : vector<512x256xf32>
    %cst_5 = arith.constant 0.000000e+00 : f32
    %6 = vector.broadcast %cst_5 : f32 to vector<512x256xf32>
    %7 = arith.cmpf ogt, %5, %6 : vector<512x256xf32>
    %cst_6 = arith.constant 0.00999999977 : f32
    %8 = vector.broadcast %cst_6 : f32 to vector<512x256xf32>
    %9 = arith.mulf %8, %5 : vector<512x256xf32>
    %10 = arith.select %7, %5, %9 : vector<512x256xi1>, vector<512x256xf32>
    %11 = arith.truncf %10 : vector<512x256xf32> to vector<512x256xbf16>
    %c0_7 = arith.constant 0 : index
    %c0_8 = arith.constant 0 : index
    %12 = vector.load %arg4[%c0_7, %c0_8] : memref<512x256xbf16, #tpu.memory_space<vmem>>, vector<512x256xbf16>
    tpu.vector_store %arg4[%c0_7, %c0_8], %11 {strides = array<i32>} : memref<512x256xbf16, #tpu.memory_space<vmem>>, vector<512x256xbf16>,
    return
  }
  func.func @transform_0(%arg0: i32) -> (i32, i32) {
    %c0_i32 = arith.constant 0 : i32
    %c0_i32_0 = arith.constant 0 : i32
    return %arg0, %c0_i32 : i32, i32
  }
  func.func @transform_1(%arg0: i32) -> (i32, i32) {
    %c0_i32 = arith.constant 0 : i32
    %c0_i32_0 = arith.constant 0 : i32
    %c0_i32_1 = arith.constant 0 : i32
    return %c0_i32, %c0_i32_0 : i32, i32
  }
  func.func @transform_2(%arg0: i32) -> (i32, i32) {
    %c0_i32 = arith.constant 0 : i32
    %c0_i32_0 = arith.constant 0 : i32
    %c0_i32_1 = arith.constant 0 : i32
    return %c0_i32, %c0_i32_0 : i32, i32
  }
  func.func @transform_3(%arg0: i32) -> (i32, i32) {
    %c0_i32 = arith.constant 0 : i32
    %c0_i32_0 = arith.constant 0 : i32
    return %arg0, %c0_i32 : i32, i32
  }
}

module attributes {stable_mosaic.version = 11 : i64} {
  func.func @_gemm_fused_kernel(%arg0: i32, %arg1: memref<8x16384xbf16, #tpu.memory_space<vmem>>, %arg2: memref<16384x128xbf16, #tpu.memory_space<vmem>>, %arg3: memref<8x128xf32, #tpu.memory_space<vmem>>) attributes {dimension_semantics = [#tpu.dimension_semantics<parallel>], iteration_bounds = array<i64: 1>, scalar_prefetch = 0 : i64, scratch_operands = 0 : i64, tpu.core_type = #tpu.core_type<tc>, window_params = [{transform_indices = @transform_0, window_bounds = array<i64: 8, 16384>}, {pipeline_mode = #tpu.pipeline_mode<synchronous>, transform_indices = @transform_1, window_bounds = array<i64: 16384, 128>}, {transform_indices = @transform_2, window_bounds = array<i64: 8, 128>}]} {
    %c0 = arith.constant 0 : index
    %c0_0 = arith.constant 0 : index
    %0 = vector.load %arg1[%c0, %c0_0] : memref<8x16384xbf16, #tpu.memory_space<vmem>>, vector<8x16384xbf16>
    %c0_1 = arith.constant 0 : index
    %c0_2 = arith.constant 0 : index
    %1 = vector.load %arg2[%c0_1, %c0_2] : memref<16384x128xbf16, #tpu.memory_space<vmem>>, vector<16384x128xbf16>
    %cst = arith.constant dense<0.000000e+00> : vector<8x128xf32>
    %2 = tpu.matmul %0, %1, %cst {dimension_numbers = #tpu.dot_dimension_numbers<[1], [0], [0], [1], [0, 0, 1, 1], [], []>} : vector<8x16384xbf16>, vector<16384x128xbf16>, vector<8x128xf32> -> vector<8x128xf32>
    %c0_3 = arith.constant 0 : index
    %c0_4 = arith.constant 0 : index
    %3 = vector.load %arg3[%c0_3, %c0_4] : memref<8x128xf32, #tpu.memory_space<vmem>>, vector<8x128xf32>
    tpu.vector_store %arg3[%c0_3, %c0_4], %2 {strides = array<i32>} : memref<8x128xf32, #tpu.memory_space<vmem>>, vector<8x128xf32>,
    return
  }
  func.func @transform_0(%arg0: i32) -> (i32, i32) {
    %c0_i32 = arith.constant 0 : i32
    %c0_i32_0 = arith.constant 0 : i32
    return %arg0, %c0_i32 : i32, i32
  }
  func.func @transform_1(%arg0: i32) -> (i32, i32) {
    %c0_i32 = arith.constant 0 : i32
    %c0_i32_0 = arith.constant 0 : i32
    %c0_i32_1 = arith.constant 0 : i32
    return %c0_i32, %c0_i32_0 : i32, i32
  }
  func.func @transform_2(%arg0: i32) -> (i32, i32) {
    %c0_i32 = arith.constant 0 : i32
    %c0_i32_0 = arith.constant 0 : i32
    return %arg0, %c0_i32 : i32, i32
  }
}

</mosaic_0001>

<bundles_post_ra>
// kernel: descriptor_forward.4
= control target key start
LH: loop header
LB: loop body
LE: loop exit
PB: predicated region body
PF: predicated region fallthrough
CT: control target
= control target key end

     0   :  { %s3221_s12 = smov 0   ;;  %s4061_s0 = inlined_call_operand.vmem [shape: bf16[2048,75], index: 0, kind: input, shape index: {}]   ;;  %s4062_s1 = inlined_call_operand.vmem [shape: bf16[75,64], index: 1, kind: input, shape index: {}]   ;;  %s4063_s2 = inlined_call_operand.vmem [shape: f32[1,64], index: 2, kind: input, shape index: {}]   ;;  %s4064_s3 = inlined_call_operand.vmem [shape: bf16[2048,64], index: 3, kind: output, shape index: {}]  }
   0x1 LB: > { %s2495_s13 = sadd.s32 4294967295, %s3198_s12   ;;  %p2499_p0 = scmp.ge.s32.totalorder %s3198_s12, 1  ;;  %s3198_s12 = sphi %s3221_s12, %s13_s12  }
   0x2   : > { %p138_p1 = scmp.lt.s32.totalorder %s3198_s12, 3 }
   0x4   : > { %p139_p2 = pnand %p2499_p0, %p138_p1 }
   0x5   : > { %v3122_v0 = vld [vmem:[%s4062_s1] sm:$0xff] (!%p139_p2)   ;;  %v3123_v1 = vld [vmem:[%s4062_s1 + $0x8] sm:$0xff] (!%p139_p2)   ;;  %vm862_vm0 = vcmask (!%p139_p2), 1044480   ;;  %v3124_v2 = vld [vmem:[%s4062_s1 + $0x10] sm:$0xff] (!%p139_p2)   ;;  %s2500_s20 = sshll.u32 (!%p139_p2), %s2495_s13, 7  ;;  %vm863_vm1 = vcmask (!%p139_p2), 1045504  }
   0x6   : > { %142 = sbr.rel (%p139_p2) target bundleno = 404 (0x194), region = 32  ;;  %2965 = vmatprep.subr.bf16.mxu0 (!%p139_p2), %v3122_v0  ;;  %3103 = vmatprep.subr.bf16.mxu1 (!%p139_p2), %v3122_v0  ;;  %v3200_v3 = vmov (!%p139_p2), 65535   ;;  %p163_p3 = scmp.lt.s32.totalorder (!%p139_p2), %s2500_s20, 255  ;;  %v3125_v5 = vld [vmem:[%s4062_s1 + $0x18] sm:$0xff] (!%p139_p2)   ;;  %v3126_v6 = vld [vmem:[%s4062_s1 + $0x20] sm:$0x3f] (!%p139_p2)  }
   0x7   : > { %2966 = vmatpush3.bf16.msra.mxu0 (!%p139_p2), %v3122_v0  ;;  %3108 = vmatpush3.bf16.msra.mxu1 (!%p139_p2), %v3122_v0  ;;  %v864_v4 = vsel (!%p139_p2), %vm862_vm0, 4294967295, %v3200_v3  ;;  %vm669_vm2 = vcmask (!%p139_p2), 613376   ;;  %vm2310_vm3 = vcmask (!%p139_p2), 519168  }
   0x8   : > { %2967 = vmatprep.subr.bf16.mxu0 (!%p139_p2), %v3123_v1  ;;  %3104 = vmatprep.subr.bf16.mxu1 (!%p139_p2), %v3123_v1  ;;  %v865_v7 = vsel (!%p139_p2), %vm863_vm1, %v864_v4, 0 }
   0x9   : > { %v867_v8 = vand.u32 (!%p139_p2), %v3126_v6, %v865_v7 }
   0xb   : > { %2968 = vmatpush3.bf16.msra.mxu0 (!%p139_p2), %v3123_v1  ;;  %3109 = vmatpush3.bf16.msra.mxu1 (!%p139_p2), %v3123_v1 }
   0xc   : > { %2969 = vmatprep.subr.bf16.mxu0 (!%p139_p2), %v3124_v2  ;;  %3105 = vmatprep.subr.bf16.mxu1 (!%p139_p2), %v3124_v2 }
   0xd   : > { %s4066_s20 = smov (!%p163_p3, %s2500_s20), 255 }
   0xe   : > { %s2501_s25 = sshll.u32 %s4066_s20, 2 }
   0xf   : > { %2970 = vmatpush3.bf16.msra.mxu0 %v3124_v2  ;;  %3110 = vmatpush3.bf16.msra.mxu1 %v3124_v2  ;;  %s3252_s28 = scalar_lea.vmem %s4061_s0, %s2501_s25  ;;  %s3396_s6 = scalar_lea.vmem %s4064_s3, %s2501_s25 }
  0x10   : > { %2971 = vmatprep.subr.bf16.mxu0 %v3125_v5  ;;  %3106 = vmatprep.subr.bf16.mxu1 %v3125_v5  ;;  %v3127_v9 = vld [vmem:[%s3252_s28] sm:$0xff]   ;;  %v3129_v11 = vld [vmem:[%s3252_s28 + $0x8] sm:$0xff]   ;;  %v3131_v13 = vld [vmem:[%s3252_s28 + $0x10] sm:$0xff]  }
  0x11   : > { %v3128_v10 = vld [vmem:[%s3252_s28 + $0x100] sm:$0xff]   ;;  %2975 = vmatprep.mubr.msk.bf16.mxu0 %vm669_vm2, %v3127_v9  ;;  %v3130_v12 = vld [vmem:[%s3252_s28 + $0x108] sm:$0xff]   ;;  %v3132_v14 = vld [vmem:[%s3252_s28 + $0x110] sm:$0xff]  }
  0x12   : > { %3039 = vmatprep.mubr.msk.bf16.mxu1 %vm669_vm2, %v3128_v10  ;;  %v3133_v15 = vld [vmem:[%s3252_s28 + $0x18] sm:$0xff]   ;;  %v3135_v17 = vld [vmem:[%s3252_s28 + $0x20] sm:$0xff]   ;;  %v3137_v19 = vld [vmem:[%s3252_s28 + $0x28] sm:$0xff]  }
  0x13   : > { %2972 = vmatpush3.bf16.msra.mxu0 %v3125_v5  ;;  %3111 = vmatpush3.bf16.msra.mxu1 %v3125_v5  ;;  %v3134_v16 = vld [vmem:[%s3252_s28 + $0x118] sm:$0xff]   ;;  %v3136_v18 = vld [vmem:[%s3252_s28 + $0x120] sm:$0xff]   ;;  %v3138_v20 = vld [vmem:[%s3252_s28 + $0x128] sm:$0xff]  }
  0x14   : > { %2973 = vmatprep.subr.bf16.mxu0 %v867_v8  ;;  %3107 = vmatprep.subr.bf16.mxu1 %v867_v8  ;;  %v3139_v21 = vld [vmem:[%s3252_s28 + $0x30] sm:$0xff]   ;;  %v3141_v23 = vld [vmem:[%s3252_s28 + $0x38] sm:$0xff]   ;;  %v3143_v25 = vld [vmem:[%s3252_s28 + $0x40] sm:$0xff]  }
  0x15   : > { %v3140_v22 = vld [vmem:[%s3252_s28 + $0x130] sm:$0xff]   ;;  %v3142_v24 = vld [vmem:[%s3252_s28 + $0x138] sm:$0xff]   ;;  %v3144_v26 = vld [vmem:[%s3252_s28 + $0x140] sm:$0xff]  }
  0x16   : > { %v3145_v27 = vld [vmem:[%s3252_s28 + $0x48] sm:$0xff]   ;;  %v3147_v29 = vld [vmem:[%s3252_s28 + $0x50] sm:$0xff]   ;;  %v3149_v31 = vld [vmem:[%s3252_s28 + $0x58] sm:$0xff]  }
  0x17   : > { %2974 = vmatpush3.bf16.msra.mxu0 %v867_v8  ;;  %3112 = vmatpush3.bf16.msra.mxu1 %v867_v8  ;;  %v3146_v28 = vld [vmem:[%s3252_s28 + $0x148] sm:$0xff]   ;;  %v3148_v30 = vld [vmem:[%s3252_s28 + $0x150] sm:$0xff]   ;;  %v3150_v32 = vld [vmem:[%s3252_s28 + $0x158] sm:$0xff]  }
  0x18   : > { %v3151_v33 = vld [vmem:[%s3252_s28 + $0x60] sm:$0xff]   ;;  %v3153_v35 = vld [vmem:[%s3252_s28 + $0x68] sm:$0xff]   ;;  %v3155_v37 = vld [vmem:[%s3252_s28 + $0x70] sm:$0xff]  }
  0x19   : > { %v3152_v34 = vld [vmem:[%s3252_s28 + $0x160] sm:$0xff]   ;;  %v3154_v36 = vld [vmem:[%s3252_s28 + $0x168] sm:$0xff]   ;;  %v3156_v38 = vld [vmem:[%s3252_s28 + $0x170] sm:$0xff]  }
  0x1a   : > { %2976 = vmatmul.mubr.msk.bf16.vlgmr.msra.gmra.mrb[0].mxu0 %vm669_vm2, %v3129_v11  ;;  %3040 = vmatmul.mubr.msk.bf16.vlgmr.msra.gmra.mrb[0].mxu1 %vm669_vm2, %v3130_v12  ;;  %v3157_v39 = vld [vmem:[%s3252_s28 + $0x78] sm:$0xff]   ;;  %v3159_v41 = vld [vmem:[%s3252_s28 + $0x80] sm:$0xff]   ;;  %v3161_v43 = vld [vmem:[%s3252_s28 + $0x88] sm:$0xff]  }
  0x1b   : > { %2979 = vmatprep.mubr.msk.bf16.mxu0 %vm669_vm2, %v3131_v13  ;;  %3043 = vmatprep.mubr.msk.bf16.mxu1 %vm669_vm2, %v3132_v14  ;;  %v3158_v40 = vld [vmem:[%s3252_s28 + $0x178] sm:$0xff]   ;;  %v3160_v42 = vld [vmem:[%s3252_s28 + $0x180] sm:$0xff]   ;;  %v3162_v44 = vld [vmem:[%s3252_s28 + $0x188] sm:$0xff]  }
  0x1c   : > { %v3163_v45 = vld [vmem:[%s3252_s28 + $0x90] sm:$0xff]   ;;  %v3165_v47 = vld [vmem:[%s3252_s28 + $0x98] sm:$0xff]   ;;  %v3167_v49 = vld [vmem:[%s3252_s28 + $0xa0] sm:$0xff]  }
  0x1d   : > { %v3164_v46 = vld [vmem:[%s3252_s28 + $0x190] sm:$0xff]   ;;  %v3166_v48 = vld [vmem:[%s3252_s28 + $0x198] sm:$0xff]   ;;  %v3168_v50 = vld [vmem:[%s3252_s28 + $0x1a0] sm:$0xff]  }
  0x1e   : > { %v3169_v51 = vld [vmem:[%s3252_s28 + $0xa8] sm:$0xff]   ;;  %v3171_v53 = vld [vmem:[%s3252_s28 + $0xb0] sm:$0xff]   ;;  %v3173_v55 = vld [vmem:[%s3252_s28 + $0xb8] sm:$0xff]  }
  0x1f   : > { %v3170_v52 = vld [vmem:[%s3252_s28 + $0x1a8] sm:$0xff]   ;;  %v3172_v54 = vld [vmem:[%s3252_s28 + $0x1b0] sm:$0xff]   ;;  %v3174_v56 = vld [vmem:[%s3252_s28 + $0x1b8] sm:$0xff]  }
  0x20   : > { %v3175_v57 = vld [vmem:[%s3252_s28 + $0xc0] sm:$0xff]   ;;  %v3177_v59 = vld [vmem:[%s3252_s28 + $0xc8] sm:$0xff]   ;;  %v3179_v61 = vld [vmem:[%s3252_s28 + $0xd0] sm:$0xff]  }
  0x21   : > { %v3176_v58 = vld [vmem:[%s3252_s28 + $0x1c0] sm:$0xff]   ;;  %v3178_v60 = vld [vmem:[%s3252_s28 + $0x1c8] sm:$0xff]   ;;  %v3180_v62 = vld [vmem:[%s3252_s28 + $0x1d0] sm:$0xff]  }
  0x22   : > { %2980 = vmatmul.mubr.msk.bf16.gmra.mrb[4].mxu0 %vm669_vm2, %v3133_v15  ;;  %3044 = vmatmul.mubr.msk.bf16.gmra.mrb[4].mxu1 %vm669_vm2, %v3134_v16  ;;  %v3181_v63 = vld [vmem:[%s3252_s28 + $0xd8] sm:$0xff]   ;;  %v3183_v1 = vld [vmem:[%s3252_s28 + $0xe0] sm:$0xff]   ;;  %v3185_v3 = vld [vmem:[%s3252_s28 + $0xe8] sm:$0xff]  }
  0x23   : > { %2983 = vmatprep.mubr.msk.bf16.mxu0 %vm669_vm2, %v3135_v17  ;;  %3047 = vmatprep.mubr.msk.bf16.mxu1 %vm669_vm2, %v3136_v18  ;;  %v3182_v0 = vld [vmem:[%s3252_s28 + $0x1d8] sm:$0xff]   ;;  %v3184_v2 = vld [vmem:[%s3252_s28 + $0x1e0] sm:$0xff]   ;;  %v3186_v4 = vld [vmem:[%s3252_s28 + $0x1e8] sm:$0xff]  }
  0x24   : > { %v3187_v5 = vld [vmem:[%s3252_s28 + $0xf0] sm:$0xff]   ;;  %v3189_v7 = vld [vmem:[%s3252_s28 + $0xf8] sm:$0xff]   ;;  %v3385_v9 = vld [vmem:[%s4063_s2] ss:$0 sm:$0xff] }
  0x25   : > { %v3188_v6 = vld [vmem:[%s3252_s28 + $0x1f0] sm:$0xff]   ;;  %v3190_v8 = vld [vmem:[%s3252_s28 + $0x1f8] sm:$0xff]  }
  0x2a   : > { %2984 = vmatmul.mubr.msk.bf16.gmra.mrb[8].mxu0 %vm669_vm2, %v3137_v19  ;;  %3048 = vmatmul.mubr.msk.bf16.gmra.mrb[8].mxu1 %vm669_vm2, %v3138_v20 }
  0x2b   : > { %2987 = vmatprep.mubr.msk.bf16.mxu0 %vm669_vm2, %v3139_v21  ;;  %3051 = vmatprep.mubr.msk.bf16.mxu1 %vm669_vm2, %v3140_v22 }
  0x32   : > { %2988 = vmatmul.mubr.msk.bf16.gmra.mrb[12].mxu0 %vm669_vm2, %v3141_v23  ;;  %3052 = vmatmul.mubr.msk.bf16.gmra.mrb[12].mxu1 %vm669_vm2, %v3142_v24 }
  0x33   : > { %2991 = vmatprep.mubr.msk.bf16.mxu0 %vm669_vm2, %v3143_v25  ;;  %3055 = vmatprep.mubr.msk.bf16.mxu1 %vm669_vm2, %v3144_v26 }
  0x3a   : > { %2992 = vmatmul.mubr.msk.bf16.gmra.mrb[16].mxu0 %vm669_vm2, %v3145_v27  ;;  %3056 = vmatmul.mubr.msk.bf16.gmra.mrb[16].mxu1 %vm669_vm2, %v3146_v28 }
  0x3b   : > { %2995 = vmatprep.mubr.msk.bf16.mxu0 %vm669_vm2, %v3147_v29  ;;  %3059 = vmatprep.mubr.msk.bf16.mxu1 %vm669_vm2, %v3148_v30 }
  0x42   : > { %2996 = vmatmul.mubr.msk.bf16.gmra.mrb[20].mxu0 %vm669_vm2, %v3149_v31  ;;  %3060 = vmatmul.mubr.msk.bf16.gmra.mrb[20].mxu1 %vm669_vm2, %v3150_v32 }
  0x43   : > { %2999 = vmatprep.mubr.msk.bf16.mxu0 %vm669_vm2, %v3151_v33  ;;  %3063 = vmatprep.mubr.msk.bf16.mxu1 %vm669_vm2, %v3152_v34 }
  0x4a   : > { %3000 = vmatmul.mubr.msk.bf16.gmra.mrb[24].mxu0 %vm669_vm2, %v3153_v35  ;;  %3064 = vmatmul.mubr.msk.bf16.gmra.mrb[24].mxu1 %vm669_vm2, %v3154_v36 }
  0x4b   : > { %3003 = vmatprep.mubr.msk.bf16.mxu0 %vm669_vm2, %v3155_v37  ;;  %3067 = vmatprep.mubr.msk.bf16.mxu1 %vm669_vm2, %v3156_v38 }
  0x52   : > { %3004 = vmatmul.mubr.msk.bf16.gmra.mrb[28].mxu0 %vm669_vm2, %v3157_v39  ;;  %3068 = vmatmul.mubr.msk.bf16.gmra.mrb[28].mxu1 %vm669_vm2, %v3158_v40 }
  0x53   : > { %3007 = vmatprep.mubr.msk.bf16.mxu0 %vm669_vm2, %v3159_v41  ;;  %3071 = vmatprep.mubr.msk.bf16.mxu1 %vm669_vm2, %v3160_v42 }
  0x5a   : > { %3008 = vmatmul.mubr.msk.bf16.gmra.mrb[32].mxu0 %vm669_vm2, %v3161_v43  ;;  %3072 = vmatmul.mubr.msk.bf16.gmra.mrb[32].mxu1 %vm669_vm2, %v3162_v44 }
  0x5b   : > { %3011 = vmatprep.mubr.msk.bf16.mxu0 %vm669_vm2, %v3163_v45  ;;  %3075 = vmatprep.mubr.msk.bf16.mxu1 %vm669_vm2, %v3164_v46 }
  0x62   : > { %3012 = vmatmul.mubr.msk.bf16.gmra.mrb[36].mxu0 %vm669_vm2, %v3165_v47  ;;  %3076 = vmatmul.mubr.msk.bf16.gmra.mrb[36].mxu1 %vm669_vm2, %v3166_v48 }
  0x63   : > { %3015 = vmatprep.mubr.msk.bf16.mxu0 %vm669_vm2, %v3167_v49  ;;  %3079 = vmatprep.mubr.msk.bf16.mxu1 %vm669_vm2, %v3168_v50 }
  0x6a   : > { %3016 = vmatmul.mubr.msk.bf16.gmra.mrb[40].mxu0 %vm669_vm2, %v3169_v51  ;;  %3080 = vmatmul.mubr.msk.bf16.gmra.mrb[40].mxu1 %vm669_vm2, %v3170_v52 }
  0x6b   : > { %3019 = vmatprep.mubr.msk.bf16.mxu0 %vm669_vm2, %v3171_v53  ;;  %3083 = vmatprep.mubr.msk.bf16.mxu1 %vm669_vm2, %v3172_v54 }
  0x72   : > { %3020 = vmatmul.mubr.msk.bf16.gmra.mrb[44].mxu0 %vm669_vm2, %v3173_v55  ;;  %3084 = vmatmul.mubr.msk.bf16.gmra.mrb[44].mxu1 %vm669_vm2, %v3174_v56 }
  0x73   : > { %3023 = vmatprep.mubr.msk.bf16.mxu0 %vm669_vm2, %v3175_v57  ;;  %3087 = vmatprep.mubr.msk.bf16.mxu1 %vm669_vm2, %v3176_v58 }
  0x7a   : > { %3024 = vmatmul.mubr.msk.bf16.gmra.mrb[48].mxu0 %vm669_vm2, %v3177_v59  ;;  %3088 = vmatmul.mubr.msk.bf16.gmra.mrb[48].mxu1 %vm669_vm2, %v3178_v60 }
  0x7b   : > { %3027 = vmatprep.mubr.msk.bf16.mxu0 %vm669_vm2, %v3179_v61  ;;  %3091 = vmatprep.mubr.msk.bf16.mxu1 %vm669_vm2, %v3180_v62 }
  0x82   : > { %3028 = vmatmul.mubr.msk.bf16.gmra.mrb[52].mxu0 %vm669_vm2, %v3181_v63  ;;  %3092 = vmatmul.mubr.msk.bf16.gmra.mrb[52].mxu1 %vm669_vm2, %v3182_v0 }
  0x83   : > { %3031 = vmatprep.mubr.msk.bf16.mxu0 %vm669_vm2, %v3183_v1  ;;  %3095 = vmatprep.mubr.msk.bf16.mxu1 %vm669_vm2, %v3184_v2 }
  0x8a   : > { %3032 = vmatmul.mubr.msk.bf16.gmra.mrb[56].mxu0 %vm669_vm2, %v3185_v3  ;;  %3096 = vmatmul.mubr.msk.bf16.gmra.mrb[56].mxu1 %vm669_vm2, %v3186_v4 }
  0x8b   : > { %3035 = vmatprep.mubr.msk.bf16.mxu0 %vm669_vm2, %v3187_v5  ;;  %3099 = vmatprep.mubr.msk.bf16.mxu1 %vm669_vm2, %v3188_v6 }
  0x92   : > { %3036 = vmatmul.mubr.msk.bf16.gmra.mrb[60].mxu0 %vm669_vm2, %v3189_v7  ;;  %3100 = vmatmul.mubr.msk.bf16.gmra.mrb[60].mxu1 %vm669_vm2, %v3190_v8 }
  0xed   : > { %v2977_v10 = vpop.f32.mrb[0].mxu0  ;;  %v3041_v11 = vpop.f32.mrb[0].mxu1 }
  0xee   : > { %v912_v12 = vadd.f32 %v2977_v10, %v3385_v9  ;;  %v1168_v13 = vadd.f32 %v3041_v11, %v3385_v9  ;;  %v903_v14 = vpop.f32.mrb[1].mxu0  ;;  %v1159_v15 = vpop.f32.mrb[1].mxu1 }
  0xef   : > { %v904_v16 = vadd.f32 %v3385_v9, %v903_v14  ;;  %v1160_v17 = vadd.f32 %v3385_v9, %v1159_v15  ;;  %v2978_v18 = vpop.f32.mrb[2].mxu0  ;;  %v3042_v19 = vpop.f32.mrb[2].mxu1 }
  0xf0   : > { %vm1416_vm4 = vcmp.gt.f32.partialorder %v912_v12, 0.0  ;;  %v1544_v20 = vmul.f32 0.01, %v912_v12  ;;  %vm1480_vm5 = vcmp.gt.f32.partialorder %v1168_v13, 0.0  ;;  %v1608_v21 = vmul.f32 0.01, %v1168_v13 }
  0xf1   : > { %vm1414_vm6 = vcmp.gt.f32.partialorder %v904_v16, 0.0  ;;  %v1542_v22 = vmul.f32 0.01, %v904_v16  ;;  %vm1478_vm7 = vcmp.gt.f32.partialorder %v1160_v17, 0.0  ;;  %v1606_v23 = vmul.f32 0.01, %v1160_v17 }
  0xf2   : > { %v1672_v24 = vsel %vm1416_vm4, %v912_v12, %v1544_v20  ;;  %v1736_v25 = vsel %vm1480_vm5, %v1168_v13, %v1608_v21  ;;  %v915_v26 = vadd.f32 %v2978_v18, %v3385_v9  ;;  %v1171_v27 = vadd.f32 %v3042_v19, %v3385_v9  ;;  %v906_v28 = vpop.f32.mrb[3].mxu0  ;;  %v1162_v29 = vpop.f32.mrb[3].mxu1 }
  0xf3   : > { %v2770_v30 = vpack.c.bf16 %v1672_v24, %v1672_v24  ;;  %v2834_v31 = vpack.c.bf16 %v1736_v25, %v1736_v25  ;;  %v1670_v32 = vsel %vm1414_vm6, %v904_v16, %v1542_v22  ;;  %v1734_v33 = vsel %vm1478_vm7, %v1160_v17, %v1606_v23 }
  0xf4   : > { %v2768_v34 = vpack.c.bf16 %v1670_v32, %v1670_v32  ;;  %v2832_v35 = vpack.c.bf16 %v1734_v33, %v1734_v33  ;;  %vm1417_vm8 = vcmp.gt.f32.partialorder %v915_v26, 0.0  ;;  %v1545_v36 = vmul.f32 0.01, %v915_v26 }
  0xf5   : > { %2313 = vst.msk [vmem:[%s3396_s6 + $0x8] sm:$0xf] %vm2310_vm3, %v2770_v30  ;;  %2377 = vst.msk [vmem:[%s3396_s6 + $0x108] sm:$0xf] %vm2310_vm3, %v2834_v31  ;;  %vm1481_vm9 = vcmp.gt.f32.partialorder %v1171_v27, 0.0  ;;  %v907_v38 = vadd.f32 %v3385_v9, %v906_v28  ;;  %v1163_v39 = vadd.f32 %v3385_v9, %v1162_v29  ;;  %v2981_v40 = vpop.f32.mrb[4].mxu0 }
  0xf6   : > { %v1609_v37 = vmul.f32 0.01, %v1171_v27  ;;  %v3045_v41 = vpop.f32.mrb[4].mxu1  ;;  %2311 = vst.msk [vmem:[%s3396_s6] sm:$0xf] %vm2310_vm3, %v2768_v34  ;;  %v1673_v42 = vsel %vm1417_vm8, %v915_v26, %v1545_v36  ;;  %v928_v43 = vadd.f32 %v2981_v40, %v3385_v9  ;;  %v919_v45 = vpop.f32.mrb[5].mxu0 }
  0xf7   : > { %2375 = vst.msk [vmem:[%s3396_s6 + $0x100] sm:$0xf] %vm2310_vm3, %v2832_v35  ;;  %v1184_v44 = vadd.f32 %v3045_v41, %v3385_v9  ;;  %v1175_v46 = vpop.f32.mrb[5].mxu1  ;;  %v2771_v47 = vpack.c.bf16 %v1673_v42, %v1673_v42  ;;  %vm1415_vm10 = vcmp.gt.f32.partialorder %v907_v38, 0.0  ;;  %v1543_v49 = vmul.f32 0.01, %v907_v38 }
  0xf8   : > { %v1737_v48 = vsel %vm1481_vm9, %v1171_v27, %v1609_v37  ;;  %v2982_v50 = vpop.f32.mrb[6].mxu0  ;;  %v3046_v51 = vpop.f32.mrb[6].mxu1  ;;  %vm1479_vm11 = vcmp.gt.f32.partialorder %v1163_v39, 0.0  ;;  %v1607_v53 = vmul.f32 0.01, %v1163_v39  ;;  %vm1420_vm12 = vcmp.gt.f32.partialorder %v928_v43, 0.0 }
  0xf9   : > { %v2835_v52 = vpack.c.bf16 %v1737_v48, %v1737_v48  ;;  %v922_v54 = vpop.f32.mrb[7].mxu0  ;;  %v1178_v55 = vpop.f32.mrb[7].mxu1  ;;  %2314 = vst.msk [vmem:[%s3396_s6 + $0xc] sm:$0xf] %vm2310_vm3, %v2771_v47  ;;  %v1671_v56 = vsel %vm1415_vm10, %v907_v38, %v1543_v49  ;;  %v1548_v57 = vmul.f32 0.01, %v928_v43  ;;  %v920_v61 = vadd.f32 %v3385_v9, %v919_v45 }
  0xfa   : > { %vm1484_vm13 = vcmp.gt.f32.partialorder %v1184_v44, 0.0  ;;  %v1612_v58 = vmul.f32 0.01, %v1184_v44  ;;  %v2769_v59 = vpack.c.bf16 %v1671_v56, %v1671_v56  ;;  %v1735_v60 = vsel %vm1479_vm11, %v1163_v39, %v1607_v53 }
  0xfb   : > { %2378 = vst.msk [vmem:[%s3396_s6 + $0x10c] sm:$0xf] %vm2310_vm3, %v2835_v52  ;;  %v1176_v62 = vadd.f32 %v3385_v9, %v1175_v46  ;;  %v2833_v63 = vpack.c.bf16 %v1735_v60, %v1735_v60  ;;  %v1676_v0 = vsel %vm1420_vm12, %v928_v43, %v1548_v57  ;;  %v931_v2 = vadd.f32 %v2982_v50, %v3385_v9 }
  0xfc   : > { %v1740_v1 = vsel %vm1484_vm13, %v1184_v44, %v1612_v58  ;;  %2312 = vst.msk [vmem:[%s3396_s6 + $0x4] sm:$0xf] %vm2310_vm3, %v2769_v59  ;;  %v2774_v3 = vpack.c.bf16 %v1676_v0, %v1676_v0  ;;  %vm1418_vm14 = vcmp.gt.f32.partialorder %v920_v61, 0.0  ;;  %v1546_v5 = vmul.f32 0.01, %v920_v61 }
  0xfd   : > { %v2838_v4 = vpack.c.bf16 %v1740_v1, %v1740_v1  ;;  %2376 = vst.msk [vmem:[%s3396_s6 + $0x104] sm:$0xf] %vm2310_vm3, %v2833_v63  ;;  %vm1482_vm15 = vcmp.gt.f32.partialorder %v1176_v62, 0.0  ;;  %v1610_v6 = vmul.f32 0.01, %v1176_v62  ;;  %vm1421_vm0 = vcmp.gt.f32.partialorder %v931_v2, 0.0 }
  0xfe   : > { %v1549_v7 = vmul.f32 0.01, %v931_v2  ;;  %2317 = vst.msk [vmem:[%s3396_s6 + $0x18] sm:$0xf] %vm2310_vm3, %v2774_v3  ;;  %v1674_v8 = vsel %vm1418_vm14, %v920_v61, %v1546_v5  ;;  %v1187_v10 = vadd.f32 %v3046_v51, %v3385_v9  ;;  %v923_v11 = vadd.f32 %v3385_v9, %v922_v54  ;;  %v2985_v13 = vpop.f32.mrb[8].mxu0  ;;  %v3049_v14 = vpop.f32.mrb[8].mxu1 }
  0xff   : > { %2381 = vst.msk [vmem:[%s3396_s6 + $0x118] sm:$0xf] %vm2310_vm3, %v2838_v4  ;;  %v1179_v12 = vadd.f32 %v3385_v9, %v1178_v55  ;;  %v2772_v15 = vpack.c.bf16 %v1674_v8, %v1674_v8  ;;  %v1738_v16 = vsel %vm1482_vm15, %v1176_v62, %v1610_v6  ;;  %v944_v18 = vadd.f32 %v2985_v13, %v3385_v9  ;;  %v935_v19 = vpop.f32.mrb[9].mxu0  ;;  %v1191_v20 = vpop.f32.mrb[9].mxu1 }
 0x100   : > { %v1677_v17 = vsel %vm1421_vm0, %v931_v2, %v1549_v7  ;;  %v2836_v21 = vpack.c.bf16 %v1738_v16, %v1738_v16  ;;  %vm1485_vm1 = vcmp.gt.f32.partialorder %v1187_v10, 0.0  ;;  %v1613_v23 = vmul.f32 0.01, %v1187_v10  ;;  %v2986_v24 = vpop.f32.mrb[10].mxu0  ;;  %v3050_v25 = vpop.f32.mrb[10].mxu1 }
 0x101   : > { %v2775_v22 = vpack.c.bf16 %v1677_v17, %v1677_v17  ;;  %2315 = vst.msk [vmem:[%s3396_s6 + $0x10] sm:$0xf] %vm2310_vm3, %v2772_v15  ;;  %vm1419_vm2 = vcmp.gt.f32.partialorder %v923_v11, 0.0  ;;  %v1547_v26 = vmul.f32 0.01, %v923_v11  ;;  %vm1483_vm4 = vcmp.gt.f32.partialorder %v1179_v12, 0.0 }
 0x102   : > { %v1611_v27 = vmul.f32 0.01, %v1179_v12  ;;  %2379 = vst.msk [vmem:[%s3396_s6 + $0x110] sm:$0xf] %vm2310_vm3, %v2836_v21  ;;  %v1741_v28 = vsel %vm1485_vm1, %v1187_v10, %v1613_v23  ;;  %vm1424_vm5 = vcmp.gt.f32.partialorder %v944_v18, 0.0  ;;  %v1200_v30 = vadd.f32 %v3049_v14, %v3385_v9  ;;  %v938_v31 = vpop.f32.mrb[11].mxu0 }
 0x103   : > { %2318 = vst.msk [vmem:[%s3396_s6 + $0x1c] sm:$0xf] %vm2310_vm3, %v2775_v22  ;;  %v1552_v29 = vmul.f32 0.01, %v944_v18  ;;  %v1194_v32 = vpop.f32.mrb[11].mxu1  ;;  %v2839_v33 = vpack.c.bf16 %v1741_v28, %v1741_v28  ;;  %v1675_v34 = vsel %vm1419_vm2, %v923_v11, %v1547_v26  ;;  %v936_v36 = vadd.f32 %v3385_v9, %v935_v19 }
 0x104   : > { %v1739_v35 = vsel %vm1483_vm4, %v1179_v12, %v1611_v27  ;;  %v2773_v37 = vpack.c.bf16 %v1675_v34, %v1675_v34  ;;  %vm1488_vm6 = vcmp.gt.f32.partialorder %v1200_v30, 0.0  ;;  %v1616_v41 = vmul.f32 0.01, %v1200_v30 }
 0x105   : > { %v2837_v38 = vpack.c.bf16 %v1739_v35, %v1739_v35  ;;  %v1680_v39 = vsel %vm1424_vm5, %v944_v18, %v1552_v29  ;;  %2382 = vst.msk [vmem:[%s3396_s6 + $0x11c] sm:$0xf] %vm2310_vm3, %v2839_v33  ;;  %vm1422_vm7 = vcmp.gt.f32.partialorder %v936_v36, 0.0  ;;  %v1550_v42 = vmul.f32 0.01, %v936_v36  ;;  %v2989_v43 = vpop.f32.mrb[12].mxu0 }
 0x106   : > { %v2778_v40 = vpack.c.bf16 %v1680_v39, %v1680_v39  ;;  %2316 = vst.msk [vmem:[%s3396_s6 + $0x14] sm:$0xf] %vm2310_vm3, %v2773_v37  ;;  %v1192_v44 = vadd.f32 %v3385_v9, %v1191_v20  ;;  %v947_v45 = vadd.f32 %v2986_v24, %v3385_v9  ;;  %v1203_v46 = vadd.f32 %v3050_v25, %v3385_v9  ;;  %v3053_v48 = vpop.f32.mrb[12].mxu1  ;;  %v951_v49 = vpop.f32.mrb[13].mxu0 }
 0x107   : > { %2380 = vst.msk [vmem:[%s3396_s6 + $0x114] sm:$0xf] %vm2310_vm3, %v2837_v38  ;;  %v939_v47 = vadd.f32 %v3385_v9, %v938_v31  ;;  %v1744_v50 = vsel %vm1488_vm6, %v1200_v30, %v1616_v41  ;;  %v1678_v51 = vsel %vm1422_vm7, %v936_v36, %v1550_v42  ;;  %v1195_v52 = vadd.f32 %v3385_v9, %v1194_v32  ;;  %v1207_v54 = vpop.f32.mrb[13].mxu1  ;;  %v2990_v55 = vpop.f32.mrb[14].mxu0 }
 0x108   : > { %2321 = vst.msk [vmem:[%s3396_s6 + $0x28] sm:$0xf] %vm2310_vm3, %v2778_v40  ;;  %v960_v53 = vadd.f32 %v2989_v43, %v3385_v9  ;;  %v2842_v56 = vpack.c.bf16 %v1744_v50, %v1744_v50  ;;  %v2776_v57 = vpack.c.bf16 %v1678_v51, %v1678_v51  ;;  %vm1486_vm8 = vcmp.gt.f32.partialorder %v1192_v44, 0.0  ;;  %v3054_v59 = vpop.f32.mrb[14].mxu1  ;;  %v954_v60 = vpop.f32.mrb[15].mxu0 }
 0x109   : > { %v1614_v58 = vmul.f32 0.01, %v1192_v44  ;;  %vm1425_vm9 = vcmp.gt.f32.partialorder %v947_v45, 0.0  ;;  %v1553_v61 = vmul.f32 0.01, %v947_v45  ;;  %vm1489_vm10 = vcmp.gt.f32.partialorder %v1203_v46, 0.0 }
 0x10a   : > { %v1617_v62 = vmul.f32 0.01, %v1203_v46  ;;  %2385 = vst.msk [vmem:[%s3396_s6 + $0x128] sm:$0xf] %vm2310_vm3, %v2842_v56  ;;  %2319 = vst.msk [vmem:[%s3396_s6 + $0x20] sm:$0xf] %vm2310_vm3, %v2776_v57  ;;  %v1216_v13 = vadd.f32 %v3053_v48, %v3385_v9  ;;  %v952_v17 = vadd.f32 %v3385_v9, %v951_v49  ;;  %v1208_v18 = vadd.f32 %v3385_v9, %v1207_v54 }
 0x10b   : > { %v1742_v63 = vsel %vm1486_vm8, %v1192_v44, %v1614_v58  ;;  %vm1423_vm11 = vcmp.gt.f32.partialorder %v939_v47, 0.0  ;;  %v1551_v0 = vmul.f32 0.01, %v939_v47  ;;  %vm1487_vm12 = vcmp.gt.f32.partialorder %v1195_v52, 0.0  ;;  %v1210_v1 = vpop.f32.mrb[15].mxu1 }
 0x10c   : > { %v2840_v2 = vpack.c.bf16 %v1742_v63, %v1742_v63  ;;  %v1681_v3 = vsel %vm1425_vm9, %v947_v45, %v1553_v61  ;;  %v1745_v4 = vsel %vm1489_vm10, %v1203_v46, %v1617_v62  ;;  %v1615_v5 = vmul.f32 0.01, %v1195_v52 }
 0x10d   : > { %v2779_v6 = vpack.c.bf16 %v1681_v3, %v1681_v3  ;;  %v2843_v7 = vpack.c.bf16 %v1745_v4, %v1745_v4  ;;  %v1679_v8 = vsel %vm1423_vm11, %v939_v47, %v1551_v0  ;;  %vm1428_vm13 = vcmp.gt.f32.partialorder %v960_v53, 0.0  ;;  %v2993_v14 = vpop.f32.mrb[16].mxu0  ;;  %v3057_v15 = vpop.f32.mrb[16].mxu1 }
 0x10e   : > { %2383 = vst.msk [vmem:[%s3396_s6 + $0x120] sm:$0xf] %vm2310_vm3, %v2840_v2  ;;  %v2777_v10 = vpack.c.bf16 %v1679_v8, %v1679_v8  ;;  %v1743_v11 = vsel %vm1487_vm12, %v1195_v52, %v1615_v5  ;;  %v1556_v12 = vmul.f32 0.01, %v960_v53  ;;  %v963_v19 = vadd.f32 %v2990_v55, %v3385_v9  ;;  %v967_v20 = vpop.f32.mrb[17].mxu0  ;;  %v1223_v21 = vpop.f32.mrb[17].mxu1 }
 0x10f   : > { %2322 = vst.msk [vmem:[%s3396_s6 + $0x2c] sm:$0xf] %vm2310_vm3, %v2779_v6  ;;  %2386 = vst.msk [vmem:[%s3396_s6 + $0x12c] sm:$0xf] %vm2310_vm3, %v2843_v7  ;;  %v2841_v16 = vpack.c.bf16 %v1743_v11, %v1743_v11  ;;  %vm1492_vm14 = vcmp.gt.f32.partialorder %v1216_v13, 0.0  ;;  %v1219_v24 = vadd.f32 %v3054_v59, %v3385_v9  ;;  %v3472_v25 = vpop.f32.mrb[18].mxu0  ;;  %v955_v40 = vadd.f32 %v3385_v9, %v954_v60 }
 0x110   : > { %2320 = vst.msk [vmem:[%s3396_s6 + $0x24] sm:$0xf] %vm2310_vm3, %v2777_v10  ;;  %v1684_v22 = vsel %vm1428_vm13, %v960_v53, %v1556_v12  ;;  %v1620_v23 = vmul.f32 0.01, %v1216_v13  ;;  %v3474_v26 = vpop.f32.mrb[18].mxu1  ;;  %vm1426_vm15 = vcmp.gt.f32.partialorder %v952_v17, 0.0  ;;  %v1211_v44 = vadd.f32 %v3385_v9, %v1210_v1 }
 0x111   : > { %2384 = vst.msk [vmem:[%s3396_s6 + $0x124] sm:$0xf] %vm2310_vm3, %v2841_v16  ;;  %v2782_v27 = vpack.c.bf16 %v1684_v22, %v1684_v22  ;;  %v1554_v28 = vmul.f32 0.01, %v952_v17  ;;  %vm1490_vm0 = vcmp.gt.f32.partialorder %v1208_v18, 0.0  ;;  %v3478_v29 = vpop.f32.mrb[19].mxu0  ;;  %v976_v47 = vadd.f32 %v2993_v14, %v3385_v9 }
 0x112   : > { %v3480_v30 = vpop.f32.mrb[19].mxu1  ;;  %v1748_v31 = vsel %vm1492_vm14, %v1216_v13, %v1620_v23  ;;  %v1618_v32 = vmul.f32 0.01, %v1208_v18  ;;  %vm1429_vm1 = vcmp.gt.f32.partialorder %v963_v19, 0.0  ;;  %v1557_v33 = vmul.f32 0.01, %v963_v19 }
 0x113   : > { %2325 = vst.msk [vmem:[%s3396_s6 + $0x38] sm:$0xf] %vm2310_vm3, %v2782_v27  ;;  %v2846_v34 = vpack.c.bf16 %v1748_v31, %v1748_v31  ;;  %v1682_v35 = vsel %vm1426_vm15, %v952_v17, %v1554_v28  ;;  %vm1493_vm2 = vcmp.gt.f32.partialorder %v1219_v24, 0.0  ;;  %v1621_v36 = vmul.f32 0.01, %v1219_v24 }
 0x114   : > { %v2780_v37 = vpack.c.bf16 %v1682_v35, %v1682_v35  ;;  %v1746_v38 = vsel %vm1490_vm0, %v1208_v18, %v1618_v32  ;;  %v1685_v39 = vsel %vm1429_vm1, %v963_v19, %v1557_v33  ;;  %vm1427_vm4 = vcmp.gt.f32.partialorder %v955_v40, 0.0 }
 0x115   : > { %2389 = vst.msk [vmem:[%s3396_s6 + $0x138] sm:$0xf] %vm2310_vm3, %v2846_v34  ;;  %v2844_v41 = vpack.c.bf16 %v1746_v38, %v1746_v38  ;;  %v2783_v42 = vpack.c.bf16 %v1685_v39, %v1685_v39  ;;  %v1749_v43 = vsel %vm1493_vm2, %v1219_v24, %v1621_v36  ;;  %v1555_v46 = vmul.f32 0.01, %v955_v40  ;;  %v2997_v48 = vpop.f32.mrb[20].mxu0  ;;  %v3061_v49 = vpop.f32.mrb[20].mxu1 }
 0x116   : > { %2323 = vst.msk [vmem:[%s3396_s6 + $0x30] sm:$0xf] %vm2310_vm3, %v2780_v37  ;;  %v2847_v45 = vpack.c.bf16 %v1749_v43, %v1749_v43  ;;  %vm1491_vm5 = vcmp.gt.f32.partialorder %v1211_v44, 0.0  ;;  %v1619_v50 = vmul.f32 0.01, %v1211_v44  ;;  %v1232_v51 = vadd.f32 %v3057_v15, %v3385_v9  ;;  %v983_v53 = vpop.f32.mrb[21].mxu0 }
 0x117   : > { %2387 = vst.msk [vmem:[%s3396_s6 + $0x130] sm:$0xf] %vm2310_vm3, %v2844_v41  ;;  %2326 = vst.msk [vmem:[%s3396_s6 + $0x3c] sm:$0xf] %vm2310_vm3, %v2783_v42  ;;  %v968_v52 = vadd.f32 %v3385_v9, %v967_v20  ;;  %v3497_v54 = vpop.f32.mrb[21].mxu1  ;;  %v1683_v55 = vsel %vm1427_vm4, %v955_v40, %v1555_v46  ;;  %vm1432_vm6 = vcmp.gt.f32.partialorder %v976_v47, 0.0  ;;  %v1224_v57 = vadd.f32 %v3385_v9, %v1223_v21 }
 0x118   : > { %2390 = vst.msk [vmem:[%s3396_s6 + $0x13c] sm:$0xf] %vm2310_vm3, %v2847_v45  ;;  %v1560_v56 = vmul.f32 0.01, %v976_v47  ;;  %v3502_v58 = vpop.f32.mrb[22].mxu0  ;;  %v3504_v59 = vpop.f32.mrb[22].mxu1  ;;  %v2781_v60 = vpack.c.bf16 %v1683_v55, %v1683_v55  ;;  %v1747_v61 = vsel %vm1491_vm5, %v1211_v44, %v1619_v50  ;;  %v979_v10 = vadd.f32 %v3472_v25, %v3385_v9 }
 0x119   : > { %vm1496_vm7 = vcmp.gt.f32.partialorder %v1232_v51, 0.0  ;;  %v1624_v62 = vmul.f32 0.01, %v1232_v51  ;;  %v3506_v63 = vpop.f32.mrb[23].mxu0  ;;  %v3508_v0 = vpop.f32.mrb[23].mxu1  ;;  %v2845_v1 = vpack.c.bf16 %v1747_v61, %v1747_v61  ;;  %vm1430_vm8 = vcmp.gt.f32.partialorder %v968_v52, 0.0 }
 0x11a   : > { %v1688_v2 = vsel %vm1432_vm6, %v976_v47, %v1560_v56  ;;  %v1558_v3 = vmul.f32 0.01, %v968_v52  ;;  %2324 = vst.msk [vmem:[%s3396_s6 + $0x34] sm:$0xf] %vm2310_vm3, %v2781_v60  ;;  %vm1494_vm9 = vcmp.gt.f32.partialorder %v1224_v57, 0.0  ;;  %v1235_v11 = vadd.f32 %v3474_v26, %v3385_v9 }
 0x11b   : > { %v2786_v4 = vpack.c.bf16 %v1688_v2, %v1688_v2  ;;  %v1752_v5 = vsel %vm1496_vm7, %v1232_v51, %v1624_v62  ;;  %v1622_v6 = vmul.f32 0.01, %v1224_v57  ;;  %2388 = vst.msk [vmem:[%s3396_s6 + $0x134] sm:$0xf] %vm2310_vm3, %v2845_v1  ;;  %v971_v14 = vadd.f32 %v3385_v9, %v3478_v29 }
 0x11c   : > { %v2850_v7 = vpack.c.bf16 %v1752_v5, %v1752_v5  ;;  %v1686_v8 = vsel %vm1430_vm8, %v968_v52, %v1558_v3  ;;  %v1227_v15 = vadd.f32 %v3385_v9, %v3480_v30  ;;  %vm1433_vm10 = vcmp.gt.f32.partialorder %v979_v10, 0.0 }
 0x11d   : > { %2329 = vst.msk [vmem:[%s3396_s6 + $0x48] sm:$0xf] %vm2310_vm3, %v2786_v4  ;;  %v2784_v12 = vpack.c.bf16 %v1686_v8, %v1686_v8  ;;  %v1750_v13 = vsel %vm1494_vm9, %v1224_v57, %v1622_v6  ;;  %v1561_v17 = vmul.f32 0.01, %v979_v10  ;;  %vm1497_vm11 = vcmp.gt.f32.partialorder %v1235_v11, 0.0  ;;  %v3526_v18 = vpop.f32.mrb[24].mxu0 }
 0x11e   : > { %2393 = vst.msk [vmem:[%s3396_s6 + $0x148] sm:$0xf] %vm2310_vm3, %v2850_v7  ;;  %v2848_v16 = vpack.c.bf16 %v1750_v13, %v1750_v13  ;;  %v3528_v19 = vpop.f32.mrb[24].mxu1  ;;  %v1625_v20 = vmul.f32 0.01, %v1235_v11  ;;  %vm1431_vm12 = vcmp.gt.f32.partialorder %v971_v14, 0.0  ;;  %v992_v24 = vadd.f32 %v2997_v48, %v3385_v9 }
 0x11f   : > { %2327 = vst.msk [vmem:[%s3396_s6 + $0x40] sm:$0xf] %vm2310_vm3, %v2784_v12  ;;  %v1559_v21 = vmul.f32 0.01, %v971_v14  ;;  %vm1495_vm13 = vcmp.gt.f32.partialorder %v1227_v15, 0.0  ;;  %v1689_v22 = vsel %vm1433_vm10, %v979_v10, %v1561_v17  ;;  %v1248_v25 = vadd.f32 %v3061_v49, %v3385_v9  ;;  %v3536_v26 = vpop.f32.mrb[25].mxu0 }
 0x120   : > { %2391 = vst.msk [vmem:[%s3396_s6 + $0x140] sm:$0xf] %vm2310_vm3, %v2848_v16  ;;  %v1623_v23 = vmul.f32 0.01, %v1227_v15  ;;  %v3538_v27 = vpop.f32.mrb[25].mxu1  ;;  %v2787_v28 = vpack.c.bf16 %v1689_v22, %v1689_v22  ;;  %v1753_v29 = vsel %vm1497_vm11, %v1235_v11, %v1625_v20  ;;  %v984_v31 = vadd.f32 %v3385_v9, %v983_v53  ;;  %v3542_v32 = vpop.f32.mrb[26].mxu0 }
 0x121   : > { %v1687_v30 = vsel %vm1431_vm12, %v971_v14, %v1559_v21  ;;  %v3544_v33 = vpop.f32.mrb[26].mxu1  ;;  %v2851_v34 = vpack.c.bf16 %v1753_v29, %v1753_v29  ;;  %vm1436_vm14 = vcmp.gt.f32.partialorder %v992_v24, 0.0  ;;  %v3547_v37 = vpop.f32.mrb[27].mxu0  ;;  %v1564_v40 = vmul.f32 0.01, %v992_v24 }
 0x122   : > { %v2785_v35 = vpack.c.bf16 %v1687_v30, %v1687_v30  ;;  %v1751_v36 = vsel %vm1495_vm13, %v1227_v15, %v1623_v23  ;;  %v3549_v38 = vpop.f32.mrb[27].mxu1  ;;  %2330 = vst.msk [vmem:[%s3396_s6 + $0x4c] sm:$0xf] %vm2310_vm3, %v2787_v28  ;;  %vm1500_vm15 = vcmp.gt.f32.partialorder %v1248_v25, 0.0  ;;  %v1628_v41 = vmul.f32 0.01, %v1248_v25 }
 0x123   : > { %v2849_v39 = vpack.c.bf16 %v1751_v36, %v1751_v36  ;;  %2394 = vst.msk [vmem:[%s3396_s6 + $0x14c] sm:$0xf] %vm2310_vm3, %v2851_v34  ;;  %vm1434_vm0 = vcmp.gt.f32.partialorder %v984_v31, 0.0  ;;  %v1562_v42 = vmul.f32 0.01, %v984_v31  ;;  %v1240_v43 = vadd.f32 %v3385_v9, %v3497_v54 }
 0x124   : > { %2328 = vst.msk [vmem:[%s3396_s6 + $0x44] sm:$0xf] %vm2310_vm3, %v2785_v35  ;;  %v995_v44 = vadd.f32 %v3502_v58, %v3385_v9  ;;  %v1692_v45 = vsel %vm1436_vm14, %v992_v24, %v1564_v40  ;;  %v1756_v46 = vsel %vm1500_vm15, %v1248_v25, %v1628_v41  ;;  %v1251_v47 = vadd.f32 %v3504_v59, %v3385_v9 }
 0x125   : > { %2392 = vst.msk [vmem:[%s3396_s6 + $0x144] sm:$0xf] %vm2310_vm3, %v2849_v39  ;;  %v987_v48 = vadd.f32 %v3385_v9, %v3506_v63  ;;  %v2790_v49 = vpack.c.bf16 %v1692_v45, %v1692_v45  ;;  %v2854_v50 = vpack.c.bf16 %v1756_v46, %v1756_v46  ;;  %v1690_v51 = vsel %vm1434_vm0, %v984_v31, %v1562_v42  ;;  %v3567_v52 = vpop.f32.mrb[28].mxu0  ;;  %v3569_v53 = vpop.f32.mrb[28].mxu1 }
 0x126   : > { %vm1498_vm1 = vcmp.gt.f32.partialorder %v1240_v43, 0.0  ;;  %v2788_v54 = vpack.c.bf16 %v1690_v51, %v1690_v51  ;;  %v1626_v55 = vmul.f32 0.01, %v1240_v43  ;;  %vm1437_vm2 = vcmp.gt.f32.partialorder %v995_v44, 0.0  ;;  %v3571_v57 = vpop.f32.mrb[29].mxu0  ;;  %v3583_v1 = vpop.f32.mrb[29].mxu1 }
 0x127   : > { %v1565_v56 = vmul.f32 0.01, %v995_v44  ;;  %2333 = vst.msk [vmem:[%s3396_s6 + $0x58] sm:$0xf] %vm2310_vm3, %v2790_v49  ;;  %2397 = vst.msk [vmem:[%s3396_s6 + $0x158] sm:$0xf] %vm2310_vm3, %v2854_v50  ;;  %v1243_v62 = vadd.f32 %v3385_v9, %v3508_v0  ;;  %v1008_v63 = vadd.f32 %v3526_v18, %v3385_v9  ;;  %v1264_v14 = vadd.f32 %v3528_v19, %v3385_v9 }
 0x128   : > { %vm1501_vm4 = vcmp.gt.f32.partialorder %v1251_v47, 0.0  ;;  %v1629_v58 = vmul.f32 0.01, %v1251_v47  ;;  %vm1435_vm5 = vcmp.gt.f32.partialorder %v987_v48, 0.0  ;;  %v1563_v59 = vmul.f32 0.01, %v987_v48 }
 0x129   : > { %2331 = vst.msk [vmem:[%s3396_s6 + $0x50] sm:$0xf] %vm2310_vm3, %v2788_v54  ;;  %v1754_v60 = vsel %vm1498_vm1, %v1240_v43, %v1626_v55  ;;  %v1693_v61 = vsel %vm1437_vm2, %v995_v44, %v1565_v56  ;;  %v3585_v2 = vpop.f32.mrb[30].mxu0  ;;  %v3587_v7 = vpop.f32.mrb[30].mxu1  ;;  %vm1499_vm6 = vcmp.gt.f32.partialorder %v1243_v62, 0.0  ;;  %vm1440_vm7 = vcmp.gt.f32.partialorder %v1008_v63, 0.0 }
 0x12a   : > { %v2852_v3 = vpack.c.bf16 %v1754_v60, %v1754_v60  ;;  %v2791_v4 = vpack.c.bf16 %v1693_v61, %v1693_v61  ;;  %v1757_v5 = vsel %vm1501_vm4, %v1251_v47, %v1629_v58  ;;  %v1691_v6 = vsel %vm1435_vm5, %v987_v48, %v1563_v59  ;;  %v3589_v8 = vpop.f32.mrb[31].mxu0  ;;  %v3591_v12 = vpop.f32.mrb[31].mxu1 }
 0x12b   : > { %v2855_v10 = vpack.c.bf16 %v1757_v5, %v1757_v5  ;;  %v2789_v0 = vpack.c.bf16 %v1691_v6, %v1691_v6  ;;  %v1627_v11 = vmul.f32 0.01, %v1243_v62  ;;  %v1568_v13 = vmul.f32 0.01, %v1008_v63 }
 0x12c   : > { %2395 = vst.msk [vmem:[%s3396_s6 + $0x150] sm:$0xf] %vm2310_vm3, %v2852_v3  ;;  %2334 = vst.msk [vmem:[%s3396_s6 + $0x5c] sm:$0xf] %vm2310_vm3, %v2791_v4  ;;  %v1000_v15 = vadd.f32 %v3385_v9, %v3536_v26  ;;  %v1256_v17 = vadd.f32 %v3385_v9, %v3538_v27  ;;  %v1011_v18 = vadd.f32 %v3542_v32, %v3385_v9  ;;  %vm1504_vm8 = vcmp.gt.f32.partialorder %v1264_v14, 0.0 }
 0x12d   : > { %2398 = vst.msk [vmem:[%s3396_s6 + $0x15c] sm:$0xf] %vm2310_vm3, %v2855_v10  ;;  %2332 = vst.msk [vmem:[%s3396_s6 + $0x54] sm:$0xf] %vm2310_vm3, %v2789_v0  ;;  %v1755_v16 = vsel %vm1499_vm6, %v1243_v62, %v1627_v11  ;;  %v1267_v20 = vadd.f32 %v3544_v33, %v3385_v9  ;;  %v1696_v19 = vsel %vm1440_vm7, %v1008_v63, %v1568_v13  ;;  %v1632_v22 = vmul.f32 0.01, %v1264_v14 }
 0x12e   : > { %v2853_v21 = vpack.c.bf16 %v1755_v16, %v1755_v16  ;;  %v3611_v23 = vpop.f32.mrb[32].mxu0  ;;  %v3613_v24 = vpop.f32.mrb[32].mxu1  ;;  %v2794_v25 = vpack.c.bf16 %v1696_v19, %v1696_v19  ;;  %vm1438_vm9 = vcmp.gt.f32.partialorder %v1000_v15, 0.0  ;;  %v1566_v26 = vmul.f32 0.01, %v1000_v15 }
 0x12f   : > { %vm1502_vm10 = vcmp.gt.f32.partialorder %v1256_v17, 0.0  ;;  %v3615_v27 = vpop.f32.mrb[33].mxu0  ;;  %v3617_v28 = vpop.f32.mrb[33].mxu1  ;;  %v1760_v29 = vsel %vm1504_vm8, %v1264_v14, %v1632_v22  ;;  %v1630_v30 = vmul.f32 0.01, %v1256_v17  ;;  %vm1441_vm11 = vcmp.gt.f32.partialorder %v1011_v18, 0.0 }
 0x130   : > { %2396 = vst.msk [vmem:[%s3396_s6 + $0x154] sm:$0xf] %vm2310_vm3, %v2853_v21  ;;  %v1569_v31 = vmul.f32 0.01, %v1011_v18  ;;  %v3621_v32 = vpop.f32.mrb[34].mxu0  ;;  %v2858_v33 = vpack.c.bf16 %v1760_v29, %v1760_v29  ;;  %v1694_v34 = vsel %vm1438_vm9, %v1000_v15, %v1566_v26  ;;  %vm1505_vm12 = vcmp.gt.f32.partialorder %v1267_v20, 0.0 }
 0x131   : > { %2337 = vst.msk [vmem:[%s3396_s6 + $0x68] sm:$0xf] %vm2310_vm3, %v2794_v25  ;;  %v1633_v35 = vmul.f32 0.01, %v1267_v20  ;;  %v3625_v36 = vpop.f32.mrb[34].mxu1  ;;  %v3627_v39 = vpop.f32.mrb[35].mxu0  ;;  %v2792_v40 = vpack.c.bf16 %v1694_v34, %v1694_v34  ;;  %v1758_v41 = vsel %vm1502_vm10, %v1256_v17, %v1630_v30  ;;  %v1003_v43 = vadd.f32 %v3385_v9, %v3547_v37 }
 0x132   : > { %v1697_v42 = vsel %vm1441_vm11, %v1011_v18, %v1569_v31  ;;  %v3632_v44 = vpop.f32.mrb[35].mxu1  ;;  %2401 = vst.msk [vmem:[%s3396_s6 + $0x168] sm:$0xf] %vm2310_vm3, %v2858_v33  ;;  %v2856_v45 = vpack.c.bf16 %v1758_v41, %v1758_v41  ;;  %v1259_v48 = vadd.f32 %v3385_v9, %v3549_v38  ;;  %v1024_v51 = vadd.f32 %v3567_v52, %v3385_v9 }
 0x133   : > { %v2795_v46 = vpack.c.bf16 %v1697_v42, %v1697_v42  ;;  %v1761_v47 = vsel %vm1505_vm12, %v1267_v20, %v1633_v35  ;;  %2335 = vst.msk [vmem:[%s3396_s6 + $0x60] sm:$0xf] %vm2310_vm3, %v2792_v40  ;;  %vm1439_vm13 = vcmp.gt.f32.partialorder %v1003_v43, 0.0  ;;  %v1567_v50 = vmul.f32 0.01, %v1003_v43 }
 0x134   : > { %v2859_v49 = vpack.c.bf16 %v1761_v47, %v1761_v47  ;;  %2399 = vst.msk [vmem:[%s3396_s6 + $0x160] sm:$0xf] %vm2310_vm3, %v2856_v45  ;;  %vm1503_vm14 = vcmp.gt.f32.partialorder %v1259_v48, 0.0  ;;  %v1631_v37 = vmul.f32 0.01, %v1259_v48  ;;  %v1280_v54 = vadd.f32 %v3569_v53, %v3385_v9 }
 0x135   : > { %2338 = vst.msk [vmem:[%s3396_s6 + $0x6c] sm:$0xf] %vm2310_vm3, %v2795_v46  ;;  %v1016_v38 = vadd.f32 %v3385_v9, %v3571_v57  ;;  %v1695_v55 = vsel %vm1439_vm13, %v1003_v43, %v1567_v50  ;;  %vm1444_vm15 = vcmp.gt.f32.partialorder %v1024_v51, 0.0  ;;  %v1572_v56 = vmul.f32 0.01, %v1024_v51  ;;  %v3654_v58 = vpop.f32.mrb[36].mxu0 }
 0x136   : > { %2402 = vst.msk [vmem:[%s3396_s6 + $0x16c] sm:$0xf] %vm2310_vm3, %v2859_v49  ;;  %v1272_v52 = vadd.f32 %v3385_v9, %v3583_v1  ;;  %v3656_v59 = vpop.f32.mrb[36].mxu1  ;;  %v2793_v60 = vpack.c.bf16 %v1695_v55, %v1695_v55  ;;  %v1759_v61 = vsel %vm1503_vm14, %v1259_v48, %v1631_v37  ;;  %vm1508_vm0 = vcmp.gt.f32.partialorder %v1280_v54, 0.0  ;;  %v3658_v62 = vpop.f32.mrb[37].mxu0 }
 0x137   : > { %v1636_v53 = vmul.f32 0.01, %v1280_v54  ;;  %v3660_v57 = vpop.f32.mrb[37].mxu1  ;;  %v2857_v63 = vpack.c.bf16 %v1759_v61, %v1759_v61  ;;  %v1700_v3 = vsel %vm1444_vm15, %v1024_v51, %v1572_v56  ;;  %vm1442_vm1 = vcmp.gt.f32.partialorder %v1016_v38, 0.0  ;;  %v3662_v5 = vpop.f32.mrb[38].mxu0 }
 0x138   : > { %v1570_v4 = vmul.f32 0.01, %v1016_v38  ;;  %v3664_v1 = vpop.f32.mrb[38].mxu1  ;;  %2336 = vst.msk [vmem:[%s3396_s6 + $0x64] sm:$0xf] %vm2310_vm3, %v2793_v60  ;;  %v2798_v6 = vpack.c.bf16 %v1700_v3, %v1700_v3  ;;  %vm1506_vm2 = vcmp.gt.f32.partialorder %v1272_v52, 0.0  ;;  %v1027_v16 = vadd.f32 %v3585_v2, %v3385_v9 }
 0x139   : > { %v1764_v10 = vsel %vm1508_vm0, %v1280_v54, %v1636_v53  ;;  %v1634_v0 = vmul.f32 0.01, %v1272_v52  ;;  %v3668_v11 = vpop.f32.mrb[39].mxu0  ;;  %v3670_v13 = vpop.f32.mrb[39].mxu1  ;;  %2400 = vst.msk [vmem:[%s3396_s6 + $0x164] sm:$0xf] %vm2310_vm3, %v2857_v63  ;;  %v1283_v17 = vadd.f32 %v3587_v7, %v3385_v9  ;;  %v1019_v21 = vadd.f32 %v3385_v9, %v3589_v8 }
 0x13a   : > { %v2862_v14 = vpack.c.bf16 %v1764_v10, %v1764_v10  ;;  %v1698_v15 = vsel %vm1442_vm1, %v1016_v38, %v1570_v4  ;;  %2341 = vst.msk [vmem:[%s3396_s6 + $0x78] sm:$0xf] %vm2310_vm3, %v2798_v6  ;;  %v1275_v19 = vadd.f32 %v3385_v9, %v3591_v12  ;;  %vm1445_vm4 = vcmp.gt.f32.partialorder %v1027_v16, 0.0 }
 0x13b   : > { %v2796_v18 = vpack.c.bf16 %v1698_v15, %v1698_v15  ;;  %v1762_v20 = vsel %vm1506_vm2, %v1272_v52, %v1634_v0  ;;  %v1573_v25 = vmul.f32 0.01, %v1027_v16  ;;  %vm1509_vm5 = vcmp.gt.f32.partialorder %v1283_v17, 0.0 }
 0x13c   : > { %2405 = vst.msk [vmem:[%s3396_s6 + $0x178] sm:$0xf] %vm2310_vm3, %v2862_v14  ;;  %v2860_v22 = vpack.c.bf16 %v1762_v20, %v1762_v20  ;;  %v1637_v2 = vmul.f32 0.01, %v1283_v17  ;;  %vm1443_vm6 = vcmp.gt.f32.partialorder %v1019_v21, 0.0  ;;  %vm1507_vm7 = vcmp.gt.f32.partialorder %v1275_v19, 0.0 }
 0x13d   : > { %2339 = vst.msk [vmem:[%s3396_s6 + $0x70] sm:$0xf] %vm2310_vm3, %v2796_v18  ;;  %v1571_v7 = vmul.f32 0.01, %v1019_v21  ;;  %v1701_v26 = vsel %vm1445_vm4, %v1027_v16, %v1573_v25  ;;  %v1635_v29 = vmul.f32 0.01, %v1275_v19  ;;  %v1040_v8 = vadd.f32 %v3611_v23, %v3385_v9 }
 0x13e   : > { %2403 = vst.msk [vmem:[%s3396_s6 + $0x170] sm:$0xf] %vm2310_vm3, %v2860_v22  ;;  %v1296_v12 = vadd.f32 %v3613_v24, %v3385_v9  ;;  %v3694_v30 = vpop.f32.mrb[40].mxu0  ;;  %v3696_v31 = vpop.f32.mrb[40].mxu1  ;;  %v2799_v33 = vpack.c.bf16 %v1701_v26, %v1701_v26  ;;  %v1765_v34 = vsel %vm1509_vm5, %v1283_v17, %v1637_v2  ;;  %v1032_v40 = vadd.f32 %v3385_v9, %v3615_v27  ;;  %v3759_v2 = vld [vmem:[%s4063_s2] ss:$0 sm:$0xff] }
 0x13f   : > { %v1699_v35 = vsel %vm1443_vm6, %v1019_v21, %v1571_v7  ;;  %v3700_v41 = vpop.f32.mrb[41].mxu0  ;;  %v3702_v42 = vpop.f32.mrb[41].mxu1  ;;  %v2863_v23 = vpack.c.bf16 %v1765_v34, %v1765_v34  ;;  %v1763_v24 = vsel %vm1507_vm7, %v1275_v19, %v1635_v29  ;;  %vm1448_vm8 = vcmp.gt.f32.partialorder %v1040_v8, 0.0 }
 0x140   : > { %v2797_v43 = vpack.c.bf16 %v1699_v35, %v1699_v35  ;;  %v3705_v45 = vpop.f32.mrb[42].mxu0  ;;  %v3707_v46 = vpop.f32.mrb[42].mxu1  ;;  %2342 = vst.msk [vmem:[%s3396_s6 + $0x7c] sm:$0xf] %vm2310_vm3, %v2799_v33  ;;  %v2861_v47 = vpack.c.bf16 %v1763_v24, %v1763_v24  ;;  %v1576_v48 = vmul.f32 0.01, %v1040_v8  ;;  %v1288_v51 = vadd.f32 %v3385_v9, %v3617_v28 }
 0x141   : > { %vm1512_vm9 = vcmp.gt.f32.partialorder %v1296_v12, 0.0  ;;  %v1640_v27 = vmul.f32 0.01, %v1296_v12  ;;  %v3711_v49 = vpop.f32.mrb[43].mxu0  ;;  %2406 = vst.msk [vmem:[%s3396_s6 + $0x17c] sm:$0xf] %vm2310_vm3, %v2863_v23  ;;  %v1043_v37 = vadd.f32 %v3621_v32, %v3385_v9  ;;  %v1299_v56 = vadd.f32 %v3625_v36, %v3385_v9 }
 0x142   : > { %2340 = vst.msk [vmem:[%s3396_s6 + $0x74] sm:$0xf] %vm2310_vm3, %v2797_v43  ;;  %vm1446_vm10 = vcmp.gt.f32.partialorder %v1032_v40, 0.0  ;;  %v1574_v50 = vmul.f32 0.01, %v1032_v40  ;;  %v3721_v54 = vpop.f32.mrb[43].mxu1  ;;  %v1704_v38 = vsel %vm1448_vm8, %v1040_v8, %v1576_v48  ;;  %v1035_v52 = vadd.f32 %v3385_v9, %v3627_v39 }
 0x143   : > { %2404 = vst.msk [vmem:[%s3396_s6 + $0x174] sm:$0xf] %vm2310_vm3, %v2861_v47  ;;  %v1768_v55 = vsel %vm1512_vm9, %v1296_v12, %v1640_v27  ;;  %v2802_v28 = vpack.c.bf16 %v1704_v38, %v1704_v38  ;;  %vm1510_vm11 = vcmp.gt.f32.partialorder %v1288_v51, 0.0  ;;  %v1638_v53 = vmul.f32 0.01, %v1288_v51 }
 0x144   : > { %v2866_v60 = vpack.c.bf16 %v1768_v55, %v1768_v55  ;;  %v1702_v61 = vsel %vm1446_vm10, %v1032_v40, %v1574_v50  ;;  %vm1449_vm12 = vcmp.gt.f32.partialorder %v1043_v37, 0.0  ;;  %v1577_v63 = vmul.f32 0.01, %v1043_v37 }
 0x145   : > { %v2800_v32 = vpack.c.bf16 %v1702_v61, %v1702_v61  ;;  %2345 = vst.msk [vmem:[%s3396_s6 + $0x88] sm:$0xf] %vm2310_vm3, %v2802_v28  ;;  %vm1513_vm13 = vcmp.gt.f32.partialorder %v1299_v56, 0.0  ;;  %v1641_v3 = vmul.f32 0.01, %v1299_v56  ;;  %vm1447_vm14 = vcmp.gt.f32.partialorder %v1035_v52, 0.0 }
 0x146   : > { %2409 = vst.msk [vmem:[%s3396_s6 + $0x188] sm:$0xf] %vm2310_vm3, %v2866_v60  ;;  %v1575_v36 = vmul.f32 0.01, %v1035_v52  ;;  %v1766_v4 = vsel %vm1510_vm11, %v1288_v51, %v1638_v53  ;;  %v1705_v39 = vsel %vm1449_vm12, %v1043_v37, %v1577_v63  ;;  %v1291_v6 = vadd.f32 %v3385_v9, %v3632_v44  ;;  %v3740_v0 = vpop.f32.mrb[44].mxu0  ;;  %v3742_v14 = vpop.f32.mrb[44].mxu1 }
 0x147   : > { %2343 = vst.msk [vmem:[%s3396_s6 + $0x80] sm:$0xf] %vm2310_vm3, %v2800_v32  ;;  %v1056_v10 = vadd.f32 %v3654_v58, %v3385_v9  ;;  %v2864_v15 = vpack.c.bf16 %v1766_v4, %v1766_v4  ;;  %v2803_v16 = vpack.c.bf16 %v1705_v39, %v1705_v39  ;;  %v1769_v17 = vsel %vm1513_vm13, %v1299_v56, %v1641_v3  ;;  %v3744_v20 = vpop.f32.mrb[45].mxu0  ;;  %v3746_v21 = vpop.f32.mrb[45].mxu1 }
 0x148   : > { %v1703_v18 = vsel %vm1447_vm14, %v1035_v52, %v1575_v36  ;;  %v2867_v19 = vpack.c.bf16 %v1769_v17, %v1769_v17  ;;  %vm1511_vm15 = vcmp.gt.f32.partialorder %v1291_v6, 0.0  ;;  %v1639_v22 = vmul.f32 0.01, %v1291_v6  ;;  %v3748_v9 = vpop.f32.mrb[46].mxu0  ;;  %v3750_v58 = vpop.f32.mrb[46].mxu1 }
 0x149   : > { %v2801_v44 = vpack.c.bf16 %v1703_v18, %v1703_v18  ;;  %2407 = vst.msk [vmem:[%s3396_s6 + $0x180] sm:$0xf] %vm2310_vm3, %v2864_v15  ;;  %2346 = vst.msk [vmem:[%s3396_s6 + $0x8c] sm:$0xf] %vm2310_vm3, %v2803_v16  ;;  %vm1452_vm0 = vcmp.gt.f32.partialorder %v1056_v10, 0.0  ;;  %v1312_v7 = vadd.f32 %v3759_v2, %v3656_v59  ;;  %v1048_v26 = vadd.f32 %v3759_v2, %v3658_v62  ;;  %v3765_v29 = vpop.f32.mrb[47].mxu0 }
 0x14a   : > { %v1580_v25 = vmul.f32 0.01, %v1056_v10  ;;  %v3767_v8 = vpop.f32.mrb[47].mxu1  ;;  %2410 = vst.msk [vmem:[%s3396_s6 + $0x18c] sm:$0xf] %vm2310_vm3, %v2867_v19  ;;  %v1767_v12 = vsel %vm1511_vm15, %v1291_v6, %v1639_v22  ;;  %v1304_v33 = vadd.f32 %v3759_v2, %v3660_v57  ;;  %v1059_v34 = vadd.f32 %v3759_v2, %v3662_v5 }
 0x14b   : > { %2344 = vst.msk [vmem:[%s3396_s6 + $0x84] sm:$0xf] %vm2310_vm3, %v2801_v44  ;;  %v1315_v59 = vadd.f32 %v3759_v2, %v3664_v1  ;;  %v2865_v62 = vpack.c.bf16 %v1767_v12, %v1767_v12  ;;  %vm1516_vm1 = vcmp.gt.f32.partialorder %v1312_v7, 0.0  ;;  %v1644_v40 = vmul.f32 0.01, %v1312_v7 }
 0x14c   : > { %v1708_v35 = vsel %vm1452_vm0, %v1056_v10, %v1580_v25  ;;  %vm1450_vm2 = vcmp.gt.f32.partialorder %v1048_v26, 0.0  ;;  %v1578_v43 = vmul.f32 0.01, %v1048_v26  ;;  %vm1514_vm4 = vcmp.gt.f32.partialorder %v1304_v33, 0.0 }
 0x14d   : > { %v2806_v23 = vpack.c.bf16 %v1708_v35, %v1708_v35  ;;  %2408 = vst.msk [vmem:[%s3396_s6 + $0x184] sm:$0xf] %vm2310_vm3, %v2865_v62  ;;  %v1772_v24 = vsel %vm1516_vm1, %v1312_v7, %v1644_v40  ;;  %v1642_v47 = vmul.f32 0.01, %v1304_v33  ;;  %vm1453_vm5 = vcmp.gt.f32.partialorder %v1059_v34, 0.0  ;;  %v3781_v5 = vpop.f32.mrb[48].mxu0 }
 0x14e   : > { %v1581_v57 = vmul.f32 0.01, %v1059_v34  ;;  %v2870_v1 = vpack.c.bf16 %v1772_v24, %v1772_v24  ;;  %v1706_v48 = vsel %vm1450_vm2, %v1048_v26, %v1578_v43  ;;  %vm1517_vm6 = vcmp.gt.f32.partialorder %v1315_v59, 0.0  ;;  %v3785_v50 = vpop.f32.mrb[48].mxu1  ;;  %v3787_v51 = vpop.f32.mrb[49].mxu0 }
 0x14f   : > { %2349 = vst.msk [vmem:[%s3396_s6 + $0x98] sm:$0xf] %vm2310_vm3, %v2806_v23  ;;  %v1645_v27 = vmul.f32 0.01, %v1315_v59  ;;  %v2804_v37 = vpack.c.bf16 %v1706_v48, %v1706_v48  ;;  %v1770_v38 = vsel %vm1514_vm4, %v1304_v33, %v1642_v47  ;;  %v1051_v56 = vadd.f32 %v3759_v2, %v3668_v11  ;;  %v3791_v52 = vpop.f32.mrb[49].mxu1  ;;  %v3793_v28 = vpop.f32.mrb[50].mxu0 }
 0x150   : > { %v1709_v55 = vsel %vm1453_vm5, %v1059_v34, %v1581_v57  ;;  %2413 = vst.msk [vmem:[%s3396_s6 + $0x198] sm:$0xf] %vm2310_vm3, %v2870_v1  ;;  %v2868_v60 = vpack.c.bf16 %v1770_v38, %v1770_v38  ;;  %v1307_v53 = vadd.f32 %v3759_v2, %v3670_v13  ;;  %v3799_v63 = vpop.f32.mrb[50].mxu1  ;;  %v3801_v3 = vpop.f32.mrb[51].mxu0  ;;  %v1072_v4 = vadd.f32 %v3759_v2, %v3694_v30 }
 0x151   : > { %v2807_v61 = vpack.c.bf16 %v1709_v55, %v1709_v55  ;;  %v1773_v32 = vsel %vm1517_vm6, %v1315_v59, %v1645_v27  ;;  %2347 = vst.msk [vmem:[%s3396_s6 + $0x90] sm:$0xf] %vm2310_vm3, %v2804_v37  ;;  %vm1451_vm7 = vcmp.gt.f32.partialorder %v1051_v56, 0.0  ;;  %v1579_v36 = vmul.f32 0.01, %v1051_v56  ;;  %v3807_v39 = vpop.f32.mrb[51].mxu1 }
 0x152   : > { %v2871_v11 = vpack.c.bf16 %v1773_v32, %v1773_v32  ;;  %2411 = vst.msk [vmem:[%s3396_s6 + $0x190] sm:$0xf] %vm2310_vm3, %v2868_v60  ;;  %vm1515_vm8 = vcmp.gt.f32.partialorder %v1307_v53, 0.0  ;;  %v1643_v13 = vmul.f32 0.01, %v1307_v53  ;;  %v1328_v6 = vadd.f32 %v3759_v2, %v3696_v31 }
 0x153   : > { %2350 = vst.msk [vmem:[%s3396_s6 + $0x9c] sm:$0xf] %vm2310_vm3, %v2807_v61  ;;  %v1064_v10 = vadd.f32 %v3759_v2, %v3700_v41  ;;  %v1707_v15 = vsel %vm1451_vm7, %v1051_v56, %v1579_v36  ;;  %vm1456_vm9 = vcmp.gt.f32.partialorder %v1072_v4, 0.0  ;;  %v1584_v30 = vmul.f32 0.01, %v1072_v4 }
 0x154   : > { %2414 = vst.msk [vmem:[%s3396_s6 + $0x19c] sm:$0xf] %vm2310_vm3, %v2871_v11  ;;  %v1320_v16 = vadd.f32 %v3759_v2, %v3702_v42  ;;  %v2805_v17 = vpack.c.bf16 %v1707_v15, %v1707_v15  ;;  %v1771_v18 = vsel %vm1515_vm8, %v1307_v53, %v1643_v13  ;;  %vm1520_vm10 = vcmp.gt.f32.partialorder %v1328_v6, 0.0 }
 0x155   : > { %v1648_v19 = vmul.f32 0.01, %v1328_v6  ;;  %v2869_v44 = vpack.c.bf16 %v1771_v18, %v1771_v18  ;;  %v1712_v22 = vsel %vm1456_vm9, %v1072_v4, %v1584_v30  ;;  %vm1454_vm11 = vcmp.gt.f32.partialorder %v1064_v10, 0.0  ;;  %v3821_v25 = vpop.f32.mrb[52].mxu0  ;;  %v3823_v41 = vpop.f32.mrb[52].mxu1 }
 0x156   : > { %v1582_v31 = vmul.f32 0.01, %v1064_v10  ;;  %2348 = vst.msk [vmem:[%s3396_s6 + $0x94] sm:$0xf] %vm2310_vm3, %v2805_v17  ;;  %v2810_v7 = vpack.c.bf16 %v1712_v22, %v1712_v22  ;;  %vm1518_vm12 = vcmp.gt.f32.partialorder %v1320_v16, 0.0  ;;  %v3827_v12 = vpop.f32.mrb[53].mxu0  ;;  %v1075_v62 = vadd.f32 %v3759_v2, %v3705_v45 }
 0x157   : > { %v1776_v26 = vsel %vm1520_vm10, %v1328_v6, %v1648_v19  ;;  %v1646_v42 = vmul.f32 0.01, %v1320_v16  ;;  %v3829_v33 = vpop.f32.mrb[53].mxu1  ;;  %2412 = vst.msk [vmem:[%s3396_s6 + $0x194] sm:$0xf] %vm2310_vm3, %v2869_v44  ;;  %v1331_v35 = vadd.f32 %v3759_v2, %v3707_v46  ;;  %v3837_v40 = vpop.f32.mrb[54].mxu0  ;;  %v1067_v47 = vadd.f32 %v3759_v2, %v3711_v49 }
 0x158   : > { %v2874_v34 = vpack.c.bf16 %v1776_v26, %v1776_v26  ;;  %v1710_v59 = vsel %vm1454_vm11, %v1064_v10, %v1582_v31  ;;  %v3839_v23 = vpop.f32.mrb[54].mxu1  ;;  %2353 = vst.msk [vmem:[%s3396_s6 + $0xa8] sm:$0xf] %vm2310_vm3, %v2810_v7  ;;  %v1323_v57 = vadd.f32 %v3759_v2, %v3721_v54  ;;  %v3847_v45 = vpop.f32.mrb[55].mxu0  ;;  %vm1457_vm13 = vcmp.gt.f32.partialorder %v1075_v62, 0.0 }
 0x159   : > { %v2808_v43 = vpack.c.bf16 %v1710_v59, %v1710_v59  ;;  %v1774_v24 = vsel %vm1518_vm12, %v1320_v16, %v1646_v42  ;;  %v3849_v1 = vpop.f32.mrb[55].mxu1  ;;  %v1585_v48 = vmul.f32 0.01, %v1075_v62  ;;  %vm1521_vm14 = vcmp.gt.f32.partialorder %v1331_v35, 0.0 }
 0x15a   : > { %2417 = vst.msk [vmem:[%s3396_s6 + $0x1a8] sm:$0xf] %vm2310_vm3, %v2874_v34  ;;  %v2872_v46 = vpack.c.bf16 %v1774_v24, %v1774_v24  ;;  %v1649_v27 = vmul.f32 0.01, %v1331_v35  ;;  %vm1455_vm15 = vcmp.gt.f32.partialorder %v1067_v47, 0.0  ;;  %vm1519_vm0 = vcmp.gt.f32.partialorder %v1323_v57, 0.0 }
 0x15b   : > { %2351 = vst.msk [vmem:[%s3396_s6 + $0xa0] sm:$0xf] %vm2310_vm3, %v2808_v43  ;;  %v1583_v37 = vmul.f32 0.01, %v1067_v47  ;;  %v1713_v49 = vsel %vm1457_vm13, %v1075_v62, %v1585_v48  ;;  %v1647_v54 = vmul.f32 0.01, %v1323_v57  ;;  %v1088_v38 = vadd.f32 %v3759_v2, %v3740_v0 }
 0x15c   : > { %2415 = vst.msk [vmem:[%s3396_s6 + $0x1a0] sm:$0xf] %vm2310_vm3, %v2872_v46  ;;  %v1344_v55 = vadd.f32 %v3759_v2, %v3742_v14  ;;  %v2811_v56 = vpack.c.bf16 %v1713_v49, %v1713_v49  ;;  %v1777_v60 = vsel %vm1521_vm14, %v1331_v35, %v1649_v27  ;;  %v1080_v32 = vadd.f32 %v3759_v2, %v3744_v20 }
 0x15d   : > { %v1711_v61 = vsel %vm1455_vm15, %v1067_v47, %v1583_v37  ;;  %v2875_v53 = vpack.c.bf16 %v1777_v60, %v1777_v60  ;;  %v1775_v36 = vsel %vm1519_vm0, %v1323_v57, %v1647_v54  ;;  %vm1460_vm1 = vcmp.gt.f32.partialorder %v1088_v38, 0.0  ;;  %v3863_v4 = vpop.f32.mrb[56].mxu0  ;;  %v3865_v13 = vpop.f32.mrb[56].mxu1 }
 0x15e   : > { %v2809_v11 = vpack.c.bf16 %v1711_v61, %v1711_v61  ;;  %2354 = vst.msk [vmem:[%s3396_s6 + $0xac] sm:$0xf] %vm2310_vm3, %v2811_v56  ;;  %v2873_v0 = vpack.c.bf16 %v1775_v36, %v1775_v36  ;;  %v1588_v14 = vmul.f32 0.01, %v1088_v38  ;;  %vm1524_vm2 = vcmp.gt.f32.partialorder %v1344_v55, 0.0  ;;  %v3869_v10 = vpop.f32.mrb[57].mxu0 }
 0x15f   : > { %v1652_v6 = vmul.f32 0.01, %v1344_v55  ;;  %2418 = vst.msk [vmem:[%s3396_s6 + $0x1ac] sm:$0xf] %vm2310_vm3, %v2875_v53  ;;  %vm1458_vm4 = vcmp.gt.f32.partialorder %v1080_v32, 0.0  ;;  %v1336_v15 = vadd.f32 %v3759_v2, %v3746_v21  ;;  %v1091_v30 = vadd.f32 %v3759_v2, %v3748_v9  ;;  %v3879_v16 = vpop.f32.mrb[57].mxu1 }
 0x160   : > { %2352 = vst.msk [vmem:[%s3396_s6 + $0xa4] sm:$0xf] %vm2310_vm3, %v2809_v11  ;;  %v1586_v20 = vmul.f32 0.01, %v1080_v32  ;;  %v3881_v17 = vpop.f32.mrb[58].mxu0  ;;  %v1716_v18 = vsel %vm1460_vm1, %v1088_v38, %v1588_v14  ;;  %v1347_v44 = vadd.f32 %v3759_v2, %v3750_v58  ;;  %v1083_v21 = vadd.f32 %v3759_v2, %v3765_v29  ;;  %v3890_v22 = vpop.f32.mrb[58].mxu1 }
 0x161   : > { %2416 = vst.msk [vmem:[%s3396_s6 + $0x1a4] sm:$0xf] %vm2310_vm3, %v2873_v0  ;;  %v1780_v19 = vsel %vm1524_vm2, %v1344_v55, %v1652_v6  ;;  %v3892_v9 = vpop.f32.mrb[59].mxu0  ;;  %v2814_v31 = vpack.c.bf16 %v1716_v18, %v1716_v18  ;;  %vm1522_vm5 = vcmp.gt.f32.partialorder %v1336_v15, 0.0  ;;  %v3894_v42 = vpop.f32.mrb[59].mxu1  ;;  %vm1461_vm6 = vcmp.gt.f32.partialorder %v1091_v30, 0.0 }
 0x162   : > { %v2878_v7 = vpack.c.bf16 %v1780_v19, %v1780_v19  ;;  %v1714_v26 = vsel %vm1458_vm4, %v1080_v32, %v1586_v20  ;;  %v1650_v59 = vmul.f32 0.01, %v1336_v15  ;;  %v1589_v62 = vmul.f32 0.01, %v1091_v30 }
 0x163   : > { %v2812_v34 = vpack.c.bf16 %v1714_v26, %v1714_v26  ;;  %2357 = vst.msk [vmem:[%s3396_s6 + $0xb8] sm:$0xf] %vm2310_vm3, %v2814_v31  ;;  %vm1525_vm7 = vcmp.gt.f32.partialorder %v1347_v44, 0.0  ;;  %v1653_v58 = vmul.f32 0.01, %v1347_v44  ;;  %vm1459_vm8 = vcmp.gt.f32.partialorder %v1083_v21, 0.0 }
 0x164   : > { %2421 = vst.msk [vmem:[%s3396_s6 + $0x1b8] sm:$0xf] %vm2310_vm3, %v2878_v7  ;;  %v1587_v29 = vmul.f32 0.01, %v1083_v21  ;;  %v1778_v35 = vsel %vm1522_vm5, %v1336_v15, %v1650_v59  ;;  %v1717_v43 = vsel %vm1461_vm6, %v1091_v30, %v1589_v62  ;;  %v1339_v24 = vadd.f32 %v3759_v2, %v3767_v8 }
 0x165   : > { %2355 = vst.msk [vmem:[%s3396_s6 + $0xb0] sm:$0xf] %vm2310_vm3, %v2812_v34  ;;  %v1104_v47 = vadd.f32 %v3759_v2, %v3781_v5  ;;  %v2876_v57 = vpack.c.bf16 %v1778_v35, %v1778_v35  ;;  %v2815_v46 = vpack.c.bf16 %v1717_v43, %v1717_v43  ;;  %v1781_v48 = vsel %vm1525_vm7, %v1347_v44, %v1653_v58  ;;  %v3906_v37 = vpop.f32.mrb[60].mxu0  ;;  %v3908_v49 = vpop.f32.mrb[60].mxu1 }
 0x166   : > { %v1715_v27 = vsel %vm1459_vm8, %v1083_v21, %v1587_v29  ;;  %v2879_v54 = vpack.c.bf16 %v1781_v48, %v1781_v48  ;;  %vm1523_vm9 = vcmp.gt.f32.partialorder %v1339_v24, 0.0  ;;  %v1651_v55 = vmul.f32 0.01, %v1339_v24  ;;  %v3910_v56 = vpop.f32.mrb[61].mxu0  ;;  %v3912_v8 = vpop.f32.mrb[61].mxu1 }
 0x167   : > { %v2813_v38 = vpack.c.bf16 %v1715_v27, %v1715_v27  ;;  %2419 = vst.msk [vmem:[%s3396_s6 + $0x1b0] sm:$0xf] %vm2310_vm3, %v2876_v57  ;;  %2358 = vst.msk [vmem:[%s3396_s6 + $0xbc] sm:$0xf] %vm2310_vm3, %v2815_v46  ;;  %vm1464_vm10 = vcmp.gt.f32.partialorder %v1104_v47, 0.0  ;;  %v1360_v60 = vadd.f32 %v3759_v2, %v3785_v50  ;;  %v1096_v61 = vadd.f32 %v3759_v2, %v3787_v51  ;;  %v3922_v32 = vpop.f32.mrb[62].mxu0 }
 0x168   : > { %v1592_v5 = vmul.f32 0.01, %v1104_v47  ;;  %v3924_v53 = vpop.f32.mrb[62].mxu1  ;;  %2422 = vst.msk [vmem:[%s3396_s6 + $0x1bc] sm:$0xf] %vm2310_vm3, %v2879_v54  ;;  %v1779_v11 = vsel %vm1523_vm9, %v1339_v24, %v1651_v55  ;;  %v1352_v36 = vadd.f32 %v3759_v2, %v3791_v52  ;;  %v1107_v0 = vadd.f32 %v3759_v2, %v3793_v28  ;;  %v3936_v51 = vpop.f32.mrb[63].mxu0 }
 0x169   : > { %2356 = vst.msk [vmem:[%s3396_s6 + $0xb4] sm:$0xf] %vm2310_vm3, %v2813_v38  ;;  %v1363_v50 = vadd.f32 %v3759_v2, %v3799_v63  ;;  %v3938_v14 = vpop.f32.mrb[63].mxu1  ;;  %v2877_v6 = vpack.c.bf16 %v1779_v11, %v1779_v11  ;;  %vm1528_vm11 = vcmp.gt.f32.partialorder %v1360_v60, 0.0  ;;  %v1656_v15 = vmul.f32 0.01, %v1360_v60 }
 0x16a   : > { %v1720_v20 = vsel %vm1464_vm10, %v1104_v47, %v1592_v5  ;;  %vm1462_vm12 = vcmp.gt.f32.partialorder %v1096_v61, 0.0  ;;  %v1590_v18 = vmul.f32 0.01, %v1096_v61  ;;  %vm1526_vm13 = vcmp.gt.f32.partialorder %v1352_v36, 0.0 }
 0x16b   : > { %v2818_v30 = vpack.c.bf16 %v1720_v20, %v1720_v20  ;;  %2420 = vst.msk [vmem:[%s3396_s6 + $0x1b4] sm:$0xf] %vm2310_vm3, %v2877_v6  ;;  %v1784_v52 = vsel %vm1528_vm11, %v1360_v60, %v1656_v15  ;;  %v1654_v28 = vmul.f32 0.01, %v1352_v36  ;;  %vm1465_vm14 = vcmp.gt.f32.partialorder %v1107_v0, 0.0 }
 0x16c   : > { %v1593_v63 = vmul.f32 0.01, %v1107_v0  ;;  %v2882_v19 = vpack.c.bf16 %v1784_v52, %v1784_v52  ;;  %v1718_v44 = vsel %vm1462_vm12, %v1096_v61, %v1590_v18  ;;  %vm1529_vm15 = vcmp.gt.f32.partialorder %v1363_v50, 0.0 }
 0x16d   : > { %2361 = vst.msk [vmem:[%s3396_s6 + $0xc8] sm:$0xf] %vm2310_vm3, %v2818_v30  ;;  %v1657_v21 = vmul.f32 0.01, %v1363_v50  ;;  %v2816_v31 = vpack.c.bf16 %v1718_v44, %v1718_v44  ;;  %v1782_v7 = vsel %vm1526_vm13, %v1352_v36, %v1654_v28  ;;  %v1099_v34 = vadd.f32 %v3759_v2, %v3801_v3 }
 0x16e   : > { %v1721_v26 = vsel %vm1465_vm14, %v1107_v0, %v1593_v63  ;;  %2425 = vst.msk [vmem:[%s3396_s6 + $0x1c8] sm:$0xf] %vm2310_vm3, %v2882_v19  ;;  %v2880_v59 = vpack.c.bf16 %v1782_v7, %v1782_v7  ;;  %v1355_v29 = vadd.f32 %v3759_v2, %v3807_v39  ;;  %v1120_v24 = vadd.f32 %v3759_v2, %v3821_v25 }
 0x16f   : > { %v2819_v62 = vpack.c.bf16 %v1721_v26, %v1721_v26  ;;  %v1785_v58 = vsel %vm1529_vm15, %v1363_v50, %v1657_v21  ;;  %2359 = vst.msk [vmem:[%s3396_s6 + $0xc0] sm:$0xf] %vm2310_vm3, %v2816_v31  ;;  %vm1463_vm0 = vcmp.gt.f32.partialorder %v1099_v34, 0.0  ;;  %v1591_v43 = vmul.f32 0.01, %v1099_v34 }
 0x170   : > { %v2883_v35 = vpack.c.bf16 %v1785_v58, %v1785_v58  ;;  %2423 = vst.msk [vmem:[%s3396_s6 + $0x1c0] sm:$0xf] %vm2310_vm3, %v2880_v59  ;;  %vm1527_vm1 = vcmp.gt.f32.partialorder %v1355_v29, 0.0  ;;  %v1655_v3 = vmul.f32 0.01, %v1355_v29  ;;  %v1376_v47 = vadd.f32 %v3759_v2, %v3823_v41 }
 0x171   : > { %2362 = vst.msk [vmem:[%s3396_s6 + $0xcc] sm:$0xf] %vm2310_vm3, %v2819_v62  ;;  %v1112_v39 = vadd.f32 %v3759_v2, %v3827_v12  ;;  %v1719_v57 = vsel %vm1463_vm0, %v1099_v34, %v1591_v43  ;;  %vm1468_vm2 = vcmp.gt.f32.partialorder %v1120_v24, 0.0  ;;  %v1596_v46 = vmul.f32 0.01, %v1120_v24 }
 0x172   : > { %2426 = vst.msk [vmem:[%s3396_s6 + $0x1cc] sm:$0xf] %vm2310_vm3, %v2883_v35  ;;  %v1368_v25 = vadd.f32 %v3759_v2, %v3829_v33  ;;  %v2817_v48 = vpack.c.bf16 %v1719_v57, %v1719_v57  ;;  %v1783_v27 = vsel %vm1527_vm1, %v1355_v29, %v1655_v3  ;;  %vm1532_vm4 = vcmp.gt.f32.partialorder %v1376_v47, 0.0 }
 0x173   : > { %v1660_v54 = vmul.f32 0.01, %v1376_v47  ;;  %v2881_v38 = vpack.c.bf16 %v1783_v27, %v1783_v27  ;;  %v1724_v55 = vsel %vm1468_vm2, %v1120_v24, %v1596_v46  ;;  %vm1466_vm5 = vcmp.gt.f32.partialorder %v1112_v39, 0.0 }
 0x174   : > { %v1594_v41 = vmul.f32 0.01, %v1112_v39  ;;  %2360 = vst.msk [vmem:[%s3396_s6 + $0xc4] sm:$0xf] %vm2310_vm3, %v2817_v48  ;;  %v2822_v12 = vpack.c.bf16 %v1724_v55, %v1724_v55  ;;  %vm1530_vm6 = vcmp.gt.f32.partialorder %v1368_v25, 0.0  ;;  %v1123_v11 = vadd.f32 %v3759_v2, %v3837_v40 }
 0x175   : > { %v1788_v5 = vsel %vm1532_vm4, %v1376_v47, %v1660_v54  ;;  %v1658_v60 = vmul.f32 0.01, %v1368_v25  ;;  %2424 = vst.msk [vmem:[%s3396_s6 + $0x1c4] sm:$0xf] %vm2310_vm3, %v2881_v38  ;;  %v1379_v36 = vadd.f32 %v3759_v2, %v3839_v23  ;;  %v1115_v6 = vadd.f32 %v3759_v2, %v3847_v45 }
 0x176   : > { %v2886_v33 = vpack.c.bf16 %v1788_v5, %v1788_v5  ;;  %v1722_v61 = vsel %vm1466_vm5, %v1112_v39, %v1594_v41  ;;  %2365 = vst.msk [vmem:[%s3396_s6 + $0xd8] sm:$0xf] %vm2310_vm3, %v2822_v12  ;;  %v1371_v20 = vadd.f32 %v3759_v2, %v3849_v1  ;;  %vm1469_vm7 = vcmp.gt.f32.partialorder %v1123_v11, 0.0 }
 0x177   : > { %v2820_v0 = vpack.c.bf16 %v1722_v61, %v1722_v61  ;;  %v1786_v50 = vsel %vm1530_vm6, %v1368_v25, %v1658_v60  ;;  %v1597_v30 = vmul.f32 0.01, %v1123_v11  ;;  %vm1533_vm8 = vcmp.gt.f32.partialorder %v1379_v36, 0.0 }
 0x178   : > { %2429 = vst.msk [vmem:[%s3396_s6 + $0x1d8] sm:$0xf] %vm2310_vm3, %v2886_v33  ;;  %v2884_v15 = vpack.c.bf16 %v1786_v50, %v1786_v50  ;;  %v1661_v40 = vmul.f32 0.01, %v1379_v36  ;;  %vm1467_vm9 = vcmp.gt.f32.partialorder %v1115_v6, 0.0  ;;  %vm1531_vm10 = vcmp.gt.f32.partialorder %v1371_v20, 0.0 }
 0x179   : > { %2363 = vst.msk [vmem:[%s3396_s6 + $0xd0] sm:$0xf] %vm2310_vm3, %v2820_v0  ;;  %v1595_v23 = vmul.f32 0.01, %v1115_v6  ;;  %v1725_v18 = vsel %vm1469_vm7, %v1123_v11, %v1597_v30  ;;  %v1659_v45 = vmul.f32 0.01, %v1371_v20  ;;  %v1136_v1 = vadd.f32 %v3759_v2, %v3863_v4 }
 0x17a   : > { %2427 = vst.msk [vmem:[%s3396_s6 + $0x1d0] sm:$0xf] %vm2310_vm3, %v2884_v15  ;;  %v1392_v52 = vadd.f32 %v3759_v2, %v3865_v13  ;;  %v2823_v28 = vpack.c.bf16 %v1725_v18, %v1725_v18  ;;  %v1789_v63 = vsel %vm1533_vm8, %v1379_v36, %v1661_v40  ;;  %v1128_v44 = vadd.f32 %v3759_v2, %v3869_v10 }
 0x17b   : > { %v1723_v19 = vsel %vm1467_vm9, %v1115_v6, %v1595_v23  ;;  %v2887_v21 = vpack.c.bf16 %v1789_v63, %v1789_v63  ;;  %v1787_v7 = vsel %vm1531_vm10, %v1371_v20, %v1659_v45  ;;  %vm1472_vm11 = vcmp.gt.f32.partialorder %v1136_v1, 0.0 }
 0x17c   : > { %v2821_v31 = vpack.c.bf16 %v1723_v19, %v1723_v19  ;;  %2366 = vst.msk [vmem:[%s3396_s6 + $0xdc] sm:$0xf] %vm2310_vm3, %v2823_v28  ;;  %v2885_v26 = vpack.c.bf16 %v1787_v7, %v1787_v7  ;;  %v1600_v34 = vmul.f32 0.01, %v1136_v1  ;;  %vm1536_vm12 = vcmp.gt.f32.partialorder %v1392_v52, 0.0 }
 0x17d   : > { %v1664_v4 = vmul.f32 0.01, %v1392_v52  ;;  %2430 = vst.msk [vmem:[%s3396_s6 + $0x1dc] sm:$0xf] %vm2310_vm3, %v2887_v21  ;;  %vm1470_vm13 = vcmp.gt.f32.partialorder %v1128_v44, 0.0  ;;  %v1384_v10 = vadd.f32 %v3759_v2, %v3879_v16  ;;  %v1139_v59 = vadd.f32 %v3759_v2, %v3881_v17 }
 0x17e   : > { %2364 = vst.msk [vmem:[%s3396_s6 + $0xd4] sm:$0xf] %vm2310_vm3, %v2821_v31  ;;  %v1598_v13 = vmul.f32 0.01, %v1128_v44  ;;  %2428 = vst.msk [vmem:[%s3396_s6 + $0x1d4] sm:$0xf] %vm2310_vm3, %v2885_v26  ;;  %v1728_v62 = vsel %vm1472_vm11, %v1136_v1, %v1600_v34  ;;  %v1395_v29 = vadd.f32 %v3759_v2, %v3890_v22  ;;  %v1131_v35 = vadd.f32 %v3759_v2, %v3892_v9 }
 0x17f   : > { %v1792_v58 = vsel %vm1536_vm12, %v1392_v52, %v1664_v4  ;;  %v2826_v43 = vpack.c.bf16 %v1728_v62, %v1728_v62  ;;  %vm1534_vm14 = vcmp.gt.f32.partialorder %v1384_v10, 0.0  ;;  %v1662_v47 = vmul.f32 0.01, %v1384_v10 }
 0x180   : > { %v2890_v24 = vpack.c.bf16 %v1792_v58, %v1792_v58  ;;  %v1726_v3 = vsel %vm1470_vm13, %v1128_v44, %v1598_v13  ;;  %vm1473_vm15 = vcmp.gt.f32.partialorder %v1139_v59, 0.0  ;;  %v1601_v39 = vmul.f32 0.01, %v1139_v59 }
 0x181   : > { %v2824_v16 = vpack.c.bf16 %v1726_v3, %v1726_v3  ;;  %2369 = vst.msk [vmem:[%s3396_s6 + $0xe8] sm:$0xf] %vm2310_vm3, %v2826_v43  ;;  %vm1537_vm0 = vcmp.gt.f32.partialorder %v1395_v29, 0.0  ;;  %v1665_v17 = vmul.f32 0.01, %v1395_v29  ;;  %vm1471_vm1 = vcmp.gt.f32.partialorder %v1131_v35, 0.0 }
 0x182   : > { %2433 = vst.msk [vmem:[%s3396_s6 + $0x1e8] sm:$0xf] %vm2310_vm3, %v2890_v24  ;;  %v1599_v22 = vmul.f32 0.01, %v1131_v35  ;;  %v1790_v9 = vsel %vm1534_vm14, %v1384_v10, %v1662_v47  ;;  %v1729_v57 = vsel %vm1473_vm15, %v1139_v59, %v1601_v39  ;;  %v1387_v46 = vadd.f32 %v3759_v2, %v3894_v42 }
 0x183   : > { %2367 = vst.msk [vmem:[%s3396_s6 + $0xe0] sm:$0xf] %vm2310_vm3, %v2824_v16  ;;  %v1152_v25 = vadd.f32 %v3759_v2, %v3906_v37  ;;  %v2888_v48 = vpack.c.bf16 %v1790_v9, %v1790_v9  ;;  %v2827_v27 = vpack.c.bf16 %v1729_v57, %v1729_v57  ;;  %v1793_v54 = vsel %vm1537_vm0, %v1395_v29, %v1665_v17 }
 0x184   : > { %v1727_v38 = vsel %vm1471_vm1, %v1131_v35, %v1599_v22  ;;  %v2891_v55 = vpack.c.bf16 %v1793_v54, %v1793_v54  ;;  %vm1535_vm2 = vcmp.gt.f32.partialorder %v1387_v46, 0.0  ;;  %v1663_v12 = vmul.f32 0.01, %v1387_v46 }
 0x185   : > { %v2825_v41 = vpack.c.bf16 %v1727_v38, %v1727_v38  ;;  %2431 = vst.msk [vmem:[%s3396_s6 + $0x1e0] sm:$0xf] %vm2310_vm3, %v2888_v48  ;;  %2370 = vst.msk [vmem:[%s3396_s6 + $0xec] sm:$0xf] %vm2310_vm3, %v2827_v27  ;;  %vm1476_vm4 = vcmp.gt.f32.partialorder %v1152_v25, 0.0  ;;  %v1408_v42 = vadd.f32 %v3759_v2, %v3908_v49  ;;  %v1144_v37 = vadd.f32 %v3759_v2, %v3910_v56 }
 0x186   : > { %v1604_v5 = vmul.f32 0.01, %v1152_v25  ;;  %2434 = vst.msk [vmem:[%s3396_s6 + $0x1ec] sm:$0xf] %vm2310_vm3, %v2891_v55  ;;  %v1791_v60 = vsel %vm1535_vm2, %v1387_v46, %v1663_v12  ;;  %v1400_v33 = vadd.f32 %v3759_v2, %v3912_v8  ;;  %v1155_v61 = vadd.f32 %v3759_v2, %v3922_v32 }
 0x187   : > { %2368 = vst.msk [vmem:[%s3396_s6 + $0xe4] sm:$0xf] %vm2310_vm3, %v2825_v41  ;;  %v1411_v11 = vadd.f32 %v3759_v2, %v3924_v53  ;;  %v2889_v49 = vpack.c.bf16 %v1791_v60, %v1791_v60  ;;  %vm1540_vm5 = vcmp.gt.f32.partialorder %v1408_v42, 0.0  ;;  %v1668_v0 = vmul.f32 0.01, %v1408_v42 }
 0x188   : > { %v1732_v36 = vsel %vm1476_vm4, %v1152_v25, %v1604_v5  ;;  %vm1474_vm6 = vcmp.gt.f32.partialorder %v1144_v37, 0.0  ;;  %v1602_v50 = vmul.f32 0.01, %v1144_v37  ;;  %vm1538_vm7 = vcmp.gt.f32.partialorder %v1400_v33, 0.0 }
 0x189   : > { %v2830_v56 = vpack.c.bf16 %v1732_v36, %v1732_v36  ;;  %2432 = vst.msk [vmem:[%s3396_s6 + $0x1e4] sm:$0xf] %vm2310_vm3, %v2889_v49  ;;  %v1796_v6 = vsel %vm1540_vm5, %v1408_v42, %v1668_v0  ;;  %v1666_v8 = vmul.f32 0.01, %v1400_v33  ;;  %vm1477_vm8 = vcmp.gt.f32.partialorder %v1155_v61, 0.0 }
 0x18a   : > { %v1605_v20 = vmul.f32 0.01, %v1155_v61  ;;  %v2894_v32 = vpack.c.bf16 %v1796_v6, %v1796_v6  ;;  %v1730_v53 = vsel %vm1474_vm6, %v1144_v37, %v1602_v50  ;;  %vm1541_vm9 = vcmp.gt.f32.partialorder %v1411_v11, 0.0 }
 0x18b   : > { %2373 = vst.msk [vmem:[%s3396_s6 + $0xf8] sm:$0xf] %vm2310_vm3, %v2830_v56  ;;  %v1669_v15 = vmul.f32 0.01, %v1411_v11  ;;  %v2828_v30 = vpack.c.bf16 %v1730_v53, %v1730_v53  ;;  %v1794_v40 = vsel %vm1538_vm7, %v1400_v33, %v1666_v8  ;;  %v1147_v18 = vadd.f32 %v3759_v2, %v3936_v51 }
 0x18c   : > { %v1733_v23 = vsel %vm1477_vm8, %v1155_v61, %v1605_v20  ;;  %2437 = vst.msk [vmem:[%s3396_s6 + $0x1f8] sm:$0xf] %vm2310_vm3, %v2894_v32  ;;  %v2892_v45 = vpack.c.bf16 %v1794_v40, %v1794_v40  ;;  %v1403_v28 = vadd.f32 %v3759_v2, %v3938_v14 }
 0x18d   : > { %v2831_v1 = vpack.c.bf16 %v1733_v23, %v1733_v23  ;;  %v1797_v52 = vsel %vm1541_vm9, %v1411_v11, %v1669_v15  ;;  %2371 = vst.msk [vmem:[%s3396_s6 + $0xf0] sm:$0xf] %vm2310_vm3, %v2828_v30  ;;  %vm1475_vm10 = vcmp.gt.f32.partialorder %v1147_v18, 0.0  ;;  %v1603_v19 = vmul.f32 0.01, %v1147_v18 }
 0x18e   : > { %v2895_v63 = vpack.c.bf16 %v1797_v52, %v1797_v52  ;;  %2435 = vst.msk [vmem:[%s3396_s6 + $0x1f0] sm:$0xf] %vm2310_vm3, %v2892_v45  ;;  %vm1539_vm11 = vcmp.gt.f32.partialorder %v1403_v28, 0.0  ;;  %v1667_v51 = vmul.f32 0.01, %v1403_v28 }
 0x18f   : > { %2374 = vst.msk [vmem:[%s3396_s6 + $0xfc] sm:$0xf] %vm2310_vm3, %v2831_v1  ;;  %v1731_v44 = vsel %vm1475_vm10, %v1147_v18, %v1603_v19 }
 0x190   : > { %2438 = vst.msk [vmem:[%s3396_s6 + $0x1fc] sm:$0xf] %vm2310_vm3, %v2895_v63  ;;  %v2829_v21 = vpack.c.bf16 %v1731_v44, %v1731_v44  ;;  %v1795_v31 = vsel %vm1539_vm11, %v1403_v28, %v1667_v51 }
 0x191   : > { %v2893_v7 = vpack.c.bf16 %v1795_v31, %v1795_v31 }
 0x192   : > { %2372 = vst.msk [vmem:[%s3396_s6 + $0xf4] sm:$0xf] %vm2310_vm3, %v2829_v21 }
 0x193   : > { %2436 = vst.msk [vmem:[%s3396_s6 + $0x1f4] sm:$0xf] %vm2310_vm3, %v2893_v7 }
 0x194 PF: > { %s13_s12 = sadd.s32 1, %s3198_s12  }
 0x195   : > { %p10_p4 = scmp.ge.s32.totalorder %s13_s12, 4  }
 0x197   :  { %12 = sbr.rel (!%p10_p4) target bundleno = 1 (0x1), region = 62 }

// kernel: descriptor_forward.5
= control target key start
LH: loop header
LB: loop body
LE: loop exit
PB: predicated region body
PF: predicated region fallthrough
CT: control target
= control target key end

     0   :  { %v3876_v0 = vmov 0   ;;  %vm1302_vm0 = vcmask 523264   ;;  %s5053_s1 = inlined_call_operand.vmem [shape: bf16[576,128], index: 1, kind: input, shape index: {}]   ;;  %s5054_s0 = inlined_call_operand.vmem [shape: bf16[512,576], index: 0, kind: input, shape index: {}]   ;;  %s5055_s2 = inlined_call_operand.vmem [shape: f32[1,128], index: 2, kind: input, shape index: {}]   ;;  %s5056_s3 = inlined_call_operand.vmem [shape: bf16[512,128], index: 3, kind: output, shape index: {}]  }
   0x1   :  { %1399 = vmatprep.subr.bf16.mxu0 %v3876_v0  ;;  %3438 = vmatprep.subr.bf16.mxu1 %v3876_v0  ;;  %v3615_v1 = vld [vmem:[%s5053_s1] sm:$0xff]   ;;  %v3616_v2 = vld [vmem:[%s5053_s1 + $0x8] sm:$0xff]   ;;  %v3617_v3 = vld [vmem:[%s5053_s1 + $0x10] sm:$0xff]  }
   0x2   :  { %1400 = vmatpush1.bf16.msra.mxu0 %v3615_v1  ;;  %3454 = vmatpush1.bf16.msra.mxu1 %v3615_v1  ;;  %v3618_v4 = vld [vmem:[%s5053_s1 + $0x18] sm:$0xff]   ;;  %v3619_v5 = vld [vmem:[%s5053_s1 + $0x20] sm:$0xff]   ;;  %v3620_v7 = vld [vmem:[%s5053_s1 + $0x28] sm:$0xff]  }
   0x3   :  { %1401 = vmatprep.subr.bf16.mxu0 %v3876_v0  ;;  %3439 = vmatprep.subr.bf16.mxu1 %v3876_v0  ;;  %v3633_v6 = vld [vmem:[%s5054_s0 + $0x4] ss:$20 sps:$4 sm:$0xff]   ;;  %v3621_v9 = vld [vmem:[%s5053_s1 + $0x30] sm:$0xff]   ;;  %v3624_v12 = vld [vmem:[%s5053_s1 + $0x48] sm:$0xff]  }
   0x4   :  { %v3636_v8 = vld [vmem:[%s5054_s0 + $0x144] ss:$20 sps:$4 sm:$0xff]   ;;  %1431 = vmatprep.mubr.bf16.mxu0 %v3633_v6  ;;  %v3625_v13 = vld [vmem:[%s5053_s1 + $0x50] sm:$0xff]   ;;  %v3628_v16 = vld [vmem:[%s5053_s1 + $0x68] sm:$0xff]  }
   0x5   :  { %1495 = vmatprep.mubr.bf16.mxu1 %v3636_v8  ;;  %v3622_v10 = vld [vmem:[%s5053_s1 + $0x38] sm:$0xff]   ;;  %v3623_v11 = vld [vmem:[%s5053_s1 + $0x40] sm:$0xff]   ;;  %v3629_v17 = vld [vmem:[%s5053_s1 + $0x70] sm:$0xff]  }
   0x6   :  { %1402 = vmatpush1.bf16.msra.mxu0 %v3616_v2  ;;  %3455 = vmatpush1.bf16.msra.mxu1 %v3616_v2  ;;  %v3626_v14 = vld [vmem:[%s5053_s1 + $0x58] sm:$0xff]   ;;  %v3627_v15 = vld [vmem:[%s5053_s1 + $0x60] sm:$0xff]   ;;  %v3687_v25 = vld [vmem:[%s5053_s1 + $0x108] sm:$0xff]  }
   0x7   :  { %1403 = vmatprep.subr.bf16.mxu0 %v3876_v0  ;;  %3440 = vmatprep.subr.bf16.mxu1 %v3876_v0  ;;  %v3630_v18 = vld [vmem:[%s5053_s1 + $0x78] sm:$0xff]   ;;  %v3638_v19 = vld [vmem:[%s5053_s1 + $0x100] sm:$0xff]   ;;  %v3639_v26 = vld [vmem:[%s5053_s1 + $0x88] sm:$0xff]  }
   0x8   :  { %v3631_v20 = vld [vmem:[%s5054_s0] ss:$20 sps:$4 sm:$0xff]   ;;  %v3644_v27 = vld [vmem:[%s5054_s0 + $0x28] ss:$20 sps:$4 sm:$0xff]   ;;  %v3652_v34 = vld [vmem:[%s5054_s0 + $0x50] ss:$20 sps:$4 sm:$0xff]  }
   0x9   :  { %v3634_v21 = vld [vmem:[%s5054_s0 + $0x140] ss:$20 sps:$4 sm:$0xff]   ;;  %v3645_v28 = vld [vmem:[%s5054_s0 + $0x168] ss:$20 sps:$4 sm:$0xff]   ;;  %v3653_v35 = vld [vmem:[%s5054_s0 + $0x190] ss:$20 sps:$4 sm:$0xff]  }
   0xa   :  { %1404 = vmatpush1.bf16.msra.mxu0 %v3617_v3  ;;  %3456 = vmatpush1.bf16.msra.mxu1 %v3617_v3  ;;  %v3637_v22 = vld [vmem:[%s5053_s1 + $0x80] sm:$0xff]   ;;  %v3646_v29 = vld [vmem:[%s5053_s1 + $0x90] sm:$0xff]   ;;  %v3647_v33 = vld [vmem:[%s5053_s1 + $0x98] sm:$0xff]  }
   0xb   :  { %1405 = vmatprep.subr.bf16.mxu0 %v3876_v0  ;;  %3441 = vmatprep.subr.bf16.mxu1 %v3876_v0  ;;  %v3640_v23 = vld [vmem:[%s5054_s0 + $0x2c] ss:$20 sps:$4 sm:$0xff]   ;;  %v3727_v30 = vld [vmem:[%s5053_s1 + $0x110] sm:$0xff]   ;;  %v3664_v43 = vld [vmem:[%s5054_s0 + $0xa4] ss:$20 sps:$4 sm:$0xff]  }
   0xc   :  { %v3642_v24 = vld [vmem:[%s5054_s0 + $0x16c] ss:$20 sps:$4 sm:$0xff]   ;;  %v3648_v31 = vld [vmem:[%s5054_s0 + $0x54] ss:$20 sps:$4 sm:$0xff]   ;;  %v3656_v37 = vld [vmem:[%s5054_s0 + $0x7c] ss:$20 sps:$4 sm:$0xff]  }
   0xd   :  { %v3650_v32 = vld [vmem:[%s5054_s0 + $0x194] ss:$20 sps:$4 sm:$0xff]   ;;  %v3654_v36 = vld [vmem:[%s5053_s1 + $0xa0] sm:$0xff]   ;;  %v3658_v38 = vld [vmem:[%s5054_s0 + $0x1bc] ss:$20 sps:$4 sm:$0xff]  }
   0xe   :  { %1406 = vmatpush1.bf16.msra.mxu0 %v3618_v4  ;;  %3457 = vmatpush1.bf16.msra.mxu1 %v3618_v4  ;;  %v3655_v39 = vld [vmem:[%s5053_s1 + $0xa8] sm:$0xff]   ;;  %v3662_v42 = vld [vmem:[%s5053_s1 + $0xb0] sm:$0xff]   ;;  %v3764_v44 = vld [vmem:[%s5053_s1 + $0x118] sm:$0xff]  }
   0xf   :  { %1407 = vmatprep.subr.bf16.mxu0 %v3876_v0  ;;  %3442 = vmatprep.subr.bf16.mxu1 %v3876_v0  ;;  %v3660_v40 = vld [vmem:[%s5054_s0 + $0x78] ss:$20 sps:$4 sm:$0xff]   ;;  %v3668_v47 = vld [vmem:[%s5054_s0 + $0xa0] ss:$20 sps:$4 sm:$0xff]   ;;  %v3676_v53 = vld [vmem:[%s5054_s0 + $0xc8] ss:$20 sps:$4 sm:$0xff]  }
  0x10   :  { %v3661_v41 = vld [vmem:[%s5054_s0 + $0x1b8] ss:$20 sps:$4 sm:$0xff]   ;;  %v3669_v48 = vld [vmem:[%s5054_s0 + $0x1e0] ss:$20 sps:$4 sm:$0xff]   ;;  %v3677_v54 = vld [vmem:[%s5054_s0 + $0x208] ss:$20 sps:$4 sm:$0xff]  }
  0x11   :  { %v3666_v45 = vld [vmem:[%s5054_s0 + $0x1e4] ss:$20 sps:$4 sm:$0xff]   ;;  %v3672_v50 = vld [vmem:[%s5054_s0 + $0xcc] ss:$20 sps:$4 sm:$0xff]   ;;  %v3678_v55 = vld [vmem:[%s5053_s1 + $0xd0] sm:$0xff]  }
  0x12   :  { %1408 = vmatpush1.bf16.msra.mxu0 %v3619_v5  ;;  %3458 = vmatpush1.bf16.msra.mxu1 %v3619_v5  ;;  %v3663_v46 = vld [vmem:[%s5053_s1 + $0xb8] sm:$0xff]   ;;  %v3670_v49 = vld [vmem:[%s5053_s1 + $0xc0] sm:$0xff]   ;;  %v3671_v52 = vld [vmem:[%s5053_s1 + $0xc8] sm:$0xff]  }
  0x13   :  { %1409 = vmatprep.subr.bf16.mxu0 %v3876_v0  ;;  %3443 = vmatprep.subr.bf16.mxu1 %v3876_v0  ;;  %v3674_v51 = vld [vmem:[%s5054_s0 + $0x20c] ss:$20 sps:$4 sm:$0xff]   ;;  %v3680_v56 = vld [vmem:[%s5054_s0 + $0xf4] ss:$20 sps:$4 sm:$0xff]   ;;  %v3679_v58 = vld [vmem:[%s5053_s1 + $0xd8] sm:$0xff]  }
  0x14   :  { %v3682_v57 = vld [vmem:[%s5054_s0 + $0x234] ss:$20 sps:$4 sm:$0xff]   ;;  %v3684_v59 = vld [vmem:[%s5054_s0 + $0xf0] ss:$20 sps:$4 sm:$0xff]   ;;  %v3693_v2 = vld [vmem:[%s5054_s0 + $0x118] ss:$20 sps:$4 sm:$0xff]  }
  0x15   :  { %v3685_v60 = vld [vmem:[%s5054_s0 + $0x230] ss:$20 sps:$4 sm:$0xff]   ;;  %v3688_v1 = vld [vmem:[%s5053_s1 + $0xe8] sm:$0xff]  }
  0x16   :  { %1410 = vmatpush1.bf16.msra.mxu0 %v3620_v7  ;;  %3459 = vmatpush1.bf16.msra.mxu1 %v3620_v7  ;;  %v3686_v61 = vld [vmem:[%s5053_s1 + $0xe0] sm:$0xff]   ;;  %v3689_v62 = vld [vmem:[%s5054_s0 + $0x11c] ss:$20 sps:$4 sm:$0xff]   ;;  %v3694_v3 = vld [vmem:[%s5054_s0 + $0x258] ss:$20 sps:$4 sm:$0xff]  }
  0x17   :  { %1411 = vmatprep.subr.bf16.mxu0 %v3876_v0  ;;  %3444 = vmatprep.subr.bf16.mxu1 %v3876_v0  ;;  %v3691_v63 = vld [vmem:[%s5054_s0 + $0x25c] ss:$20 sps:$4 sm:$0xff]   ;;  %v3697_v5 = vld [vmem:[%s5054_s0 + $0x284] ss:$20 sps:$4 sm:$0xff]   ;;  %v3701_v6 = vld [vmem:[%s5054_s0 + $0xc] ss:$20 sps:$4 sm:$0xff]  }
  0x18   :  { %v3695_v4 = vld [vmem:[%s5053_s1 + $0xf0] sm:$0xff]   ;;  %v3696_v7 = vld [vmem:[%s5053_s1 + $0xf8] sm:$0xff]  }
  0x19   :  { %v3699_v8 = vld [vmem:[%s5054_s0 + $0x8] ss:$20 sps:$4 sm:$0xff]  }
  0x1a   :  { %1412 = vmatpush1.bf16.msra.mxu0 %v3621_v9  ;;  %3460 = vmatpush1.bf16.msra.mxu1 %v3621_v9  ;;  %v3702_v9 = vld [vmem:[%s5054_s0 + $0x280] ss:$20 sps:$4 sm:$0xff]  }
  0x1b   :  { %1413 = vmatprep.subr.bf16.mxu0 %v3876_v0  ;;  %3445 = vmatprep.subr.bf16.mxu1 %v3876_v0 }
  0x1e   :  { %1414 = vmatpush1.bf16.msra.mxu0 %v3622_v10  ;;  %3461 = vmatpush1.bf16.msra.mxu1 %v3622_v10  ;;  %v3703_v10 = vld [vmem:[%s5054_s0 + $0x2ac] ss:$20 sps:$4 sm:$0xff]  }
  0x1f   :  { %1415 = vmatprep.subr.bf16.mxu0 %v3876_v0  ;;  %3446 = vmatprep.subr.bf16.mxu1 %v3876_v0 }
  0x22   :  { %1416 = vmatpush1.bf16.msra.mxu0 %v3623_v11  ;;  %3462 = vmatpush1.bf16.msra.mxu1 %v3623_v11  ;;  %v3705_v11 = vld [vmem:[%s5054_s0 + $0x34] ss:$20 sps:$4 sm:$0xff]  }
  0x23   :  { %1417 = vmatprep.subr.bf16.mxu0 %v3876_v0  ;;  %3447 = vmatprep.subr.bf16.mxu1 %v3876_v0 }
  0x26   :  { %1418 = vmatpush1.bf16.msra.mxu0 %v3624_v12  ;;  %3463 = vmatpush1.bf16.msra.mxu1 %v3624_v12  ;;  %v3708_v12 = vld [vmem:[%s5054_s0 + $0x30] ss:$20 sps:$4 sm:$0xff]  }
  0x27   :  { %1419 = vmatprep.subr.bf16.mxu0 %v3876_v0  ;;  %3448 = vmatprep.subr.bf16.mxu1 %v3876_v0 }
  0x2a   :  { %1420 = vmatpush1.bf16.msra.mxu0 %v3625_v13  ;;  %3464 = vmatpush1.bf16.msra.mxu1 %v3625_v13  ;;  %v3709_v13 = vld [vmem:[%s5054_s0 + $0x2d4] ss:$20 sps:$4 sm:$0xff]  }
  0x2b   :  { %1421 = vmatprep.subr.bf16.mxu0 %v3876_v0  ;;  %3449 = vmatprep.subr.bf16.mxu1 %v3876_v0 }
  0x2e   :  { %1422 = vmatpush1.bf16.msra.mxu0 %v3626_v14  ;;  %3465 = vmatpush1.bf16.msra.mxu1 %v3626_v14  ;;  %v3711_v14 = vld [vmem:[%s5054_s0 + $0x5c] ss:$20 sps:$4 sm:$0xff]  }
  0x2f   :  { %1423 = vmatprep.subr.bf16.mxu0 %v3876_v0  ;;  %3450 = vmatprep.subr.bf16.mxu1 %v3876_v0 }
  0x32   :  { %1424 = vmatpush1.bf16.msra.mxu0 %v3627_v15  ;;  %3466 = vmatpush1.bf16.msra.mxu1 %v3627_v15  ;;  %v3713_v15 = vld [vmem:[%s5054_s0 + $0x2d0] ss:$20 sps:$4 sm:$0xff]  }
  0x33   :  { %1425 = vmatprep.subr.bf16.mxu0 %v3876_v0  ;;  %3451 = vmatprep.subr.bf16.mxu1 %v3876_v0 }
  0x36   :  { %1426 = vmatpush1.bf16.msra.mxu0 %v3628_v16  ;;  %3467 = vmatpush1.bf16.msra.mxu1 %v3628_v16  ;;  %v3714_v16 = vld [vmem:[%s5054_s0 + $0x58] ss:$20 sps:$4 sm:$0xff]  }
  0x37   :  { %1427 = vmatprep.subr.bf16.mxu0 %v3876_v0  ;;  %3452 = vmatprep.subr.bf16.mxu1 %v3876_v0 }
  0x3a   :  { %1428 = vmatpush1.bf16.msra.mxu0 %v3629_v17  ;;  %3468 = vmatpush1.bf16.msra.mxu1 %v3629_v17  ;;  %v3715_v17 = vld [vmem:[%s5054_s0 + $0x2fc] ss:$20 sps:$4 sm:$0xff]  }
  0x3b   :  { %1429 = vmatprep.subr.bf16.mxu0 %v3876_v0  ;;  %3453 = vmatprep.subr.bf16.mxu1 %v3876_v0 }
  0x3e   :  { %1430 = vmatpush1.bf16.msra.mxu0 %v3630_v18  ;;  %3469 = vmatpush1.bf16.msra.mxu1 %v3630_v18  ;;  %v3717_v18 = vld [vmem:[%s5054_s0 + $0x84] ss:$20 sps:$4 sm:$0xff]  }
  0x3f   :  { %1688 = vmatprep.subr.bf16.mxu0 %v3876_v0  ;;  %3366 = vmatprep.subr.bf16.mxu1 %v3638_v19 }
  0x41   :  { %1432 = vmatmul.mubr.bf16.vlgmr.msra.gmra.mrb[0].mxu0 %v3631_v20  ;;  %1496 = vmatmul.mubr.bf16.vlgmr.msra.gmra.mrb[0].mxu1 %v3634_v21  ;;  %v3720_v20 = vld [vmem:[%s5054_s0 + $0x80] ss:$20 sps:$4 sm:$0xff]   ;;  %v3721_v21 = vld [vmem:[%s5054_s0 + $0x324] ss:$20 sps:$4 sm:$0xff]  }
  0x42   :  { %1689 = vmatpush1.bf16.msra.mxu0 %v3637_v22  ;;  %3367 = vmatpush3.bf16.msra.mxu1 %v3638_v19  ;;  %v3719_v19 = vld [vmem:[%s5054_s0 + $0x2f8] ss:$20 sps:$4 sm:$0xff]  }
  0x43   :  { %1690 = vmatprep.subr.bf16.mxu0 %v3876_v0  ;;  %1439 = vmatprep.mubr.bf16.mxu0 %v3640_v23  ;;  %v3723_v22 = vld [vmem:[%s5054_s0 + $0xac] ss:$20 sps:$4 sm:$0xff]  }
  0x44   :  { %1503 = vmatprep.mubr.bf16.mxu1 %v3642_v24  ;;  %3368 = vmatprep.subr.bf16.mxu1 %v3687_v25  ;;  %v3725_v23 = vld [vmem:[%s5054_s0 + $0x320] ss:$20 sps:$4 sm:$0xff]   ;;  %v3726_v24 = vld [vmem:[%s5054_s0 + $0xa8] ss:$20 sps:$4 sm:$0xff]  }
  0x46   :  { %1691 = vmatpush1.bf16.msra.mxu0 %v3639_v26  ;;  %3369 = vmatpush3.bf16.msra.mxu1 %v3687_v25  ;;  %v3728_v25 = vld [vmem:[%s5054_s0 + $0x34c] ss:$20 sps:$4 sm:$0xff]   ;;  %v3730_v26 = vld [vmem:[%s5054_s0 + $0xd4] ss:$20 sps:$4 sm:$0xff]  }
  0x47   :  { %1692 = vmatprep.subr.bf16.mxu0 %v3876_v0  ;;  %3370 = vmatprep.subr.bf16.mxu1 %v3727_v30 }
  0x49   :  { %1440 = vmatmul.mubr.bf16.gmra.mrb[4].mxu0 %v3644_v27  ;;  %1504 = vmatmul.mubr.bf16.gmra.mrb[4].mxu1 %v3645_v28  ;;  %v3732_v27 = vld [vmem:[%s5054_s0 + $0x348] ss:$20 sps:$4 sm:$0xff]   ;;  %v3733_v28 = vld [vmem:[%s5054_s0 + $0xd0] ss:$20 sps:$4 sm:$0xff]  }
  0x4a   :  { %1693 = vmatpush1.bf16.msra.mxu0 %v3646_v29  ;;  %1447 = vmatprep.mubr.bf16.mxu0 %v3648_v31  ;;  %v3734_v29 = vld [vmem:[%s5054_s0 + $0x374] ss:$20 sps:$4 sm:$0xff]   ;;  %v3738_v31 = vld [vmem:[%s5054_s0 + $0x370] ss:$20 sps:$4 sm:$0xff]  }
  0x4b   :  { %1694 = vmatprep.subr.bf16.mxu0 %v3876_v0  ;;  %1511 = vmatprep.mubr.bf16.mxu1 %v3650_v32  ;;  %v3739_v32 = vld [vmem:[%s5054_s0 + $0xf8] ss:$20 sps:$4 sm:$0xff]  }
  0x4c   :  { %3371 = vmatpush3.bf16.msra.mxu1 %v3727_v30  ;;  %v3736_v30 = vld [vmem:[%s5054_s0 + $0xfc] ss:$20 sps:$4 sm:$0xff]  }
  0x4d   :  { %3372 = vmatprep.subr.bf16.mxu1 %v3764_v44 }
  0x4e   :  { %1695 = vmatpush1.bf16.msra.mxu0 %v3647_v33  ;;  %v3740_v33 = vld [vmem:[%s5054_s0 + $0x39c] ss:$20 sps:$4 sm:$0xff]  }
  0x4f   :  { %1696 = vmatprep.subr.bf16.mxu0 %v3876_v0 }
  0x50   :  { %3373 = vmatpush3.bf16.msra.mxu1 %v3764_v44  ;;  %v3757_v44 = vld [vmem:[%s5054_s0 + $0x170] ss:$20 sps:$4 sm:$0xff]  }
  0x51   :  { %1448 = vmatmul.mubr.bf16.gmra.mrb[8].mxu0 %v3652_v34  ;;  %1512 = vmatmul.mubr.bf16.gmra.mrb[8].mxu1 %v3653_v35  ;;  %v3742_v34 = vld [vmem:[%s5054_s0 + $0x124] ss:$20 sps:$4 sm:$0xff]  }
  0x52   :  { %1697 = vmatpush1.bf16.msra.mxu0 %v3654_v36  ;;  %1455 = vmatprep.mubr.bf16.mxu0 %v3656_v37  ;;  %v3744_v35 = vld [vmem:[%s5054_s0 + $0x398] ss:$20 sps:$4 sm:$0xff]   ;;  %v3745_v36 = vld [vmem:[%s5054_s0 + $0x120] ss:$20 sps:$4 sm:$0xff]  }
  0x53   :  { %1698 = vmatprep.subr.bf16.mxu0 %v3876_v0  ;;  %1519 = vmatprep.mubr.bf16.mxu1 %v3658_v38  ;;  %v3746_v37 = vld [vmem:[%s5054_s0 + $0x3c4] ss:$20 sps:$4 sm:$0xff]   ;;  %v3748_v38 = vld [vmem:[%s5054_s0 + $0x14c] ss:$20 sps:$4 sm:$0xff]  }
  0x56   :  { %1699 = vmatpush1.bf16.msra.mxu0 %v3655_v39  ;;  %v3750_v39 = vld [vmem:[%s5054_s0 + $0x3c0] ss:$20 sps:$4 sm:$0xff]  }
  0x57   :  { %1700 = vmatprep.subr.bf16.mxu0 %v3876_v0 }
  0x59   :  { %1456 = vmatmul.mubr.bf16.gmra.mrb[12].mxu0 %v3660_v40  ;;  %1520 = vmatmul.mubr.bf16.gmra.mrb[12].mxu1 %v3661_v41  ;;  %v3751_v40 = vld [vmem:[%s5054_s0 + $0x148] ss:$20 sps:$4 sm:$0xff]   ;;  %v3752_v41 = vld [vmem:[%s5054_s0 + $0x3ec] ss:$20 sps:$4 sm:$0xff]  }
  0x5a   :  { %1701 = vmatpush1.bf16.msra.mxu0 %v3662_v42  ;;  %1463 = vmatprep.mubr.bf16.mxu0 %v3664_v43  ;;  %v3754_v42 = vld [vmem:[%s5054_s0 + $0x174] ss:$20 sps:$4 sm:$0xff]  }
  0x5b   :  { %1702 = vmatprep.subr.bf16.mxu0 %v3876_v0  ;;  %1527 = vmatprep.mubr.bf16.mxu1 %v3666_v45  ;;  %v3756_v43 = vld [vmem:[%s5054_s0 + $0x3e8] ss:$20 sps:$4 sm:$0xff]  }
  0x5c   :  { %v3758_v45 = vld [vmem:[%s5054_s0 + $0x414] ss:$20 sps:$4 sm:$0xff]  }
  0x5e   :  { %1703 = vmatpush1.bf16.msra.mxu0 %v3663_v46  ;;  %v3760_v46 = vld [vmem:[%s5054_s0 + $0x19c] ss:$20 sps:$4 sm:$0xff]  }
  0x5f   :  { %1704 = vmatprep.subr.bf16.mxu0 %v3876_v0 }
  0x61   :  { %1464 = vmatmul.mubr.bf16.gmra.mrb[16].mxu0 %v3668_v47  ;;  %1528 = vmatmul.mubr.bf16.gmra.mrb[16].mxu1 %v3669_v48  ;;  %v3762_v47 = vld [vmem:[%s5054_s0 + $0x410] ss:$20 sps:$4 sm:$0xff]   ;;  %v3763_v48 = vld [vmem:[%s5054_s0 + $0x198] ss:$20 sps:$4 sm:$0xff]  }
  0x62   :  { %1705 = vmatpush1.bf16.msra.mxu0 %v3670_v49  ;;  %1471 = vmatprep.mubr.bf16.mxu0 %v3672_v50  ;;  %v3765_v49 = vld [vmem:[%s5054_s0 + $0x43c] ss:$20 sps:$4 sm:$0xff]   ;;  %v3767_v50 = vld [vmem:[%s5054_s0 + $0x1c4] ss:$20 sps:$4 sm:$0xff]  }
  0x63   :  { %1706 = vmatprep.subr.bf16.mxu0 %v3876_v0  ;;  %1535 = vmatprep.mubr.bf16.mxu1 %v3674_v51  ;;  %v3769_v51 = vld [vmem:[%s5054_s0 + $0x438] ss:$20 sps:$4 sm:$0xff]  }
  0x66   :  { %1707 = vmatpush1.bf16.msra.mxu0 %v3671_v52  ;;  %v3770_v52 = vld [vmem:[%s5054_s0 + $0x1c0] ss:$20 sps:$4 sm:$0xff]  }
  0x67   :  { %1708 = vmatprep.subr.bf16.mxu0 %v3876_v0 }
  0x69   :  { %1472 = vmatmul.mubr.bf16.gmra.mrb[20].mxu0 %v3676_v53  ;;  %1536 = vmatmul.mubr.bf16.gmra.mrb[20].mxu1 %v3677_v54  ;;  %v3771_v53 = vld [vmem:[%s5054_s0 + $0x464] ss:$20 sps:$4 sm:$0xff]   ;;  %v3773_v54 = vld [vmem:[%s5054_s0 + $0x1ec] ss:$20 sps:$4 sm:$0xff]  }
  0x6a   :  { %1709 = vmatpush1.bf16.msra.mxu0 %v3678_v55  ;;  %1479 = vmatprep.mubr.bf16.mxu0 %v3680_v56  ;;  %v3775_v55 = vld [vmem:[%s5054_s0 + $0x460] ss:$20 sps:$4 sm:$0xff]   ;;  %v3776_v56 = vld [vmem:[%s5054_s0 + $0x1e8] ss:$20 sps:$4 sm:$0xff]  }
  0x6b   :  { %1710 = vmatprep.subr.bf16.mxu0 %v3876_v0  ;;  %1543 = vmatprep.mubr.bf16.mxu1 %v3682_v57  ;;  %v3777_v57 = vld [vmem:[%s5054_s0 + $0x48c] ss:$20 sps:$4 sm:$0xff]  }
  0x6e   :  { %1711 = vmatpush1.bf16.msra.mxu0 %v3679_v58  ;;  %v3779_v58 = vld [vmem:[%s5054_s0 + $0x214] ss:$20 sps:$4 sm:$0xff]  }
  0x6f   :  { %1712 = vmatprep.subr.bf16.mxu0 %v3876_v0 }
  0x71   :  { %1480 = vmatmul.mubr.bf16.gmra.mrb[24].mxu0 %v3684_v59  ;;  %1544 = vmatmul.mubr.bf16.gmra.mrb[24].mxu1 %v3685_v60  ;;  %v3781_v59 = vld [vmem:[%s5054_s0 + $0x488] ss:$20 sps:$4 sm:$0xff]   ;;  %v3782_v60 = vld [vmem:[%s5054_s0 + $0x210] ss:$20 sps:$4 sm:$0xff]  }
  0x72   :  { %1713 = vmatpush1.bf16.msra.mxu0 %v3686_v61  ;;  %1487 = vmatprep.mubr.bf16.mxu0 %v3689_v62  ;;  %v3783_v61 = vld [vmem:[%s5054_s0 + $0x4b4] ss:$20 sps:$4 sm:$0xff]   ;;  %v3785_v62 = vld [vmem:[%s5054_s0 + $0x23c] ss:$20 sps:$4 sm:$0xff]  }
  0x73   :  { %1714 = vmatprep.subr.bf16.mxu0 %v3876_v0  ;;  %1551 = vmatprep.mubr.bf16.mxu1 %v3691_v63  ;;  %v3787_v63 = vld [vmem:[%s5054_s0 + $0x4b0] ss:$20 sps:$4 sm:$0xff]  }
  0x76   :  { %1715 = vmatpush1.bf16.msra.mxu0 %v3688_v1  ;;  %v3788_v1 = vld [vmem:[%s5054_s0 + $0x238] ss:$20 sps:$4 sm:$0xff]  }
  0x77   :  { %1716 = vmatprep.subr.bf16.mxu0 %v3876_v0 }
  0x79   :  { %1488 = vmatmul.mubr.bf16.gmra.mrb[28].mxu0 %v3693_v2  ;;  %1552 = vmatmul.mubr.bf16.gmra.mrb[28].mxu1 %v3694_v3  ;;  %v3789_v2 = vld [vmem:[%s5054_s0 + $0x4dc] ss:$20 sps:$4 sm:$0xff]   ;;  %v3791_v3 = vld [vmem:[%s5054_s0 + $0x264] ss:$20 sps:$4 sm:$0xff]  }
  0x7a   :  { %1717 = vmatpush1.bf16.msra.mxu0 %v3695_v4  ;;  %1559 = vmatprep.mubr.bf16.mxu1 %v3697_v5  ;;  %v3793_v4 = vld [vmem:[%s5054_s0 + $0x4d8] ss:$20 sps:$4 sm:$0xff]   ;;  %v3794_v5 = vld [vmem:[%s5054_s0 + $0x260] ss:$20 sps:$4 sm:$0xff]  }
  0x7b   :  { %1718 = vmatprep.subr.bf16.mxu0 %v3876_v0  ;;  %1720 = vmatprep.mubr.bf16.mxu0 %v3701_v6  ;;  %v3707_v0 = vld [vmem:[%s5054_s0 + $0x2a8] ss:$20 sps:$4 sm:$0xff]   ;;  %v3795_v6 = vld [vmem:[%s5054_s0 + $0x28c] ss:$20 sps:$4 sm:$0xff]  }
  0x7e   :  { %1719 = vmatpush1.bf16.msra.mxu0 %v3696_v7  ;;  %v3797_v7 = vld [vmem:[%s5054_s0 + $0x10] ss:$20 sps:$4 sm:$0xff]  }
  0x81   :  { %1560 = vmatmul.mubr.bf16.gmra.mrb[32].mxu1 %v3702_v9  ;;  %1721 = vmatmul.mubr.bf16.vlgmr.msra.gmra.mrb[0].mxu0 %v3699_v8  ;;  %v3798_v8 = vld [vmem:[%s5054_s0 + $0x288] ss:$20 sps:$4 sm:$0xff]   ;;  %v3799_v9 = vld [vmem:[%s5054_s0 + $0x38] ss:$20 sps:$4 sm:$0xff]  }
  0x82   :  { %1567 = vmatprep.mubr.bf16.mxu1 %v3703_v10  ;;  %1728 = vmatprep.mubr.bf16.mxu0 %v3705_v11  ;;  %v3800_v10 = vld [vmem:[%s5054_s0 + $0x2b4] ss:$20 sps:$4 sm:$0xff]  }
  0x83   :  { %v3802_v11 = vld [vmem:[%s5054_s0 + $0x60] ss:$20 sps:$4 sm:$0xff]  }
  0x89   :  { %1568 = vmatmul.mubr.bf16.gmra.mrb[36].mxu1 %v3707_v0  ;;  %1729 = vmatmul.mubr.bf16.gmra.mrb[4].mxu0 %v3708_v12  ;;  %v3803_v0 = vld [vmem:[%s5054_s0 + $0x2b0] ss:$20 sps:$4 sm:$0xff]   ;;  %v3804_v12 = vld [vmem:[%s5054_s0 + $0x88] ss:$20 sps:$4 sm:$0xff]  }
  0x8a   :  { %1575 = vmatprep.mubr.bf16.mxu1 %v3709_v13  ;;  %1736 = vmatprep.mubr.bf16.mxu0 %v3711_v14  ;;  %v3805_v13 = vld [vmem:[%s5054_s0 + $0x2dc] ss:$20 sps:$4 sm:$0xff]  }
  0x8b   :  { %v3807_v14 = vld [vmem:[%s5054_s0 + $0xb0] ss:$20 sps:$4 sm:$0xff]  }
  0x91   :  { %1576 = vmatmul.mubr.bf16.gmra.mrb[40].mxu1 %v3713_v15  ;;  %1737 = vmatmul.mubr.bf16.gmra.mrb[8].mxu0 %v3714_v16  ;;  %v3808_v15 = vld [vmem:[%s5054_s0 + $0x2d8] ss:$20 sps:$4 sm:$0xff]  }
  0x92   :  { %1583 = vmatprep.mubr.bf16.mxu1 %v3715_v17  ;;  %1744 = vmatprep.mubr.bf16.mxu0 %v3717_v18  ;;  %v3809_v16 = vld [vmem:[%s5054_s0 + $0xd8] ss:$20 sps:$4 sm:$0xff]   ;;  %v3812_v18 = vld [vmem:[%s5054_s0 + $0x100] ss:$20 sps:$4 sm:$0xff]  }
  0x93   :  { %v3810_v17 = vld [vmem:[%s5054_s0 + $0x304] ss:$20 sps:$4 sm:$0xff]  }
  0x99   :  { %1584 = vmatmul.mubr.bf16.gmra.mrb[44].mxu1 %v3719_v19  ;;  %1745 = vmatmul.mubr.bf16.gmra.mrb[12].mxu0 %v3720_v20 }
  0x9a   :  { %1591 = vmatprep.mubr.bf16.mxu1 %v3721_v21  ;;  %1752 = vmatprep.mubr.bf16.mxu0 %v3723_v22  ;;  %v3813_v21 = vld [vmem:[%s5054_s0 + $0x300] ss:$20 sps:$4 sm:$0xff]   ;;  %v3814_v22 = vld [vmem:[%s5054_s0 + $0x128] ss:$20 sps:$4 sm:$0xff]  }
  0xa1   :  { %1592 = vmatmul.mubr.bf16.gmra.mrb[48].mxu1 %v3725_v23  ;;  %1753 = vmatmul.mubr.bf16.gmra.mrb[16].mxu0 %v3726_v24  ;;  %v3815_v24 = vld [vmem:[%s5054_s0 + $0x32c] ss:$20 sps:$4 sm:$0xff]  }
  0xa2   :  { %1599 = vmatprep.mubr.bf16.mxu1 %v3728_v25  ;;  %1760 = vmatprep.mubr.bf16.mxu0 %v3730_v26  ;;  %v3817_v25 = vld [vmem:[%s5054_s0 + $0x150] ss:$20 sps:$4 sm:$0xff]  }
  0xa9   :  { %1600 = vmatmul.mubr.bf16.gmra.mrb[52].mxu1 %v3732_v27  ;;  %1761 = vmatmul.mubr.bf16.gmra.mrb[20].mxu0 %v3733_v28 }
  0xaa   :  { %1607 = vmatprep.mubr.bf16.mxu1 %v3734_v29  ;;  %1768 = vmatprep.mubr.bf16.mxu0 %v3736_v30  ;;  %v3818_v29 = vld [vmem:[%s5054_s0 + $0x328] ss:$20 sps:$4 sm:$0xff]   ;;  %v3819_v30 = vld [vmem:[%s5054_s0 + $0x178] ss:$20 sps:$4 sm:$0xff]  }
  0xb1   :  { %1608 = vmatmul.mubr.bf16.gmra.mrb[56].mxu1 %v3738_v31  ;;  %1769 = vmatmul.mubr.bf16.gmra.mrb[24].mxu0 %v3739_v32  ;;  %v3820_v32 = vld [vmem:[%s5054_s0 + $0x354] ss:$20 sps:$4 sm:$0xff]  }
  0xb2   :  { %1615 = vmatprep.mubr.bf16.mxu1 %v3740_v33  ;;  %1776 = vmatprep.mubr.bf16.mxu0 %v3742_v34  ;;  %v3822_v33 = vld [vmem:[%s5054_s0 + $0x1a0] ss:$20 sps:$4 sm:$0xff]  }
  0xb9   :  { %1616 = vmatmul.mubr.bf16.gmra.mrb[60].mxu1 %v3744_v35  ;;  %1777 = vmatmul.mubr.bf16.gmra.mrb[28].mxu0 %v3745_v36 }
  0xba   :  { %1623 = vmatprep.mubr.bf16.mxu1 %v3746_v37  ;;  %1784 = vmatprep.mubr.bf16.mxu0 %v3748_v38  ;;  %v3823_v37 = vld [vmem:[%s5054_s0 + $0x350] ss:$20 sps:$4 sm:$0xff]   ;;  %v3824_v38 = vld [vmem:[%s5054_s0 + $0x1c8] ss:$20 sps:$4 sm:$0xff]  }
  0xc1   :  { %1624 = vmatmul.mubr.bf16.gmra.mrb[64].mxu1 %v3750_v39  ;;  %1785 = vmatmul.mubr.bf16.gmra.mrb[32].mxu0 %v3751_v40  ;;  %v3825_v40 = vld [vmem:[%s5054_s0 + $0x37c] ss:$20 sps:$4 sm:$0xff]  }
  0xc2   :  { %1631 = vmatprep.mubr.bf16.mxu1 %v3752_v41  ;;  %1792 = vmatprep.mubr.bf16.mxu0 %v3754_v42  ;;  %v3827_v41 = vld [vmem:[%s5054_s0 + $0x1f0] ss:$20 sps:$4 sm:$0xff]  }
  0xc9   :  { %1632 = vmatmul.mubr.bf16.gmra.mrb[68].mxu1 %v3756_v43  ;;  %1793 = vmatmul.mubr.bf16.gmra.mrb[36].mxu0 %v3757_v44 }
  0xca   :  { %1639 = vmatprep.mubr.bf16.mxu1 %v3758_v45  ;;  %1800 = vmatprep.mubr.bf16.mxu0 %v3760_v46  ;;  %v3828_v45 = vld [vmem:[%s5054_s0 + $0x378] ss:$20 sps:$4 sm:$0xff]  }
  0xcb   :  { %v3829_v46 = vld [vmem:[%s5054_s0 + $0x218] ss:$20 sps:$4 sm:$0xff]  }
  0xd1   :  { %1640 = vmatmul.mubr.bf16.gmra.mrb[72].mxu1 %v3762_v47  ;;  %1801 = vmatmul.mubr.bf16.gmra.mrb[40].mxu0 %v3763_v48  ;;  %v3830_v48 = vld [vmem:[%s5054_s0 + $0x3a4] ss:$20 sps:$4 sm:$0xff]  }
  0xd2   :  { %1647 = vmatprep.mubr.bf16.mxu1 %v3765_v49  ;;  %1808 = vmatprep.mubr.bf16.mxu0 %v3767_v50  ;;  %v3832_v49 = vld [vmem:[%s5054_s0 + $0x240] ss:$20 sps:$4 sm:$0xff]  }
  0xd9   :  { %1648 = vmatmul.mubr.bf16.gmra.mrb[76].mxu1 %v3769_v51  ;;  %1809 = vmatmul.mubr.bf16.gmra.mrb[44].mxu0 %v3770_v52 }
  0xda   :  { %1655 = vmatprep.mubr.bf16.mxu1 %v3771_v53  ;;  %1816 = vmatprep.mubr.bf16.mxu0 %v3773_v54  ;;  %v3833_v53 = vld [vmem:[%s5054_s0 + $0x3a0] ss:$20 sps:$4 sm:$0xff]   ;;  %v3834_v54 = vld [vmem:[%s5054_s0 + $0x268] ss:$20 sps:$4 sm:$0xff]  }
  0xe1   :  { %1656 = vmatmul.mubr.bf16.gmra.mrb[80].mxu1 %v3775_v55  ;;  %1817 = vmatmul.mubr.bf16.gmra.mrb[48].mxu0 %v3776_v56  ;;  %v3835_v56 = vld [vmem:[%s5054_s0 + $0x3cc] ss:$20 sps:$4 sm:$0xff]  }
  0xe2   :  { %1663 = vmatprep.mubr.bf16.mxu1 %v3777_v57  ;;  %1824 = vmatprep.mubr.bf16.mxu0 %v3779_v58  ;;  %v3837_v57 = vld [vmem:[%s5054_s0 + $0x290] ss:$20 sps:$4 sm:$0xff]  }
  0xe9   :  { %1664 = vmatmul.mubr.bf16.gmra.mrb[84].mxu1 %v3781_v59  ;;  %1825 = vmatmul.mubr.bf16.gmra.mrb[52].mxu0 %v3782_v60 }
  0xea   :  { %1671 = vmatprep.mubr.bf16.mxu1 %v3783_v61  ;;  %1832 = vmatprep.mubr.bf16.mxu0 %v3785_v62  ;;  %v3838_v61 = vld [vmem:[%s5054_s0 + $0x3c8] ss:$20 sps:$4 sm:$0xff]   ;;  %v3839_v62 = vld [vmem:[%s5054_s0 + $0x2b8] ss:$20 sps:$4 sm:$0xff]  }
  0xf1   :  { %1672 = vmatmul.mubr.bf16.gmra.mrb[88].mxu1 %v3787_v63  ;;  %1833 = vmatmul.mubr.bf16.gmra.mrb[56].mxu0 %v3788_v1  ;;  %v3840_v1 = vld [vmem:[%s5054_s0 + $0x3f4] ss:$20 sps:$4 sm:$0xff]  }
  0xf2   :  { %1679 = vmatprep.mubr.bf16.mxu1 %v3789_v2  ;;  %1840 = vmatprep.mubr.bf16.mxu0 %v3791_v3  ;;  %v3842_v2 = vld [vmem:[%s5054_s0 + $0x2e0] ss:$20 sps:$4 sm:$0xff]  }
  0xf9   :  { %1680 = vmatmul.mubr.bf16.gmra.mrb[92].mxu1 %v3793_v4  ;;  %1841 = vmatmul.mubr.bf16.gmra.mrb[60].mxu0 %v3794_v5 }
  0xfa   :  { %1848 = vmatprep.mubr.bf16.mxu0 %v3795_v6  ;;  %3374 = vmatprep.mubr.msk.bf16.mxu1 %vm1302_vm0, %v3797_v7  ;;  %v3843_v6 = vld [vmem:[%s5054_s0 + $0x3f0] ss:$20 sps:$4 sm:$0xff]   ;;  %v3844_v7 = vld [vmem:[%s5054_s0 + $0x308] ss:$20 sps:$4 sm:$0xff]  }
 0x101   :  { %1849 = vmatmul.mubr.bf16.gmra.mrb[64].mxu0 %v3798_v8  ;;  %3375 = vmatmul.mubr.msk.bf16.vlgmr.msra.gmra.mrb[96].mxu1 %vm1302_vm0, %v3799_v9  ;;  %v3845_v9 = vld [vmem:[%s5054_s0 + $0x41c] ss:$20 sps:$4 sm:$0xff]  }
 0x102   :  { %1856 = vmatprep.mubr.bf16.mxu0 %v3800_v10  ;;  %3378 = vmatprep.mubr.msk.bf16.mxu1 %vm1302_vm0, %v3802_v11  ;;  %v3847_v10 = vld [vmem:[%s5054_s0 + $0x330] ss:$20 sps:$4 sm:$0xff]  }
 0x109   :  { %1857 = vmatmul.mubr.bf16.gmra.mrb[68].mxu0 %v3803_v0  ;;  %3379 = vmatmul.mubr.msk.bf16.gmra.mrb[100].mxu1 %vm1302_vm0, %v3804_v12 }
 0x10a   :  { %1864 = vmatprep.mubr.bf16.mxu0 %v3805_v13  ;;  %3382 = vmatprep.mubr.msk.bf16.mxu1 %vm1302_vm0, %v3807_v14  ;;  %v3848_v13 = vld [vmem:[%s5054_s0 + $0x418] ss:$20 sps:$4 sm:$0xff]  }
 0x10b   :  { %v3849_v14 = vld [vmem:[%s5054_s0 + $0x358] ss:$20 sps:$4 sm:$0xff]  }
 0x111   :  { %1865 = vmatmul.mubr.bf16.gmra.mrb[72].mxu0 %v3808_v15  ;;  %3383 = vmatmul.mubr.msk.bf16.gmra.mrb[104].mxu1 %vm1302_vm0, %v3809_v16  ;;  %v3850_v16 = vld [vmem:[%s5054_s0 + $0x444] ss:$20 sps:$4 sm:$0xff]  }
 0x112   :  { %1872 = vmatprep.mubr.bf16.mxu0 %v3810_v17  ;;  %3386 = vmatprep.mubr.msk.bf16.mxu1 %vm1302_vm0, %v3812_v18  ;;  %v3852_v17 = vld [vmem:[%s5054_s0 + $0x380] ss:$20 sps:$4 sm:$0xff]  }
 0x114   :  { %v4390_v19 = vpop.f32.mrb[0].mxu1 }
 0x115   :  { %v1499_v20 = vpop.f32.mrb[1].mxu1 }
 0x116   :  { %v4398_v23 = vpop.f32.mrb[2].mxu1 }
 0x117   :  { %v1502_v26 = vpop.f32.mrb[3].mxu1 }
 0x118   :  { %v3854_v26 = vld [vmem:[%s5054_s0 + $0x3a8] ss:$20 sps:$4 sm:$0xff]  }
 0x119   :  { %1873 = vmatmul.mubr.bf16.gmra.mrb[76].mxu0 %v3813_v21  ;;  %3387 = vmatmul.mubr.msk.bf16.gmra.mrb[108].mxu1 %vm1302_vm0, %v3814_v22 }
 0x11a   :  { %1880 = vmatprep.mubr.bf16.mxu0 %v3815_v24  ;;  %3390 = vmatprep.mubr.msk.bf16.mxu1 %vm1302_vm0, %v3817_v25  ;;  %v3853_v25 = vld [vmem:[%s5054_s0 + $0x440] ss:$20 sps:$4 sm:$0xff]  }
 0x11c   :  { %v4408_v27 = vpop.f32.mrb[4].mxu1 }
 0x11d   :  { %v1507_v28 = vpop.f32.mrb[5].mxu1 }
 0x11e   :  { %v4416_v31 = vpop.f32.mrb[6].mxu1 }
 0x11f   :  { %v1510_v34 = vpop.f32.mrb[7].mxu1 }
 0x121   :  { %1881 = vmatmul.mubr.bf16.gmra.mrb[80].mxu0 %v3818_v29  ;;  %3391 = vmatmul.mubr.msk.bf16.gmra.mrb[112].mxu1 %vm1302_vm0, %v3819_v30  ;;  %v3855_v30 = vld [vmem:[%s5054_s0 + $0x46c] ss:$20 sps:$4 sm:$0xff]  }
 0x122   :  { %1888 = vmatprep.mubr.bf16.mxu0 %v3820_v32  ;;  %3394 = vmatprep.mubr.msk.bf16.mxu1 %vm1302_vm0, %v3822_v33  ;;  %v3857_v32 = vld [vmem:[%s5054_s0 + $0x3d0] ss:$20 sps:$4 sm:$0xff]  }
 0x124   :  { %v4426_v35 = vpop.f32.mrb[8].mxu1 }
 0x125   :  { %v1515_v36 = vpop.f32.mrb[9].mxu1 }
 0x126   :  { %v4434_v39 = vpop.f32.mrb[10].mxu1 }
 0x127   :  { %v1518_v42 = vpop.f32.mrb[11].mxu1 }
 0x128   :  { %v3859_v42 = vld [vmem:[%s5054_s0 + $0x3f8] ss:$20 sps:$4 sm:$0xff]  }
 0x129   :  { %1889 = vmatmul.mubr.bf16.gmra.mrb[84].mxu0 %v3823_v37  ;;  %3395 = vmatmul.mubr.msk.bf16.gmra.mrb[116].mxu1 %vm1302_vm0, %v3824_v38 }
 0x12a   :  { %1896 = vmatprep.mubr.bf16.mxu0 %v3825_v40  ;;  %3398 = vmatprep.mubr.msk.bf16.mxu1 %vm1302_vm0, %v3827_v41  ;;  %v3858_v41 = vld [vmem:[%s5054_s0 + $0x468] ss:$20 sps:$4 sm:$0xff]  }
 0x12c   :  { %v4444_v43 = vpop.f32.mrb[12].mxu1 }
 0x12d   :  { %v1523_v44 = vpop.f32.mrb[13].mxu1 }
 0x12e   :  { %v4452_v47 = vpop.f32.mrb[14].mxu1 }
 0x12f   :  { %v1526_v50 = vpop.f32.mrb[15].mxu1 }
 0x131   :  { %1897 = vmatmul.mubr.bf16.gmra.mrb[88].mxu0 %v3828_v45  ;;  %3399 = vmatmul.mubr.msk.bf16.gmra.mrb[120].mxu1 %vm1302_vm0, %v3829_v46  ;;  %v3860_v46 = vld [vmem:[%s5054_s0 + $0x494] ss:$20 sps:$4 sm:$0xff]  }
 0x132   :  { %1904 = vmatprep.mubr.bf16.mxu0 %v3830_v48  ;;  %3402 = vmatprep.mubr.msk.bf16.mxu1 %vm1302_vm0, %v3832_v49  ;;  %v3862_v48 = vld [vmem:[%s5054_s0 + $0x420] ss:$20 sps:$4 sm:$0xff]  }
 0x134   :  { %v4462_v51 = vpop.f32.mrb[16].mxu1 }
 0x135   :  { %v1531_v52 = vpop.f32.mrb[17].mxu1 }
 0x136   :  { %v4470_v55 = vpop.f32.mrb[18].mxu1 }
 0x137   :  { %v1534_v58 = vpop.f32.mrb[19].mxu1 }
 0x138   :  { %v3864_v58 = vld [vmem:[%s5054_s0 + $0x448] ss:$20 sps:$4 sm:$0xff]  }
 0x139   :  { %1905 = vmatmul.mubr.bf16.gmra.mrb[92].mxu0 %v3833_v53  ;;  %3403 = vmatmul.mubr.msk.bf16.gmra.mrb[124].mxu1 %vm1302_vm0, %v3834_v54 }
 0x13a   :  { %1912 = vmatprep.mubr.bf16.mxu0 %v3835_v56  ;;  %3406 = vmatprep.mubr.msk.bf16.mxu1 %vm1302_vm0, %v3837_v57  ;;  %v3863_v57 = vld [vmem:[%s5054_s0 + $0x490] ss:$20 sps:$4 sm:$0xff]  }
 0x13c   :  { %v4480_v59 = vpop.f32.mrb[20].mxu1 }
 0x13d   :  { %v1539_v60 = vpop.f32.mrb[21].mxu1 }
 0x13e   :  { %v4488_v63 = vpop.f32.mrb[22].mxu1 }
 0x13f   :  { %v1542_v3 = vpop.f32.mrb[23].mxu1 }
 0x141   :  { %1913 = vmatmul.mubr.bf16.gmra.mrb[96].mxu0 %v3838_v61  ;;  %3407 = vmatmul.mubr.msk.bf16.gmra.mrb[128].mxu1 %vm1302_vm0, %v3839_v62  ;;  %v3865_v62 = vld [vmem:[%s5054_s0 + $0x4bc] ss:$20 sps:$4 sm:$0xff]  }
 0x142   :  { %1920 = vmatprep.mubr.bf16.mxu0 %v3840_v1  ;;  %3410 = vmatprep.mubr.msk.bf16.mxu1 %vm1302_vm0, %v3842_v2  ;;  %v3867_v1 = vld [vmem:[%s5054_s0 + $0x470] ss:$20 sps:$4 sm:$0xff]  }
 0x144   :  { %v4498_v4 = vpop.f32.mrb[24].mxu1 }
 0x145   :  { %v1547_v5 = vpop.f32.mrb[25].mxu1 }
 0x146   :  { %v4506_v8 = vpop.f32.mrb[26].mxu1 }
 0x147   :  { %v1550_v11 = vpop.f32.mrb[27].mxu1 }
 0x148   :  { %v3869_v11 = vld [vmem:[%s5054_s0 + $0x498] ss:$20 sps:$4 sm:$0xff]  }
 0x149   :  { %1921 = vmatmul.mubr.bf16.gmra.mrb[100].mxu0 %v3843_v6  ;;  %3411 = vmatmul.mubr.msk.bf16.gmra.mrb[132].mxu1 %vm1302_vm0, %v3844_v7 }
 0x14a   :  { %1928 = vmatprep.mubr.bf16.mxu0 %v3845_v9  ;;  %3414 = vmatprep.mubr.msk.bf16.mxu1 %vm1302_vm0, %v3847_v10  ;;  %v3868_v10 = vld [vmem:[%s5054_s0 + $0x4b8] ss:$20 sps:$4 sm:$0xff]  }
 0x14c   :  { %v4516_v0 = vpop.f32.mrb[28].mxu1 }
 0x14d   :  { %v1555_v12 = vpop.f32.mrb[29].mxu1 }
 0x14e   :  { %v4524_v15 = vpop.f32.mrb[30].mxu1 }
 0x14f   :  { %v1558_v18 = vpop.f32.mrb[31].mxu1 }
 0x151   :  { %1929 = vmatmul.mubr.bf16.gmra.mrb[104].mxu0 %v3848_v13  ;;  %3415 = vmatmul.mubr.msk.bf16.gmra.mrb[136].mxu1 %vm1302_vm0, %v3849_v14  ;;  %v3870_v14 = vld [vmem:[%s5054_s0 + $0x4e4] ss:$20 sps:$4 sm:$0xff]  }
 0x152   :  { %1936 = vmatprep.mubr.bf16.mxu0 %v3850_v16  ;;  %3418 = vmatprep.mubr.msk.bf16.mxu1 %vm1302_vm0, %v3852_v17  ;;  %v3872_v16 = vld [vmem:[%s5054_s0 + $0x4c0] ss:$20 sps:$4 sm:$0xff]  }
 0x154   :  { %v4534_v20 = vpop.f32.mrb[32].mxu1  ;;  %v4536_v21 = vpop.f32.mrb[0].mxu0 }
 0x155   :  { %v1563_v22 = vpop.f32.mrb[33].mxu1  ;;  %v1724_v24 = vpop.f32.mrb[1].mxu0 }
 0x156   :  { %v4544_v28 = vpop.f32.mrb[34].mxu1  ;;  %v4546_v29 = vpop.f32.mrb[2].mxu0 }
 0x157   :  { %v1566_v33 = vpop.f32.mrb[35].mxu1  ;;  %v1727_v34 = vpop.f32.mrb[3].mxu0 }
 0x159   :  { %1937 = vmatmul.mubr.bf16.gmra.mrb[108].mxu0 %v3853_v25  ;;  %3419 = vmatmul.mubr.msk.bf16.gmra.mrb[140].mxu1 %vm1302_vm0, %v3854_v26 }
 0x15a   :  { %1944 = vmatprep.mubr.bf16.mxu0 %v3855_v30  ;;  %3422 = vmatprep.mubr.msk.bf16.mxu1 %vm1302_vm0, %v3857_v32  ;;  %v3873_v30 = vld [vmem:[%s5054_s0 + $0x4e0] ss:$20 sps:$4 sm:$0xff]   ;;  %v3874_v32 = vld [vmem:[%s5054_s0 + $0x4e8] ss:$20 sps:$4 sm:$0xff]  }
 0x15c   :  { %v4556_v36 = vpop.f32.mrb[36].mxu1  ;;  %v4558_v37 = vpop.f32.mrb[4].mxu0 }
 0x15d   :  { %v1571_v38 = vpop.f32.mrb[37].mxu1  ;;  %v1732_v40 = vpop.f32.mrb[5].mxu0 }
 0x15e   :  { %v4566_v44 = vpop.f32.mrb[38].mxu1  ;;  %v4568_v45 = vpop.f32.mrb[6].mxu0 }
 0x15f   :  { %v1574_v49 = vpop.f32.mrb[39].mxu1  ;;  %v1735_v50 = vpop.f32.mrb[7].mxu0 }
 0x161   :  { %1945 = vmatmul.mubr.bf16.gmra.mrb[112].mxu0 %v3858_v41  ;;  %3423 = vmatmul.mubr.msk.bf16.gmra.mrb[144].mxu1 %vm1302_vm0, %v3859_v42 }
 0x162   :  { %1952 = vmatprep.mubr.bf16.mxu0 %v3860_v46  ;;  %3426 = vmatprep.mubr.msk.bf16.mxu1 %vm1302_vm0, %v3862_v48 }
 0x164   :  { %v4578_v52 = vpop.f32.mrb[40].mxu1  ;;  %v4580_v53 = vpop.f32.mrb[8].mxu0 }
 0x165   :  { %v1579_v54 = vpop.f32.mrb[41].mxu1  ;;  %v1740_v56 = vpop.f32.mrb[9].mxu0 }
 0x166   :  { %v4588_v60 = vpop.f32.mrb[42].mxu1  ;;  %v4590_v61 = vpop.f32.mrb[10].mxu0 }
 0x167   :  { %v1582_v2 = vpop.f32.mrb[43].mxu1  ;;  %v1743_v3 = vpop.f32.mrb[11].mxu0 }
 0x169   :  { %1953 = vmatmul.mubr.bf16.gmra.mrb[116].mxu0 %v3863_v57  ;;  %3427 = vmatmul.mubr.msk.bf16.gmra.mrb[148].mxu1 %vm1302_vm0, %v3864_v58 }
 0x16a   :  { %1960 = vmatprep.mubr.bf16.mxu0 %v3865_v62  ;;  %3430 = vmatprep.mubr.msk.bf16.mxu1 %vm1302_vm0, %v3867_v1 }
 0x16c   :  { %v4600_v5 = vpop.f32.mrb[44].mxu1  ;;  %v4602_v6 = vpop.f32.mrb[12].mxu0 }
 0x16d   :  { %v1587_v7 = vpop.f32.mrb[45].mxu1  ;;  %v1748_v9 = vpop.f32.mrb[13].mxu0 }
 0x16e   :  { %v4610_v12 = vpop.f32.mrb[46].mxu1  ;;  %v4612_v13 = vpop.f32.mrb[14].mxu0 }
 0x16f   :  { %v1590_v17 = vpop.f32.mrb[47].mxu1  ;;  %v1751_v18 = vpop.f32.mrb[15].mxu0 }
 0x171   :  { %1961 = vmatmul.mubr.bf16.gmra.mrb[120].mxu0 %v3868_v10  ;;  %3431 = vmatmul.mubr.msk.bf16.gmra.mrb[152].mxu1 %vm1302_vm0, %v3869_v11 }
 0x172   :  { %1968 = vmatprep.mubr.bf16.mxu0 %v3870_v14  ;;  %3434 = vmatprep.mubr.msk.bf16.mxu1 %vm1302_vm0, %v3872_v16 }
 0x174   :  { %v4622_v22 = vpop.f32.mrb[48].mxu1  ;;  %v4624_v24 = vpop.f32.mrb[16].mxu0 }
 0x175   :  { %v1595_v25 = vpop.f32.mrb[49].mxu1  ;;  %v1756_v26 = vpop.f32.mrb[17].mxu0 }
 0x176   :  { %v4632_v33 = vpop.f32.mrb[50].mxu1  ;;  %v4634_v34 = vpop.f32.mrb[18].mxu0 }
 0x177   :  { %v1598_v38 = vpop.f32.mrb[51].mxu1  ;;  %v1759_v40 = vpop.f32.mrb[19].mxu0 }
 0x179   :  { %1969 = vmatmul.mubr.bf16.gmra.mrb[124].mxu0 %v3873_v30  ;;  %3435 = vmatmul.mubr.msk.bf16.gmra.mrb[156].mxu1 %vm1302_vm0, %v3874_v32  ;;  %v4664_v30 = vld [vmem:[%s5055_s2] ss:$0 sm:$0xff] }
 0x17a   :  { %v1498_v32 = vadd.f32 %v4664_v30, %v4390_v19  ;;  %v1506_v19 = vadd.f32 %v4664_v30, %v4408_v27  ;;  %v1514_v27 = vadd.f32 %v4664_v30, %v4426_v35  ;;  %v1522_v35 = vadd.f32 %v4664_v30, %v4444_v43 }
 0x17b   :  { %v1530_v43 = vadd.f32 %v4664_v30, %v4462_v51  ;;  %v1538_v51 = vadd.f32 %v4664_v30, %v4480_v59  ;;  %v1546_v59 = vadd.f32 %v4664_v30, %v4498_v4  ;;  %v1554_v4 = vadd.f32 %v4664_v30, %v4516_v0 }
 0x17c   :  { %v4637_v41 = vpop.f32.mrb[52].mxu1  ;;  %v4639_v42 = vpop.f32.mrb[20].mxu0  ;;  %v1562_v0 = vadd.f32 %v4664_v30, %v4534_v20  ;;  %v3471_v20 = vadd.f32 %v4664_v30, %v4546_v29 }
 0x17d   :  { %v1603_v46 = vpop.f32.mrb[53].mxu1  ;;  %v1764_v48 = vpop.f32.mrb[21].mxu0 }
 0x17e   :  { %v4641_v49 = vpop.f32.mrb[54].mxu1  ;;  %v4643_v50 = vpop.f32.mrb[22].mxu0  ;;  %v1501_v46 = vadd.f32 %v4664_v30, %v4398_v23  ;;  %v1509_v23 = vadd.f32 %v4664_v30, %v4416_v31  ;;  %v1517_v31 = vadd.f32 %v4664_v30, %v4434_v39  ;;  %v1525_v39 = vadd.f32 %v4664_v30, %v4452_v47 }
 0x17f   :  { %v1606_v54 = vpop.f32.mrb[55].mxu1  ;;  %v1767_v56 = vpop.f32.mrb[23].mxu0  ;;  %v1533_v47 = vadd.f32 %v4664_v30, %v4470_v55  ;;  %v1541_v55 = vadd.f32 %v4664_v30, %v4488_v63  ;;  %v1549_v63 = vadd.f32 %v4664_v30, %v4506_v8  ;;  %v1557_v8 = vadd.f32 %v4664_v30, %v4524_v15 }
 0x180   :  { %v3470_v15 = vadd.f32 %v4664_v30, %v4536_v21 }
 0x184   :  { %v4645_v57 = vpop.f32.mrb[56].mxu1  ;;  %v4647_v58 = vpop.f32.mrb[24].mxu0 }
 0x185   :  { %v1611_v62 = vpop.f32.mrb[57].mxu1  ;;  %v1772_v1 = vpop.f32.mrb[25].mxu0 }
 0x186   :  { %v4649_v2 = vpop.f32.mrb[58].mxu1  ;;  %v4651_v3 = vpop.f32.mrb[26].mxu0 }
 0x187   :  { %v1614_v7 = vpop.f32.mrb[59].mxu1  ;;  %v1775_v9 = vpop.f32.mrb[27].mxu0 }
 0x18c   :  { %v4653_v10 = vpop.f32.mrb[60].mxu1  ;;  %v4655_v11 = vpop.f32.mrb[28].mxu0 }
 0x18d   :  { %v1619_v14 = vpop.f32.mrb[61].mxu1  ;;  %v1780_v16 = vpop.f32.mrb[29].mxu0 }
 0x18e   :  { %v4657_v17 = vpop.f32.mrb[62].mxu1  ;;  %v4659_v18 = vpop.f32.mrb[30].mxu0 }
 0x18f   :  { %v1622_v25 = vpop.f32.mrb[63].mxu1  ;;  %v1783_v26 = vpop.f32.mrb[31].mxu0 }
 0x194   :  { %v4668_v38 = vpop.f32.mrb[64].mxu1  ;;  %v1786_v40 = vpop.f32.mrb[32].mxu0 }
 0x195   :  { %5057 = vst [vmem:[#allocation2_spill] sm:$0xff] %v4668_v38  ;;  %v4672_v48 = vadd.f32 %v1786_v40, %v1498_v32  ;;  %v1627_v54 = vpop.f32.mrb[65].mxu1  ;;  %v1788_v56 = vpop.f32.mrb[33].mxu0 }
 0x196   :  { %v4674_v62 = vpop.f32.mrb[66].mxu1  ;;  %v1789_v1 = vpop.f32.mrb[34].mxu0 }
 0x197   :  { %5058 = vst [vmem:[#allocation3_spill] sm:$0xff] %v4674_v62  ;;  %v4676_v7 = vadd.f32 %v1789_v1, %v1501_v46  ;;  %v1630_v9 = vpop.f32.mrb[67].mxu1  ;;  %v1791_v14 = vpop.f32.mrb[35].mxu0 }
 0x19c   :  { %v4680_v16 = vpop.f32.mrb[68].mxu1  ;;  %v1794_v25 = vpop.f32.mrb[36].mxu0 }
 0x19d   :  { %5059 = vst [vmem:[#allocation4_spill] sm:$0xff] %v4680_v16  ;;  %v4684_v26 = vadd.f32 %v1794_v25, %v1506_v19  ;;  %v1635_v32 = vpop.f32.mrb[69].mxu1  ;;  %v1796_v40 = vpop.f32.mrb[37].mxu0 }
 0x19e   :  { %v4686_v54 = vpop.f32.mrb[70].mxu1  ;;  %v1797_v56 = vpop.f32.mrb[38].mxu0 }
 0x19f   :  { %5060 = vst [vmem:[#allocation5_spill] sm:$0xff] %v4686_v54  ;;  %v4688_v46 = vadd.f32 %v1797_v56, %v1509_v23  ;;  %v1638_v1 = vpop.f32.mrb[71].mxu1  ;;  %v1799_v9 = vpop.f32.mrb[39].mxu0 }
 0x1a4   :  { %v4692_v14 = vpop.f32.mrb[72].mxu1  ;;  %v1802_v16 = vpop.f32.mrb[40].mxu0 }
 0x1a5   :  { %5061 = vst [vmem:[#allocation6_spill] sm:$0xff] %v4692_v14  ;;  %v4696_v19 = vadd.f32 %v1802_v16, %v1514_v27  ;;  %v1643_v25 = vpop.f32.mrb[73].mxu1  ;;  %v1804_v32 = vpop.f32.mrb[41].mxu0 }
 0x1a6   :  { %v4698_v40 = vpop.f32.mrb[74].mxu1  ;;  %v1805_v54 = vpop.f32.mrb[42].mxu0 }
 0x1a7   :  { %5062 = vst [vmem:[#allocation7_spill] sm:$0xff] %v4698_v40  ;;  %v4700_v23 = vadd.f32 %v1805_v54, %v1517_v31  ;;  %v1646_v56 = vpop.f32.mrb[75].mxu1  ;;  %v1807_v1 = vpop.f32.mrb[43].mxu0 }
 0x1ac   :  { %v4704_v9 = vpop.f32.mrb[76].mxu1  ;;  %v1810_v14 = vpop.f32.mrb[44].mxu0 }
 0x1ad   :  { %5063 = vst [vmem:[#allocation8_spill] sm:$0xff] %v4704_v9  ;;  %v4708_v16 = vadd.f32 %v1810_v14, %v1522_v35  ;;  %v1651_v27 = vpop.f32.mrb[77].mxu1  ;;  %v1812_v25 = vpop.f32.mrb[45].mxu0 }
 0x1ae   :  { %v4710_v32 = vpop.f32.mrb[78].mxu1  ;;  %v1813_v40 = vpop.f32.mrb[46].mxu0 }
 0x1af   :  { %5064 = vst [vmem:[#allocation9_spill] sm:$0xff] %v4710_v32  ;;  %v4712_v54 = vadd.f32 %v1813_v40, %v1525_v39  ;;  %v1654_v31 = vpop.f32.mrb[79].mxu1  ;;  %v1815_v56 = vpop.f32.mrb[47].mxu0 }
 0x1b4   :  { %v4716_v1 = vpop.f32.mrb[80].mxu1  ;;  %v1818_v9 = vpop.f32.mrb[48].mxu0 }
 0x1b5   :  { %5065 = vst [vmem:[#allocation10_spill] sm:$0xff] %v4716_v1  ;;  %v4720_v14 = vadd.f32 %v1818_v9, %v1530_v43  ;;  %v1659_v35 = vpop.f32.mrb[81].mxu1  ;;  %v1820_v27 = vpop.f32.mrb[49].mxu0 }
 0x1b6   :  { %v4722_v25 = vpop.f32.mrb[82].mxu1  ;;  %v1821_v32 = vpop.f32.mrb[50].mxu0 }
 0x1b7   :  { %5066 = vst [vmem:[#allocation11_spill] sm:$0xff] %v4722_v25  ;;  %v4724_v40 = vadd.f32 %v1821_v32, %v1533_v47  ;;  %v1662_v39 = vpop.f32.mrb[83].mxu1  ;;  %v1823_v31 = vpop.f32.mrb[51].mxu0 }
 0x1bc   :  { %v4728_v56 = vpop.f32.mrb[84].mxu1  ;;  %v1826_v1 = vpop.f32.mrb[52].mxu0 }
 0x1bd   :  { %5067 = vst [vmem:[#allocation12_spill] sm:$0xff] %v4728_v56  ;;  %v4732_v9 = vadd.f32 %v1826_v1, %v1538_v51  ;;  %v1667_v43 = vpop.f32.mrb[85].mxu1  ;;  %v1828_v35 = vpop.f32.mrb[53].mxu0 }
 0x1be   :  { %v4734_v27 = vpop.f32.mrb[86].mxu1  ;;  %v1829_v25 = vpop.f32.mrb[54].mxu0 }
 0x1bf   :  { %5068 = vst [vmem:[#allocation13_spill] sm:$0xff] %v4734_v27  ;;  %v4736_v32 = vadd.f32 %v1829_v25, %v1541_v55  ;;  %v1670_v47 = vpop.f32.mrb[87].mxu1  ;;  %v1831_v39 = vpop.f32.mrb[55].mxu0 }
 0x1c4   :  { %v4740_v31 = vpop.f32.mrb[88].mxu1  ;;  %v1834_v56 = vpop.f32.mrb[56].mxu0 }
 0x1c5   :  { %5069 = vst [vmem:[#allocation14_spill] sm:$0xff] %v4740_v31  ;;  %v4744_v1 = vadd.f32 %v1834_v56, %v1546_v59  ;;  %v1675_v51 = vpop.f32.mrb[89].mxu1  ;;  %v1836_v43 = vpop.f32.mrb[57].mxu0 }
 0x1c6   :  { %v4746_v35 = vpop.f32.mrb[90].mxu1  ;;  %v1837_v27 = vpop.f32.mrb[58].mxu0 }
 0x1c7   :  { %5070 = vst [vmem:[#allocation15_spill] sm:$0xff] %v4746_v35  ;;  %v4748_v25 = vadd.f32 %v1837_v27, %v1549_v63  ;;  %v1678_v55 = vpop.f32.mrb[91].mxu1  ;;  %v1839_v47 = vpop.f32.mrb[59].mxu0 }
 0x1c8   :  { %v3472_v47 = vadd.f32 %v4664_v30, %v4558_v37 }
 0x1c9   :  { %5071 = vst [vmem:[#allocation16_spill] sm:$0xff] %v4748_v25 }
 0x1cc   :  { %v4752_v39 = vpop.f32.mrb[92].mxu1  ;;  %v1842_v31 = vpop.f32.mrb[60].mxu0 }
 0x1cd   :  { %5072 = vst [vmem:[#allocation17_spill] sm:$0xff] %v4752_v39  ;;  %v4756_v56 = vadd.f32 %v1842_v31, %v1554_v4  ;;  %v1683_v59 = vpop.f32.mrb[93].mxu1  ;;  %v1844_v51 = vpop.f32.mrb[61].mxu0 }
 0x1ce   :  { %v4758_v43 = vpop.f32.mrb[94].mxu1  ;;  %v1845_v35 = vpop.f32.mrb[62].mxu0  ;;  %v1565_v59 = vadd.f32 %v4664_v30, %v4544_v28 }
 0x1cf   :  { %5073 = vst [vmem:[#allocation18_spill] sm:$0xff] %v4758_v43  ;;  %v4760_v27 = vadd.f32 %v1845_v35, %v1557_v8  ;;  %v1686_v63 = vpop.f32.mrb[95].mxu1  ;;  %v1847_v55 = vpop.f32.mrb[63].mxu0  ;;  %v3473_v35 = vadd.f32 %v4664_v30, %v4568_v45 }
 0x1d1   :  { %5074 = vst [vmem:[#allocation19_spill] sm:$0xff] %v4760_v27 }
 0x1d4   :  { %v1850_v31 = vpop.f32.mrb[64].mxu0  ;;  %v3376_v4 = vpop.f32.mrb[96].mxu1 }
 0x1d5   :  { %v4772_v8 = vadd.f32 %v1850_v31, %v1562_v0  ;;  %v2020_v51 = vadd.f32 %v3472_v47, %v3376_v4  ;;  %v1852_v63 = vpop.f32.mrb[65].mxu0  ;;  %v2011_v55 = vpop.f32.mrb[97].mxu1  ;;  %v1570_v47 = vadd.f32 %v4664_v30, %v4556_v36  ;;  %v3474_v31 = vadd.f32 %v4664_v30, %v4580_v53 }
 0x1d6   :  { %v2012_v37 = vadd.f32 %v3470_v15, %v2011_v55  ;;  %v1853_v43 = vpop.f32.mrb[66].mxu0  ;;  %v3377_v39 = vpop.f32.mrb[98].mxu1  ;;  %v1573_v15 = vadd.f32 %v4664_v30, %v4566_v44  ;;  %v3477_v36 = vadd.f32 %v4664_v30, %v4612_v13 }
 0x1d7   :  { %5075 = vst [vmem:[#allocation20_spill] sm:$0xff] %v4772_v8  ;;  %v2332_v21 = vmul.f32 0.01, %v2020_v51  ;;  %v4776_v62 = vadd.f32 %v1853_v43, %v1565_v59  ;;  %v2023_v38 = vadd.f32 %v3473_v35, %v3377_v39  ;;  %v1855_v25 = vpop.f32.mrb[67].mxu0  ;;  %v2014_v28 = vpop.f32.mrb[99].mxu1  ;;  %vm2268_vm1 = vcmp.gt.f32.partialorder %v2020_v51, 0.0 }
 0x1d8   :  { %v2330_v27 = vmul.f32 0.01, %v2012_v37  ;;  %v2015_v45 = vadd.f32 %v3471_v20, %v2014_v28  ;;  %vm2266_vm2 = vcmp.gt.f32.partialorder %v2012_v37, 0.0  ;;  %v3476_v43 = vadd.f32 %v4664_v30, %v4602_v6 }
 0x1d9   :  { %5076 = vst [vmem:[#allocation21_spill] sm:$0xff] %v4776_v62  ;;  %vm2269_vm3 = vcmp.gt.f32.partialorder %v2023_v38, 0.0  ;;  %v2333_v0 = vmul.f32 0.01, %v2023_v38  ;;  %v2396_v39 = vsel %vm2268_vm1, %v2020_v51, %v2332_v21  ;;  %v3475_v6 = vadd.f32 %v4664_v30, %v4590_v61 }
 0x1da   :  { %vm2267_vm4 = vcmp.gt.f32.partialorder %v2015_v45, 0.0  ;;  %v2331_v29 = vmul.f32 0.01, %v2015_v45  ;;  %v2394_v4 = vsel %vm2266_vm2, %v2012_v37, %v2330_v27 }
 0x1db   :  { %v2397_v25 = vsel %vm2269_vm3, %v2023_v38, %v2333_v0 }
 0x1dc   :  { %v3147_v59 = vpack.c.bf16 %v2397_v25, %v2396_v39  ;;  %v2395_v35 = vsel %vm2267_vm4, %v2015_v45, %v2331_v29  ;;  %v1858_v63 = vpop.f32.mrb[68].mxu0  ;;  %v3380_v55 = vpop.f32.mrb[100].mxu1  ;;  %v1581_v29 = vadd.f32 %v4664_v30, %v4588_v60  ;;  %v3478_v25 = vadd.f32 %v4664_v30, %v4624_v24 }
 0x1dd   :  { %v3142_v20 = vpack.c.bf16 %v2395_v35, %v2394_v4  ;;  %v4788_v28 = vadd.f32 %v1858_v63, %v1570_v47  ;;  %v2036_v44 = vadd.f32 %v3476_v43, %v3380_v55  ;;  %v1860_v62 = vpop.f32.mrb[69].mxu0  ;;  %v2027_v8 = vpop.f32.mrb[101].mxu1 }
 0x1de   :  { %3299 = vst [vmem:[%s5056_s3 + $0x8] sm:$0xff] %v3147_v59   ;;  %v2028_v53 = vadd.f32 %v3474_v31, %v2027_v8  ;;  %v1861_v38 = vpop.f32.mrb[70].mxu0  ;;  %v3381_v27 = vpop.f32.mrb[102].mxu1  ;;  %v1578_v8 = vadd.f32 %v4664_v30, %v4578_v52  ;;  %v3481_v52 = vadd.f32 %v4664_v30, %v4643_v50 }
 0x1df   :  { %3143 = vst [vmem:[%s5056_s3] sm:$0xff] %v3142_v20   ;;  %v2336_v13 = vmul.f32 0.01, %v2036_v44  ;;  %v4798_v51 = vadd.f32 %v1861_v38, %v1573_v15  ;;  %v2039_v37 = vadd.f32 %v3477_v36, %v3381_v27  ;;  %v1863_v62 = vpop.f32.mrb[71].mxu0  ;;  %v2030_v21 = vpop.f32.mrb[103].mxu1  ;;  %vm2272_vm5 = vcmp.gt.f32.partialorder %v2036_v44, 0.0 }
 0x1e0   :  { %v2334_v45 = vmul.f32 0.01, %v2028_v53  ;;  %v2031_v61 = vadd.f32 %v3475_v6, %v2030_v21  ;;  %vm2270_vm6 = vcmp.gt.f32.partialorder %v2028_v53, 0.0  ;;  %v3480_v15 = vadd.f32 %v4664_v30, %v4639_v42 }
 0x1e1   :  { %vm2273_vm7 = vcmp.gt.f32.partialorder %v2039_v37, 0.0  ;;  %v2337_v0 = vmul.f32 0.01, %v2039_v37  ;;  %v2400_v43 = vsel %vm2272_vm5, %v2036_v44, %v2336_v13  ;;  %v3479_v42 = vadd.f32 %v4664_v30, %v4634_v34 }
 0x1e2   :  { %vm2271_vm8 = vcmp.gt.f32.partialorder %v2031_v61, 0.0  ;;  %v2335_v47 = vmul.f32 0.01, %v2031_v61  ;;  %v2398_v31 = vsel %vm2270_vm6, %v2028_v53, %v2334_v45  ;;  %v1586_v45 = vadd.f32 %v4664_v30, %v4600_v5 }
 0x1e3   :  { %v2401_v39 = vsel %vm2273_vm7, %v2039_v37, %v2337_v0  ;;  %v1589_v0 = vadd.f32 %v4664_v30, %v4610_v12  ;;  %v3485_v5 = vadd.f32 %v4664_v30, %v4659_v18 }
 0x1e4   :  { %v3157_v4 = vpack.c.bf16 %v2401_v39, %v2400_v43  ;;  %v2399_v59 = vsel %vm2271_vm8, %v2031_v61, %v2335_v47  ;;  %v1866_v35 = vpop.f32.mrb[72].mxu0  ;;  %v3384_v63 = vpop.f32.mrb[104].mxu1 }
 0x1e5   :  { %v3152_v55 = vpack.c.bf16 %v2399_v59, %v2398_v31  ;;  %v4810_v36 = vadd.f32 %v1866_v35, %v1578_v8  ;;  %v2052_v60 = vadd.f32 %v3480_v15, %v3384_v63  ;;  %v1868_v20 = vpop.f32.mrb[73].mxu0  ;;  %v2043_v6 = vpop.f32.mrb[105].mxu1  ;;  %v3484_v8 = vadd.f32 %v4664_v30, %v4655_v11 }
 0x1e6   :  { %3301 = vst [vmem:[%s5056_s3 + $0x18] sm:$0xff] %v3157_v4   ;;  %v2044_v24 = vadd.f32 %v3478_v25, %v2043_v6  ;;  %v1869_v44 = vpop.f32.mrb[74].mxu0  ;;  %v3385_v53 = vpop.f32.mrb[106].mxu1  ;;  %v3482_v15 = vadd.f32 %v4664_v30, %v4647_v58  ;;  %v3483_v11 = vadd.f32 %v4664_v30, %v4651_v3 }
 0x1e7   :  { %3300 = vst [vmem:[%s5056_s3 + $0x10] sm:$0xff] %v3152_v55   ;;  %v2340_v50 = vmul.f32 0.01, %v2052_v60  ;;  %v4820_v38 = vadd.f32 %v1869_v44, %v1581_v29  ;;  %v2055_v27 = vadd.f32 %v3481_v52, %v3385_v53  ;;  %v1871_v13 = vpop.f32.mrb[75].mxu0  ;;  %v2046_v37 = vpop.f32.mrb[107].mxu1  ;;  %vm2276_vm9 = vcmp.gt.f32.partialorder %v2052_v60, 0.0 }
 0x1e8   :  { %v2338_v62 = vmul.f32 0.01, %v2044_v24  ;;  %v2047_v34 = vadd.f32 %v3479_v42, %v2046_v37  ;;  %vm2274_vm10 = vcmp.gt.f32.partialorder %v2044_v24, 0.0 }
 0x1e9   :  { %vm2277_vm11 = vcmp.gt.f32.partialorder %v2055_v27, 0.0  ;;  %v2341_v21 = vmul.f32 0.01, %v2055_v27  ;;  %v2404_v47 = vsel %vm2276_vm9, %v2052_v60, %v2340_v50 }
 0x1ea   :  { %vm2275_vm12 = vcmp.gt.f32.partialorder %v2047_v34, 0.0  ;;  %v2339_v61 = vmul.f32 0.01, %v2047_v34  ;;  %v2402_v43 = vsel %vm2274_vm10, %v2044_v24, %v2338_v62 }
 0x1eb   :  { %v2405_v29 = vsel %vm2277_vm11, %v2055_v27, %v2341_v21  ;;  %v1594_v27 = vadd.f32 %v4664_v30, %v4622_v22 }
 0x1ec   :  { %v3167_v39 = vpack.c.bf16 %v2405_v29, %v2404_v47  ;;  %v2403_v25 = vsel %vm2275_vm12, %v2047_v34, %v2339_v61  ;;  %v1874_v31 = vpop.f32.mrb[76].mxu0  ;;  %v3388_v4 = vpop.f32.mrb[108].mxu1 }
 0x1ed   :  { %v3162_v59 = vpack.c.bf16 %v2403_v25, %v2402_v43  ;;  %v4832_v35 = vadd.f32 %v1874_v31, %v1586_v45  ;;  %v2068_v12 = vadd.f32 %v3484_v8, %v3388_v4  ;;  %v1876_v63 = vpop.f32.mrb[77].mxu0  ;;  %v2059_v52 = vpop.f32.mrb[109].mxu1 }
 0x1ee   :  { %3303 = vst [vmem:[%s5056_s3 + $0x28] sm:$0xff] %v3167_v39   ;;  %v2060_v58 = vadd.f32 %v3482_v15, %v2059_v52  ;;  %v1877_v55 = vpop.f32.mrb[78].mxu0  ;;  %v3389_v60 = vpop.f32.mrb[110].mxu1  ;;  %v1602_v52 = vadd.f32 %v4664_v30, %v4637_v41 }
 0x1ef   :  { %3302 = vst [vmem:[%s5056_s3 + $0x20] sm:$0xff] %v3162_v59   ;;  %v2344_v18 = vmul.f32 0.01, %v2068_v12  ;;  %v4842_v20 = vadd.f32 %v1877_v55, %v1589_v0  ;;  %v2071_v6 = vadd.f32 %v3485_v5, %v3389_v60  ;;  %v1879_v42 = vpop.f32.mrb[79].mxu0  ;;  %v2062_v24 = vpop.f32.mrb[111].mxu1  ;;  %vm2280_vm13 = vcmp.gt.f32.partialorder %v2068_v12, 0.0 }
 0x1f0   :  { %v2342_v44 = vmul.f32 0.01, %v2060_v58  ;;  %v2063_v3 = vadd.f32 %v3483_v11, %v2062_v24  ;;  %vm2278_vm14 = vcmp.gt.f32.partialorder %v2060_v58, 0.0  ;;  %v1597_v0 = vadd.f32 %v4664_v30, %v4632_v33 }
 0x1f1   :  { %vm2281_vm15 = vcmp.gt.f32.partialorder %v2071_v6, 0.0  ;;  %v2345_v53 = vmul.f32 0.01, %v2071_v6  ;;  %v2408_v13 = vsel %vm2280_vm13, %v2068_v12, %v2344_v18  ;;  %v1605_v42 = vadd.f32 %v4664_v30, %v4641_v49 }
 0x1f2   :  { %vm2279_vm0 = vcmp.gt.f32.partialorder %v2063_v3, 0.0  ;;  %v2343_v50 = vmul.f32 0.01, %v2063_v3  ;;  %v2406_v62 = vsel %vm2278_vm14, %v2060_v58, %v2342_v44 }
 0x1f3   :  { %v2409_v37 = vsel %vm2281_vm15, %v2071_v6, %v2345_v53 }
 0x1f4   :  { %v3177_v34 = vpack.c.bf16 %v2409_v37, %v2408_v13  ;;  %v2407_v21 = vsel %vm2279_vm0, %v2063_v3, %v2343_v50  ;;  %v1882_v45 = vpop.f32.mrb[80].mxu0  ;;  %v3392_v61 = vpop.f32.mrb[112].mxu1 }
 0x1f5   :  { %v3172_v8 = vpack.c.bf16 %v2407_v21, %v2406_v62  ;;  %v4848_v47 = vadd.f32 %v1882_v45, %v1594_v27  ;;  %v2084_v29 = vadd.f32 %v3392_v61, %v4684_v26  ;;  %v1884_v15 = vpop.f32.mrb[81].mxu0  ;;  %v2075_v43 = vpop.f32.mrb[113].mxu1  ;;  %v1610_v61 = vadd.f32 %v4664_v30, %v4645_v57 }
 0x1f6   :  { %3305 = vst [vmem:[%s5056_s3 + $0x38] sm:$0xff] %v3177_v34   ;;  %v2076_v22 = vadd.f32 %v2075_v43, %v4672_v48  ;;  %v1885_v39 = vpop.f32.mrb[82].mxu0  ;;  %v3393_v25 = vpop.f32.mrb[114].mxu1 }
 0x1f7   :  { %3304 = vst [vmem:[%s5056_s3 + $0x30] sm:$0xff] %v3172_v8   ;;  %v2348_v33 = vmul.f32 0.01, %v2084_v29  ;;  %v4858_v31 = vadd.f32 %v1885_v39, %v1597_v0  ;;  %v2087_v4 = vadd.f32 %v3393_v25, %v4688_v46  ;;  %v1887_v26 = vpop.f32.mrb[83].mxu0  ;;  %v2078_v5 = vpop.f32.mrb[115].mxu1  ;;  %vm2284_vm1 = vcmp.gt.f32.partialorder %v2084_v29, 0.0 }
 0x1f8   :  { %v2346_v59 = vmul.f32 0.01, %v2076_v22  ;;  %v2079_v12 = vadd.f32 %v2078_v5, %v4676_v7  ;;  %vm2282_vm2 = vcmp.gt.f32.partialorder %v2076_v22, 0.0  ;;  %v1613_v39 = vadd.f32 %v4664_v30, %v4649_v2 }
 0x1f9   :  { %vm2285_vm3 = vcmp.gt.f32.partialorder %v2087_v4, 0.0  ;;  %v2349_v48 = vmul.f32 0.01, %v2087_v4  ;;  %v2412_v11 = vsel %vm2284_vm1, %v2084_v29, %v2348_v33 }
 0x1fa   :  { %vm2283_vm4 = vcmp.gt.f32.partialorder %v2079_v12, 0.0  ;;  %v2347_v63 = vmul.f32 0.01, %v2079_v12  ;;  %v2410_v55 = vsel %vm2282_vm2, %v2076_v22, %v2346_v59 }
 0x1fb   :  { %v2413_v58 = vsel %vm2285_vm3, %v2087_v4, %v2349_v48 }
 0x1fc   :  { %v3187_v60 = vpack.c.bf16 %v2413_v58, %v2412_v11  ;;  %v2411_v18 = vsel %vm2283_vm4, %v2079_v12, %v2347_v63  ;;  %v1890_v46 = vpop.f32.mrb[84].mxu0  ;;  %v3396_v6 = vpop.f32.mrb[116].mxu1 }
 0x1fd   :  { %v3182_v24 = vpack.c.bf16 %v2411_v18, %v2410_v55  ;;  %v4866_v7 = vadd.f32 %v1890_v46, %v1602_v52  ;;  %v2100_v44 = vadd.f32 %v3396_v6, %v4708_v16  ;;  %v1892_v3 = vpop.f32.mrb[85].mxu0  ;;  %v2091_v53 = vpop.f32.mrb[117].mxu1  ;;  %v1618_v55 = vadd.f32 %v4664_v30, %v4653_v10 }
 0x1fe   :  { %3307 = vst [vmem:[%s5056_s3 + $0x48] sm:$0xff] %v3187_v60   ;;  %v2092_v41 = vadd.f32 %v2091_v53, %v4696_v19  ;;  %v1893_v50 = vpop.f32.mrb[86].mxu0  ;;  %v3397_v27 = vpop.f32.mrb[118].mxu1 }
 0x1ff   :  { %3306 = vst [vmem:[%s5056_s3 + $0x40] sm:$0xff] %v3182_v24   ;;  %v2352_v49 = vmul.f32 0.01, %v2100_v44  ;;  %v4876_v13 = vadd.f32 %v1893_v50, %v1605_v42  ;;  %v2103_v37 = vadd.f32 %v3397_v27, %v4712_v54  ;;  %v1895_v16 = vpop.f32.mrb[87].mxu0  ;;  %v2094_v62 = vpop.f32.mrb[119].mxu1  ;;  %vm2288_vm5 = vcmp.gt.f32.partialorder %v2100_v44, 0.0 }
 0x200   :  { %v2350_v34 = vmul.f32 0.01, %v2092_v41  ;;  %v2095_v21 = vadd.f32 %v2094_v62, %v4700_v23  ;;  %vm2286_vm6 = vcmp.gt.f32.partialorder %v2092_v41, 0.0  ;;  %v5077_v16 = vld [vmem:[#allocation19_spill] sm:$0xff] }
 0x201   :  { %vm2289_vm7 = vcmp.gt.f32.partialorder %v2103_v37, 0.0  ;;  %v2353_v19 = vmul.f32 0.01, %v2103_v37  ;;  %v2416_v0 = vsel %vm2288_vm5, %v2100_v44, %v2352_v49  ;;  %v1621_v44 = vadd.f32 %v4664_v30, %v4657_v17 }
 0x202   :  { %vm2287_vm8 = vcmp.gt.f32.partialorder %v2095_v21, 0.0  ;;  %v2351_v45 = vmul.f32 0.01, %v2095_v21  ;;  %v2414_v29 = vsel %vm2286_vm6, %v2092_v41, %v2350_v34 }
 0x203   :  { %v2417_v8 = vsel %vm2289_vm7, %v2103_v37, %v2353_v19  ;;  %v5078_v19 = vld [vmem:[#allocation16_spill] sm:$0xff] }
 0x204   :  { %v3197_v15 = vpack.c.bf16 %v2417_v8, %v2416_v0  ;;  %v2415_v43 = vsel %vm2287_vm8, %v2095_v21, %v2351_v45  ;;  %v1898_v54 = vpop.f32.mrb[88].mxu0  ;;  %v3400_v22 = vpop.f32.mrb[120].mxu1  ;;  %v5079_v0 = vld [vmem:[#allocation2_spill] sm:$0xff] }
 0x205   :  { %v3192_v25 = vpack.c.bf16 %v2415_v43, %v2414_v29  ;;  %v4884_v23 = vadd.f32 %v1898_v54, %v1610_v61  ;;  %v2116_v33 = vadd.f32 %v3400_v22, %v4732_v9  ;;  %v1900_v4 = vpop.f32.mrb[89].mxu0  ;;  %v2107_v26 = vpop.f32.mrb[121].mxu1  ;;  %v1626_v8 = vadd.f32 %v4664_v30, %v5079_v0 }
 0x206   :  { %3309 = vst [vmem:[%s5056_s3 + $0x58] sm:$0xff] %v3197_v15   ;;  %v2108_v57 = vadd.f32 %v2107_v26, %v4720_v14  ;;  %v1901_v5 = vpop.f32.mrb[90].mxu0  ;;  %v3401_v59 = vpop.f32.mrb[122].mxu1 }
 0x207   :  { %3308 = vst [vmem:[%s5056_s3 + $0x50] sm:$0xff] %v3192_v25   ;;  %v2356_v2 = vmul.f32 0.01, %v2116_v33  ;;  %v4894_v12 = vadd.f32 %v1901_v5, %v1613_v39  ;;  %v2119_v48 = vadd.f32 %v3401_v59, %v4736_v32  ;;  %v1903_v9 = vpop.f32.mrb[91].mxu0  ;;  %v2110_v63 = vpop.f32.mrb[123].mxu1  ;;  %vm2292_vm9 = vcmp.gt.f32.partialorder %v2116_v33, 0.0 }
 0x208   :  { %v2354_v52 = vmul.f32 0.01, %v2108_v57  ;;  %v2111_v11 = vadd.f32 %v2110_v63, %v4724_v40  ;;  %vm2290_vm10 = vcmp.gt.f32.partialorder %v2108_v57, 0.0 }
 0x209   :  { %vm2293_vm11 = vcmp.gt.f32.partialorder %v2119_v48, 0.0  ;;  %v2357_v14 = vmul.f32 0.01, %v2119_v48  ;;  %v2420_v60 = vsel %vm2292_vm9, %v2116_v33, %v2356_v2  ;;  %v5080_v33 = vld [vmem:[#allocation3_spill] sm:$0xff] }
 0x20a   :  { %vm2291_vm12 = vcmp.gt.f32.partialorder %v2111_v11, 0.0  ;;  %v2355_v58 = vmul.f32 0.01, %v2111_v11  ;;  %v2418_v46 = vsel %vm2290_vm10, %v2108_v57, %v2354_v52  ;;  %v1629_v4 = vadd.f32 %v4664_v30, %v5080_v33 }
 0x20b   :  { %v2421_v18 = vsel %vm2293_vm11, %v2119_v48, %v2357_v14  ;;  %v5081_v48 = vld [vmem:[#allocation20_spill] sm:$0xff] }
 0x20c   :  { %v3207_v6 = vpack.c.bf16 %v2421_v18, %v2420_v60  ;;  %v2419_v42 = vsel %vm2291_vm12, %v2111_v11, %v2355_v58  ;;  %v1906_v32 = vpop.f32.mrb[92].mxu0  ;;  %v3404_v24 = vpop.f32.mrb[124].mxu1  ;;  %v5082_v18 = vld [vmem:[#allocation21_spill] sm:$0xff] }
 0x20d   :  { %v3202_v3 = vpack.c.bf16 %v2419_v42, %v2418_v46  ;;  %v4902_v40 = vadd.f32 %v1906_v32, %v1618_v55  ;;  %v2132_v53 = vadd.f32 %v3404_v24, %v4756_v56  ;;  %v1908_v41 = vpop.f32.mrb[93].mxu0  ;;  %v2123_v50 = vpop.f32.mrb[125].mxu1  ;;  %v5083_v32 = vld [vmem:[#allocation4_spill] sm:$0xff] }
 0x20e   :  { %3311 = vst [vmem:[%s5056_s3 + $0x68] sm:$0xff] %v3207_v6   ;;  %v2124_v10 = vadd.f32 %v2123_v50, %v4744_v1  ;;  %v1909_v27 = vpop.f32.mrb[94].mxu0  ;;  %v3405_v49 = vpop.f32.mrb[126].mxu1  ;;  %v1634_v24 = vadd.f32 %v4664_v30, %v5083_v32 }
 0x20f   :  { %3310 = vst [vmem:[%s5056_s3 + $0x60] sm:$0xff] %v3202_v3   ;;  %v2360_v17 = vmul.f32 0.01, %v2132_v53  ;;  %v4912_v37 = vadd.f32 %v1909_v27, %v1621_v44  ;;  %v2135_v62 = vadd.f32 %v3405_v49, %v5077_v16  ;;  %v1911_v56 = vpop.f32.mrb[95].mxu0  ;;  %v2126_v34 = vpop.f32.mrb[127].mxu1  ;;  %vm2296_vm13 = vcmp.gt.f32.partialorder %v2132_v53, 0.0 }
 0x210   :  { %v2358_v21 = vmul.f32 0.01, %v2124_v10  ;;  %v2127_v45 = vadd.f32 %v2126_v34, %v5078_v19  ;;  %vm2294_vm14 = vcmp.gt.f32.partialorder %v2124_v10, 0.0  ;;  %v5084_v27 = vld [vmem:[#allocation5_spill] sm:$0xff] }
 0x211   :  { %vm2297_vm15 = vcmp.gt.f32.partialorder %v2135_v62, 0.0  ;;  %v2361_v1 = vmul.f32 0.01, %v2135_v62  ;;  %v2424_v29 = vsel %vm2296_vm13, %v2132_v53, %v2360_v17  ;;  %v1637_v49 = vadd.f32 %v4664_v30, %v5084_v27  ;;  %v5088_v27 = vld [vmem:[#allocation9_spill] sm:$0xff] }
 0x212   :  { %vm2295_vm0 = vcmp.gt.f32.partialorder %v2127_v45, 0.0  ;;  %v2359_v61 = vmul.f32 0.01, %v2127_v45  ;;  %v2422_v43 = vsel %vm2294_vm14, %v2124_v10, %v2358_v21 }
 0x213   :  { %v2425_v15 = vsel %vm2297_vm15, %v2135_v62, %v2361_v1 }
 0x214   :  { %v3217_v54 = vpack.c.bf16 %v2425_v15, %v2424_v29  ;;  %v2423_v22 = vsel %vm2295_vm0, %v2127_v45, %v2359_v61  ;;  %v1914_v39 = vpop.f32.mrb[96].mxu0  ;;  %v3408_v25 = vpop.f32.mrb[128].mxu1 }
 0x215   :  { %v3212_v26 = vpack.c.bf16 %v2423_v22, %v2422_v43  ;;  %v4920_v57 = vadd.f32 %v1914_v39, %v1626_v8  ;;  %v2148_v5 = vadd.f32 %v3408_v25, %v4788_v28  ;;  %v1916_v59 = vpop.f32.mrb[97].mxu0  ;;  %v2139_v2 = vpop.f32.mrb[129].mxu1 }
 0x216   :  { %3313 = vst [vmem:[%s5056_s3 + $0x78] sm:$0xff] %v3217_v54   ;;  %v2140_v9 = vadd.f32 %v2139_v2, %v5081_v48  ;;  %v1917_v63 = vpop.f32.mrb[98].mxu0  ;;  %v3409_v52 = vpop.f32.mrb[130].mxu1  ;;  %v5085_v54 = vld [vmem:[#allocation6_spill] sm:$0xff]  ;;  %v5086_v59 = vld [vmem:[#allocation7_spill] sm:$0xff] }
 0x217   :  { %3312 = vst [vmem:[%s5056_s3 + $0x70] sm:$0xff] %v3212_v26   ;;  %v2364_v11 = vmul.f32 0.01, %v2148_v5  ;;  %v4930_v14 = vadd.f32 %v1917_v63, %v1629_v4  ;;  %v2151_v58 = vadd.f32 %v3409_v52, %v4798_v51  ;;  %v1919_v28 = vpop.f32.mrb[99].mxu0  ;;  %v2142_v55 = vpop.f32.mrb[131].mxu1  ;;  %vm2300_vm1 = vcmp.gt.f32.partialorder %v2148_v5, 0.0 }
 0x218   :  { %v2362_v60 = vmul.f32 0.01, %v2140_v9  ;;  %v2143_v46 = vadd.f32 %v2142_v55, %v5082_v18  ;;  %vm2298_vm2 = vcmp.gt.f32.partialorder %v2140_v9, 0.0  ;;  %v1642_v22 = vadd.f32 %v4664_v30, %v5085_v54 }
 0x219   :  { %vm2301_vm3 = vcmp.gt.f32.partialorder %v2151_v58, 0.0  ;;  %v2365_v6 = vmul.f32 0.01, %v2151_v58  ;;  %v2428_v44 = vsel %vm2300_vm1, %v2148_v5, %v2364_v11  ;;  %v1645_v2 = vadd.f32 %v4664_v30, %v5086_v59 }
 0x21a   :  { %vm2299_vm4 = vcmp.gt.f32.partialorder %v2143_v46, 0.0  ;;  %v2363_v42 = vmul.f32 0.01, %v2143_v46  ;;  %v2426_v53 = vsel %vm2298_vm2, %v2140_v9, %v2362_v60 }
 0x21b   :  { %v2429_v3 = vsel %vm2301_vm3, %v2151_v58, %v2365_v6 }
 0x21c   :  { %v3227_v41 = vpack.c.bf16 %v2429_v3, %v2428_v44  ;;  %v2427_v50 = vsel %vm2299_vm4, %v2143_v46, %v2363_v42  ;;  %v1922_v51 = vpop.f32.mrb[100].mxu0  ;;  %v3412_v10 = vpop.f32.mrb[132].mxu1 }
 0x21d   :  { %v3222_v17 = vpack.c.bf16 %v2427_v50, %v2426_v53  ;;  %v4938_v16 = vadd.f32 %v1922_v51, %v1634_v24  ;;  %v2164_v62 = vadd.f32 %v3412_v10, %v4832_v35  ;;  %v1924_v56 = vpop.f32.mrb[101].mxu0  ;;  %v2155_v34 = vpop.f32.mrb[133].mxu1  ;;  %v5087_v24 = vld [vmem:[#allocation8_spill] sm:$0xff] }
 0x21e   :  { %3315 = vst [vmem:[%s5056_s3 + $0x88] sm:$0xff] %v3227_v41   ;;  %v2156_v21 = vadd.f32 %v2155_v34, %v4810_v36  ;;  %v1925_v19 = vpop.f32.mrb[102].mxu0  ;;  %v3413_v45 = vpop.f32.mrb[134].mxu1  ;;  %v1650_v44 = vadd.f32 %v4664_v30, %v5087_v24 }
 0x21f   :  { %3314 = vst [vmem:[%s5056_s3 + $0x80] sm:$0xff] %v3222_v17   ;;  %v2368_v1 = vmul.f32 0.01, %v2164_v62  ;;  %v4948_v61 = vadd.f32 %v1925_v19, %v1637_v49  ;;  %v2167_v0 = vadd.f32 %v3413_v45, %v4842_v20  ;;  %v1927_v35 = vpop.f32.mrb[103].mxu0  ;;  %v2158_v8 = vpop.f32.mrb[135].mxu1  ;;  %vm2304_vm5 = vcmp.gt.f32.partialorder %v2164_v62, 0.0 }
 0x220   :  { %v2366_v29 = vmul.f32 0.01, %v2156_v21  ;;  %v2159_v15 = vadd.f32 %v2158_v8, %v4820_v38  ;;  %vm2302_vm6 = vcmp.gt.f32.partialorder %v2156_v21, 0.0  ;;  %v1653_v49 = vadd.f32 %v4664_v30, %v5088_v27 }
 0x221   :  { %vm2305_vm7 = vcmp.gt.f32.partialorder %v2167_v0, 0.0  ;;  %v2369_v36 = vmul.f32 0.01, %v2167_v0  ;;  %v2432_v39 = vsel %vm2304_vm5, %v2164_v62, %v2368_v1 }
 0x222   :  { %vm2303_vm8 = vcmp.gt.f32.partialorder %v2159_v15, 0.0  ;;  %v2367_v43 = vmul.f32 0.01, %v2159_v15  ;;  %v2430_v33 = vsel %vm2302_vm6, %v2156_v21, %v2366_v29 }
 0x223   :  { %v2433_v25 = vsel %vm2305_vm7, %v2167_v0, %v2369_v36 }
 0x224   :  { %v3237_v4 = vpack.c.bf16 %v2433_v25, %v2432_v39  ;;  %v2431_v26 = vsel %vm2303_vm8, %v2159_v15, %v2367_v43  ;;  %v1930_v20 = vpop.f32.mrb[104].mxu0  ;;  %v3416_v5 = vpop.f32.mrb[136].mxu1  ;;  %v5089_v43 = vld [vmem:[#allocation10_spill] sm:$0xff] }
 0x225   :  { %v3232_v48 = vpack.c.bf16 %v2431_v26, %v2430_v33  ;;  %v4956_v38 = vadd.f32 %v1930_v20, %v1642_v22  ;;  %v2180_v9 = vadd.f32 %v3416_v5, %v4866_v7  ;;  %v1932_v63 = vpop.f32.mrb[105].mxu0  ;;  %v2171_v52 = vpop.f32.mrb[137].mxu1  ;;  %v1658_v54 = vadd.f32 %v4664_v30, %v5089_v43  ;;  %v5090_v20 = vld [vmem:[#allocation11_spill] sm:$0xff] }
 0x226   :  { %3317 = vst [vmem:[%s5056_s3 + $0x98] sm:$0xff] %v3237_v4   ;;  %v2172_v11 = vadd.f32 %v2171_v52, %v4848_v47  ;;  %v1933_v58 = vpop.f32.mrb[106].mxu0  ;;  %v3417_v28 = vpop.f32.mrb[138].mxu1  ;;  %v1661_v5 = vadd.f32 %v4664_v30, %v5090_v20 }
 0x227   :  { %3316 = vst [vmem:[%s5056_s3 + $0x90] sm:$0xff] %v3232_v48   ;;  %v2372_v55 = vmul.f32 0.01, %v2180_v9  ;;  %v4966_v60 = vadd.f32 %v1933_v58, %v1645_v2  ;;  %v2183_v18 = vadd.f32 %v3417_v28, %v4876_v13  ;;  %v1935_v7 = vpop.f32.mrb[107].mxu0  ;;  %v2174_v46 = vpop.f32.mrb[139].mxu1  ;;  %vm2308_vm9 = vcmp.gt.f32.partialorder %v2180_v9, 0.0 }
 0x228   :  { %v2370_v6 = vmul.f32 0.01, %v2172_v11  ;;  %v2175_v42 = vadd.f32 %v2174_v46, %v4858_v31  ;;  %vm2306_vm10 = vcmp.gt.f32.partialorder %v2172_v11, 0.0 }
 0x229   :  { %vm2309_vm11 = vcmp.gt.f32.partialorder %v2183_v18, 0.0  ;;  %v2373_v47 = vmul.f32 0.01, %v2183_v18  ;;  %v2436_v3 = vsel %vm2308_vm9, %v2180_v9, %v2372_v55 }
 0x22a   :  { %vm2307_vm12 = vcmp.gt.f32.partialorder %v2175_v42, 0.0  ;;  %v2371_v32 = vmul.f32 0.01, %v2175_v42  ;;  %v2434_v41 = vsel %vm2306_vm10, %v2172_v11, %v2370_v6  ;;  %v5009_v6 = vld [vmem:[%s5055_s2] ss:$0 sm:$0xff] }
 0x22b   :  { %v2437_v53 = vsel %vm2309_vm11, %v2183_v18, %v2373_v47 }
 0x22c   :  { %v3247_v50 = vpack.c.bf16 %v2437_v53, %v2436_v3  ;;  %v2435_v51 = vsel %vm2307_vm12, %v2175_v42, %v2371_v32  ;;  %v1938_v13 = vpop.f32.mrb[108].mxu0  ;;  %v3420_v10 = vpop.f32.mrb[140].mxu1  ;;  %v5091_v42 = vld [vmem:[#allocation12_spill] sm:$0xff] }
 0x22d   :  { %v3242_v17 = vpack.c.bf16 %v2435_v51, %v2434_v41  ;;  %v4974_v31 = vadd.f32 %v1938_v13, %v1650_v44  ;;  %v2196_v62 = vadd.f32 %v3420_v10, %v4902_v40  ;;  %v1940_v56 = vpop.f32.mrb[109].mxu0  ;;  %v2187_v34 = vpop.f32.mrb[141].mxu1  ;;  %v1666_v47 = vadd.f32 %v5009_v6, %v5091_v42  ;;  %v5092_v41 = vld [vmem:[#allocation13_spill] sm:$0xff] }
 0x22e   :  { %3319 = vst [vmem:[%s5056_s3 + $0xa8] sm:$0xff] %v3247_v50   ;;  %v2188_v21 = vadd.f32 %v2187_v34, %v4884_v23  ;;  %v1941_v19 = vpop.f32.mrb[110].mxu0  ;;  %v3421_v45 = vpop.f32.mrb[142].mxu1  ;;  %v1669_v50 = vadd.f32 %v5009_v6, %v5092_v41 }
 0x22f   :  { %3318 = vst [vmem:[%s5056_s3 + $0xa0] sm:$0xff] %v3242_v17   ;;  %v2376_v1 = vmul.f32 0.01, %v2196_v62  ;;  %v4984_v0 = vadd.f32 %v1941_v19, %v1653_v49  ;;  %v2199_v35 = vadd.f32 %v3421_v45, %v4912_v37  ;;  %v1943_v40 = vpop.f32.mrb[111].mxu0  ;;  %v2190_v8 = vpop.f32.mrb[143].mxu1  ;;  %vm2312_vm13 = vcmp.gt.f32.partialorder %v2196_v62, 0.0 }
 0x230   :  { %v2374_v29 = vmul.f32 0.01, %v2188_v21  ;;  %v2191_v15 = vadd.f32 %v2190_v8, %v4894_v12  ;;  %vm2310_vm14 = vcmp.gt.f32.partialorder %v2188_v21, 0.0  ;;  %v5093_v8 = vld [vmem:[#allocation14_spill] sm:$0xff] }
 0x231   :  { %vm2313_vm15 = vcmp.gt.f32.partialorder %v2199_v35, 0.0  ;;  %v2377_v23 = vmul.f32 0.01, %v2199_v35  ;;  %v2440_v22 = vsel %vm2312_vm13, %v2196_v62, %v2376_v1 }
 0x232   :  { %vm2311_vm0 = vcmp.gt.f32.partialorder %v2191_v15, 0.0  ;;  %v2375_v36 = vmul.f32 0.01, %v2191_v15  ;;  %v2438_v25 = vsel %vm2310_vm14, %v2188_v21, %v2374_v29  ;;  %v1674_v29 = vadd.f32 %v5009_v6, %v5093_v8 }
 0x233   :  { %v2441_v39 = vsel %vm2313_vm15, %v2199_v35, %v2377_v23 }
 0x234   :  { %v3257_v33 = vpack.c.bf16 %v2441_v39, %v2440_v22  ;;  %v2439_v4 = vsel %vm2311_vm0, %v2191_v15, %v2375_v36  ;;  %v1946_v37 = vpop.f32.mrb[112].mxu0  ;;  %v3424_v26 = vpop.f32.mrb[144].mxu1  ;;  %v5094_v39 = vld [vmem:[#allocation15_spill] sm:$0xff] }
 0x235   :  { %v3252_v59 = vpack.c.bf16 %v2439_v4, %v2438_v25  ;;  %v4992_v12 = vadd.f32 %v1946_v37, %v1658_v54  ;;  %v2212_v2 = vadd.f32 %v3424_v26, %v4938_v16  ;;  %v1948_v48 = vpop.f32.mrb[113].mxu0  ;;  %v2203_v9 = vpop.f32.mrb[145].mxu1  ;;  %v1677_v25 = vadd.f32 %v5009_v6, %v5094_v39 }
 0x236   :  { %3321 = vst [vmem:[%s5056_s3 + $0xb8] sm:$0xff] %v3257_v33   ;;  %v2204_v63 = vadd.f32 %v2203_v9, %v4920_v57  ;;  %v1949_v52 = vpop.f32.mrb[114].mxu0  ;;  %v3425_v11 = vpop.f32.mrb[146].mxu1 }
 0x237   :  { %3320 = vst [vmem:[%s5056_s3 + $0xb0] sm:$0xff] %v3252_v59   ;;  %v2380_v30 = vmul.f32 0.01, %v2212_v2  ;;  %v5002_v58 = vadd.f32 %v1949_v52, %v1661_v5  ;;  %v2215_v28 = vadd.f32 %v3425_v11, %v4948_v61  ;;  %v1951_v16 = vpop.f32.mrb[115].mxu0  ;;  %v2206_v55 = vpop.f32.mrb[147].mxu1  ;;  %vm2316_vm1 = vcmp.gt.f32.partialorder %v2212_v2, 0.0 }
 0x238   :  { %v2378_v18 = vmul.f32 0.01, %v2204_v63  ;;  %v2207_v7 = vadd.f32 %v2206_v55, %v4930_v14  ;;  %vm2314_vm2 = vcmp.gt.f32.partialorder %v2204_v63, 0.0  ;;  %v5095_v16 = vld [vmem:[#allocation17_spill] sm:$0xff] }
 0x239   :  { %vm2317_vm3 = vcmp.gt.f32.partialorder %v2215_v28, 0.0  ;;  %v2381_v57 = vmul.f32 0.01, %v2215_v28  ;;  %v2444_v61 = vsel %vm2316_vm1, %v2212_v2, %v2380_v30  ;;  %v1682_v55 = vadd.f32 %v5009_v6, %v5095_v16 }
 0x23a   :  { %vm2315_vm4 = vcmp.gt.f32.partialorder %v2207_v7, 0.0  ;;  %v2379_v46 = vmul.f32 0.01, %v2207_v7  ;;  %v2442_v24 = vsel %vm2314_vm2, %v2204_v63, %v2378_v18 }
 0x23b   :  { %v2445_v32 = vsel %vm2317_vm3, %v2215_v28, %v2381_v57 }
 0x23c   :  { %v3267_v44 = vpack.c.bf16 %v2445_v32, %v2444_v61  ;;  %v2443_v3 = vsel %vm2315_vm4, %v2207_v7, %v2379_v46  ;;  %v1954_v53 = vpop.f32.mrb[116].mxu0  ;;  %v3428_v14 = vpop.f32.mrb[148].mxu1  ;;  %v5096_v32 = vld [vmem:[#allocation18_spill] sm:$0xff] }
 0x23d   :  { %v3262_v51 = vpack.c.bf16 %v2443_v3, %v2442_v24  ;;  %v1955_v13 = vadd.f32 %v1954_v53, %v1666_v47  ;;  %v2228_v10 = vadd.f32 %v3428_v14, %v4974_v31  ;;  %v1956_v27 = vpop.f32.mrb[117].mxu0  ;;  %v2219_v49 = vpop.f32.mrb[149].mxu1  ;;  %v1685_v24 = vadd.f32 %v5009_v6, %v5096_v32 }
 0x23e   :  { %3323 = vst [vmem:[%s5056_s3 + $0xc8] sm:$0xff] %v3267_v44   ;;  %v2220_v17 = vadd.f32 %v2219_v49, %v4956_v38  ;;  %v1957_v62 = vpop.f32.mrb[118].mxu0  ;;  %v3429_v56 = vpop.f32.mrb[150].mxu1 }
 0x23f   :  { %3322 = vst [vmem:[%s5056_s3 + $0xc0] sm:$0xff] %v3262_v51   ;;  %v2384_v34 = vmul.f32 0.01, %v2228_v10  ;;  %v1958_v21 = vadd.f32 %v1957_v62, %v1669_v50  ;;  %v2231_v19 = vadd.f32 %v3429_v56, %v4984_v0  ;;  %v1959_v45 = vpop.f32.mrb[119].mxu0  ;;  %v2222_v31 = vpop.f32.mrb[151].mxu1  ;;  %vm2320_vm5 = vcmp.gt.f32.partialorder %v2228_v10, 0.0 }
 0x240   :  { %v2382_v1 = vmul.f32 0.01, %v2220_v17  ;;  %v2223_v35 = vadd.f32 %v2222_v31, %v4966_v60  ;;  %vm2318_vm6 = vcmp.gt.f32.partialorder %v2220_v17, 0.0 }
 0x241   :  { %vm2321_vm7 = vcmp.gt.f32.partialorder %v2231_v19, 0.0  ;;  %v2385_v40 = vmul.f32 0.01, %v2231_v19  ;;  %v2448_v15 = vsel %vm2320_vm5, %v2228_v10, %v2384_v34 }
 0x242   :  { %vm2319_vm8 = vcmp.gt.f32.partialorder %v2223_v35, 0.0  ;;  %v2383_v38 = vmul.f32 0.01, %v2223_v35  ;;  %v2446_v36 = vsel %vm2318_vm6, %v2220_v17, %v2382_v1 }
 0x243   :  { %v2449_v23 = vsel %vm2321_vm7, %v2231_v19, %v2385_v40 }
 0x244   :  { %v3277_v43 = vpack.c.bf16 %v2449_v23, %v2448_v15  ;;  %v2447_v54 = vsel %vm2319_vm8, %v2223_v35, %v2383_v38  ;;  %v1962_v0 = vpop.f32.mrb[120].mxu0  ;;  %v3432_v22 = vpop.f32.mrb[152].mxu1 }
 0x245   :  { %v3272_v33 = vpack.c.bf16 %v2447_v54, %v2446_v36  ;;  %v1963_v60 = vadd.f32 %v1962_v0, %v1674_v29  ;;  %v2244_v4 = vadd.f32 %v3432_v22, %v1955_v13  ;;  %v1964_v37 = vpop.f32.mrb[121].mxu0  ;;  %v2235_v26 = vpop.f32.mrb[153].mxu1 }
 0x246   :  { %3325 = vst [vmem:[%s5056_s3 + $0xd8] sm:$0xff] %v3277_v43   ;;  %v2236_v20 = vadd.f32 %v2235_v26, %v4992_v12  ;;  %v1965_v5 = vpop.f32.mrb[122].mxu0  ;;  %v3433_v59 = vpop.f32.mrb[154].mxu1 }
 0x247   :  { %3324 = vst [vmem:[%s5056_s3 + $0xd0] sm:$0xff] %v3272_v33   ;;  %v2388_v2 = vmul.f32 0.01, %v2244_v4  ;;  %v1966_v48 = vadd.f32 %v1965_v5, %v1677_v25  ;;  %v2247_v9 = vadd.f32 %v3433_v59, %v1958_v21  ;;  %v1967_v63 = vpop.f32.mrb[123].mxu0  ;;  %v2238_v52 = vpop.f32.mrb[155].mxu1  ;;  %vm2324_vm9 = vcmp.gt.f32.partialorder %v2244_v4, 0.0 }
 0x248   :  { %v2386_v11 = vmul.f32 0.01, %v2236_v20  ;;  %v2239_v30 = vadd.f32 %v2238_v52, %v5002_v58  ;;  %vm2322_vm10 = vcmp.gt.f32.partialorder %v2236_v20, 0.0 }
 0x249   :  { %vm2325_vm11 = vcmp.gt.f32.partialorder %v2247_v9, 0.0  ;;  %v2389_v28 = vmul.f32 0.01, %v2247_v9  ;;  %v2452_v18 = vsel %vm2324_vm9, %v2244_v4, %v2388_v2 }
 0x24a   :  { %vm2323_vm12 = vcmp.gt.f32.partialorder %v2239_v30, 0.0  ;;  %v2387_v12 = vmul.f32 0.01, %v2239_v30  ;;  %v2450_v57 = vsel %vm2322_vm10, %v2236_v20, %v2386_v11 }
 0x24b   :  { %v2453_v7 = vsel %vm2325_vm11, %v2247_v9, %v2389_v28 }
 0x24c   :  { %v3287_v46 = vpack.c.bf16 %v2453_v7, %v2452_v18  ;;  %v2451_v42 = vsel %vm2323_vm12, %v2239_v30, %v2387_v12  ;;  %v1970_v47 = vpop.f32.mrb[124].mxu0  ;;  %v3436_v61 = vpop.f32.mrb[156].mxu1 }
 0x24d   :  { %v3282_v44 = vpack.c.bf16 %v2451_v42, %v2450_v57  ;;  %v1971_v58 = vadd.f32 %v1970_v47, %v1682_v55  ;;  %v1972_v3 = vpop.f32.mrb[125].mxu0  ;;  %v2251_v53 = vpop.f32.mrb[157].mxu1 }
 0x24e   :  { %3327 = vst [vmem:[%s5056_s3 + $0xe8] sm:$0xff] %v3287_v46   ;;  %v2252_v14 = vadd.f32 %v2251_v53, %v1963_v60  ;;  %v1973_v41 = vpop.f32.mrb[126].mxu0  ;;  %v3437_v50 = vpop.f32.mrb[158].mxu1 }
 0x24f   :  { %3326 = vst [vmem:[%s5056_s3 + $0xe0] sm:$0xff] %v3282_v44   ;;  %v2260_v51 = vadd.f32 %v3436_v61, %v1971_v58  ;;  %v1974_v13 = vadd.f32 %v1973_v41, %v1685_v24  ;;  %v1975_v10 = vpop.f32.mrb[127].mxu0  ;;  %v2254_v27 = vpop.f32.mrb[159].mxu1 }
 0x250   :  { %v2390_v6 = vmul.f32 0.01, %v2252_v14  ;;  %v2255_v49 = vadd.f32 %v2254_v27, %v1966_v48  ;;  %vm2326_vm13 = vcmp.gt.f32.partialorder %v2252_v14, 0.0 }
 0x251   :  { %v2392_v17 = vmul.f32 0.01, %v2260_v51  ;;  %v2263_v62 = vadd.f32 %v3437_v50, %v1974_v13  ;;  %vm2328_vm14 = vcmp.gt.f32.partialorder %v2260_v51, 0.0 }
 0x252   :  { %vm2327_vm15 = vcmp.gt.f32.partialorder %v2255_v49, 0.0  ;;  %v2391_v56 = vmul.f32 0.01, %v2255_v49  ;;  %v2454_v21 = vsel %vm2326_vm13, %v2252_v14, %v2390_v6 }
 0x253   :  { %vm2329_vm0 = vcmp.gt.f32.partialorder %v2263_v62, 0.0  ;;  %v2393_v34 = vmul.f32 0.01, %v2263_v62  ;;  %v2456_v45 = vsel %vm2328_vm14, %v2260_v51, %v2392_v17 }
 0x254   :  { %v2455_v19 = vsel %vm2327_vm15, %v2255_v49, %v2391_v56 }
 0x255   :  { %v2457_v31 = vsel %vm2329_vm0, %v2263_v62, %v2393_v34  ;;  %v3292_v1 = vpack.c.bf16 %v2455_v19, %v2454_v21 }
 0x256   :  { %v3297_v35 = vpack.c.bf16 %v2457_v31, %v2456_v45 }
 0x257   :  { %3328 = vst [vmem:[%s5056_s3 + $0xf0] sm:$0xff] %v3292_v1  }
 0x258   :  { %3329 = vst [vmem:[%s5056_s3 + $0xf8] sm:$0xff] %v3297_v35  }

// kernel: descriptor_forward.6
= control target key start
LH: loop header
LB: loop body
LE: loop exit
PB: predicated region body
PF: predicated region fallthrough
CT: control target
= control target key end

     0   :  { %s9145_s1 = inlined_call_operand.vmem [shape: bf16[1152,256], index: 1, kind: input, shape index: {}]   ;;  %s9146_s0 = inlined_call_operand.vmem [shape: bf16[512,1152], index: 0, kind: input, shape index: {}]   ;;  %s9147_s2 = inlined_call_operand.vmem [shape: f32[1,256], index: 2, kind: input, shape index: {}]   ;;  %s9148_s3 = inlined_call_operand.vmem [shape: bf16[512,256], index: 3, kind: output, shape index: {}]  }
   0x1   :  { %v6517_v0 = vld [vmem:[%s9145_s1 + $0x4] ss:$8 sps:$4 sm:$0xff]   ;;  %v6521_v2 = vld [vmem:[%s9145_s1] ss:$8 sps:$4 sm:$0xff]   ;;  %v6523_v4 = vld [vmem:[%s9145_s1 + $0x14] ss:$8 sps:$4 sm:$0xff]  }
   0x2   :  { %v6519_v1 = vld [vmem:[%s9145_s1 + $0x204] ss:$8 sps:$4 sm:$0xff]   ;;  %2683 = vmatprep.subr.bf16.mxu1 %v6517_v0  ;;  %v6522_v3 = vld [vmem:[%s9145_s1 + $0x200] ss:$8 sps:$4 sm:$0xff]   ;;  %v6525_v5 = vld [vmem:[%s9145_s1 + $0x214] ss:$8 sps:$4 sm:$0xff]  }
   0x3   :  { %3389 = vmatprep.subr.bf16.mxu0 %v6519_v1  ;;  %2684 = vmatpush1.bf16.msra.mxu1 %v6521_v2  ;;  %v6527_v6 = vld [vmem:[%s9145_s1 + $0x10] ss:$8 sps:$4 sm:$0xff]   ;;  %v6529_v8 = vld [vmem:[%s9145_s1 + $0x24] ss:$8 sps:$4 sm:$0xff]   ;;  %v6533_v10 = vld [vmem:[%s9145_s1 + $0x20] ss:$8 sps:$4 sm:$0xff]  }
   0x4   :  { %3390 = vmatpush1.bf16.msra.mxu0 %v6522_v3  ;;  %2685 = vmatprep.subr.bf16.mxu1 %v6523_v4  ;;  %v6528_v7 = vld [vmem:[%s9145_s1 + $0x210] ss:$8 sps:$4 sm:$0xff]   ;;  %v6531_v9 = vld [vmem:[%s9145_s1 + $0x224] ss:$8 sps:$4 sm:$0xff]   ;;  %v6534_v11 = vld [vmem:[%s9145_s1 + $0x220] ss:$8 sps:$4 sm:$0xff]  }
   0x5   :  { %3391 = vmatprep.subr.bf16.mxu0 %v6525_v5  ;;  %v6535_v12 = vld [vmem:[%s9145_s1 + $0x34] ss:$8 sps:$4 sm:$0xff]   ;;  %v6539_v14 = vld [vmem:[%s9145_s1 + $0x30] ss:$8 sps:$4 sm:$0xff]   ;;  %v6541_v16 = vld [vmem:[%s9145_s1 + $0x44] ss:$8 sps:$4 sm:$0xff]  }
   0x6   :  { %v6537_v13 = vld [vmem:[%s9145_s1 + $0x234] ss:$8 sps:$4 sm:$0xff]   ;;  %v6540_v15 = vld [vmem:[%s9145_s1 + $0x230] ss:$8 sps:$4 sm:$0xff]   ;;  %v6543_v17 = vld [vmem:[%s9145_s1 + $0x244] ss:$8 sps:$4 sm:$0xff]  }
   0x7   :  { %2686 = vmatpush1.bf16.msra.mxu1 %v6527_v6  ;;  %v6545_v18 = vld [vmem:[%s9145_s1 + $0x40] ss:$8 sps:$4 sm:$0xff]   ;;  %v6547_v20 = vld [vmem:[%s9145_s1 + $0x54] ss:$8 sps:$4 sm:$0xff]   ;;  %v6551_v22 = vld [vmem:[%s9145_s1 + $0x50] ss:$8 sps:$4 sm:$0xff]  }
   0x8   :  { %3392 = vmatpush1.bf16.msra.mxu0 %v6528_v7  ;;  %2687 = vmatprep.subr.bf16.mxu1 %v6529_v8  ;;  %v6546_v19 = vld [vmem:[%s9145_s1 + $0x240] ss:$8 sps:$4 sm:$0xff]   ;;  %v6549_v21 = vld [vmem:[%s9145_s1 + $0x254] ss:$8 sps:$4 sm:$0xff]   ;;  %v6552_v23 = vld [vmem:[%s9145_s1 + $0x250] ss:$8 sps:$4 sm:$0xff]  }
   0x9   :  { %3393 = vmatprep.subr.bf16.mxu0 %v6531_v9  ;;  %v6553_v24 = vld [vmem:[%s9145_s1 + $0x64] ss:$8 sps:$4 sm:$0xff]   ;;  %v6557_v26 = vld [vmem:[%s9145_s1 + $0x60] ss:$8 sps:$4 sm:$0xff]   ;;  %v6559_v28 = vld [vmem:[%s9145_s1 + $0x74] ss:$8 sps:$4 sm:$0xff]  }
   0xa   :  { %v6555_v25 = vld [vmem:[%s9145_s1 + $0x264] ss:$8 sps:$4 sm:$0xff]   ;;  %v6558_v27 = vld [vmem:[%s9145_s1 + $0x260] ss:$8 sps:$4 sm:$0xff]   ;;  %v6561_v29 = vld [vmem:[%s9145_s1 + $0x274] ss:$8 sps:$4 sm:$0xff]  }
   0xb   :  { %2688 = vmatpush1.bf16.msra.mxu1 %v6533_v10  ;;  %v6563_v30 = vld [vmem:[%s9145_s1 + $0x70] ss:$8 sps:$4 sm:$0xff]   ;;  %v6565_v32 = vld [vmem:[%s9145_s1 + $0x84] ss:$8 sps:$4 sm:$0xff]   ;;  %v6569_v34 = vld [vmem:[%s9145_s1 + $0x80] ss:$8 sps:$4 sm:$0xff]  }
   0xc   :  { %3394 = vmatpush1.bf16.msra.mxu0 %v6534_v11  ;;  %2689 = vmatprep.subr.bf16.mxu1 %v6535_v12  ;;  %v6564_v31 = vld [vmem:[%s9145_s1 + $0x270] ss:$8 sps:$4 sm:$0xff]   ;;  %v6567_v33 = vld [vmem:[%s9145_s1 + $0x284] ss:$8 sps:$4 sm:$0xff]   ;;  %v6570_v35 = vld [vmem:[%s9145_s1 + $0x280] ss:$8 sps:$4 sm:$0xff]  }
   0xd   :  { %3395 = vmatprep.subr.bf16.mxu0 %v6537_v13  ;;  %v6571_v36 = vld [vmem:[%s9145_s1 + $0x94] ss:$8 sps:$4 sm:$0xff]   ;;  %v6575_v38 = vld [vmem:[%s9145_s1 + $0x90] ss:$8 sps:$4 sm:$0xff]   ;;  %v6577_v40 = vld [vmem:[%s9145_s1 + $0xa4] ss:$8 sps:$4 sm:$0xff]  }
   0xe   :  { %v6573_v37 = vld [vmem:[%s9145_s1 + $0x294] ss:$8 sps:$4 sm:$0xff]   ;;  %v6576_v39 = vld [vmem:[%s9145_s1 + $0x290] ss:$8 sps:$4 sm:$0xff]   ;;  %v6579_v41 = vld [vmem:[%s9145_s1 + $0x2a4] ss:$8 sps:$4 sm:$0xff]  }
   0xf   :  { %2690 = vmatpush1.bf16.msra.mxu1 %v6539_v14  ;;  %v6581_v42 = vld [vmem:[%s9145_s1 + $0xa0] ss:$8 sps:$4 sm:$0xff]   ;;  %v6583_v44 = vld [vmem:[%s9145_s1 + $0xb4] ss:$8 sps:$4 sm:$0xff]   ;;  %v6587_v46 = vld [vmem:[%s9145_s1 + $0xb0] ss:$8 sps:$4 sm:$0xff]  }
  0x10   :  { %3396 = vmatpush1.bf16.msra.mxu0 %v6540_v15  ;;  %2691 = vmatprep.subr.bf16.mxu1 %v6541_v16  ;;  %v6582_v43 = vld [vmem:[%s9145_s1 + $0x2a0] ss:$8 sps:$4 sm:$0xff]   ;;  %v6585_v45 = vld [vmem:[%s9145_s1 + $0x2b4] ss:$8 sps:$4 sm:$0xff]   ;;  %v6588_v47 = vld [vmem:[%s9145_s1 + $0x2b0] ss:$8 sps:$4 sm:$0xff]  }
  0x11   :  { %3397 = vmatprep.subr.bf16.mxu0 %v6543_v17  ;;  %v6589_v48 = vld [vmem:[%s9145_s1 + $0xc4] ss:$8 sps:$4 sm:$0xff]   ;;  %v6618_v51 = vld [vmem:[%s9146_s0 + $0x14] ss:$36 sps:$4 sm:$0xff]   ;;  %v6593_v52 = vld [vmem:[%s9145_s1 + $0xc0] ss:$8 sps:$4 sm:$0xff]  }
  0x12   :  { %v6615_v49 = vld [vmem:[%s9146_s0 + $0x4] ss:$36 sps:$4 sm:$0xff]   ;;  %3421 = vmatprep.mubr.bf16.mxu0 %v6618_v51  ;;  %v6595_v54 = vld [vmem:[%s9145_s1 + $0xd4] ss:$8 sps:$4 sm:$0xff]   ;;  %v6599_v56 = vld [vmem:[%s9145_s1 + $0xd0] ss:$8 sps:$4 sm:$0xff]  }
  0x13   :  { %2692 = vmatpush1.bf16.msra.mxu1 %v6545_v18  ;;  %v6591_v50 = vld [vmem:[%s9145_s1 + $0x2c4] ss:$8 sps:$4 sm:$0xff]   ;;  %2715 = vmatprep.mubr.bf16.mxu1 %v6615_v49  ;;  %v6594_v53 = vld [vmem:[%s9145_s1 + $0x2c0] ss:$8 sps:$4 sm:$0xff]   ;;  %v6597_v55 = vld [vmem:[%s9145_s1 + $0x2d4] ss:$8 sps:$4 sm:$0xff]  }
  0x14   :  { %3398 = vmatpush1.bf16.msra.mxu0 %v6546_v19  ;;  %2693 = vmatprep.subr.bf16.mxu1 %v6547_v20  ;;  %v6600_v57 = vld [vmem:[%s9145_s1 + $0x2d0] ss:$8 sps:$4 sm:$0xff]   ;;  %v6601_v58 = vld [vmem:[%s9145_s1 + $0xe4] ss:$8 sps:$4 sm:$0xff]   ;;  %v6605_v60 = vld [vmem:[%s9145_s1 + $0xe0] ss:$8 sps:$4 sm:$0xff]  }
  0x15   :  { %3399 = vmatprep.subr.bf16.mxu0 %v6549_v21  ;;  %v6603_v59 = vld [vmem:[%s9145_s1 + $0x2e4] ss:$8 sps:$4 sm:$0xff]   ;;  %v6606_v61 = vld [vmem:[%s9145_s1 + $0x2e0] ss:$8 sps:$4 sm:$0xff]   ;;  %v6607_v62 = vld [vmem:[%s9145_s1 + $0xf4] ss:$8 sps:$4 sm:$0xff]  }
  0x16   :  { %v6609_v63 = vld [vmem:[%s9145_s1 + $0x2f4] ss:$8 sps:$4 sm:$0xff]   ;;  %v6611_v0 = vld [vmem:[%s9145_s1 + $0xf0] ss:$8 sps:$4 sm:$0xff]   ;;  %v6621_v2 = vld [vmem:[%s9145_s1 + $0x104] ss:$8 sps:$4 sm:$0xff]  }
  0x17   :  { %2694 = vmatpush1.bf16.msra.mxu1 %v6551_v22  ;;  %v6612_v1 = vld [vmem:[%s9145_s1 + $0x2f0] ss:$8 sps:$4 sm:$0xff]   ;;  %v6624_v3 = vld [vmem:[%s9145_s1 + $0x304] ss:$8 sps:$4 sm:$0xff]   ;;  %v6619_v6 = vld [vmem:[%s9145_s1 + $0x100] ss:$8 sps:$4 sm:$0xff]  }
  0x18   :  { %3400 = vmatpush1.bf16.msra.mxu0 %v6552_v23  ;;  %2695 = vmatprep.subr.bf16.mxu1 %v6553_v24  ;;  %v6613_v4 = vld [vmem:[%s9146_s0] ss:$36 sps:$4 sm:$0xff]   ;;  %v6616_v5 = vld [vmem:[%s9146_s0 + $0x10] ss:$36 sps:$4 sm:$0xff]   ;;  %v6629_v16 = vld [vmem:[%s9146_s0 + $0x48] ss:$36 sps:$4 sm:$0xff]  }
  0x19   :  { %3401 = vmatprep.subr.bf16.mxu0 %v6555_v25  ;;  %v6622_v7 = vld [vmem:[%s9145_s1 + $0x300] ss:$8 sps:$4 sm:$0xff]   ;;  %v6625_v8 = vld [vmem:[%s9146_s0 + $0x4c] ss:$36 sps:$4 sm:$0xff]   ;;  %v6633_v10 = vld [vmem:[%s9145_s1 + $0x314] ss:$8 sps:$4 sm:$0xff]  }
  0x1a   :  { %v6627_v9 = vld [vmem:[%s9146_s0 + $0x5c] ss:$36 sps:$4 sm:$0xff]   ;;  %v6631_v12 = vld [vmem:[%s9145_s1 + $0x310] ss:$8 sps:$4 sm:$0xff]   ;;  %v6645_v14 = vld [vmem:[%s9145_s1 + $0x324] ss:$8 sps:$4 sm:$0xff]  }
  0x1b   :  { %2696 = vmatpush1.bf16.msra.mxu1 %v6557_v26  ;;  %v6641_v11 = vld [vmem:[%s9145_s1 + $0x114] ss:$8 sps:$4 sm:$0xff]   ;;  %v6639_v13 = vld [vmem:[%s9145_s1 + $0x110] ss:$8 sps:$4 sm:$0xff]   ;;  %v6662_v15 = vld [vmem:[%s9145_s1 + $0x124] ss:$8 sps:$4 sm:$0xff]  }
  0x1c   :  { %3402 = vmatpush1.bf16.msra.mxu0 %v6558_v27  ;;  %2697 = vmatprep.subr.bf16.mxu1 %v6559_v28  ;;  %v6630_v17 = vld [vmem:[%s9146_s0 + $0x58] ss:$36 sps:$4 sm:$0xff]   ;;  %v6636_v19 = vld [vmem:[%s9146_s0 + $0xa4] ss:$36 sps:$4 sm:$0xff]   ;;  %v6638_v26 = vld [vmem:[%s9146_s0 + $0x90] ss:$36 sps:$4 sm:$0xff]  }
  0x1d   :  { %3403 = vmatprep.subr.bf16.mxu0 %v6561_v29  ;;  %v6634_v18 = vld [vmem:[%s9146_s0 + $0x94] ss:$36 sps:$4 sm:$0xff]   ;;  %v6643_v20 = vld [vmem:[%s9145_s1 + $0x320] ss:$8 sps:$4 sm:$0xff]   ;;  %v6666_v27 = vld [vmem:[%s9145_s1 + $0x344] ss:$8 sps:$4 sm:$0xff]  }
  0x1e   :  { %v6660_v21 = vld [vmem:[%s9145_s1 + $0x120] ss:$8 sps:$4 sm:$0xff]   ;;  %v6654_v22 = vld [vmem:[%s9145_s1 + $0x334] ss:$8 sps:$4 sm:$0xff]   ;;  %v6652_v24 = vld [vmem:[%s9145_s1 + $0x330] ss:$8 sps:$4 sm:$0xff]  }
  0x1f   :  { %2698 = vmatpush1.bf16.msra.mxu1 %v6563_v30  ;;  %v6683_v23 = vld [vmem:[%s9145_s1 + $0x134] ss:$8 sps:$4 sm:$0xff]   ;;  %v6681_v25 = vld [vmem:[%s9145_s1 + $0x130] ss:$8 sps:$4 sm:$0xff]   ;;  %v6642_v28 = vld [vmem:[%s9146_s0 + $0xa0] ss:$36 sps:$4 sm:$0xff]  }
  0x20   :  { %3404 = vmatpush1.bf16.msra.mxu0 %v6564_v31  ;;  %2699 = vmatprep.subr.bf16.mxu1 %v6565_v32  ;;  %v6646_v29 = vld [vmem:[%s9146_s0 + $0xdc] ss:$36 sps:$4 sm:$0xff]   ;;  %v6648_v30 = vld [vmem:[%s9146_s0 + $0xec] ss:$36 sps:$4 sm:$0xff]  }
  0x21   :  { %3405 = vmatprep.subr.bf16.mxu0 %v6567_v33  ;;  %v6664_v31 = vld [vmem:[%s9145_s1 + $0x340] ss:$8 sps:$4 sm:$0xff]   ;;  %v6675_v32 = vld [vmem:[%s9145_s1 + $0x354] ss:$8 sps:$4 sm:$0xff]   ;;  %v6667_v49 = vld [vmem:[%s9146_s0 + $0x16c] ss:$36 sps:$4 sm:$0xff]  }
  0x22   :  { %v6702_v33 = vld [vmem:[%s9145_s1 + $0x140] ss:$8 sps:$4 sm:$0xff]  }
  0x23   :  { %2700 = vmatpush1.bf16.msra.mxu1 %v6569_v34  ;;  %v6704_v34 = vld [vmem:[%s9145_s1 + $0x144] ss:$8 sps:$4 sm:$0xff]   ;;  %v6706_v51 = vld [vmem:[%s9145_s1 + $0x380] ss:$8 sps:$4 sm:$0xff]  }
  0x24   :  { %3406 = vmatpush1.bf16.msra.mxu0 %v6570_v35  ;;  %2701 = vmatprep.subr.bf16.mxu1 %v6571_v36  ;;  %v6673_v35 = vld [vmem:[%s9145_s1 + $0x350] ss:$8 sps:$4 sm:$0xff]   ;;  %v6687_v36 = vld [vmem:[%s9145_s1 + $0x364] ss:$8 sps:$4 sm:$0xff]  }
  0x25   :  { %3407 = vmatprep.subr.bf16.mxu0 %v6573_v37  ;;  %v6650_v37 = vld [vmem:[%s9146_s0 + $0xd8] ss:$36 sps:$4 sm:$0xff]  }
  0x27   :  { %2702 = vmatpush1.bf16.msra.mxu1 %v6575_v38  ;;  %v6651_v38 = vld [vmem:[%s9146_s0 + $0xe8] ss:$36 sps:$4 sm:$0xff]  }
  0x28   :  { %3408 = vmatpush1.bf16.msra.mxu0 %v6576_v39  ;;  %2703 = vmatprep.subr.bf16.mxu1 %v6577_v40  ;;  %v6655_v39 = vld [vmem:[%s9146_s0 + $0x124] ss:$36 sps:$4 sm:$0xff]   ;;  %v6657_v40 = vld [vmem:[%s9146_s0 + $0x134] ss:$36 sps:$4 sm:$0xff]  }
  0x29   :  { %3409 = vmatprep.subr.bf16.mxu0 %v6579_v41  ;;  %v6685_v41 = vld [vmem:[%s9145_s1 + $0x360] ss:$8 sps:$4 sm:$0xff]  }
  0x2b   :  { %2704 = vmatpush1.bf16.msra.mxu1 %v6581_v42  ;;  %v6696_v42 = vld [vmem:[%s9145_s1 + $0x374] ss:$8 sps:$4 sm:$0xff]  }
  0x2c   :  { %3410 = vmatpush1.bf16.msra.mxu0 %v6582_v43  ;;  %2705 = vmatprep.subr.bf16.mxu1 %v6583_v44  ;;  %v6723_v43 = vld [vmem:[%s9145_s1 + $0x150] ss:$8 sps:$4 sm:$0xff]   ;;  %v6725_v44 = vld [vmem:[%s9145_s1 + $0x154] ss:$8 sps:$4 sm:$0xff]  }
  0x2d   :  { %3411 = vmatprep.subr.bf16.mxu0 %v6585_v45  ;;  %v6694_v45 = vld [vmem:[%s9145_s1 + $0x370] ss:$8 sps:$4 sm:$0xff]  }
  0x2f   :  { %2706 = vmatpush1.bf16.msra.mxu1 %v6587_v46  ;;  %v6659_v46 = vld [vmem:[%s9146_s0 + $0x120] ss:$36 sps:$4 sm:$0xff]  }
  0x30   :  { %3412 = vmatpush1.bf16.msra.mxu0 %v6588_v47  ;;  %2707 = vmatprep.subr.bf16.mxu1 %v6589_v48  ;;  %v6708_v47 = vld [vmem:[%s9145_s1 + $0x384] ss:$8 sps:$4 sm:$0xff]   ;;  %v6663_v48 = vld [vmem:[%s9146_s0 + $0x130] ss:$36 sps:$4 sm:$0xff]  }
  0x31   :  { %3413 = vmatprep.subr.bf16.mxu0 %v6591_v50  ;;  %v6669_v50 = vld [vmem:[%s9146_s0 + $0x17c] ss:$36 sps:$4 sm:$0xff]  }
  0x33   :  { %2708 = vmatpush1.bf16.msra.mxu1 %v6593_v52  ;;  %v6717_v52 = vld [vmem:[%s9145_s1 + $0x394] ss:$8 sps:$4 sm:$0xff]  }
  0x34   :  { %3414 = vmatpush1.bf16.msra.mxu0 %v6594_v53  ;;  %2709 = vmatprep.subr.bf16.mxu1 %v6595_v54  ;;  %v6715_v53 = vld [vmem:[%s9145_s1 + $0x390] ss:$8 sps:$4 sm:$0xff]   ;;  %v6671_v54 = vld [vmem:[%s9146_s0 + $0x168] ss:$36 sps:$4 sm:$0xff]  }
  0x35   :  { %3415 = vmatprep.subr.bf16.mxu0 %v6597_v55  ;;  %v6744_v55 = vld [vmem:[%s9145_s1 + $0x160] ss:$8 sps:$4 sm:$0xff]  }
  0x37   :  { %2710 = vmatpush1.bf16.msra.mxu1 %v6599_v56  ;;  %v6729_v56 = vld [vmem:[%s9145_s1 + $0x3a4] ss:$8 sps:$4 sm:$0xff]  }
  0x38   :  { %3416 = vmatpush1.bf16.msra.mxu0 %v6600_v57  ;;  %2711 = vmatprep.subr.bf16.mxu1 %v6601_v58  ;;  %v6746_v57 = vld [vmem:[%s9145_s1 + $0x164] ss:$8 sps:$4 sm:$0xff]   ;;  %v6672_v58 = vld [vmem:[%s9146_s0 + $0x178] ss:$36 sps:$4 sm:$0xff]  }
  0x39   :  { %3417 = vmatprep.subr.bf16.mxu0 %v6603_v59  ;;  %v6676_v59 = vld [vmem:[%s9146_s0 + $0x1b4] ss:$36 sps:$4 sm:$0xff]  }
  0x3b   :  { %2712 = vmatpush1.bf16.msra.mxu1 %v6605_v60  ;;  %v6678_v60 = vld [vmem:[%s9146_s0 + $0x1c4] ss:$36 sps:$4 sm:$0xff]  }
  0x3c   :  { %3418 = vmatpush1.bf16.msra.mxu0 %v6606_v61  ;;  %2713 = vmatprep.subr.bf16.mxu1 %v6607_v62  ;;  %v6727_v61 = vld [vmem:[%s9145_s1 + $0x3a0] ss:$8 sps:$4 sm:$0xff]   ;;  %v6738_v62 = vld [vmem:[%s9145_s1 + $0x3b4] ss:$8 sps:$4 sm:$0xff]  }
  0x3d   :  { %3419 = vmatprep.subr.bf16.mxu0 %v6609_v63  ;;  %v6680_v63 = vld [vmem:[%s9146_s0 + $0x1b0] ss:$36 sps:$4 sm:$0xff]  }
  0x3f   :  { %2714 = vmatpush1.bf16.msra.mxu1 %v6611_v0  ;;  %v6684_v0 = vld [vmem:[%s9146_s0 + $0x1c0] ss:$36 sps:$4 sm:$0xff]  }
  0x40   :  { %3420 = vmatpush1.bf16.msra.mxu0 %v6612_v1  ;;  %3036 = vmatprep.subr.bf16.mxu1 %v6621_v2  ;;  %v6736_v1 = vld [vmem:[%s9145_s1 + $0x3b0] ss:$8 sps:$4 sm:$0xff]   ;;  %v6750_v2 = vld [vmem:[%s9145_s1 + $0x3c4] ss:$8 sps:$4 sm:$0xff]  }
  0x41   :  { %3742 = vmatprep.subr.bf16.mxu0 %v6624_v3  ;;  %v6688_v3 = vld [vmem:[%s9146_s0 + $0x1fc] ss:$36 sps:$4 sm:$0xff]  }
  0x42   :  { %2716 = vmatmul.mubr.bf16.vlgmr.msra.gmra.mrb[0].mxu1 %v6613_v4  ;;  %v6765_v4 = vld [vmem:[%s9145_s1 + $0x170] ss:$8 sps:$4 sm:$0xff]  }
  0x43   :  { %3422 = vmatmul.mubr.bf16.vlgmr.msra.gmra.mrb[0].mxu0 %v6616_v5  ;;  %3037 = vmatpush1.bf16.msra.mxu1 %v6619_v6  ;;  %v6767_v5 = vld [vmem:[%s9145_s1 + $0x174] ss:$8 sps:$4 sm:$0xff]   ;;  %v6690_v6 = vld [vmem:[%s9146_s0 + $0x20c] ss:$36 sps:$4 sm:$0xff]  }
  0x44   :  { %3743 = vmatpush1.bf16.msra.mxu0 %v6622_v7  ;;  %2725 = vmatprep.mubr.bf16.mxu1 %v6625_v8  ;;  %v6748_v7 = vld [vmem:[%s9145_s1 + $0x3c0] ss:$8 sps:$4 sm:$0xff]   ;;  %v6759_v8 = vld [vmem:[%s9145_s1 + $0x3d4] ss:$8 sps:$4 sm:$0xff]  }
  0x45   :  { %3431 = vmatprep.mubr.bf16.mxu0 %v6627_v9  ;;  %3744 = vmatprep.subr.bf16.mxu0 %v6633_v10  ;;  %v6692_v9 = vld [vmem:[%s9146_s0 + $0x1f8] ss:$36 sps:$4 sm:$0xff]  }
  0x46   :  { %3038 = vmatprep.subr.bf16.mxu1 %v6641_v11  ;;  %v6757_v10 = vld [vmem:[%s9145_s1 + $0x3d0] ss:$8 sps:$4 sm:$0xff]   ;;  %v6771_v11 = vld [vmem:[%s9145_s1 + $0x3e4] ss:$8 sps:$4 sm:$0xff]  }
  0x47   :  { %3039 = vmatpush1.bf16.msra.mxu1 %v6639_v13  ;;  %v6697_v13 = vld [vmem:[%s9146_s0 + $0x244] ss:$36 sps:$4 sm:$0xff]  }
  0x48   :  { %3745 = vmatpush1.bf16.msra.mxu0 %v6631_v12  ;;  %3040 = vmatprep.subr.bf16.mxu1 %v6662_v15  ;;  %v6693_v12 = vld [vmem:[%s9146_s0 + $0x208] ss:$36 sps:$4 sm:$0xff]  }
  0x49   :  { %3746 = vmatprep.subr.bf16.mxu0 %v6645_v14  ;;  %v6699_v14 = vld [vmem:[%s9146_s0 + $0x254] ss:$36 sps:$4 sm:$0xff]   ;;  %v6769_v15 = vld [vmem:[%s9145_s1 + $0x3e0] ss:$8 sps:$4 sm:$0xff]  }
  0x4a   :  { %2726 = vmatmul.mubr.bf16.gmra.mrb[4].mxu1 %v6629_v16  ;;  %v6789_v16 = vld [vmem:[%s9145_s1 + $0x184] ss:$8 sps:$4 sm:$0xff]  }
  0x4b   :  { %3432 = vmatmul.mubr.bf16.gmra.mrb[4].mxu0 %v6630_v17  ;;  %2735 = vmatprep.mubr.bf16.mxu1 %v6634_v18  ;;  %v6780_v17 = vld [vmem:[%s9145_s1 + $0x3f4] ss:$8 sps:$4 sm:$0xff]   ;;  %v6787_v18 = vld [vmem:[%s9145_s1 + $0x180] ss:$8 sps:$4 sm:$0xff]  }
  0x4c   :  { %3441 = vmatprep.mubr.bf16.mxu0 %v6636_v19  ;;  %3747 = vmatpush1.bf16.msra.mxu0 %v6643_v20  ;;  %v6701_v19 = vld [vmem:[%s9146_s0 + $0x240] ss:$36 sps:$4 sm:$0xff]   ;;  %v6778_v20 = vld [vmem:[%s9145_s1 + $0x3f0] ss:$8 sps:$4 sm:$0xff]  }
  0x4d   :  { %3041 = vmatpush1.bf16.msra.mxu1 %v6660_v21  ;;  %3748 = vmatprep.subr.bf16.mxu0 %v6654_v22  ;;  %v6792_v21 = vld [vmem:[%s9145_s1 + $0x404] ss:$8 sps:$4 sm:$0xff]   ;;  %v6705_v22 = vld [vmem:[%s9146_s0 + $0x250] ss:$36 sps:$4 sm:$0xff]  }
  0x4e   :  { %3042 = vmatprep.subr.bf16.mxu1 %v6683_v23  ;;  %v6709_v23 = vld [vmem:[%s9146_s0 + $0x28c] ss:$36 sps:$4 sm:$0xff]  }
  0x50   :  { %3749 = vmatpush1.bf16.msra.mxu0 %v6652_v24  ;;  %v6711_v24 = vld [vmem:[%s9146_s0 + $0x29c] ss:$36 sps:$4 sm:$0xff]  }
  0x51   :  { %3043 = vmatpush1.bf16.msra.mxu1 %v6681_v25  ;;  %3750 = vmatprep.subr.bf16.mxu0 %v6666_v27  ;;  %v6806_v25 = vld [vmem:[%s9145_s1 + $0x194] ss:$8 sps:$4 sm:$0xff]   ;;  %v6713_v27 = vld [vmem:[%s9146_s0 + $0x288] ss:$36 sps:$4 sm:$0xff]  }
  0x52   :  { %2736 = vmatmul.mubr.bf16.gmra.mrb[8].mxu1 %v6638_v26  ;;  %3044 = vmatprep.subr.bf16.mxu1 %v6704_v34  ;;  %v6804_v26 = vld [vmem:[%s9145_s1 + $0x190] ss:$8 sps:$4 sm:$0xff]   ;;  %v6726_v34 = vld [vmem:[%s9146_s0 + $0x2e0] ss:$36 sps:$4 sm:$0xff]  }
  0x53   :  { %3442 = vmatmul.mubr.bf16.gmra.mrb[8].mxu0 %v6642_v28  ;;  %2745 = vmatprep.mubr.bf16.mxu1 %v6646_v29  ;;  %v6714_v28 = vld [vmem:[%s9146_s0 + $0x298] ss:$36 sps:$4 sm:$0xff]  }
  0x54   :  { %3451 = vmatprep.mubr.bf16.mxu0 %v6648_v30  ;;  %3751 = vmatpush1.bf16.msra.mxu0 %v6664_v31  ;;  %v6718_v29 = vld [vmem:[%s9146_s0 + $0x2d4] ss:$36 sps:$4 sm:$0xff]   ;;  %v6819_v30 = vld [vmem:[%s9145_s1 + $0x1a0] ss:$8 sps:$4 sm:$0xff]   ;;  %v6821_v31 = vld [vmem:[%s9145_s1 + $0x1a4] ss:$8 sps:$4 sm:$0xff]  }
  0x55   :  { %3752 = vmatprep.subr.bf16.mxu0 %v6675_v32  ;;  %3045 = vmatpush1.bf16.msra.mxu1 %v6702_v33  ;;  %v6720_v32 = vld [vmem:[%s9146_s0 + $0x2e4] ss:$36 sps:$4 sm:$0xff]   ;;  %v6722_v33 = vld [vmem:[%s9146_s0 + $0x2d0] ss:$36 sps:$4 sm:$0xff]  }
  0x56   :  { %3046 = vmatprep.subr.bf16.mxu1 %v6725_v44  ;;  %v6741_v44 = vld [vmem:[%s9146_s0 + $0x374] ss:$36 sps:$4 sm:$0xff]  }
  0x58   :  { %3753 = vmatpush1.bf16.msra.mxu0 %v6673_v35  ;;  %v6730_v35 = vld [vmem:[%s9146_s0 + $0x31c] ss:$36 sps:$4 sm:$0xff]  }
  0x59   :  { %3754 = vmatprep.subr.bf16.mxu0 %v6687_v36  ;;  %3047 = vmatpush1.bf16.msra.mxu1 %v6723_v43  ;;  %v6837_v36 = vld [vmem:[%s9145_s1 + $0x1b0] ss:$8 sps:$4 sm:$0xff]   ;;  %v6739_v43 = vld [vmem:[%s9146_s0 + $0x364] ss:$36 sps:$4 sm:$0xff]  }
  0x5a   :  { %2746 = vmatmul.mubr.bf16.gmra.mrb[12].mxu1 %v6650_v37  ;;  %3048 = vmatprep.subr.bf16.mxu1 %v6746_v57  ;;  %v6839_v37 = vld [vmem:[%s9145_s1 + $0x1b4] ss:$8 sps:$4 sm:$0xff]  }
  0x5b   :  { %3452 = vmatmul.mubr.bf16.gmra.mrb[12].mxu0 %v6651_v38  ;;  %2755 = vmatprep.mubr.bf16.mxu1 %v6655_v39  ;;  %v6732_v38 = vld [vmem:[%s9146_s0 + $0x32c] ss:$36 sps:$4 sm:$0xff]   ;;  %v6852_v39 = vld [vmem:[%s9145_s1 + $0x1c0] ss:$8 sps:$4 sm:$0xff]  }
  0x5c   :  { %3461 = vmatprep.mubr.bf16.mxu0 %v6657_v40  ;;  %3755 = vmatpush1.bf16.msra.mxu0 %v6685_v41  ;;  %v6734_v40 = vld [vmem:[%s9146_s0 + $0x318] ss:$36 sps:$4 sm:$0xff]   ;;  %v6854_v41 = vld [vmem:[%s9145_s1 + $0x1c4] ss:$8 sps:$4 sm:$0xff]   ;;  %v6764_v57 = vld [vmem:[%s9146_s0 + $0x3f0] ss:$36 sps:$4 sm:$0xff]  }
  0x5d   :  { %3756 = vmatprep.subr.bf16.mxu0 %v6696_v42  ;;  %3049 = vmatpush1.bf16.msra.mxu1 %v6744_v55  ;;  %v6735_v42 = vld [vmem:[%s9146_s0 + $0x328] ss:$36 sps:$4 sm:$0xff]   ;;  %v6760_v55 = vld [vmem:[%s9146_s0 + $0x3f4] ss:$36 sps:$4 sm:$0xff]  }
  0x5e   :  { %3050 = vmatprep.subr.bf16.mxu1 %v6767_v5  ;;  %v6786_v5 = vld [vmem:[%s9146_s0 + $0x480] ss:$36 sps:$4 sm:$0xff]  }
  0x60   :  { %3757 = vmatpush1.bf16.msra.mxu0 %v6694_v45  ;;  %v6870_v45 = vld [vmem:[%s9145_s1 + $0x1d0] ss:$8 sps:$4 sm:$0xff]  }
  0x61   :  { %3758 = vmatprep.subr.bf16.mxu0 %v6708_v47  ;;  %3051 = vmatpush1.bf16.msra.mxu1 %v6765_v4  ;;  %v6872_v47 = vld [vmem:[%s9145_s1 + $0x1d4] ss:$8 sps:$4 sm:$0xff]  }
  0x62   :  { %2756 = vmatmul.mubr.bf16.gmra.mrb[16].mxu1 %v6659_v46  ;;  %3052 = vmatprep.subr.bf16.mxu1 %v6789_v16  ;;  %v6743_v46 = vld [vmem:[%s9146_s0 + $0x360] ss:$36 sps:$4 sm:$0xff]   ;;  %v6783_v4 = vld [vmem:[%s9146_s0 + $0x18] ss:$36 sps:$4 sm:$0xff]  }
  0x63   :  { %3462 = vmatmul.mubr.bf16.gmra.mrb[16].mxu0 %v6663_v48  ;;  %2765 = vmatprep.mubr.bf16.mxu1 %v6667_v49  ;;  %v6747_v48 = vld [vmem:[%s9146_s0 + $0x370] ss:$36 sps:$4 sm:$0xff]   ;;  %v6856_v16 = vld [vmem:[%s9145_s1 + $0x420] ss:$8 sps:$4 sm:$0xff]  }
  0x64   :  { %3471 = vmatprep.mubr.bf16.mxu0 %v6669_v50  ;;  %3759 = vmatpush1.bf16.msra.mxu0 %v6706_v51  ;;  %v6751_v49 = vld [vmem:[%s9146_s0 + $0x3ac] ss:$36 sps:$4 sm:$0xff]   ;;  %v6753_v50 = vld [vmem:[%s9146_s0 + $0x3bc] ss:$36 sps:$4 sm:$0xff]  }
  0x65   :  { %3760 = vmatprep.subr.bf16.mxu0 %v6717_v52  ;;  %3053 = vmatpush1.bf16.msra.mxu1 %v6787_v18  ;;  %v6885_v51 = vld [vmem:[%s9145_s1 + $0x1e0] ss:$8 sps:$4 sm:$0xff]   ;;  %v6887_v52 = vld [vmem:[%s9145_s1 + $0x1e4] ss:$8 sps:$4 sm:$0xff]   ;;  %v6889_v18 = vld [vmem:[%s9145_s1 + $0x430] ss:$8 sps:$4 sm:$0xff]  }
  0x66   :  { %3054 = vmatprep.subr.bf16.mxu1 %v6806_v25  ;;  %v6812_v25 = vld [vmem:[%s9146_s0 + $0x558] ss:$36 sps:$4 sm:$0xff]  }
  0x68   :  { %3761 = vmatpush1.bf16.msra.mxu0 %v6715_v53  ;;  %v6755_v53 = vld [vmem:[%s9146_s0 + $0x3a8] ss:$36 sps:$4 sm:$0xff]  }
  0x69   :  { %3762 = vmatprep.subr.bf16.mxu0 %v6729_v56  ;;  %3055 = vmatpush1.bf16.msra.mxu1 %v6804_v26  ;;  %v6762_v56 = vld [vmem:[%s9146_s0 + $0x404] ss:$36 sps:$4 sm:$0xff]   ;;  %v6813_v26 = vld [vmem:[%s9146_s0 + $0xf0] ss:$36 sps:$4 sm:$0xff]  }
  0x6a   :  { %2766 = vmatmul.mubr.bf16.gmra.mrb[20].mxu1 %v6671_v54  ;;  %3056 = vmatprep.subr.bf16.mxu1 %v6821_v31  ;;  %v6756_v54 = vld [vmem:[%s9146_s0 + $0x3b8] ss:$36 sps:$4 sm:$0xff]   ;;  %v6826_v31 = vld [vmem:[%s9146_s0 + $0x5ec] ss:$36 sps:$4 sm:$0xff]  }
  0x6b   :  { %3472 = vmatmul.mubr.bf16.gmra.mrb[20].mxu0 %v6672_v58  ;;  %2775 = vmatprep.mubr.bf16.mxu1 %v6676_v59  ;;  %v6768_v58 = vld [vmem:[%s9146_s0 + $0x400] ss:$36 sps:$4 sm:$0xff]  }
  0x6c   :  { %3481 = vmatprep.mubr.bf16.mxu0 %v6678_v60  ;;  %3763 = vmatpush1.bf16.msra.mxu0 %v6727_v61  ;;  %v6772_v59 = vld [vmem:[%s9146_s0 + $0x43c] ss:$36 sps:$4 sm:$0xff]   ;;  %v6774_v60 = vld [vmem:[%s9146_s0 + $0x44c] ss:$36 sps:$4 sm:$0xff]  }
  0x6d   :  { %3764 = vmatprep.subr.bf16.mxu0 %v6738_v62  ;;  %3057 = vmatpush1.bf16.msra.mxu1 %v6819_v30  ;;  %v6903_v61 = vld [vmem:[%s9145_s1 + $0x1f0] ss:$8 sps:$4 sm:$0xff]   ;;  %v6905_v62 = vld [vmem:[%s9145_s1 + $0x1f4] ss:$8 sps:$4 sm:$0xff]  }
  0x6e   :  { %3058 = vmatprep.subr.bf16.mxu1 %v6839_v37  ;;  %v6822_v30 = vld [vmem:[%s9146_s0 + $0x138] ss:$36 sps:$4 sm:$0xff]  }
  0x6f   :  { %v6832_v37 = vld [vmem:[%s9146_s0 + $0x634] ss:$36 sps:$4 sm:$0xff]  }
  0x70   :  { %3765 = vmatpush1.bf16.msra.mxu0 %v6736_v1  ;;  %v6781_v1 = vld [vmem:[%s9146_s0 + $0x484] ss:$36 sps:$4 sm:$0xff]  }
  0x71   :  { %3766 = vmatprep.subr.bf16.mxu0 %v6750_v2  ;;  %3059 = vmatpush1.bf16.msra.mxu1 %v6837_v36  ;;  %v6785_v2 = vld [vmem:[%s9146_s0 + $0x1c] ss:$36 sps:$4 sm:$0xff]  }
  0x72   :  { %2776 = vmatmul.mubr.bf16.gmra.mrb[24].mxu1 %v6680_v63  ;;  %3060 = vmatprep.subr.bf16.mxu1 %v6854_v41  ;;  %v6776_v63 = vld [vmem:[%s9146_s0 + $0x438] ss:$36 sps:$4 sm:$0xff]   ;;  %v6831_v36 = vld [vmem:[%s9146_s0 + $0x180] ss:$36 sps:$4 sm:$0xff]  }
  0x73   :  { %3482 = vmatmul.mubr.bf16.gmra.mrb[24].mxu0 %v6684_v0  ;;  %2785 = vmatprep.mubr.bf16.mxu1 %v6688_v3  ;;  %v6777_v0 = vld [vmem:[%s9146_s0 + $0x448] ss:$36 sps:$4 sm:$0xff]   ;;  %v6841_v41 = vld [vmem:[%s9146_s0 + $0x67c] ss:$36 sps:$4 sm:$0xff]  }
  0x74   :  { %3491 = vmatprep.mubr.bf16.mxu0 %v6690_v6  ;;  %3767 = vmatpush1.bf16.msra.mxu0 %v6748_v7  ;;  %v7149_v3 = vld [vmem:[%s9145_s1 + $0x204] ss:$8 sps:$4 sm:$0xff]   ;;  %v6790_v6 = vld [vmem:[%s9145_s1 + $0x400] ss:$8 sps:$4 sm:$0xff]  }
  0x75   :  { %3768 = vmatprep.subr.bf16.mxu0 %v6759_v8  ;;  %3061 = vmatpush1.bf16.msra.mxu1 %v6852_v39  ;;  %v6793_v7 = vld [vmem:[%s9146_s0 + $0x4cc] ss:$36 sps:$4 sm:$0xff]   ;;  %v6795_v8 = vld [vmem:[%s9146_s0 + $0x64] ss:$36 sps:$4 sm:$0xff]  }
  0x76   :  { %3062 = vmatprep.subr.bf16.mxu1 %v6872_v47  ;;  %v6836_v39 = vld [vmem:[%s9146_s0 + $0x630] ss:$36 sps:$4 sm:$0xff]   ;;  %v6851_v47 = vld [vmem:[%s9146_s0 + $0x6c0] ss:$36 sps:$4 sm:$0xff]  }
  0x78   :  { %3769 = vmatpush1.bf16.msra.mxu0 %v6757_v10  ;;  %v6823_v10 = vld [vmem:[%s9145_s1 + $0x410] ss:$8 sps:$4 sm:$0xff]  }
  0x79   :  { %3770 = vmatprep.subr.bf16.mxu0 %v6771_v11  ;;  %3063 = vmatpush1.bf16.msra.mxu1 %v6870_v45  ;;  %v6797_v11 = vld [vmem:[%s9146_s0 + $0x4c8] ss:$36 sps:$4 sm:$0xff]  }
  0x7a   :  { %2786 = vmatmul.mubr.bf16.gmra.mrb[28].mxu1 %v6692_v9  ;;  %3064 = vmatprep.subr.bf16.mxu1 %v6887_v52  ;;  %v6825_v9 = vld [vmem:[%s9145_s1 + $0x414] ss:$8 sps:$4 sm:$0xff]   ;;  %v6847_v45 = vld [vmem:[%s9146_s0 + $0x6c4] ss:$36 sps:$4 sm:$0xff]  }
  0x7b   :  { %3492 = vmatmul.mubr.bf16.gmra.mrb[28].mxu0 %v6693_v12  ;;  %2795 = vmatprep.mubr.bf16.mxu1 %v6697_v13  ;;  %v6798_v12 = vld [vmem:[%s9146_s0 + $0x60] ss:$36 sps:$4 sm:$0xff]  }
  0x7c   :  { %3501 = vmatprep.mubr.bf16.mxu0 %v6699_v14  ;;  %3771 = vmatpush1.bf16.msra.mxu0 %v6769_v15  ;;  %v6858_v13 = vld [vmem:[%s9145_s1 + $0x424] ss:$8 sps:$4 sm:$0xff]   ;;  %v6799_v14 = vld [vmem:[%s9146_s0 + $0x514] ss:$36 sps:$4 sm:$0xff]  }
  0x7d   :  { %3772 = vmatprep.subr.bf16.mxu0 %v6780_v17  ;;  %3065 = vmatpush1.bf16.msra.mxu1 %v6885_v51  ;;  %v6801_v15 = vld [vmem:[%s9146_s0 + $0xac] ss:$36 sps:$4 sm:$0xff]   ;;  %v6891_v17 = vld [vmem:[%s9145_s1 + $0x434] ss:$8 sps:$4 sm:$0xff]   ;;  %v6973_v51 = vld [vmem:[%s9145_s1 + $0x460] ss:$8 sps:$4 sm:$0xff]  }
  0x7e   :  { %3066 = vmatprep.subr.bf16.mxu1 %v6905_v62  ;;  %v6975_v52 = vld [vmem:[%s9145_s1 + $0x464] ss:$8 sps:$4 sm:$0xff]   ;;  %v6879_v62 = vld [vmem:[%s9146_s0 + $0x330] ss:$36 sps:$4 sm:$0xff]  }
  0x80   :  { %3773 = vmatpush1.bf16.msra.mxu0 %v6778_v20  ;;  %v6803_v20 = vld [vmem:[%s9146_s0 + $0x510] ss:$36 sps:$4 sm:$0xff]  }
  0x81   :  { %4095 = vmatprep.subr.bf16.mxu0 %v6792_v21  ;;  %3067 = vmatpush1.bf16.msra.mxu1 %v6903_v61  ;;  %v6807_v21 = vld [vmem:[%s9146_s0 + $0xa8] ss:$36 sps:$4 sm:$0xff]   ;;  %v6878_v61 = vld [vmem:[%s9146_s0 + $0x798] ss:$36 sps:$4 sm:$0xff]  }
  0x82   :  { %2796 = vmatmul.mubr.bf16.gmra.mrb[32].mxu1 %v6701_v19  ;;  %5844 = vmatprep.subr.bf16.mxu1 %v7149_v3  ;;  %v6921_v19 = vld [vmem:[%s9145_s1 + $0x444] ss:$8 sps:$4 sm:$0xff]  }
  0x83   :  { %3502 = vmatmul.mubr.bf16.gmra.mrb[32].mxu0 %v6705_v22  ;;  %2805 = vmatprep.mubr.bf16.mxu1 %v6709_v23  ;;  %v6808_v22 = vld [vmem:[%s9146_s0 + $0x55c] ss:$36 sps:$4 sm:$0xff]   ;;  %v6810_v23 = vld [vmem:[%s9146_s0 + $0xf4] ss:$36 sps:$4 sm:$0xff]   ;;  %v6892_v3 = vld [vmem:[%s9146_s0 + $0x82c] ss:$36 sps:$4 sm:$0xff]  }
  0x84   :  { %3511 = vmatprep.mubr.bf16.mxu0 %v6711_v24  ;;  %v6919_v24 = vld [vmem:[%s9145_s1 + $0x440] ss:$8 sps:$4 sm:$0xff]  }
  0x8a   :  { %2806 = vmatmul.mubr.bf16.gmra.mrb[36].mxu1 %v6713_v27  ;;  %v6814_v27 = vld [vmem:[%s9146_s0 + $0x5a4] ss:$36 sps:$4 sm:$0xff]  }
  0x8b   :  { %3512 = vmatmul.mubr.bf16.gmra.mrb[36].mxu0 %v6714_v28  ;;  %2815 = vmatprep.mubr.bf16.mxu1 %v6718_v29  ;;  %v6816_v28 = vld [vmem:[%s9146_s0 + $0x13c] ss:$36 sps:$4 sm:$0xff]  }
  0x8c   :  { %3521 = vmatprep.mubr.bf16.mxu0 %v6720_v32  ;;  %v6818_v29 = vld [vmem:[%s9146_s0 + $0x5a0] ss:$36 sps:$4 sm:$0xff]  }
  0x8d   :  { %v6828_v32 = vld [vmem:[%s9146_s0 + $0x184] ss:$36 sps:$4 sm:$0xff]  }
  0x92   :  { %2816 = vmatmul.mubr.bf16.gmra.mrb[40].mxu1 %v6722_v33  ;;  %v6946_v33 = vld [vmem:[%s9145_s1 + $0x450] ss:$8 sps:$4 sm:$0xff]  }
  0x93   :  { %3522 = vmatmul.mubr.bf16.gmra.mrb[40].mxu0 %v6726_v34  ;;  %2825 = vmatprep.mubr.bf16.mxu1 %v6730_v35  ;;  %v6948_v34 = vld [vmem:[%s9145_s1 + $0x454] ss:$8 sps:$4 sm:$0xff]   ;;  %v6830_v35 = vld [vmem:[%s9146_s0 + $0x5e8] ss:$36 sps:$4 sm:$0xff]  }
  0x94   :  { %3531 = vmatprep.mubr.bf16.mxu0 %v6732_v38  ;;  %v6834_v38 = vld [vmem:[%s9146_s0 + $0x1cc] ss:$36 sps:$4 sm:$0xff]  }
  0x9a   :  { %2826 = vmatmul.mubr.bf16.gmra.mrb[44].mxu1 %v6734_v40  ;;  %v6840_v40 = vld [vmem:[%s9146_s0 + $0x1c8] ss:$36 sps:$4 sm:$0xff]  }
  0x9b   :  { %3532 = vmatmul.mubr.bf16.gmra.mrb[44].mxu0 %v6735_v42  ;;  %2835 = vmatprep.mubr.bf16.mxu1 %v6739_v43  ;;  %v6843_v42 = vld [vmem:[%s9146_s0 + $0x214] ss:$36 sps:$4 sm:$0xff]  }
  0x9c   :  { %3541 = vmatprep.mubr.bf16.mxu0 %v6741_v44  ;;  %v6845_v43 = vld [vmem:[%s9146_s0 + $0x678] ss:$36 sps:$4 sm:$0xff]   ;;  %v6846_v44 = vld [vmem:[%s9146_s0 + $0x210] ss:$36 sps:$4 sm:$0xff]  }
  0xa2   :  { %2836 = vmatmul.mubr.bf16.gmra.mrb[48].mxu1 %v6743_v46  ;;  %v6849_v46 = vld [vmem:[%s9146_s0 + $0x25c] ss:$36 sps:$4 sm:$0xff]  }
  0xa3   :  { %3542 = vmatmul.mubr.bf16.gmra.mrb[48].mxu0 %v6747_v48  ;;  %2845 = vmatprep.mubr.bf16.mxu1 %v6751_v49  ;;  %v6855_v48 = vld [vmem:[%s9146_s0 + $0x258] ss:$36 sps:$4 sm:$0xff]   ;;  %v6859_v49 = vld [vmem:[%s9146_s0 + $0x70c] ss:$36 sps:$4 sm:$0xff]  }
  0xa4   :  { %3551 = vmatprep.mubr.bf16.mxu0 %v6753_v50  ;;  %v6861_v50 = vld [vmem:[%s9146_s0 + $0x2a4] ss:$36 sps:$4 sm:$0xff]  }
  0xaa   :  { %2846 = vmatmul.mubr.bf16.gmra.mrb[52].mxu1 %v6755_v53  ;;  %v6863_v53 = vld [vmem:[%s9146_s0 + $0x708] ss:$36 sps:$4 sm:$0xff]  }
  0xab   :  { %3552 = vmatmul.mubr.bf16.gmra.mrb[52].mxu0 %v6756_v54  ;;  %2855 = vmatprep.mubr.bf16.mxu1 %v6760_v55  ;;  %v6864_v54 = vld [vmem:[%s9146_s0 + $0x2a0] ss:$36 sps:$4 sm:$0xff]   ;;  %v6865_v55 = vld [vmem:[%s9146_s0 + $0x754] ss:$36 sps:$4 sm:$0xff]  }
  0xac   :  { %3561 = vmatprep.mubr.bf16.mxu0 %v6762_v56  ;;  %v6867_v56 = vld [vmem:[%s9146_s0 + $0x2ec] ss:$36 sps:$4 sm:$0xff]  }
  0xb2   :  { %2856 = vmatmul.mubr.bf16.gmra.mrb[56].mxu1 %v6764_v57  ;;  %v6869_v57 = vld [vmem:[%s9146_s0 + $0x750] ss:$36 sps:$4 sm:$0xff]  }
  0xb3   :  { %3562 = vmatmul.mubr.bf16.gmra.mrb[56].mxu0 %v6768_v58  ;;  %2865 = vmatprep.mubr.bf16.mxu1 %v6772_v59  ;;  %v6873_v58 = vld [vmem:[%s9146_s0 + $0x2e8] ss:$36 sps:$4 sm:$0xff]   ;;  %v6874_v59 = vld [vmem:[%s9146_s0 + $0x79c] ss:$36 sps:$4 sm:$0xff]  }
  0xb4   :  { %3571 = vmatprep.mubr.bf16.mxu0 %v6774_v60  ;;  %v6876_v60 = vld [vmem:[%s9146_s0 + $0x334] ss:$36 sps:$4 sm:$0xff]  }
  0xba   :  { %2866 = vmatmul.mubr.bf16.gmra.mrb[60].mxu1 %v6776_v63  ;;  %v6880_v63 = vld [vmem:[%s9146_s0 + $0x7e4] ss:$36 sps:$4 sm:$0xff]  }
  0xbb   :  { %3572 = vmatmul.mubr.bf16.gmra.mrb[60].mxu0 %v6777_v0  ;;  %2875 = vmatprep.mubr.bf16.mxu1 %v6781_v1  ;;  %v6882_v0 = vld [vmem:[%s9146_s0 + $0x37c] ss:$36 sps:$4 sm:$0xff]  }
  0xbc   :  { %3774 = vmatprep.mubr.bf16.mxu0 %v6785_v2  ;;  %v6884_v1 = vld [vmem:[%s9146_s0 + $0x7e0] ss:$36 sps:$4 sm:$0xff]   ;;  %v6888_v2 = vld [vmem:[%s9146_s0 + $0x378] ss:$36 sps:$4 sm:$0xff]  }
  0xc2   :  { %2876 = vmatmul.mubr.bf16.gmra.mrb[64].mxu1 %v6786_v5  ;;  %v7000_v5 = vld [vmem:[%s9145_s1 + $0x470] ss:$8 sps:$4 sm:$0xff]  }
  0xc3   :  { %3775 = vmatmul.mubr.bf16.vlgmr.msra.gmra.mrb[0].mxu0 %v6783_v4  ;;  %2885 = vmatprep.mubr.bf16.mxu1 %v6793_v7  ;;  %v6894_v4 = vld [vmem:[%s9146_s0 + $0x3c4] ss:$36 sps:$4 sm:$0xff]  }
  0xc4   :  { %4096 = vmatpush1.bf16.msra.mxu0 %v6790_v6  ;;  %3784 = vmatprep.mubr.bf16.mxu0 %v6795_v8  ;;  %v7002_v6 = vld [vmem:[%s9145_s1 + $0x474] ss:$8 sps:$4 sm:$0xff]   ;;  %v6896_v7 = vld [vmem:[%s9146_s0 + $0x828] ss:$36 sps:$4 sm:$0xff]   ;;  %v6897_v8 = vld [vmem:[%s9146_s0 + $0x3c0] ss:$36 sps:$4 sm:$0xff]  }
  0xc5   :  { %4097 = vmatprep.subr.bf16.mxu0 %v6825_v9  ;;  %v6898_v9 = vld [vmem:[%s9146_s0 + $0x874] ss:$36 sps:$4 sm:$0xff]  }
  0xc8   :  { %4098 = vmatpush1.bf16.msra.mxu0 %v6823_v10  ;;  %v6900_v10 = vld [vmem:[%s9146_s0 + $0x40c] ss:$36 sps:$4 sm:$0xff]  }
  0xc9   :  { %4099 = vmatprep.subr.bf16.mxu0 %v6858_v13  ;;  %v6907_v13 = vld [vmem:[%s9146_s0 + $0x8bc] ss:$36 sps:$4 sm:$0xff]  }
  0xca   :  { %2886 = vmatmul.mubr.bf16.gmra.mrb[68].mxu1 %v6797_v11  ;;  %v6902_v11 = vld [vmem:[%s9146_s0 + $0x870] ss:$36 sps:$4 sm:$0xff]  }
  0xcb   :  { %3785 = vmatmul.mubr.bf16.gmra.mrb[4].mxu0 %v6798_v12  ;;  %2895 = vmatprep.mubr.bf16.mxu1 %v6799_v14  ;;  %v6906_v12 = vld [vmem:[%s9146_s0 + $0x408] ss:$36 sps:$4 sm:$0xff]   ;;  %v6909_v14 = vld [vmem:[%s9146_s0 + $0x454] ss:$36 sps:$4 sm:$0xff]  }
  0xcc   :  { %3794 = vmatprep.mubr.bf16.mxu0 %v6801_v15  ;;  %4100 = vmatpush1.bf16.msra.mxu0 %v6856_v16  ;;  %v6911_v15 = vld [vmem:[%s9146_s0 + $0x8b8] ss:$36 sps:$4 sm:$0xff]   ;;  %v6912_v16 = vld [vmem:[%s9146_s0 + $0x450] ss:$36 sps:$4 sm:$0xff]  }
  0xcd   :  { %4101 = vmatprep.subr.bf16.mxu0 %v6891_v17  ;;  %v6915_v17 = vld [vmem:[%s9146_s0 + $0xc] ss:$36 sps:$4 sm:$0xff]  }
  0xd0   :  { %4102 = vmatpush1.bf16.msra.mxu0 %v6889_v18  ;;  %v6916_v18 = vld [vmem:[%s9146_s0 + $0x49c] ss:$36 sps:$4 sm:$0xff]  }
  0xd1   :  { %4103 = vmatprep.subr.bf16.mxu0 %v6921_v19  ;;  %v6913_v19 = vld [vmem:[%s9146_s0 + $0x8] ss:$36 sps:$4 sm:$0xff]  }
  0xd2   :  { %2896 = vmatmul.mubr.bf16.gmra.mrb[72].mxu1 %v6803_v20  ;;  %v6918_v20 = vld [vmem:[%s9146_s0 + $0x498] ss:$36 sps:$4 sm:$0xff]  }
  0xd3   :  { %3795 = vmatmul.mubr.bf16.gmra.mrb[8].mxu0 %v6807_v21  ;;  %2905 = vmatprep.mubr.bf16.mxu1 %v6808_v22  ;;  %v6922_v21 = vld [vmem:[%s9146_s0 + $0x54] ss:$36 sps:$4 sm:$0xff]   ;;  %v6924_v22 = vld [vmem:[%s9146_s0 + $0x4e4] ss:$36 sps:$4 sm:$0xff]  }
  0xd4   :  { %3804 = vmatprep.mubr.bf16.mxu0 %v6810_v23  ;;  %4104 = vmatpush1.bf16.msra.mxu0 %v6919_v24  ;;  %v7150_v23 = vld [vmem:[%s9145_s1 + $0x200] ss:$8 sps:$4 sm:$0xff]   ;;  %v7151_v24 = vld [vmem:[%s9145_s1 + $0x214] ss:$8 sps:$4 sm:$0xff]  }
  0xd5   :  { %4105 = vmatprep.subr.bf16.mxu0 %v6948_v34  ;;  %v6933_v34 = vld [vmem:[%s9146_s0 + $0x528] ss:$36 sps:$4 sm:$0xff]  }
  0xd8   :  { %4106 = vmatpush1.bf16.msra.mxu0 %v6946_v33  ;;  %v6932_v33 = vld [vmem:[%s9146_s0 + $0x98] ss:$36 sps:$4 sm:$0xff]  }
  0xd9   :  { %4107 = vmatprep.subr.bf16.mxu0 %v6975_v52  ;;  %v6951_v52 = vld [vmem:[%s9146_s0 + $0x604] ss:$36 sps:$4 sm:$0xff]  }
  0xda   :  { %2906 = vmatmul.mubr.bf16.gmra.mrb[76].mxu1 %v6812_v25  ;;  %v6926_v25 = vld [vmem:[%s9146_s0 + $0x50] ss:$36 sps:$4 sm:$0xff]  }
  0xdb   :  { %3805 = vmatmul.mubr.bf16.gmra.mrb[12].mxu0 %v6813_v26  ;;  %2915 = vmatprep.mubr.bf16.mxu1 %v6814_v27  ;;  %v6927_v26 = vld [vmem:[%s9146_s0 + $0x4e0] ss:$36 sps:$4 sm:$0xff]  }
  0xdc   :  { %3814 = vmatprep.mubr.bf16.mxu0 %v6816_v28  ;;  %4108 = vmatpush1.bf16.msra.mxu0 %v6973_v51  ;;  %v6928_v27 = vld [vmem:[%s9146_s0 + $0x9c] ss:$36 sps:$4 sm:$0xff]   ;;  %v6930_v28 = vld [vmem:[%s9146_s0 + $0x52c] ss:$36 sps:$4 sm:$0xff]   ;;  %v6949_v51 = vld [vmem:[%s9146_s0 + $0x174] ss:$36 sps:$4 sm:$0xff]  }
  0xdd   :  { %4109 = vmatprep.subr.bf16.mxu0 %v7002_v6  ;;  %v7173_v6 = vld [vmem:[%s9145_s1 + $0x2c4] ss:$8 sps:$4 sm:$0xff]  }
  0xe0   :  { %4110 = vmatpush1.bf16.msra.mxu0 %v7000_v5  ;;  %v7172_v5 = vld [vmem:[%s9145_s1 + $0x2b0] ss:$8 sps:$4 sm:$0xff]  }
  0xe2   :  { %2916 = vmatmul.mubr.bf16.gmra.mrb[80].mxu1 %v6818_v29  ;;  %v7152_v29 = vld [vmem:[%s9145_s1 + $0x210] ss:$8 sps:$4 sm:$0xff]  }
  0xe3   :  { %3815 = vmatmul.mubr.bf16.gmra.mrb[16].mxu0 %v6822_v30  ;;  %2925 = vmatprep.mubr.bf16.mxu1 %v6826_v31  ;;  %v7153_v30 = vld [vmem:[%s9145_s1 + $0x224] ss:$8 sps:$4 sm:$0xff]   ;;  %v7154_v31 = vld [vmem:[%s9145_s1 + $0x220] ss:$8 sps:$4 sm:$0xff]  }
  0xe4   :  { %3824 = vmatprep.mubr.bf16.mxu0 %v6828_v32  ;;  %v7155_v32 = vld [vmem:[%s9145_s1 + $0x234] ss:$8 sps:$4 sm:$0xff]  }
  0xea   :  { %2926 = vmatmul.mubr.bf16.gmra.mrb[84].mxu1 %v6830_v35  ;;  %v6934_v35 = vld [vmem:[%s9146_s0 + $0xe4] ss:$36 sps:$4 sm:$0xff]  }
  0xeb   :  { %3825 = vmatmul.mubr.bf16.gmra.mrb[20].mxu0 %v6831_v36  ;;  %2935 = vmatprep.mubr.bf16.mxu1 %v6832_v37  ;;  %v6936_v36 = vld [vmem:[%s9146_s0 + $0x574] ss:$36 sps:$4 sm:$0xff]  }
  0xec   :  { %3834 = vmatprep.mubr.bf16.mxu0 %v6834_v38  ;;  %v7156_v37 = vld [vmem:[%s9145_s1 + $0x230] ss:$8 sps:$4 sm:$0xff]   ;;  %v7157_v38 = vld [vmem:[%s9145_s1 + $0x244] ss:$8 sps:$4 sm:$0xff]  }
  0xf2   :  { %2936 = vmatmul.mubr.bf16.gmra.mrb[88].mxu1 %v6836_v39  ;;  %v7158_v39 = vld [vmem:[%s9145_s1 + $0x240] ss:$8 sps:$4 sm:$0xff]  }
  0xf3   :  { %3835 = vmatmul.mubr.bf16.gmra.mrb[24].mxu0 %v6840_v40  ;;  %2945 = vmatprep.mubr.bf16.mxu1 %v6841_v41  ;;  %v7159_v40 = vld [vmem:[%s9145_s1 + $0x254] ss:$8 sps:$4 sm:$0xff]   ;;  %v6938_v41 = vld [vmem:[%s9146_s0 + $0xe0] ss:$36 sps:$4 sm:$0xff]  }
  0xf4   :  { %3844 = vmatprep.mubr.bf16.mxu0 %v6843_v42  ;;  %v6939_v42 = vld [vmem:[%s9146_s0 + $0x570] ss:$36 sps:$4 sm:$0xff]  }
  0xfa   :  { %2946 = vmatmul.mubr.bf16.gmra.mrb[92].mxu1 %v6845_v43  ;;  %v6940_v43 = vld [vmem:[%s9146_s0 + $0x12c] ss:$36 sps:$4 sm:$0xff]  }
  0xfb   :  { %3845 = vmatmul.mubr.bf16.gmra.mrb[28].mxu0 %v6846_v44  ;;  %2955 = vmatprep.mubr.bf16.mxu1 %v6847_v45  ;;  %v6942_v44 = vld [vmem:[%s9146_s0 + $0x5bc] ss:$36 sps:$4 sm:$0xff]   ;;  %v7160_v45 = vld [vmem:[%s9145_s1 + $0x250] ss:$8 sps:$4 sm:$0xff]  }
  0xfc   :  { %3854 = vmatprep.mubr.bf16.mxu0 %v6849_v46  ;;  %v7161_v46 = vld [vmem:[%s9145_s1 + $0x264] ss:$8 sps:$4 sm:$0xff]  }
 0x102   :  { %2956 = vmatmul.mubr.bf16.gmra.mrb[96].mxu1 %v6851_v47  ;;  %v7162_v47 = vld [vmem:[%s9145_s1 + $0x260] ss:$8 sps:$4 sm:$0xff]  }
 0x103   :  { %3855 = vmatmul.mubr.bf16.gmra.mrb[32].mxu0 %v6855_v48  ;;  %2965 = vmatprep.mubr.bf16.mxu1 %v6859_v49  ;;  %v7163_v48 = vld [vmem:[%s9145_s1 + $0x274] ss:$8 sps:$4 sm:$0xff]   ;;  %v6944_v49 = vld [vmem:[%s9146_s0 + $0x128] ss:$36 sps:$4 sm:$0xff]  }
 0x104   :  { %3864 = vmatprep.mubr.bf16.mxu0 %v6861_v50  ;;  %v6945_v50 = vld [vmem:[%s9146_s0 + $0x5b8] ss:$36 sps:$4 sm:$0xff]  }
 0x10a   :  { %2966 = vmatmul.mubr.bf16.gmra.mrb[100].mxu1 %v6863_v53  ;;  %v7164_v53 = vld [vmem:[%s9145_s1 + $0x270] ss:$8 sps:$4 sm:$0xff]  }
 0x10b   :  { %3865 = vmatmul.mubr.bf16.gmra.mrb[36].mxu0 %v6864_v54  ;;  %2975 = vmatprep.mubr.bf16.mxu1 %v6865_v55  ;;  %v7165_v54 = vld [vmem:[%s9145_s1 + $0x284] ss:$8 sps:$4 sm:$0xff]   ;;  %v7166_v55 = vld [vmem:[%s9145_s1 + $0x280] ss:$8 sps:$4 sm:$0xff]  }
 0x10c   :  { %3874 = vmatprep.mubr.bf16.mxu0 %v6867_v56  ;;  %v7167_v56 = vld [vmem:[%s9145_s1 + $0x294] ss:$8 sps:$4 sm:$0xff]  }
 0x112   :  { %2976 = vmatmul.mubr.bf16.gmra.mrb[104].mxu1 %v6869_v57  ;;  %v6953_v57 = vld [vmem:[%s9146_s0 + $0x170] ss:$36 sps:$4 sm:$0xff]  }
 0x113   :  { %3875 = vmatmul.mubr.bf16.gmra.mrb[40].mxu0 %v6873_v58  ;;  %2985 = vmatprep.mubr.bf16.mxu1 %v6874_v59  ;;  %v6954_v58 = vld [vmem:[%s9146_s0 + $0x600] ss:$36 sps:$4 sm:$0xff]  }
 0x114   :  { %3884 = vmatprep.mubr.bf16.mxu0 %v6876_v60  ;;  %v6955_v59 = vld [vmem:[%s9146_s0 + $0x1bc] ss:$36 sps:$4 sm:$0xff]   ;;  %v6957_v60 = vld [vmem:[%s9146_s0 + $0x64c] ss:$36 sps:$4 sm:$0xff]  }
 0x11a   :  { %2986 = vmatmul.mubr.bf16.gmra.mrb[108].mxu1 %v6878_v61  ;;  %v7168_v61 = vld [vmem:[%s9145_s1 + $0x290] ss:$8 sps:$4 sm:$0xff]  }
 0x11b   :  { %3885 = vmatmul.mubr.bf16.gmra.mrb[44].mxu0 %v6879_v62  ;;  %2995 = vmatprep.mubr.bf16.mxu1 %v6880_v63  ;;  %v7169_v62 = vld [vmem:[%s9145_s1 + $0x2a4] ss:$8 sps:$4 sm:$0xff]   ;;  %v7170_v63 = vld [vmem:[%s9145_s1 + $0x2a0] ss:$8 sps:$4 sm:$0xff]  }
 0x11c   :  { %3894 = vmatprep.mubr.bf16.mxu0 %v6882_v0  ;;  %v7171_v0 = vld [vmem:[%s9145_s1 + $0x2b4] ss:$8 sps:$4 sm:$0xff]  }
 0x122   :  { %2996 = vmatmul.mubr.bf16.gmra.mrb[112].mxu1 %v6884_v1  ;;  %v6959_v1 = vld [vmem:[%s9146_s0 + $0x1b8] ss:$36 sps:$4 sm:$0xff]  }
 0x123   :  { %3895 = vmatmul.mubr.bf16.gmra.mrb[48].mxu0 %v6888_v2  ;;  %3005 = vmatprep.mubr.bf16.mxu1 %v6892_v3  ;;  %v6960_v2 = vld [vmem:[%s9146_s0 + $0x648] ss:$36 sps:$4 sm:$0xff]  }
 0x124   :  { %3904 = vmatprep.mubr.bf16.mxu0 %v6894_v4  ;;  %v6961_v3 = vld [vmem:[%s9146_s0 + $0x204] ss:$36 sps:$4 sm:$0xff]   ;;  %v6963_v4 = vld [vmem:[%s9146_s0 + $0x694] ss:$36 sps:$4 sm:$0xff]  }
 0x12a   :  { %3006 = vmatmul.mubr.bf16.gmra.mrb[116].mxu1 %v6896_v7  ;;  %v7174_v7 = vld [vmem:[%s9145_s1 + $0x2c0] ss:$8 sps:$4 sm:$0xff]  }
 0x12b   :  { %3905 = vmatmul.mubr.bf16.gmra.mrb[52].mxu0 %v6897_v8  ;;  %3015 = vmatprep.mubr.bf16.mxu1 %v6898_v9  ;;  %v7175_v8 = vld [vmem:[%s9145_s1 + $0x2d4] ss:$8 sps:$4 sm:$0xff]   ;;  %v6965_v9 = vld [vmem:[%s9146_s0 + $0x200] ss:$36 sps:$4 sm:$0xff]  }
 0x12c   :  { %3914 = vmatprep.mubr.bf16.mxu0 %v6900_v10  ;;  %v6966_v10 = vld [vmem:[%s9146_s0 + $0x690] ss:$36 sps:$4 sm:$0xff]  }
 0x132   :  { %3016 = vmatmul.mubr.bf16.gmra.mrb[120].mxu1 %v6902_v11  ;;  %v6967_v11 = vld [vmem:[%s9146_s0 + $0x24c] ss:$36 sps:$4 sm:$0xff]  }
 0x133   :  { %3915 = vmatmul.mubr.bf16.gmra.mrb[56].mxu0 %v6906_v12  ;;  %3025 = vmatprep.mubr.bf16.mxu1 %v6907_v13  ;;  %v6969_v12 = vld [vmem:[%s9146_s0 + $0x6dc] ss:$36 sps:$4 sm:$0xff]   ;;  %v7176_v13 = vld [vmem:[%s9145_s1 + $0x2d0] ss:$8 sps:$4 sm:$0xff]  }
 0x134   :  { %3924 = vmatprep.mubr.bf16.mxu0 %v6909_v14  ;;  %v7177_v14 = vld [vmem:[%s9145_s1 + $0x2e4] ss:$8 sps:$4 sm:$0xff]  }
 0x13a   :  { %3026 = vmatmul.mubr.bf16.gmra.mrb[124].mxu1 %v6911_v15  ;;  %v7178_v15 = vld [vmem:[%s9145_s1 + $0x2e0] ss:$8 sps:$4 sm:$0xff]  }
 0x13b   :  { %3925 = vmatmul.mubr.bf16.gmra.mrb[60].mxu0 %v6912_v16  ;;  %3068 = vmatprep.mubr.bf16.mxu1 %v6915_v17  ;;  %v7179_v16 = vld [vmem:[%s9145_s1 + $0x2f4] ss:$8 sps:$4 sm:$0xff]   ;;  %v6971_v17 = vld [vmem:[%s9146_s0 + $0x248] ss:$36 sps:$4 sm:$0xff]  }
 0x13c   :  { %3934 = vmatprep.mubr.bf16.mxu0 %v6916_v18  ;;  %v6972_v18 = vld [vmem:[%s9146_s0 + $0x6d8] ss:$36 sps:$4 sm:$0xff]  }
 0x142   :  { %3069 = vmatmul.mubr.bf16.vlgmr.msra.gmra.mrb[0].mxu1 %v6913_v19  ;;  %v6976_v19 = vld [vmem:[%s9146_s0 + $0x294] ss:$36 sps:$4 sm:$0xff]  }
 0x143   :  { %3935 = vmatmul.mubr.bf16.gmra.mrb[64].mxu0 %v6918_v20  ;;  %5860 = vmatpush1.bf16.msra.mxu1 %v7150_v23  ;;  %v6978_v20 = vld [vmem:[%s9146_s0 + $0x724] ss:$36 sps:$4 sm:$0xff]  }
 0x144   :  { %3078 = vmatprep.mubr.bf16.mxu1 %v6922_v21  ;;  %3944 = vmatprep.mubr.bf16.mxu0 %v6924_v22  ;;  %v7180_v21 = vld [vmem:[%s9145_s1 + $0x2f0] ss:$8 sps:$4 sm:$0xff]   ;;  %v6981_v23 = vld [vmem:[%s9146_s0 + $0x720] ss:$36 sps:$4 sm:$0xff]  }
 0x145   :  { %5845 = vmatprep.subr.bf16.mxu1 %v7151_v24  ;;  %v6980_v22 = vld [vmem:[%s9146_s0 + $0x290] ss:$36 sps:$4 sm:$0xff]   ;;  %v6982_v24 = vld [vmem:[%s9146_s0 + $0x2dc] ss:$36 sps:$4 sm:$0xff]  }
 0x147   :  { %5861 = vmatpush1.bf16.msra.mxu1 %v7152_v29  ;;  %v6990_v29 = vld [vmem:[%s9146_s0 + $0x7b4] ss:$36 sps:$4 sm:$0xff]  }
 0x148   :  { %5846 = vmatprep.subr.bf16.mxu1 %v7153_v30  ;;  %v6992_v30 = vld [vmem:[%s9146_s0 + $0x320] ss:$36 sps:$4 sm:$0xff]  }
 0x14a   :  { %3079 = vmatmul.mubr.bf16.gmra.mrb[4].mxu1 %v6926_v25  ;;  %v6984_v25 = vld [vmem:[%s9146_s0 + $0x76c] ss:$36 sps:$4 sm:$0xff]  }
 0x14b   :  { %3945 = vmatmul.mubr.bf16.gmra.mrb[68].mxu0 %v6927_v26  ;;  %3088 = vmatprep.mubr.bf16.mxu1 %v6928_v27  ;;  %v6986_v26 = vld [vmem:[%s9146_s0 + $0x2d8] ss:$36 sps:$4 sm:$0xff]   ;;  %v6987_v27 = vld [vmem:[%s9146_s0 + $0x768] ss:$36 sps:$4 sm:$0xff]  }
 0x14c   :  { %3954 = vmatprep.mubr.bf16.mxu0 %v6930_v28  ;;  %5862 = vmatpush1.bf16.msra.mxu1 %v7154_v31  ;;  %v6988_v28 = vld [vmem:[%s9146_s0 + $0x324] ss:$36 sps:$4 sm:$0xff]   ;;  %v6993_v31 = vld [vmem:[%s9146_s0 + $0x7b0] ss:$36 sps:$4 sm:$0xff]  }
 0x14d   :  { %5847 = vmatprep.subr.bf16.mxu1 %v7155_v32  ;;  %v6994_v32 = vld [vmem:[%s9146_s0 + $0x36c] ss:$36 sps:$4 sm:$0xff]  }
 0x150   :  { %5863 = vmatpush1.bf16.msra.mxu1 %v7156_v37  ;;  %v7005_v37 = vld [vmem:[%s9146_s0 + $0x844] ss:$36 sps:$4 sm:$0xff]  }
 0x151   :  { %5848 = vmatprep.subr.bf16.mxu1 %v7157_v38  ;;  %v7007_v38 = vld [vmem:[%s9146_s0 + $0x3b0] ss:$36 sps:$4 sm:$0xff]  }
 0x152   :  { %3089 = vmatmul.mubr.bf16.gmra.mrb[8].mxu1 %v6932_v33  ;;  %v6996_v33 = vld [vmem:[%s9146_s0 + $0x7fc] ss:$36 sps:$4 sm:$0xff]  }
 0x153   :  { %3955 = vmatmul.mubr.bf16.gmra.mrb[72].mxu0 %v6933_v34  ;;  %3098 = vmatprep.mubr.bf16.mxu1 %v6934_v35  ;;  %v6998_v34 = vld [vmem:[%s9146_s0 + $0x368] ss:$36 sps:$4 sm:$0xff]   ;;  %v6999_v35 = vld [vmem:[%s9146_s0 + $0x7f8] ss:$36 sps:$4 sm:$0xff]  }
 0x154   :  { %3964 = vmatprep.mubr.bf16.mxu0 %v6936_v36  ;;  %5864 = vmatpush1.bf16.msra.mxu1 %v7158_v39  ;;  %v7003_v36 = vld [vmem:[%s9146_s0 + $0x3b4] ss:$36 sps:$4 sm:$0xff]   ;;  %v7008_v39 = vld [vmem:[%s9146_s0 + $0x840] ss:$36 sps:$4 sm:$0xff]  }
 0x155   :  { %5849 = vmatprep.subr.bf16.mxu1 %v7159_v40  ;;  %v7009_v40 = vld [vmem:[%s9146_s0 + $0x3fc] ss:$36 sps:$4 sm:$0xff]  }
 0x158   :  { %5865 = vmatpush1.bf16.msra.mxu1 %v7160_v45  ;;  %v7017_v45 = vld [vmem:[%s9146_s0 + $0x8d4] ss:$36 sps:$4 sm:$0xff]  }
 0x159   :  { %5850 = vmatprep.subr.bf16.mxu1 %v7161_v46  ;;  %v7019_v46 = vld [vmem:[%s9146_s0 + $0x440] ss:$36 sps:$4 sm:$0xff]  }
 0x15a   :  { %3099 = vmatmul.mubr.bf16.gmra.mrb[12].mxu1 %v6938_v41  ;;  %v7011_v41 = vld [vmem:[%s9146_s0 + $0x88c] ss:$36 sps:$4 sm:$0xff]  }
 0x15b   :  { %3965 = vmatmul.mubr.bf16.gmra.mrb[76].mxu0 %v6939_v42  ;;  %3108 = vmatprep.mubr.bf16.mxu1 %v6940_v43  ;;  %v7013_v42 = vld [vmem:[%s9146_s0 + $0x3f8] ss:$36 sps:$4 sm:$0xff]   ;;  %v7014_v43 = vld [vmem:[%s9146_s0 + $0x888] ss:$36 sps:$4 sm:$0xff]  }
 0x15c   :  { %3974 = vmatprep.mubr.bf16.mxu0 %v6942_v44  ;;  %5866 = vmatpush1.bf16.msra.mxu1 %v7162_v47  ;;  %v7015_v44 = vld [vmem:[%s9146_s0 + $0x444] ss:$36 sps:$4 sm:$0xff]   ;;  %v7020_v47 = vld [vmem:[%s9146_s0 + $0x8d0] ss:$36 sps:$4 sm:$0xff]  }
 0x15d   :  { %5851 = vmatprep.subr.bf16.mxu1 %v7163_v48  ;;  %v7021_v48 = vld [vmem:[%s9146_s0 + $0x48c] ss:$36 sps:$4 sm:$0xff]  }
 0x160   :  { %5867 = vmatpush1.bf16.msra.mxu1 %v7164_v53  ;;  %v7027_v53 = vld [vmem:[%s9146_s0 + $0x4d0] ss:$36 sps:$4 sm:$0xff]  }
 0x161   :  { %5852 = vmatprep.subr.bf16.mxu1 %v7165_v54  ;;  %v7028_v54 = vld [vmem:[%s9146_s0 + $0x68] ss:$36 sps:$4 sm:$0xff]  }
 0x162   :  { %3109 = vmatmul.mubr.bf16.gmra.mrb[16].mxu1 %v6944_v49  ;;  %v9149_v49 = vmov 0  }
 0x163   :  { %3975 = vmatmul.mubr.bf16.gmra.mrb[80].mxu0 %v6945_v50  ;;  %3118 = vmatprep.mubr.bf16.mxu1 %v6949_v51  ;;  %v7023_v50 = vld [vmem:[%s9146_s0 + $0x488] ss:$36 sps:$4 sm:$0xff]   ;;  %v7024_v51 = vld [vmem:[%s9146_s0 + $0x20] ss:$36 sps:$4 sm:$0xff]  }
 0x164   :  { %3984 = vmatprep.mubr.bf16.mxu0 %v6951_v52  ;;  %5868 = vmatpush1.bf16.msra.mxu1 %v7166_v55  ;;  %v7025_v52 = vld [vmem:[%s9146_s0 + $0x4d4] ss:$36 sps:$4 sm:$0xff]   ;;  %v7029_v55 = vld [vmem:[%s9146_s0 + $0x51c] ss:$36 sps:$4 sm:$0xff]  }
 0x165   :  { %5853 = vmatprep.subr.bf16.mxu1 %v7167_v56  ;;  %v7031_v56 = vld [vmem:[%s9146_s0 + $0x518] ss:$36 sps:$4 sm:$0xff]  }
 0x168   :  { %5869 = vmatpush1.bf16.msra.mxu1 %v7168_v61  ;;  %v7037_v61 = vld [vmem:[%s9146_s0 + $0x5ac] ss:$36 sps:$4 sm:$0xff]  }
 0x169   :  { %5854 = vmatprep.subr.bf16.mxu1 %v7169_v62  ;;  %v7039_v62 = vld [vmem:[%s9146_s0 + $0x5a8] ss:$36 sps:$4 sm:$0xff]  }
 0x16a   :  { %3119 = vmatmul.mubr.bf16.gmra.mrb[20].mxu1 %v6953_v57  ;;  %v7032_v57 = vld [vmem:[%s9146_s0 + $0xb0] ss:$36 sps:$4 sm:$0xff]  }
 0x16b   :  { %3985 = vmatmul.mubr.bf16.gmra.mrb[84].mxu0 %v6954_v58  ;;  %3128 = vmatprep.mubr.bf16.mxu1 %v6955_v59  ;;  %v7033_v58 = vld [vmem:[%s9146_s0 + $0x564] ss:$36 sps:$4 sm:$0xff]  }
 0x16c   :  { %3994 = vmatprep.mubr.bf16.mxu0 %v6957_v60  ;;  %5870 = vmatpush1.bf16.msra.mxu1 %v7170_v63  ;;  %v7035_v59 = vld [vmem:[%s9146_s0 + $0x560] ss:$36 sps:$4 sm:$0xff]   ;;  %v7036_v60 = vld [vmem:[%s9146_s0 + $0xf8] ss:$36 sps:$4 sm:$0xff]  }
 0x16d   :  { %5855 = vmatprep.subr.bf16.mxu1 %v7171_v0  ;;  %v7040_v63 = vld [vmem:[%s9146_s0 + $0x140] ss:$36 sps:$4 sm:$0xff]   ;;  %v7041_v0 = vld [vmem:[%s9146_s0 + $0x5f4] ss:$36 sps:$4 sm:$0xff]  }
 0x170   :  { %5871 = vmatpush1.bf16.msra.mxu1 %v7172_v5  ;;  %v7048_v5 = vld [vmem:[%s9146_s0 + $0x1d0] ss:$36 sps:$4 sm:$0xff]  }
 0x171   :  { %5856 = vmatprep.subr.bf16.mxu1 %v7173_v6  ;;  %v7049_v6 = vld [vmem:[%s9146_s0 + $0x684] ss:$36 sps:$4 sm:$0xff]  }
 0x172   :  { %3129 = vmatmul.mubr.bf16.gmra.mrb[24].mxu1 %v6959_v1  ;;  %v7043_v1 = vld [vmem:[%s9146_s0 + $0x5f0] ss:$36 sps:$4 sm:$0xff]  }
 0x173   :  { %3995 = vmatmul.mubr.bf16.gmra.mrb[88].mxu0 %v6960_v2  ;;  %3138 = vmatprep.mubr.bf16.mxu1 %v6961_v3  ;;  %v7044_v2 = vld [vmem:[%s9146_s0 + $0x188] ss:$36 sps:$4 sm:$0xff]   ;;  %v7045_v3 = vld [vmem:[%s9146_s0 + $0x63c] ss:$36 sps:$4 sm:$0xff]  }
 0x174   :  { %4004 = vmatprep.mubr.bf16.mxu0 %v6963_v4  ;;  %5872 = vmatpush1.bf16.msra.mxu1 %v7174_v7  ;;  %v7047_v4 = vld [vmem:[%s9146_s0 + $0x638] ss:$36 sps:$4 sm:$0xff]   ;;  %v7051_v7 = vld [vmem:[%s9146_s0 + $0x680] ss:$36 sps:$4 sm:$0xff]  }
 0x175   :  { %5857 = vmatprep.subr.bf16.mxu1 %v7175_v8  ;;  %v7052_v8 = vld [vmem:[%s9146_s0 + $0x218] ss:$36 sps:$4 sm:$0xff]  }
 0x178   :  { %5873 = vmatpush1.bf16.msra.mxu1 %v7176_v13  ;;  %v7059_v13 = vld [vmem:[%s9146_s0 + $0x710] ss:$36 sps:$4 sm:$0xff]  }
 0x179   :  { %5858 = vmatprep.subr.bf16.mxu1 %v7177_v14  ;;  %v7060_v14 = vld [vmem:[%s9146_s0 + $0x2a8] ss:$36 sps:$4 sm:$0xff]  }
 0x17a   :  { %3139 = vmatmul.mubr.bf16.gmra.mrb[28].mxu1 %v6965_v9  ;;  %v7053_v9 = vld [vmem:[%s9146_s0 + $0x6cc] ss:$36 sps:$4 sm:$0xff]  }
 0x17b   :  { %4005 = vmatmul.mubr.bf16.gmra.mrb[92].mxu0 %v6966_v10  ;;  %3148 = vmatprep.mubr.bf16.mxu1 %v6967_v11  ;;  %v7055_v10 = vld [vmem:[%s9146_s0 + $0x6c8] ss:$36 sps:$4 sm:$0xff]   ;;  %v7056_v11 = vld [vmem:[%s9146_s0 + $0x260] ss:$36 sps:$4 sm:$0xff]  }
 0x17c   :  { %4014 = vmatprep.mubr.bf16.mxu0 %v6969_v12  ;;  %5874 = vmatpush1.bf16.msra.mxu1 %v7178_v15  ;;  %v7057_v12 = vld [vmem:[%s9146_s0 + $0x714] ss:$36 sps:$4 sm:$0xff]   ;;  %v7061_v15 = vld [vmem:[%s9146_s0 + $0x75c] ss:$36 sps:$4 sm:$0xff]  }
 0x17d   :  { %5859 = vmatprep.subr.bf16.mxu1 %v7179_v16  ;;  %v7063_v16 = vld [vmem:[%s9146_s0 + $0x758] ss:$36 sps:$4 sm:$0xff]  }
 0x180   :  { %5875 = vmatpush1.bf16.msra.mxu1 %v7180_v21  ;;  %v7067_v21 = vld [vmem:[%s9146_s0 + $0x7a0] ss:$36 sps:$4 sm:$0xff]  }
 0x182   :  { %3149 = vmatmul.mubr.bf16.gmra.mrb[32].mxu1 %v6971_v17  ;;  %v7064_v17 = vld [vmem:[%s9146_s0 + $0x2f0] ss:$36 sps:$4 sm:$0xff]  }
 0x183   :  { %4015 = vmatmul.mubr.bf16.gmra.mrb[96].mxu0 %v6972_v18  ;;  %3158 = vmatprep.mubr.bf16.mxu1 %v6976_v19  ;;  %v7065_v18 = vld [vmem:[%s9146_s0 + $0x7a4] ss:$36 sps:$4 sm:$0xff]  }
 0x184   :  { %4024 = vmatprep.mubr.bf16.mxu0 %v6978_v20 }
 0x18a   :  { %3159 = vmatmul.mubr.bf16.gmra.mrb[36].mxu1 %v6980_v22  ;;  %v7068_v22 = vld [vmem:[%s9146_s0 + $0x338] ss:$36 sps:$4 sm:$0xff]  }
 0x18b   :  { %4025 = vmatmul.mubr.bf16.gmra.mrb[100].mxu0 %v6981_v23  ;;  %3168 = vmatprep.mubr.bf16.mxu1 %v6982_v24  ;;  %v7069_v24 = vld [vmem:[%s9146_s0 + $0x7ec] ss:$36 sps:$4 sm:$0xff]  }
 0x18c   :  { %4034 = vmatprep.mubr.bf16.mxu0 %v6984_v25 }
 0x192   :  { %3169 = vmatmul.mubr.bf16.gmra.mrb[40].mxu1 %v6986_v26 }
 0x193   :  { %4035 = vmatmul.mubr.bf16.gmra.mrb[104].mxu0 %v6987_v27  ;;  %3178 = vmatprep.mubr.bf16.mxu1 %v6988_v28  ;;  %v7071_v28 = vld [vmem:[%s9146_s0 + $0x7e8] ss:$36 sps:$4 sm:$0xff]  }
 0x194   :  { %4044 = vmatprep.mubr.bf16.mxu0 %v6990_v29  ;;  %v7072_v29 = vld [vmem:[%s9146_s0 + $0x380] ss:$36 sps:$4 sm:$0xff]  }
 0x19a   :  { %3179 = vmatmul.mubr.bf16.gmra.mrb[44].mxu1 %v6992_v30 }
 0x19b   :  { %4045 = vmatmul.mubr.bf16.gmra.mrb[108].mxu0 %v6993_v31  ;;  %3188 = vmatprep.mubr.bf16.mxu1 %v6994_v32  ;;  %v7073_v31 = vld [vmem:[%s9146_s0 + $0x834] ss:$36 sps:$4 sm:$0xff]  }
 0x19c   :  { %4054 = vmatprep.mubr.bf16.mxu0 %v6996_v33 }
 0x1a2   :  { %3189 = vmatmul.mubr.bf16.gmra.mrb[48].mxu1 %v6998_v34 }
 0x1a3   :  { %4055 = vmatmul.mubr.bf16.gmra.mrb[112].mxu0 %v6999_v35  ;;  %3198 = vmatprep.mubr.bf16.mxu1 %v7003_v36  ;;  %v7075_v35 = vld [vmem:[%s9146_s0 + $0x830] ss:$36 sps:$4 sm:$0xff]   ;;  %v7076_v36 = vld [vmem:[%s9146_s0 + $0x3c8] ss:$36 sps:$4 sm:$0xff]  }
 0x1a4   :  { %4064 = vmatprep.mubr.bf16.mxu0 %v7005_v37 }
 0x1aa   :  { %3199 = vmatmul.mubr.bf16.gmra.mrb[52].mxu1 %v7007_v38  ;;  %v7077_v38 = vld [vmem:[%s9146_s0 + $0x87c] ss:$36 sps:$4 sm:$0xff]  }
 0x1ab   :  { %4065 = vmatmul.mubr.bf16.gmra.mrb[116].mxu0 %v7008_v39  ;;  %3208 = vmatprep.mubr.bf16.mxu1 %v7009_v40 }
 0x1ac   :  { %4074 = vmatprep.mubr.bf16.mxu0 %v7011_v41 }
 0x1b2   :  { %3209 = vmatmul.mubr.bf16.gmra.mrb[56].mxu1 %v7013_v42  ;;  %v7079_v42 = vld [vmem:[%s9146_s0 + $0x878] ss:$36 sps:$4 sm:$0xff]  }
 0x1b3   :  { %4075 = vmatmul.mubr.bf16.gmra.mrb[120].mxu0 %v7014_v43  ;;  %3218 = vmatprep.mubr.bf16.mxu1 %v7015_v44  ;;  %v7080_v43 = vld [vmem:[%s9146_s0 + $0x410] ss:$36 sps:$4 sm:$0xff]  }
 0x1b4   :  { %4084 = vmatprep.mubr.bf16.mxu0 %v7017_v45  ;;  %v7081_v45 = vld [vmem:[%s9146_s0 + $0x8c4] ss:$36 sps:$4 sm:$0xff]  }
 0x1ba   :  { %3219 = vmatmul.mubr.bf16.gmra.mrb[60].mxu1 %v7019_v46 }
 0x1bb   :  { %4085 = vmatmul.mubr.bf16.gmra.mrb[124].mxu0 %v7020_v47  ;;  %3228 = vmatprep.mubr.bf16.mxu1 %v7021_v48 }
 0x1bc   :  { %4127 = vmatprep.mubr.bf16.mxu0 %v9149_v49 }
 0x1c2   :  { %3229 = vmatmul.mubr.bf16.gmra.mrb[64].mxu1 %v7023_v50  ;;  %v7083_v50 = vld [vmem:[%s9146_s0 + $0x8c0] ss:$36 sps:$4 sm:$0xff]  }
 0x1c3   :  { %4128 = vmatmul.mubr.bf16.vlgmr.msra.gmra.mrb[0].mxu0 %v7024_v51  ;;  %3238 = vmatprep.mubr.bf16.mxu1 %v7025_v52  ;;  %v7084_v51 = vld [vmem:[%s9146_s0 + $0x458] ss:$36 sps:$4 sm:$0xff]  }
 0x1c4   :  { %4137 = vmatprep.mubr.bf16.mxu0 %v9149_v49 }
 0x1ca   :  { %3239 = vmatmul.mubr.bf16.gmra.mrb[68].mxu1 %v7027_v53  ;;  %v7087_v53 = vld [vmem:[%s9146_s0 + $0x494] ss:$36 sps:$4 sm:$0xff]  }
 0x1cb   :  { %4138 = vmatmul.mubr.bf16.gmra.mrb[4].mxu0 %v7028_v54  ;;  %3248 = vmatprep.mubr.bf16.mxu1 %v7029_v55 }
 0x1cc   :  { %4147 = vmatprep.mubr.bf16.mxu0 %v9149_v49 }
 0x1d2   :  { %3249 = vmatmul.mubr.bf16.gmra.mrb[72].mxu1 %v7031_v56 }
 0x1d3   :  { %4148 = vmatmul.mubr.bf16.gmra.mrb[8].mxu0 %v7032_v57  ;;  %3258 = vmatprep.mubr.bf16.mxu1 %v7033_v58  ;;  %v7085_v57 = vld [vmem:[%s9146_s0 + $0x490] ss:$36 sps:$4 sm:$0xff]   ;;  %v7088_v58 = vld [vmem:[%s9146_s0 + $0x4a0] ss:$36 sps:$4 sm:$0xff]  }
 0x1d4   :  { %4157 = vmatprep.mubr.bf16.mxu0 %v9149_v49 }
 0x1da   :  { %3259 = vmatmul.mubr.bf16.gmra.mrb[76].mxu1 %v7035_v59 }
 0x1db   :  { %4158 = vmatmul.mubr.bf16.gmra.mrb[12].mxu0 %v7036_v60  ;;  %3268 = vmatprep.mubr.bf16.mxu1 %v7037_v61  ;;  %v7089_v60 = vld [vmem:[%s9146_s0 + $0x4dc] ss:$36 sps:$4 sm:$0xff]  }
 0x1dc   :  { %4167 = vmatprep.mubr.bf16.mxu0 %v9149_v49 }
 0x1e2   :  { %3269 = vmatmul.mubr.bf16.gmra.mrb[80].mxu1 %v7039_v62 }
 0x1e3   :  { %4168 = vmatmul.mubr.bf16.gmra.mrb[16].mxu0 %v7040_v63  ;;  %3278 = vmatprep.mubr.bf16.mxu1 %v7041_v0  ;;  %v7091_v0 = vld [vmem:[%s9146_s0 + $0x4d8] ss:$36 sps:$4 sm:$0xff]  }
 0x1e4   :  { %4177 = vmatprep.mubr.bf16.mxu0 %v9149_v49 }
 0x1ea   :  { %3279 = vmatmul.mubr.bf16.gmra.mrb[84].mxu1 %v7043_v1  ;;  %v7092_v1 = vld [vmem:[%s9146_s0 + $0x4e8] ss:$36 sps:$4 sm:$0xff]  }
 0x1eb   :  { %4178 = vmatmul.mubr.bf16.gmra.mrb[20].mxu0 %v7044_v2  ;;  %3288 = vmatprep.mubr.bf16.mxu1 %v7045_v3  ;;  %v7093_v3 = vld [vmem:[%s9146_s0 + $0x524] ss:$36 sps:$4 sm:$0xff]  }
 0x1ec   :  { %4187 = vmatprep.mubr.bf16.mxu0 %v9149_v49 }
 0x1f2   :  { %3289 = vmatmul.mubr.bf16.gmra.mrb[88].mxu1 %v7047_v4 }
 0x1f3   :  { %4188 = vmatmul.mubr.bf16.gmra.mrb[24].mxu0 %v7048_v5  ;;  %3298 = vmatprep.mubr.bf16.mxu1 %v7049_v6 }
 0x1f4   :  { %4197 = vmatprep.mubr.bf16.mxu0 %v9149_v49 }
 0x1fa   :  { %3299 = vmatmul.mubr.bf16.gmra.mrb[92].mxu1 %v7051_v7  ;;  %v7095_v7 = vld [vmem:[%s9146_s0 + $0x520] ss:$36 sps:$4 sm:$0xff]  }
 0x1fb   :  { %4198 = vmatmul.mubr.bf16.gmra.mrb[28].mxu0 %v7052_v8  ;;  %3308 = vmatprep.mubr.bf16.mxu1 %v7053_v9  ;;  %v7096_v8 = vld [vmem:[%s9146_s0 + $0x530] ss:$36 sps:$4 sm:$0xff]  }
 0x1fc   :  { %4207 = vmatprep.mubr.bf16.mxu0 %v9149_v49 }
 0x202   :  { %3309 = vmatmul.mubr.bf16.gmra.mrb[96].mxu1 %v7055_v10  ;;  %v7097_v10 = vld [vmem:[%s9146_s0 + $0x56c] ss:$36 sps:$4 sm:$0xff]  }
 0x203   :  { %4208 = vmatmul.mubr.bf16.gmra.mrb[32].mxu0 %v7056_v11  ;;  %3318 = vmatprep.mubr.bf16.mxu1 %v7057_v12 }
 0x204   :  { %4217 = vmatprep.mubr.bf16.mxu0 %v9149_v49 }
 0x20a   :  { %3319 = vmatmul.mubr.bf16.gmra.mrb[100].mxu1 %v7059_v13 }
 0x20b   :  { %4218 = vmatmul.mubr.bf16.gmra.mrb[36].mxu0 %v7060_v14  ;;  %3328 = vmatprep.mubr.bf16.mxu1 %v7061_v15  ;;  %v7099_v14 = vld [vmem:[%s9146_s0 + $0x568] ss:$36 sps:$4 sm:$0xff]   ;;  %v7100_v15 = vld [vmem:[%s9146_s0 + $0x578] ss:$36 sps:$4 sm:$0xff]  }
 0x20c   :  { %4227 = vmatprep.mubr.bf16.mxu0 %v9149_v49 }
 0x212   :  { %3329 = vmatmul.mubr.bf16.gmra.mrb[104].mxu1 %v7063_v16 }
 0x213   :  { %4228 = vmatmul.mubr.bf16.gmra.mrb[40].mxu0 %v7064_v17  ;;  %3338 = vmatprep.mubr.bf16.mxu1 %v7065_v18  ;;  %v7101_v17 = vld [vmem:[%s9146_s0 + $0x5b4] ss:$36 sps:$4 sm:$0xff]  }
 0x214   :  { %4237 = vmatprep.mubr.bf16.mxu0 %v9149_v49 }
 0x215   :  { %v8420_v19 = vpop.f32.mrb[0].mxu1 }
 0x216   :  { %v8422_v20 = vpop.f32.mrb[1].mxu1 }
 0x217   :  { %v8430_v23 = vpop.f32.mrb[2].mxu1 }
 0x218   :  { %v8435_v25 = vpop.f32.mrb[3].mxu1 }
 0x21a   :  { %3339 = vmatmul.mubr.bf16.gmra.mrb[108].mxu1 %v7067_v21 }
 0x21b   :  { %4238 = vmatmul.mubr.bf16.gmra.mrb[44].mxu0 %v7068_v22  ;;  %3348 = vmatprep.mubr.bf16.mxu1 %v7069_v24  ;;  %v7103_v24 = vld [vmem:[%s9146_s0 + $0x5b0] ss:$36 sps:$4 sm:$0xff]  }
 0x21c   :  { %4247 = vmatprep.mubr.bf16.mxu0 %v9149_v49 }
 0x21d   :  { %v8438_v26 = vpop.f32.mrb[4].mxu1 }
 0x21e   :  { %v8440_v27 = vpop.f32.mrb[5].mxu1 }
 0x21f   :  { %v8448_v30 = vpop.f32.mrb[6].mxu1 }
 0x220   :  { %v8453_v32 = vpop.f32.mrb[7].mxu1 }
 0x222   :  { %3349 = vmatmul.mubr.bf16.gmra.mrb[112].mxu1 %v7071_v28  ;;  %v7104_v28 = vld [vmem:[%s9146_s0 + $0x5c0] ss:$36 sps:$4 sm:$0xff]  }
 0x223   :  { %4248 = vmatmul.mubr.bf16.gmra.mrb[48].mxu0 %v7072_v29  ;;  %3358 = vmatprep.mubr.bf16.mxu1 %v7073_v31  ;;  %v7105_v31 = vld [vmem:[%s9146_s0 + $0x5fc] ss:$36 sps:$4 sm:$0xff]  }
 0x224   :  { %4257 = vmatprep.mubr.bf16.mxu0 %v9149_v49 }
 0x225   :  { %v8456_v33 = vpop.f32.mrb[8].mxu1 }
 0x226   :  { %v8458_v34 = vpop.f32.mrb[9].mxu1 }
 0x227   :  { %v8466_v37 = vpop.f32.mrb[10].mxu1 }
 0x228   :  { %v8471_v39 = vpop.f32.mrb[11].mxu1 }
 0x22a   :  { %3359 = vmatmul.mubr.bf16.gmra.mrb[116].mxu1 %v7075_v35 }
 0x22b   :  { %4258 = vmatmul.mubr.bf16.gmra.mrb[52].mxu0 %v7076_v36  ;;  %3368 = vmatprep.mubr.bf16.mxu1 %v7077_v38 }
 0x22c   :  { %4267 = vmatprep.mubr.bf16.mxu0 %v9149_v49 }
 0x22d   :  { %v8474_v40 = vpop.f32.mrb[12].mxu1 }
 0x22e   :  { %v8476_v41 = vpop.f32.mrb[13].mxu1 }
 0x22f   :  { %v8484_v44 = vpop.f32.mrb[14].mxu1 }
 0x230   :  { %v8489_v46 = vpop.f32.mrb[15].mxu1 }
 0x232   :  { %3369 = vmatmul.mubr.bf16.gmra.mrb[120].mxu1 %v7079_v42  ;;  %v7107_v42 = vld [vmem:[%s9146_s0 + $0x5f8] ss:$36 sps:$4 sm:$0xff]  }
 0x233   :  { %4268 = vmatmul.mubr.bf16.gmra.mrb[56].mxu0 %v7080_v43  ;;  %3378 = vmatprep.mubr.bf16.mxu1 %v7081_v45  ;;  %v7108_v43 = vld [vmem:[%s9146_s0 + $0x608] ss:$36 sps:$4 sm:$0xff]  }
 0x234   :  { %4277 = vmatprep.mubr.bf16.mxu0 %v9149_v49 }
 0x235   :  { %v8492_v47 = vpop.f32.mrb[16].mxu1 }
 0x236   :  { %v8494_v48 = vpop.f32.mrb[17].mxu1 }
 0x237   :  { %v8502_v52 = vpop.f32.mrb[18].mxu1 }
 0x238   :  { %v8507_v54 = vpop.f32.mrb[19].mxu1 }
 0x23a   :  { %3379 = vmatmul.mubr.bf16.gmra.mrb[124].mxu1 %v7083_v50  ;;  %v7109_v50 = vld [vmem:[%s9146_s0 + $0x644] ss:$36 sps:$4 sm:$0xff]  }
 0x23b   :  { %4278 = vmatmul.mubr.bf16.gmra.mrb[60].mxu0 %v7084_v51  ;;  %3581 = vmatprep.mubr.bf16.mxu1 %v7087_v53 }
 0x23c   :  { %4287 = vmatprep.mubr.bf16.mxu0 %v9149_v49 }
 0x23d   :  { %v8510_v55 = vpop.f32.mrb[20].mxu1 }
 0x23e   :  { %v8512_v56 = vpop.f32.mrb[21].mxu1 }
 0x23f   :  { %v8520_v59 = vpop.f32.mrb[22].mxu1 }
 0x240   :  { %v8525_v61 = vpop.f32.mrb[23].mxu1 }
 0x242   :  { %3582 = vmatmul.mubr.bf16.vlgmr.msra.gmra.mrb[64].mxu1 %v7085_v57 }
 0x243   :  { %4288 = vmatmul.mubr.bf16.gmra.mrb[64].mxu0 %v7088_v58  ;;  %3591 = vmatprep.mubr.bf16.mxu1 %v7089_v60  ;;  %v7111_v58 = vld [vmem:[%s9146_s0 + $0x640] ss:$36 sps:$4 sm:$0xff]   ;;  %v7112_v60 = vld [vmem:[%s9146_s0 + $0x650] ss:$36 sps:$4 sm:$0xff]  }
 0x244   :  { %4297 = vmatprep.mubr.bf16.mxu0 %v9149_v49 }
 0x245   :  { %v8528_v62 = vpop.f32.mrb[24].mxu1 }
 0x246   :  { %v8530_v63 = vpop.f32.mrb[25].mxu1 }
 0x247   :  { %v8538_v2 = vpop.f32.mrb[26].mxu1 }
 0x248   :  { %v8543_v4 = vpop.f32.mrb[27].mxu1 }
 0x24a   :  { %3592 = vmatmul.mubr.bf16.gmra.mrb[68].mxu1 %v7091_v0 }
 0x24b   :  { %4298 = vmatmul.mubr.bf16.gmra.mrb[68].mxu0 %v7092_v1  ;;  %3601 = vmatprep.mubr.bf16.mxu1 %v7093_v3  ;;  %v7113_v1 = vld [vmem:[%s9146_s0 + $0x68c] ss:$36 sps:$4 sm:$0xff]  }
 0x24c   :  { %4307 = vmatprep.mubr.bf16.mxu0 %v9149_v49 }
 0x24d   :  { %v8546_v5 = vpop.f32.mrb[28].mxu1 }
 0x24e   :  { %v8548_v6 = vpop.f32.mrb[29].mxu1 }
 0x24f   :  { %v8556_v9 = vpop.f32.mrb[30].mxu1 }
 0x250   :  { %v8561_v11 = vpop.f32.mrb[31].mxu1 }
 0x252   :  { %3602 = vmatmul.mubr.bf16.gmra.mrb[72].mxu1 %v7095_v7 }
 0x253   :  { %4308 = vmatmul.mubr.bf16.gmra.mrb[72].mxu0 %v7096_v8  ;;  %3611 = vmatprep.mubr.bf16.mxu1 %v7097_v10  ;;  %v7115_v10 = vld [vmem:[%s9146_s0 + $0x688] ss:$36 sps:$4 sm:$0xff]  }
 0x254   :  { %4317 = vmatprep.mubr.bf16.mxu0 %v9149_v49 }
 0x255   :  { %v8564_v12 = vpop.f32.mrb[32].mxu1 }
 0x256   :  { %v8566_v13 = vpop.f32.mrb[33].mxu1 }
 0x257   :  { %v8574_v16 = vpop.f32.mrb[34].mxu1 }
 0x258   :  { %v8579_v18 = vpop.f32.mrb[35].mxu1 }
 0x25a   :  { %3612 = vmatmul.mubr.bf16.gmra.mrb[76].mxu1 %v7099_v14  ;;  %v7116_v14 = vld [vmem:[%s9146_s0 + $0x698] ss:$36 sps:$4 sm:$0xff]  }
 0x25b   :  { %4318 = vmatmul.mubr.bf16.gmra.mrb[76].mxu0 %v7100_v15  ;;  %3621 = vmatprep.mubr.bf16.mxu1 %v7101_v17  ;;  %v7117_v17 = vld [vmem:[%s9146_s0 + $0x6d4] ss:$36 sps:$4 sm:$0xff]  }
 0x25c   :  { %4327 = vmatprep.mubr.bf16.mxu0 %v9149_v49 }
 0x25d   :  { %v8582_v21 = vpop.f32.mrb[36].mxu1 }
 0x25e   :  { %v8584_v22 = vpop.f32.mrb[37].mxu1 }
 0x25f   :  { %v8592_v29 = vpop.f32.mrb[38].mxu1 }
 0x260   :  { %v8597_v35 = vpop.f32.mrb[39].mxu1 }
 0x262   :  { %3622 = vmatmul.mubr.bf16.gmra.mrb[80].mxu1 %v7103_v24 }
 0x263   :  { %4328 = vmatmul.mubr.bf16.gmra.mrb[80].mxu0 %v7104_v28  ;;  %3631 = vmatprep.mubr.bf16.mxu1 %v7105_v31 }
 0x264   :  { %4337 = vmatprep.mubr.bf16.mxu0 %v9149_v49 }
 0x265   :  { %v8600_v36 = vpop.f32.mrb[40].mxu1 }
 0x266   :  { %v8602_v38 = vpop.f32.mrb[41].mxu1 }
 0x267   :  { %v8610_v45 = vpop.f32.mrb[42].mxu1 }
 0x268   :  { %v8615_v51 = vpop.f32.mrb[43].mxu1 }
 0x26a   :  { %3632 = vmatmul.mubr.bf16.gmra.mrb[84].mxu1 %v7107_v42  ;;  %v7119_v42 = vld [vmem:[%s9146_s0 + $0x6d0] ss:$36 sps:$4 sm:$0xff]  }
 0x26b   :  { %4338 = vmatmul.mubr.bf16.gmra.mrb[84].mxu0 %v7108_v43  ;;  %3641 = vmatprep.mubr.bf16.mxu1 %v7109_v50  ;;  %v7120_v43 = vld [vmem:[%s9146_s0 + $0x6e0] ss:$36 sps:$4 sm:$0xff]  }
 0x26c   :  { %4347 = vmatprep.mubr.bf16.mxu0 %v9149_v49 }
 0x26d   :  { %v8618_v53 = vpop.f32.mrb[44].mxu1 }
 0x26e   :  { %v8620_v57 = vpop.f32.mrb[45].mxu1 }
 0x26f   :  { %v8628_v0 = vpop.f32.mrb[46].mxu1 }
 0x270   :  { %9151 = vst [vmem:[#allocation2_spill] sm:$0xff] %v8628_v0  ;;  %v8633_v3 = vpop.f32.mrb[47].mxu1 }
 0x271   :  { %9152 = vst [vmem:[#allocation3_spill] sm:$0xff] %v8633_v3 }
 0x272   :  { %3642 = vmatmul.mubr.bf16.gmra.mrb[88].mxu1 %v7111_v58  ;;  %v7121_v58 = vld [vmem:[%s9146_s0 + $0x71c] ss:$36 sps:$4 sm:$0xff]  }
 0x273   :  { %4348 = vmatmul.mubr.bf16.gmra.mrb[88].mxu0 %v7112_v60  ;;  %3651 = vmatprep.mubr.bf16.mxu1 %v7113_v1  ;;  %v481_v1 = vlaneseq }
 0x274   :  { %4357 = vmatprep.mubr.bf16.mxu0 %v9149_v49 }
 0x275   :  { %v8636_v7 = vpop.f32.mrb[48].mxu1 }
 0x276   :  { %9153 = vst [vmem:[#allocation4_spill] sm:$0xff] %v8636_v7  ;;  %v8638_v8 = vpop.f32.mrb[49].mxu1 }
 0x277   :  { %9154 = vst [vmem:[#allocation5_spill] sm:$0xff] %v8638_v8  ;;  %v8646_v15 = vpop.f32.mrb[50].mxu1 }
 0x278   :  { %9155 = vst [vmem:[#allocation6_spill] sm:$0xff] %v8646_v15  ;;  %v8651_v24 = vpop.f32.mrb[51].mxu1 }
 0x279   :  { %9156 = vst [vmem:[#allocation7_spill] sm:$0xff] %v8651_v24 }
 0x27a   :  { %3652 = vmatmul.mubr.bf16.gmra.mrb[92].mxu1 %v7115_v10 }
 0x27b   :  { %4358 = vmatmul.mubr.bf16.gmra.mrb[92].mxu0 %v7116_v14  ;;  %3661 = vmatprep.mubr.bf16.mxu1 %v7117_v17  ;;  %v7123_v17 = vld [vmem:[%s9146_s0 + $0x718] ss:$36 sps:$4 sm:$0xff]  }
 0x27c   :  { %4367 = vmatprep.mubr.bf16.mxu0 %v9149_v49 }
 0x27d   :  { %v8654_v28 = vpop.f32.mrb[52].mxu1 }
 0x27e   :  { %9157 = vst [vmem:[#allocation8_spill] sm:$0xff] %v8654_v28  ;;  %v8656_v31 = vpop.f32.mrb[53].mxu1 }
 0x27f   :  { %9158 = vst [vmem:[#allocation9_spill] sm:$0xff] %v8656_v31  ;;  %v8664_v50 = vpop.f32.mrb[54].mxu1 }
 0x280   :  { %9159 = vst [vmem:[#allocation10_spill] sm:$0xff] %v8664_v50  ;;  %v8669_v60 = vpop.f32.mrb[55].mxu1  ;;  %v7124_v50 = vld [vmem:[%s9146_s0 + $0x728] ss:$36 sps:$4 sm:$0xff]  }
 0x281   :  { %9160 = vst [vmem:[#allocation11_spill] sm:$0xff] %v8669_v60 }
 0x282   :  { %3662 = vmatmul.mubr.bf16.gmra.mrb[96].mxu1 %v7119_v42  ;;  %v7125_v42 = vld [vmem:[%s9146_s0 + $0x764] ss:$36 sps:$4 sm:$0xff]  }
 0x283   :  { %4368 = vmatmul.mubr.bf16.gmra.mrb[96].mxu0 %v7120_v43  ;;  %3671 = vmatprep.mubr.bf16.mxu1 %v7121_v58  ;;  %v482_v43 = vshrl.u32 %v481_v1, 7  ;;  %v7127_v1 = vld [vmem:[%s9146_s0 + $0x760] ss:$36 sps:$4 sm:$0xff]  }
 0x284   :  { %4377 = vmatprep.mubr.bf16.mxu0 %v9149_v49 }
 0x285   :  { %v8672_v10 = vpop.f32.mrb[56].mxu1  ;;  %v487_v60 = vsub.s32 1, %v482_v43 }
 0x286   :  { %9161 = vst [vmem:[#allocation12_spill] sm:$0xff] %v8672_v10  ;;  %v8674_v14 = vpop.f32.mrb[57].mxu1  ;;  %v479_v10 = vld [vmem:[%s9147_s2] sm:$0x3] }
 0x287   :  { %9162 = vst [vmem:[#allocation13_spill] sm:$0xff] %v8674_v14  ;;  %v8682_v31 = vpop.f32.mrb[58].mxu1  ;;  %v483_v14 = vsub.s32 0, %v482_v43 }
 0x288   :  { %9163 = vst [vmem:[#allocation14_spill] sm:$0xff] %v8682_v31  ;;  %v8687_v58 = vpop.f32.mrb[59].mxu1 }
 0x289   :  { %9164 = vst [vmem:[#allocation15_spill] sm:$0xff] %v8687_v58 }
 0x28a   :  { %3672 = vmatmul.mubr.bf16.gmra.mrb[100].mxu1 %v7123_v17 }
 0x28b   :  { %4378 = vmatmul.mubr.bf16.gmra.mrb[100].mxu0 %v7124_v50  ;;  %3681 = vmatprep.mubr.bf16.mxu1 %v7125_v42  ;;  %v7128_v50 = vld [vmem:[%s9146_s0 + $0x770] ss:$36 sps:$4 sm:$0xff]  }
 0x28c   :  { %4387 = vmatprep.mubr.bf16.mxu0 %v9149_v49  ;;  %v7129_v42 = vld [vmem:[%s9146_s0 + $0x7ac] ss:$36 sps:$4 sm:$0xff]   ;;  %v8708_v49 = vrot.slane %v479_v10, %v483_v14 }
 0x28d   :  { %v8693_v28 = vpop.f32.mrb[60].mxu1 }
 0x28e   :  { %9165 = vst [vmem:[#allocation16_spill] sm:$0xff] %v8693_v28  ;;  %v8695_v31 = vpop.f32.mrb[61].mxu1  ;;  %v8712_v28 = vrot.slane %v479_v10, %v487_v60  ;;  %v5876_v58 = vadd.f32 %v8420_v19, %v8708_v49  ;;  %v5880_v14 = vadd.f32 %v8430_v23, %v8708_v49  ;;  %v7131_v60 = vld [vmem:[%s9146_s0 + $0x7a8] ss:$36 sps:$4 sm:$0xff]   ;;  %v7132_v10 = vld [vmem:[%s9146_s0 + $0x7b8] ss:$36 sps:$4 sm:$0xff]  }
 0x28f   :  { %9166 = vst [vmem:[#allocation17_spill] sm:$0xff] %v8695_v31  ;;  %v8703_v17 = vpop.f32.mrb[62].mxu1  ;;  %v9169_v31 = vmov 0  }
 0x290   :  { %9167 = vst [vmem:[#allocation18_spill] sm:$0xff] %v8703_v17  ;;  %v8710_v43 = vpop.f32.mrb[63].mxu1  ;;  %v5878_v17 = vadd.f32 %v8422_v20, %v8712_v28  ;;  %v5882_v19 = vadd.f32 %v8435_v25, %v8712_v28  ;;  %v7133_v20 = vld [vmem:[%s9146_s0 + $0x7f4] ss:$36 sps:$4 sm:$0xff]  }
 0x291   :  { %9168 = vst [vmem:[#allocation19_spill] sm:$0xff] %v8710_v43 }
 0x292   :  { %3682 = vmatmul.mubr.bf16.gmra.mrb[104].mxu1 %v7127_v1 }
 0x293   :  { %4388 = vmatmul.mubr.bf16.gmra.mrb[104].mxu0 %v7128_v50  ;;  %3691 = vmatprep.mubr.bf16.mxu1 %v7129_v42 }
 0x294   :  { %4397 = vmatprep.mubr.bf16.mxu0 %v9169_v31 }
 0x296   :  { %v4129_v24 = vpop.f32.mrb[0].mxu0 }
 0x297   :  { %v5877_v15 = vadd.f32 %v5876_v58, %v4129_v24  ;;  %v4131_v8 = vpop.f32.mrb[1].mxu0 }
 0x298   :  { %v5879_v1 = vadd.f32 %v5878_v17, %v4131_v8  ;;  %v4133_v50 = vpop.f32.mrb[2].mxu0  ;;  %v5884_v8 = vadd.f32 %v8438_v26, %v8708_v49  ;;  %v7135_v26 = vld [vmem:[%s9146_s0 + $0x7f0] ss:$36 sps:$4 sm:$0xff]  }
 0x299   :  { %vm4448_vm0 = vcmp.gt.f32.partialorder %v5877_v15, 0.0  ;;  %v4576_v23 = vmul.f32 0.01, %v5877_v15  ;;  %v5881_v24 = vadd.f32 %v5880_v14, %v4133_v50  ;;  %v4135_v58 = vpop.f32.mrb[3].mxu0  ;;  %v5886_v50 = vadd.f32 %v8440_v27, %v8712_v28  ;;  %v7136_v27 = vld [vmem:[%s9146_s0 + $0x800] ss:$36 sps:$4 sm:$0xff]  }
 0x29a   :  { %vm4449_vm1 = vcmp.gt.f32.partialorder %v5879_v1, 0.0  ;;  %v4577_v42 = vmul.f32 0.01, %v5879_v1  ;;  %v5883_v43 = vadd.f32 %v5882_v19, %v4135_v58  ;;  %3692 = vmatmul.mubr.bf16.gmra.mrb[108].mxu1 %v7131_v60  ;;  %v5888_v60 = vadd.f32 %v8448_v30, %v8708_v49 }
 0x29b   :  { %v4704_v7 = vsel %vm4448_vm0, %v5877_v15, %v4576_v23  ;;  %vm4450_vm2 = vcmp.gt.f32.partialorder %v5881_v24, 0.0  ;;  %v4578_v3 = vmul.f32 0.01, %v5881_v24  ;;  %4398 = vmatmul.mubr.bf16.gmra.mrb[108].mxu0 %v7132_v10  ;;  %3701 = vmatprep.mubr.bf16.mxu1 %v7133_v20 }
 0x29c   :  { %v4705_v0 = vsel %vm4449_vm1, %v5879_v1, %v4577_v42  ;;  %vm4451_vm3 = vcmp.gt.f32.partialorder %v5883_v43, 0.0  ;;  %v4579_v25 = vmul.f32 0.01, %v5883_v43  ;;  %4407 = vmatprep.mubr.bf16.mxu0 %v9169_v31 }
 0x29d   :  { %v5780_v17 = vpack.c.bf16 %v4705_v0, %v4704_v7  ;;  %v4706_v14 = vsel %vm4450_vm2, %v5881_v24, %v4578_v3  ;;  %v5890_v0 = vadd.f32 %v8453_v32, %v8712_v28  ;;  %v7137_v7 = vld [vmem:[%s9146_s0 + $0x83c] ss:$36 sps:$4 sm:$0xff]  }
 0x29e   :  { %v4707_v19 = vsel %vm4451_vm3, %v5883_v43, %v4579_v25  ;;  %v4139_v15 = vpop.f32.mrb[4].mxu0 }
 0x29f   :  { %5216 = vst [vmem:[%s9148_s3] sm:$0xff] %v5780_v17  ;;  %v5781_v10 = vpack.c.bf16 %v4707_v19, %v4706_v14  ;;  %v5885_v1 = vadd.f32 %v5884_v8, %v4139_v15  ;;  %v4141_v20 = vpop.f32.mrb[5].mxu0  ;;  %v5892_v14 = vadd.f32 %v8456_v33, %v8708_v49  ;;  %v5894_v15 = vadd.f32 %v8458_v34, %v8712_v28  ;;  %v7139_v33 = vld [vmem:[%s9146_s0 + $0x838] ss:$36 sps:$4 sm:$0xff]   ;;  %v7140_v34 = vld [vmem:[%s9146_s0 + $0x848] ss:$36 sps:$4 sm:$0xff]  }
 0x2a0   :  { %v5887_v3 = vadd.f32 %v5886_v50, %v4141_v20  ;;  %v4143_v30 = vpop.f32.mrb[6].mxu0 }
 0x2a1   :  { %5217 = vst [vmem:[%s9148_s3 + $0x8] sm:$0xff] %v5781_v10  ;;  %vm4452_vm4 = vcmp.gt.f32.partialorder %v5885_v1, 0.0  ;;  %v4580_v43 = vmul.f32 0.01, %v5885_v1  ;;  %v5889_v23 = vadd.f32 %v5888_v60, %v4143_v30  ;;  %v4145_v24 = vpop.f32.mrb[7].mxu0 }
 0x2a2   :  { %vm4453_vm5 = vcmp.gt.f32.partialorder %v5887_v3, 0.0  ;;  %v4581_v58 = vmul.f32 0.01, %v5887_v3  ;;  %v5891_v42 = vadd.f32 %v5890_v0, %v4145_v24  ;;  %3702 = vmatmul.mubr.bf16.gmra.mrb[112].mxu1 %v7135_v26  ;;  %v5898_v0 = vadd.f32 %v8471_v39, %v8712_v28  ;;  %v7141_v30 = vld [vmem:[%s9146_s0 + $0x884] ss:$36 sps:$4 sm:$0xff]  }
 0x2a3   :  { %v4708_v25 = vsel %vm4452_vm4, %v5885_v1, %v4580_v43  ;;  %vm4454_vm6 = vcmp.gt.f32.partialorder %v5889_v23, 0.0  ;;  %v4582_v32 = vmul.f32 0.01, %v5889_v23  ;;  %4408 = vmatmul.mubr.bf16.gmra.mrb[112].mxu0 %v7136_v27  ;;  %3711 = vmatprep.mubr.bf16.mxu1 %v7137_v7  ;;  %v5896_v1 = vadd.f32 %v8466_v37, %v8708_v49 }
 0x2a4   :  { %v4709_v8 = vsel %vm4453_vm5, %v5887_v3, %v4581_v58  ;;  %vm4455_vm7 = vcmp.gt.f32.partialorder %v5891_v42, 0.0  ;;  %v4583_v17 = vmul.f32 0.01, %v5891_v42  ;;  %4417 = vmatprep.mubr.bf16.mxu0 %v9169_v31 }
 0x2a5   :  { %v5782_v50 = vpack.c.bf16 %v4709_v8, %v4708_v25  ;;  %v4710_v19 = vsel %vm4454_vm6, %v5889_v23, %v4582_v32  ;;  %v5900_v8 = vadd.f32 %v8474_v40, %v8708_v49  ;;  %v7143_v40 = vld [vmem:[%s9146_s0 + $0x880] ss:$36 sps:$4 sm:$0xff]  }
 0x2a6   :  { %v4711_v60 = vsel %vm4455_vm7, %v5891_v42, %v4583_v17  ;;  %v4149_v10 = vpop.f32.mrb[8].mxu0 }
 0x2a7   :  { %5218 = vst [vmem:[%s9148_s3 + $0x10] sm:$0xff] %v5782_v50  ;;  %v5783_v20 = vpack.c.bf16 %v4711_v60, %v4710_v19  ;;  %v5893_v26 = vadd.f32 %v5892_v14, %v4149_v10  ;;  %v4151_v27 = vpop.f32.mrb[9].mxu0  ;;  %v5902_v50 = vadd.f32 %v8476_v41, %v8712_v28  ;;  %v5904_v60 = vadd.f32 %v8484_v44, %v8708_v49  ;;  %v7144_v41 = vld [vmem:[%s9146_s0 + $0x890] ss:$36 sps:$4 sm:$0xff]  }
 0x2a8   :  { %v5895_v3 = vadd.f32 %v5894_v15, %v4151_v27  ;;  %v4153_v37 = vpop.f32.mrb[10].mxu0 }
 0x2a9   :  { %5219 = vst [vmem:[%s9148_s3 + $0x18] sm:$0xff] %v5783_v20  ;;  %vm4456_vm8 = vcmp.gt.f32.partialorder %v5893_v26, 0.0  ;;  %v4584_v7 = vmul.f32 0.01, %v5893_v26  ;;  %v5897_v43 = vadd.f32 %v5896_v1, %v4153_v37  ;;  %v4155_v23 = vpop.f32.mrb[11].mxu0 }
 0x2aa   :  { %vm4457_vm9 = vcmp.gt.f32.partialorder %v5895_v3, 0.0  ;;  %v4585_v24 = vmul.f32 0.01, %v5895_v3  ;;  %v5899_v58 = vadd.f32 %v5898_v0, %v4155_v23  ;;  %3712 = vmatmul.mubr.bf16.gmra.mrb[116].mxu1 %v7139_v33  ;;  %v7145_v33 = vld [vmem:[%s9146_s0 + $0x8cc] ss:$36 sps:$4 sm:$0xff]  }
 0x2ab   :  { %v4712_v42 = vsel %vm4456_vm8, %v5893_v26, %v4584_v7  ;;  %vm4458_vm10 = vcmp.gt.f32.partialorder %v5897_v43, 0.0  ;;  %v4586_v39 = vmul.f32 0.01, %v5897_v43  ;;  %4418 = vmatmul.mubr.bf16.gmra.mrb[116].mxu0 %v7140_v34  ;;  %3721 = vmatprep.mubr.bf16.mxu1 %v7141_v30  ;;  %v5906_v26 = vadd.f32 %v8489_v46, %v8712_v28 }
 0x2ac   :  { %v4713_v25 = vsel %vm4457_vm9, %v5895_v3, %v4585_v24  ;;  %vm4459_vm11 = vcmp.gt.f32.partialorder %v5899_v58, 0.0  ;;  %v4587_v32 = vmul.f32 0.01, %v5899_v58  ;;  %4427 = vmatprep.mubr.bf16.mxu0 %v9169_v31  ;;  %v5908_v24 = vadd.f32 %v8492_v47, %v8708_v49  ;;  %v7147_v47 = vld [vmem:[%s9146_s0 + $0x8c8] ss:$36 sps:$4 sm:$0xff]  }
 0x2ad   :  { %v5784_v17 = vpack.c.bf16 %v4713_v25, %v4712_v42  ;;  %v4714_v14 = vsel %vm4458_vm10, %v5897_v43, %v4586_v39  ;;  %v5910_v39 = vadd.f32 %v8494_v48, %v8712_v28  ;;  %v7148_v48 = vld [vmem:[%s9146_s0 + $0x8d8] ss:$36 sps:$4 sm:$0xff]  }
 0x2ae   :  { %v4715_v19 = vsel %vm4459_vm11, %v5899_v58, %v4587_v32  ;;  %v4159_v15 = vpop.f32.mrb[12].mxu0 }
 0x2af   :  { %5220 = vst [vmem:[%s9148_s3 + $0x20] sm:$0xff] %v5784_v17  ;;  %v5785_v10 = vpack.c.bf16 %v4715_v19, %v4714_v14  ;;  %v5901_v1 = vadd.f32 %v5900_v8, %v4159_v15  ;;  %v4161_v20 = vpop.f32.mrb[13].mxu0  ;;  %v5912_v8 = vadd.f32 %v8502_v52, %v8708_v49 }
 0x2b0   :  { %v5903_v27 = vadd.f32 %v5902_v50, %v4161_v20  ;;  %v4163_v44 = vpop.f32.mrb[14].mxu0  ;;  %v5914_v50 = vadd.f32 %v8507_v54, %v8712_v28 }
 0x2b1   :  { %5221 = vst [vmem:[%s9148_s3 + $0x28] sm:$0xff] %v5785_v10  ;;  %vm4460_vm12 = vcmp.gt.f32.partialorder %v5901_v1, 0.0  ;;  %v4588_v34 = vmul.f32 0.01, %v5901_v1  ;;  %v5905_v0 = vadd.f32 %v5904_v60, %v4163_v44  ;;  %v4165_v3 = vpop.f32.mrb[15].mxu0 }
 0x2b2   :  { %vm4461_vm13 = vcmp.gt.f32.partialorder %v5903_v27, 0.0  ;;  %v4589_v37 = vmul.f32 0.01, %v5903_v27  ;;  %v5907_v30 = vadd.f32 %v5906_v26, %v4165_v3  ;;  %3722 = vmatmul.mubr.bf16.gmra.mrb[120].mxu1 %v7143_v40 }
 0x2b3   :  { %v4716_v7 = vsel %vm4460_vm12, %v5901_v1, %v4588_v34  ;;  %vm4462_vm14 = vcmp.gt.f32.partialorder %v5905_v0, 0.0  ;;  %v4590_v46 = vmul.f32 0.01, %v5905_v0  ;;  %4428 = vmatmul.mubr.bf16.gmra.mrb[120].mxu0 %v7144_v41  ;;  %3731 = vmatprep.mubr.bf16.mxu1 %v7145_v33  ;;  %v5918_v34 = vadd.f32 %v8512_v56, %v8712_v28 }
 0x2b4   :  { %v4717_v43 = vsel %vm4461_vm13, %v5903_v27, %v4589_v37  ;;  %vm4463_vm15 = vcmp.gt.f32.partialorder %v5907_v30, 0.0  ;;  %v4591_v23 = vmul.f32 0.01, %v5907_v30  ;;  %4437 = vmatprep.mubr.bf16.mxu0 %v9169_v31  ;;  %v5916_v27 = vadd.f32 %v8510_v55, %v8708_v49 }
 0x2b5   :  { %v5786_v58 = vpack.c.bf16 %v4717_v43, %v4716_v7  ;;  %v4718_v42 = vsel %vm4462_vm14, %v5905_v0, %v4590_v46  ;;  %v5920_v37 = vadd.f32 %v8520_v59, %v8708_v49  ;;  %v5922_v55 = vadd.f32 %v8525_v61, %v8712_v28 }
 0x2b6   :  { %v4719_v25 = vsel %vm4463_vm15, %v5907_v30, %v4591_v23  ;;  %v4169_v32 = vpop.f32.mrb[16].mxu0  ;;  %v5924_v61 = vadd.f32 %v8528_v62, %v8708_v49  ;;  %v5930_v62 = vadd.f32 %v8543_v4, %v8712_v28  ;;  %v5932_v4 = vadd.f32 %v8546_v5, %v8708_v49 }
 0x2b7   :  { %5222 = vst [vmem:[%s9148_s3 + $0x30] sm:$0xff] %v5786_v58  ;;  %v5787_v17 = vpack.c.bf16 %v4719_v25, %v4718_v42  ;;  %v5909_v14 = vadd.f32 %v5908_v24, %v4169_v32  ;;  %v4171_v31 = vpop.f32.mrb[17].mxu0  ;;  %v5938_v5 = vadd.f32 %v8561_v11, %v8712_v28  ;;  %v5940_v11 = vadd.f32 %v8564_v12, %v8708_v49 }
 0x2b8   :  { %v5911_v19 = vadd.f32 %v5910_v39, %v4171_v31  ;;  %v4173_v52 = vpop.f32.mrb[18].mxu0  ;;  %v5926_v31 = vadd.f32 %v8530_v63, %v8712_v28  ;;  %v5946_v12 = vadd.f32 %v8579_v18, %v8712_v28  ;;  %v5948_v18 = vadd.f32 %v8582_v21, %v8708_v49 }
 0x2b9   :  { %5223 = vst [vmem:[%s9148_s3 + $0x38] sm:$0xff] %v5787_v17  ;;  %vm4464_vm0 = vcmp.gt.f32.partialorder %v5909_v14, 0.0  ;;  %v4592_v15 = vmul.f32 0.01, %v5909_v14  ;;  %v5913_v60 = vadd.f32 %v5912_v8, %v4173_v52  ;;  %v4175_v10 = vpop.f32.mrb[19].mxu0  ;;  %v5954_v21 = vadd.f32 %v8597_v35, %v8712_v28 }
 0x2ba   :  { %vm4465_vm1 = vcmp.gt.f32.partialorder %v5911_v19, 0.0  ;;  %v4593_v1 = vmul.f32 0.01, %v5911_v19  ;;  %v5915_v20 = vadd.f32 %v5914_v50, %v4175_v10  ;;  %3732 = vmatmul.mubr.bf16.gmra.mrb[124].mxu1 %v7147_v47  ;;  %v5928_v50 = vadd.f32 %v8538_v2, %v8708_v49 }
 0x2bb   :  { %v4720_v40 = vsel %vm4464_vm0, %v5909_v14, %v4592_v15  ;;  %vm4466_vm2 = vcmp.gt.f32.partialorder %v5913_v60, 0.0  ;;  %v4594_v41 = vmul.f32 0.01, %v5913_v60  ;;  %4438 = vmatmul.mubr.bf16.gmra.mrb[124].mxu0 %v7148_v48  ;;  %v5956_v35 = vadd.f32 %v8600_v36, %v8708_v49 }
 0x2bc   :  { %v4721_v26 = vsel %vm4465_vm1, %v5911_v19, %v4593_v1  ;;  %vm4467_vm3 = vcmp.gt.f32.partialorder %v5915_v20, 0.0  ;;  %v4595_v54 = vmul.f32 0.01, %v5915_v20  ;;  %v5962_v36 = vadd.f32 %v8615_v51, %v8712_v28 }
 0x2bd   :  { %v5788_v44 = vpack.c.bf16 %v4721_v26, %v4720_v40  ;;  %v4722_v33 = vsel %vm4466_vm2, %v5913_v60, %v4594_v41  ;;  %v5964_v51 = vadd.f32 %v8618_v53, %v8708_v49 }
 0x2be   :  { %v4723_v0 = vsel %vm4467_vm3, %v5915_v20, %v4595_v54  ;;  %v4179_v3 = vpop.f32.mrb[20].mxu0 }
 0x2bf   :  { %5224 = vst [vmem:[%s9148_s3 + $0x40] sm:$0xff] %v5788_v44  ;;  %v5789_v30 = vpack.c.bf16 %v4723_v0, %v4722_v33  ;;  %v5917_v7 = vadd.f32 %v5916_v27, %v4179_v3  ;;  %v4181_v46 = vpop.f32.mrb[21].mxu0 }
 0x2c0   :  { %v5919_v43 = vadd.f32 %v5918_v34, %v4181_v46  ;;  %v4183_v23 = vpop.f32.mrb[22].mxu0  ;;  %v5934_v34 = vadd.f32 %v8548_v6, %v8712_v28 }
 0x2c1   :  { %5225 = vst [vmem:[%s9148_s3 + $0x48] sm:$0xff] %v5789_v30  ;;  %vm4468_vm4 = vcmp.gt.f32.partialorder %v5917_v7, 0.0  ;;  %v4596_v56 = vmul.f32 0.01, %v5917_v7  ;;  %v5921_v24 = vadd.f32 %v5920_v37, %v4183_v23  ;;  %v4185_v59 = vpop.f32.mrb[23].mxu0  ;;  %v5936_v37 = vadd.f32 %v8556_v9, %v8708_v49 }
 0x2c2   :  { %vm4469_vm5 = vcmp.gt.f32.partialorder %v5919_v43, 0.0  ;;  %v4597_v58 = vmul.f32 0.01, %v5919_v43  ;;  %v5923_v42 = vadd.f32 %v5922_v55, %v4185_v59 }
 0x2c3   :  { %v4724_v39 = vsel %vm4468_vm4, %v5917_v7, %v4596_v56  ;;  %vm4470_vm6 = vcmp.gt.f32.partialorder %v5921_v24, 0.0  ;;  %v4598_v25 = vmul.f32 0.01, %v5921_v24 }
 0x2c4   :  { %v4725_v32 = vsel %vm4469_vm5, %v5919_v43, %v4597_v58  ;;  %vm4471_vm7 = vcmp.gt.f32.partialorder %v5923_v42, 0.0  ;;  %v4599_v8 = vmul.f32 0.01, %v5923_v42 }
 0x2c5   :  { %v5790_v17 = vpack.c.bf16 %v4725_v32, %v4724_v39  ;;  %v4726_v14 = vsel %vm4470_vm6, %v5921_v24, %v4598_v25 }
 0x2c6   :  { %v4727_v47 = vsel %vm4471_vm7, %v5923_v42, %v4599_v8  ;;  %v4189_v48 = vpop.f32.mrb[24].mxu0  ;;  %v5942_v8 = vadd.f32 %v8566_v13, %v8712_v28 }
 0x2c7   :  { %5226 = vst [vmem:[%s9148_s3 + $0x50] sm:$0xff] %v5790_v17  ;;  %v5791_v19 = vpack.c.bf16 %v4727_v47, %v4726_v14  ;;  %v5925_v52 = vadd.f32 %v5924_v61, %v4189_v48  ;;  %v4191_v15 = vpop.f32.mrb[25].mxu0  ;;  %v5944_v14 = vadd.f32 %v8574_v16, %v8708_v49 }
 0x2c8   :  { %v5927_v60 = vadd.f32 %v5926_v31, %v4191_v15  ;;  %v4193_v10 = vpop.f32.mrb[26].mxu0 }
 0x2c9   :  { %5227 = vst [vmem:[%s9148_s3 + $0x58] sm:$0xff] %v5791_v19  ;;  %vm4472_vm8 = vcmp.gt.f32.partialorder %v5925_v52, 0.0  ;;  %v4600_v63 = vmul.f32 0.01, %v5925_v52  ;;  %v5929_v1 = vadd.f32 %v5928_v50, %v4193_v10  ;;  %v4195_v2 = vpop.f32.mrb[27].mxu0 }
 0x2ca   :  { %vm4473_vm9 = vcmp.gt.f32.partialorder %v5927_v60, 0.0  ;;  %v4601_v20 = vmul.f32 0.01, %v5927_v60  ;;  %v5931_v40 = vadd.f32 %v5930_v62, %v4195_v2 }
 0x2cb   :  { %v4728_v41 = vsel %vm4472_vm8, %v5925_v52, %v4600_v63  ;;  %vm4474_vm10 = vcmp.gt.f32.partialorder %v5929_v1, 0.0  ;;  %v4602_v26 = vmul.f32 0.01, %v5929_v1 }
 0x2cc   :  { %v4729_v54 = vsel %vm4473_vm9, %v5927_v60, %v4601_v20  ;;  %vm4475_vm11 = vcmp.gt.f32.partialorder %v5931_v40, 0.0  ;;  %v4603_v27 = vmul.f32 0.01, %v5931_v40 }
 0x2cd   :  { %v5792_v44 = vpack.c.bf16 %v4729_v54, %v4728_v41  ;;  %v4730_v33 = vsel %vm4474_vm10, %v5929_v1, %v4602_v26  ;;  %v5952_v54 = vadd.f32 %v8592_v29, %v8708_v49 }
 0x2ce   :  { %v4731_v0 = vsel %vm4475_vm11, %v5931_v40, %v4603_v27  ;;  %v4199_v3 = vpop.f32.mrb[28].mxu0  ;;  %v5950_v40 = vadd.f32 %v8584_v22, %v8712_v28 }
 0x2cf   :  { %5228 = vst [vmem:[%s9148_s3 + $0x60] sm:$0xff] %v5792_v44  ;;  %v5793_v30 = vpack.c.bf16 %v4731_v0, %v4730_v33  ;;  %v5933_v7 = vadd.f32 %v5932_v4, %v4199_v3  ;;  %v4201_v46 = vpop.f32.mrb[29].mxu0 }
 0x2d0   :  { %v5935_v55 = vadd.f32 %v5934_v34, %v4201_v46  ;;  %v4203_v43 = vpop.f32.mrb[30].mxu0 }
 0x2d1   :  { %5229 = vst [vmem:[%s9148_s3 + $0x68] sm:$0xff] %v5793_v30  ;;  %vm4476_vm12 = vcmp.gt.f32.partialorder %v5933_v7, 0.0  ;;  %v4604_v6 = vmul.f32 0.01, %v5933_v7  ;;  %v5937_v23 = vadd.f32 %v5936_v37, %v4203_v43  ;;  %v4205_v9 = vpop.f32.mrb[31].mxu0 }
 0x2d2   :  { %vm4477_vm13 = vcmp.gt.f32.partialorder %v5935_v55, 0.0  ;;  %v4605_v56 = vmul.f32 0.01, %v5935_v55  ;;  %v5939_v24 = vadd.f32 %v5938_v5, %v4205_v9 }
 0x2d3   :  { %v4732_v59 = vsel %vm4476_vm12, %v5933_v7, %v4604_v6  ;;  %vm4478_vm14 = vcmp.gt.f32.partialorder %v5937_v23, 0.0  ;;  %v4606_v58 = vmul.f32 0.01, %v5937_v23  ;;  %v5958_v6 = vadd.f32 %v8602_v38, %v8712_v28 }
 0x2d4   :  { %v4733_v42 = vsel %vm4477_vm13, %v5935_v55, %v4605_v56  ;;  %vm4479_vm15 = vcmp.gt.f32.partialorder %v5939_v24, 0.0  ;;  %v4607_v39 = vmul.f32 0.01, %v5939_v24  ;;  %v5960_v56 = vadd.f32 %v8610_v45, %v8708_v49 }
 0x2d5   :  { %v5794_v25 = vpack.c.bf16 %v4733_v42, %v4732_v59  ;;  %v4734_v32 = vsel %vm4478_vm14, %v5937_v23, %v4606_v58 }
 0x2d6   :  { %v4735_v61 = vsel %vm4479_vm15, %v5939_v24, %v4607_v39  ;;  %v4209_v17 = vpop.f32.mrb[32].mxu0 }
 0x2d7   :  { %5230 = vst [vmem:[%s9148_s3 + $0x70] sm:$0xff] %v5794_v25  ;;  %v5795_v31 = vpack.c.bf16 %v4735_v61, %v4734_v32  ;;  %v5941_v47 = vadd.f32 %v5940_v11, %v4209_v17  ;;  %v4211_v48 = vpop.f32.mrb[33].mxu0 }
 0x2d8   :  { %v5943_v50 = vadd.f32 %v5942_v8, %v4211_v48  ;;  %v4213_v19 = vpop.f32.mrb[34].mxu0  ;;  %v5966_v48 = vadd.f32 %v8620_v57, %v8712_v28 }
 0x2d9   :  { %5231 = vst [vmem:[%s9148_s3 + $0x78] sm:$0xff] %v5795_v31  ;;  %vm4480_vm0 = vcmp.gt.f32.partialorder %v5941_v47, 0.0  ;;  %v4608_v13 = vmul.f32 0.01, %v5941_v47  ;;  %v5945_v52 = vadd.f32 %v5944_v14, %v4213_v19  ;;  %v4215_v16 = vpop.f32.mrb[35].mxu0  ;;  %v9170_v19 = vld [vmem:[#allocation2_spill] sm:$0xff] }
 0x2da   :  { %vm4481_vm1 = vcmp.gt.f32.partialorder %v5943_v50, 0.0  ;;  %v4609_v15 = vmul.f32 0.01, %v5943_v50  ;;  %v5947_v62 = vadd.f32 %v5946_v12, %v4215_v16 }
 0x2db   :  { %v4736_v60 = vsel %vm4480_vm0, %v5941_v47, %v4608_v13  ;;  %vm4482_vm2 = vcmp.gt.f32.partialorder %v5945_v52, 0.0  ;;  %v4610_v10 = vmul.f32 0.01, %v5945_v52  ;;  %v5968_v13 = vadd.f32 %v9170_v19, %v8708_v49 }
 0x2dc   :  { %v4737_v63 = vsel %vm4481_vm1, %v5943_v50, %v4609_v15  ;;  %vm4483_vm3 = vcmp.gt.f32.partialorder %v5947_v62, 0.0  ;;  %v4611_v1 = vmul.f32 0.01, %v5947_v62 }
 0x2dd   :  { %v5796_v2 = vpack.c.bf16 %v4737_v63, %v4736_v60  ;;  %v4738_v20 = vsel %vm4482_vm2, %v5945_v52, %v4610_v10 }
 0x2de   :  { %v4739_v41 = vsel %vm4483_vm3, %v5947_v62, %v4611_v1  ;;  %v4219_v26 = vpop.f32.mrb[36].mxu0  ;;  %v9171_v62 = vld [vmem:[#allocation3_spill] sm:$0xff] }
 0x2df   :  { %5232 = vst [vmem:[%s9148_s3 + $0x80] sm:$0xff] %v5796_v2  ;;  %v5797_v27 = vpack.c.bf16 %v4739_v41, %v4738_v20  ;;  %v5949_v4 = vadd.f32 %v5948_v18, %v4219_v26  ;;  %v4221_v44 = vpop.f32.mrb[37].mxu0  ;;  %v5970_v53 = vadd.f32 %v9171_v62, %v8712_v28 }
 0x2e0   :  { %v5951_v33 = vadd.f32 %v5950_v40, %v4221_v44  ;;  %v4223_v34 = vpop.f32.mrb[38].mxu0 }
 0x2e1   :  { %5233 = vst [vmem:[%s9148_s3 + $0x88] sm:$0xff] %v5797_v27  ;;  %vm4484_vm4 = vcmp.gt.f32.partialorder %v5949_v4, 0.0  ;;  %v4612_v22 = vmul.f32 0.01, %v5949_v4  ;;  %v5953_v0 = vadd.f32 %v5952_v54, %v4223_v34  ;;  %v4225_v29 = vpop.f32.mrb[39].mxu0  ;;  %v9172_v54 = vld [vmem:[#allocation4_spill] sm:$0xff] }
 0x2e2   :  { %vm4485_vm5 = vcmp.gt.f32.partialorder %v5951_v33, 0.0  ;;  %v4613_v3 = vmul.f32 0.01, %v5951_v33  ;;  %v5955_v37 = vadd.f32 %v5954_v21, %v4225_v29  ;;  %v5972_v27 = vadd.f32 %v9172_v54, %v8708_v49  ;;  %v9173_v21 = vld [vmem:[#allocation5_spill] sm:$0xff] }
 0x2e3   :  { %v4740_v30 = vsel %vm4484_vm4, %v5949_v4, %v4612_v22  ;;  %vm4486_vm6 = vcmp.gt.f32.partialorder %v5953_v0, 0.0  ;;  %v4614_v7 = vmul.f32 0.01, %v5953_v0 }
 0x2e4   :  { %v4741_v46 = vsel %vm4485_vm5, %v5951_v33, %v4613_v3  ;;  %vm4487_vm7 = vcmp.gt.f32.partialorder %v5955_v37, 0.0  ;;  %v4615_v5 = vmul.f32 0.01, %v5955_v37  ;;  %v5974_v33 = vadd.f32 %v9173_v21, %v8712_v28 }
 0x2e5   :  { %v5798_v55 = vpack.c.bf16 %v4741_v46, %v4740_v30  ;;  %v4742_v43 = vsel %vm4486_vm6, %v5953_v0, %v4614_v7  ;;  %v9174_v0 = vld [vmem:[#allocation6_spill] sm:$0xff]  ;;  %v9175_v7 = vld [vmem:[#allocation7_spill] sm:$0xff] }
 0x2e6   :  { %v4743_v23 = vsel %vm4487_vm7, %v5955_v37, %v4615_v5  ;;  %v4229_v9 = vpop.f32.mrb[40].mxu0  ;;  %v5976_v29 = vadd.f32 %v9174_v0, %v8708_v49  ;;  %v5978_v46 = vadd.f32 %v9175_v7, %v8712_v28 }
 0x2e7   :  { %5234 = vst [vmem:[%s9148_s3 + $0x90] sm:$0xff] %v5798_v55  ;;  %v5799_v24 = vpack.c.bf16 %v4743_v23, %v4742_v43  ;;  %v5957_v59 = vadd.f32 %v5956_v35, %v4229_v9  ;;  %v4231_v58 = vpop.f32.mrb[41].mxu0 }
 0x2e8   :  { %v5959_v42 = vadd.f32 %v5958_v6, %v4231_v58  ;;  %v4233_v39 = vpop.f32.mrb[42].mxu0 }
 0x2e9   :  { %5235 = vst [vmem:[%s9148_s3 + $0x98] sm:$0xff] %v5799_v24  ;;  %vm4488_vm8 = vcmp.gt.f32.partialorder %v5957_v59, 0.0  ;;  %v4616_v38 = vmul.f32 0.01, %v5957_v59  ;;  %v5961_v11 = vadd.f32 %v5960_v56, %v4233_v39  ;;  %v4235_v45 = vpop.f32.mrb[43].mxu0 }
 0x2ea   :  { %vm4489_vm9 = vcmp.gt.f32.partialorder %v5959_v42, 0.0  ;;  %v4617_v25 = vmul.f32 0.01, %v5959_v42  ;;  %v5963_v32 = vadd.f32 %v5962_v36, %v4235_v45  ;;  %v9176_v36 = vld [vmem:[#allocation8_spill] sm:$0xff] }
 0x2eb   :  { %v4744_v8 = vsel %vm4488_vm8, %v5957_v59, %v4616_v38  ;;  %vm4490_vm10 = vcmp.gt.f32.partialorder %v5961_v11, 0.0  ;;  %v4618_v61 = vmul.f32 0.01, %v5961_v11 }
 0x2ec   :  { %v4745_v17 = vsel %vm4489_vm9, %v5959_v42, %v4617_v25  ;;  %vm4491_vm11 = vcmp.gt.f32.partialorder %v5963_v32, 0.0  ;;  %v4619_v14 = vmul.f32 0.01, %v5963_v32  ;;  %v5980_v42 = vadd.f32 %v9176_v36, %v8708_v49 }
 0x2ed   :  { %v5800_v31 = vpack.c.bf16 %v4745_v17, %v4744_v8  ;;  %v4746_v47 = vsel %vm4490_vm10, %v5961_v11, %v4618_v61  ;;  %v9177_v11 = vld [vmem:[#allocation9_spill] sm:$0xff]  ;;  %v9178_v8 = vld [vmem:[#allocation10_spill] sm:$0xff] }
 0x2ee   :  { %v4747_v12 = vsel %vm4491_vm11, %v5963_v32, %v4619_v14  ;;  %v4239_v50 = vpop.f32.mrb[44].mxu0  ;;  %v5982_v45 = vadd.f32 %v9177_v11, %v8712_v28  ;;  %v5984_v61 = vadd.f32 %v9178_v8, %v8708_v49 }
 0x2ef   :  { %5236 = vst [vmem:[%s9148_s3 + $0xa0] sm:$0xff] %v5800_v31  ;;  %v5801_v52 = vpack.c.bf16 %v4747_v12, %v4746_v47  ;;  %v5965_v16 = vadd.f32 %v5964_v51, %v4239_v50  ;;  %v4241_v15 = vpop.f32.mrb[45].mxu0  ;;  %v9179_v31 = vld [vmem:[#allocation11_spill] sm:$0xff] }
 0x2f0   :  { %v5967_v60 = vadd.f32 %v5966_v48, %v4241_v15  ;;  %v4243_v10 = vpop.f32.mrb[46].mxu0  ;;  %v5986_v47 = vadd.f32 %v9179_v31, %v8712_v28 }
 0x2f1   :  { %5237 = vst [vmem:[%s9148_s3 + $0xa8] sm:$0xff] %v5801_v52  ;;  %vm4492_vm12 = vcmp.gt.f32.partialorder %v5965_v16, 0.0  ;;  %v4620_v57 = vmul.f32 0.01, %v5965_v16  ;;  %v5969_v63 = vadd.f32 %v5968_v13, %v4243_v10  ;;  %v4245_v1 = vpop.f32.mrb[47].mxu0  ;;  %v9180_v10 = vld [vmem:[#allocation12_spill] sm:$0xff] }
 0x2f2   :  { %vm4493_vm13 = vcmp.gt.f32.partialorder %v5967_v60, 0.0  ;;  %v4621_v18 = vmul.f32 0.01, %v5967_v60  ;;  %v5971_v2 = vadd.f32 %v5970_v53, %v4245_v1 }
 0x2f3   :  { %v4748_v20 = vsel %vm4492_vm12, %v5965_v16, %v4620_v57  ;;  %vm4494_vm14 = vcmp.gt.f32.partialorder %v5969_v63, 0.0  ;;  %v4622_v40 = vmul.f32 0.01, %v5969_v63  ;;  %v5988_v57 = vadd.f32 %v9180_v10, %v8708_v49 }
 0x2f4   :  { %v4749_v41 = vsel %vm4493_vm13, %v5967_v60, %v4621_v18  ;;  %vm4495_vm15 = vcmp.gt.f32.partialorder %v5971_v2, 0.0  ;;  %v4623_v26 = vmul.f32 0.01, %v5971_v2  ;;  %v9181_v18 = vld [vmem:[#allocation13_spill] sm:$0xff] }
 0x2f5   :  { %v5802_v4 = vpack.c.bf16 %v4749_v41, %v4748_v20  ;;  %v4750_v44 = vsel %vm4494_vm14, %v5969_v63, %v4622_v40  ;;  %v9182_v41 = vld [vmem:[#allocation14_spill] sm:$0xff] }
 0x2f6   :  { %v4751_v34 = vsel %vm4495_vm15, %v5971_v2, %v4623_v26  ;;  %v4249_v22 = vpop.f32.mrb[48].mxu0  ;;  %v5990_v2 = vadd.f32 %v9181_v18, %v8712_v28  ;;  %v5992_v26 = vadd.f32 %v9182_v41, %v8708_v49 }
 0x2f7   :  { %5238 = vst [vmem:[%s9148_s3 + $0xb0] sm:$0xff] %v5802_v4  ;;  %v5803_v3 = vpack.c.bf16 %v4751_v34, %v4750_v44  ;;  %v5973_v37 = vadd.f32 %v5972_v27, %v4249_v22  ;;  %v4251_v30 = vpop.f32.mrb[49].mxu0  ;;  %v9183_v44 = vld [vmem:[#allocation15_spill] sm:$0xff] }
 0x2f8   :  { %v5975_v5 = vadd.f32 %v5974_v33, %v4251_v30  ;;  %v4253_v35 = vpop.f32.mrb[50].mxu0  ;;  %v5994_v21 = vadd.f32 %v9183_v44, %v8712_v28 }
 0x2f9   :  { %5239 = vst [vmem:[%s9148_s3 + $0xb8] sm:$0xff] %v5803_v3  ;;  %vm4496_vm0 = vcmp.gt.f32.partialorder %v5973_v37, 0.0  ;;  %v4624_v55 = vmul.f32 0.01, %v5973_v37  ;;  %v5977_v43 = vadd.f32 %v5976_v29, %v4253_v35  ;;  %v4255_v6 = vpop.f32.mrb[51].mxu0  ;;  %v9184_v35 = vld [vmem:[#allocation16_spill] sm:$0xff] }
 0x2fa   :  { %vm4497_vm1 = vcmp.gt.f32.partialorder %v5975_v5, 0.0  ;;  %v4625_v23 = vmul.f32 0.01, %v5975_v5  ;;  %v5979_v9 = vadd.f32 %v5978_v46, %v4255_v6 }
 0x2fb   :  { %v4752_v56 = vsel %vm4496_vm0, %v5973_v37, %v4624_v55  ;;  %vm4498_vm2 = vcmp.gt.f32.partialorder %v5977_v43, 0.0  ;;  %v4626_v24 = vmul.f32 0.01, %v5977_v43  ;;  %v5996_v55 = vadd.f32 %v9184_v35, %v8708_v49 }
 0x2fc   :  { %v4753_v59 = vsel %vm4497_vm1, %v5975_v5, %v4625_v23  ;;  %vm4499_vm3 = vcmp.gt.f32.partialorder %v5979_v9, 0.0  ;;  %v4627_v58 = vmul.f32 0.01, %v5979_v9  ;;  %v9185_v23 = vld [vmem:[#allocation17_spill] sm:$0xff] }
 0x2fd   :  { %v5804_v39 = vpack.c.bf16 %v4753_v59, %v4752_v56  ;;  %v4754_v38 = vsel %vm4498_vm2, %v5977_v43, %v4626_v24  ;;  %v9186_v59 = vld [vmem:[#allocation18_spill] sm:$0xff] }
 0x2fe   :  { %v4755_v25 = vsel %vm4499_vm3, %v5979_v9, %v4627_v58  ;;  %v4259_v32 = vpop.f32.mrb[52].mxu0  ;;  %v5998_v9 = vadd.f32 %v9185_v23, %v8712_v28  ;;  %v6000_v58 = vadd.f32 %v9186_v59, %v8708_v49 }
 0x2ff   :  { %5240 = vst [vmem:[%s9148_s3 + $0xc0] sm:$0xff] %v5804_v39  ;;  %v5805_v17 = vpack.c.bf16 %v4755_v25, %v4754_v38  ;;  %v5981_v14 = vadd.f32 %v5980_v42, %v4259_v32  ;;  %v4261_v51 = vpop.f32.mrb[53].mxu0  ;;  %v9187_v38 = vld [vmem:[#allocation19_spill] sm:$0xff] }
 0x300   :  { %v5983_v48 = vadd.f32 %v5982_v45, %v4261_v51  ;;  %v4263_v12 = vpop.f32.mrb[54].mxu0  ;;  %v6002_v11 = vadd.f32 %v9187_v38, %v8712_v28 }
 0x301   :  { %5241 = vst [vmem:[%s9148_s3 + $0xc8] sm:$0xff] %v5805_v17  ;;  %vm4500_vm4 = vcmp.gt.f32.partialorder %v5981_v14, 0.0  ;;  %v4628_v50 = vmul.f32 0.01, %v5981_v14  ;;  %v5985_v19 = vadd.f32 %v5984_v61, %v4263_v12  ;;  %v4265_v13 = vpop.f32.mrb[55].mxu0 }
 0x302   :  { %vm4501_vm5 = vcmp.gt.f32.partialorder %v5983_v48, 0.0  ;;  %v4629_v52 = vmul.f32 0.01, %v5983_v48  ;;  %v5987_v16 = vadd.f32 %v5986_v47, %v4265_v13 }
 0x303   :  { %v4756_v15 = vsel %vm4500_vm4, %v5981_v14, %v4628_v50  ;;  %vm4502_vm6 = vcmp.gt.f32.partialorder %v5985_v19, 0.0  ;;  %v4630_v62 = vmul.f32 0.01, %v5985_v19 }
 0x304   :  { %v4757_v53 = vsel %vm4501_vm5, %v5983_v48, %v4629_v52  ;;  %vm4503_vm7 = vcmp.gt.f32.partialorder %v5987_v16, 0.0  ;;  %v4631_v60 = vmul.f32 0.01, %v5987_v16 }
 0x305   :  { %v5806_v63 = vpack.c.bf16 %v4757_v53, %v4756_v15  ;;  %v4758_v1 = vsel %vm4502_vm6, %v5985_v19, %v4630_v62 }
 0x306   :  { %v4759_v20 = vsel %vm4503_vm7, %v5987_v16, %v4631_v60  ;;  %v4269_v40 = vpop.f32.mrb[56].mxu0 }
 0x307   :  { %5242 = vst [vmem:[%s9148_s3 + $0xd0] sm:$0xff] %v5806_v63  ;;  %v5807_v54 = vpack.c.bf16 %v4759_v20, %v4758_v1  ;;  %v5989_v27 = vadd.f32 %v5988_v57, %v4269_v40  ;;  %v4271_v4 = vpop.f32.mrb[57].mxu0 }
 0x308   :  { %v5991_v33 = vadd.f32 %v5990_v2, %v4271_v4  ;;  %v4273_v34 = vpop.f32.mrb[58].mxu0 }
 0x309   :  { %5243 = vst [vmem:[%s9148_s3 + $0xd8] sm:$0xff] %v5807_v54  ;;  %vm4504_vm8 = vcmp.gt.f32.partialorder %v5989_v27, 0.0  ;;  %v4632_v22 = vmul.f32 0.01, %v5989_v27  ;;  %v5993_v0 = vadd.f32 %v5992_v26, %v4273_v34  ;;  %v4275_v29 = vpop.f32.mrb[59].mxu0 }
 0x30a   :  { %vm4505_vm9 = vcmp.gt.f32.partialorder %v5991_v33, 0.0  ;;  %v4633_v3 = vmul.f32 0.01, %v5991_v33  ;;  %v5995_v37 = vadd.f32 %v5994_v21, %v4275_v29 }
 0x30b   :  { %v4760_v30 = vsel %vm4504_vm8, %v5989_v27, %v4632_v22  ;;  %vm4506_vm10 = vcmp.gt.f32.partialorder %v5993_v0, 0.0  ;;  %v4634_v7 = vmul.f32 0.01, %v5993_v0 }
 0x30c   :  { %v4761_v46 = vsel %vm4505_vm9, %v5991_v33, %v4633_v3  ;;  %vm4507_vm11 = vcmp.gt.f32.partialorder %v5995_v37, 0.0  ;;  %v4635_v5 = vmul.f32 0.01, %v5995_v37 }
 0x30d   :  { %v5808_v43 = vpack.c.bf16 %v4761_v46, %v4760_v30  ;;  %v4762_v6 = vsel %vm4506_vm10, %v5993_v0, %v4634_v7 }
 0x30e   :  { %v4763_v56 = vsel %vm4507_vm11, %v5995_v37, %v4635_v5  ;;  %v4279_v24 = vpop.f32.mrb[60].mxu0 }
 0x30f   :  { %5244 = vst [vmem:[%s9148_s3 + $0xe0] sm:$0xff] %v5808_v43  ;;  %v5809_v36 = vpack.c.bf16 %v4763_v56, %v4762_v6  ;;  %v5997_v42 = vadd.f32 %v5996_v55, %v4279_v24  ;;  %v4281_v39 = vpop.f32.mrb[61].mxu0 }
 0x310   :  { %v5999_v45 = vadd.f32 %v5998_v9, %v4281_v39  ;;  %v4283_v25 = vpop.f32.mrb[62].mxu0 }
 0x311   :  { %5245 = vst [vmem:[%s9148_s3 + $0xe8] sm:$0xff] %v5809_v36  ;;  %vm4508_vm12 = vcmp.gt.f32.partialorder %v5997_v42, 0.0  ;;  %v4636_v32 = vmul.f32 0.01, %v5997_v42  ;;  %v6001_v8 = vadd.f32 %v6000_v58, %v4283_v25  ;;  %v4285_v61 = vpop.f32.mrb[63].mxu0 }
 0x312   :  { %vm4509_vm13 = vcmp.gt.f32.partialorder %v5999_v45, 0.0  ;;  %v4637_v17 = vmul.f32 0.01, %v5999_v45  ;;  %v6003_v14 = vadd.f32 %v6002_v11, %v4285_v61 }
 0x313   :  { %v4764_v51 = vsel %vm4508_vm12, %v5997_v42, %v4636_v32  ;;  %vm4510_vm14 = vcmp.gt.f32.partialorder %v6001_v8, 0.0  ;;  %v4638_v31 = vmul.f32 0.01, %v6001_v8 }
 0x314   :  { %v4765_v47 = vsel %vm4509_vm13, %v5999_v45, %v4637_v17  ;;  %vm4511_vm15 = vcmp.gt.f32.partialorder %v6003_v14, 0.0  ;;  %v4639_v48 = vmul.f32 0.01, %v6003_v14 }
 0x315   :  { %v5810_v12 = vpack.c.bf16 %v4765_v47, %v4764_v51  ;;  %v4766_v50 = vsel %vm4510_vm14, %v6001_v8, %v4638_v31  ;;  %v3583_v13 = vpop.f32.mrb[64].mxu1 }
 0x316   :  { %v4767_v19 = vsel %vm4511_vm15, %v6003_v14, %v4639_v48  ;;  %v4289_v52 = vpop.f32.mrb[64].mxu0  ;;  %v6004_v15 = vadd.f32 %v3583_v13, %v8708_v49  ;;  %v3585_v62 = vpop.f32.mrb[65].mxu1 }
 0x317   :  { %5246 = vst [vmem:[%s9148_s3 + $0xf0] sm:$0xff] %v5810_v12  ;;  %v5811_v16 = vpack.c.bf16 %v4767_v19, %v4766_v50  ;;  %v4291_v53 = vpop.f32.mrb[65].mxu0  ;;  %v6006_v60 = vadd.f32 %v3585_v62, %v8712_v28  ;;  %v3587_v10 = vpop.f32.mrb[66].mxu1 }
 0x318   :  { %v4293_v57 = vpop.f32.mrb[66].mxu0  ;;  %v6005_v63 = vadd.f32 %v6004_v15, %v4289_v52  ;;  %v6008_v1 = vadd.f32 %v3587_v10, %v8708_v49  ;;  %v3589_v18 = vpop.f32.mrb[67].mxu1 }
 0x319   :  { %5247 = vst [vmem:[%s9148_s3 + $0xf8] sm:$0xff] %v5811_v16  ;;  %v4295_v2 = vpop.f32.mrb[67].mxu0  ;;  %v6007_v20 = vadd.f32 %v6006_v60, %v4291_v53  ;;  %v6010_v40 = vadd.f32 %v3589_v18, %v8712_v28 }
 0x31a   :  { %vm4512_vm0 = vcmp.gt.f32.partialorder %v6005_v63, 0.0  ;;  %v4640_v41 = vmul.f32 0.01, %v6005_v63  ;;  %v6009_v26 = vadd.f32 %v6008_v1, %v4293_v57 }
 0x31b   :  { %vm4513_vm1 = vcmp.gt.f32.partialorder %v6007_v20, 0.0  ;;  %v4641_v54 = vmul.f32 0.01, %v6007_v20  ;;  %v6011_v27 = vadd.f32 %v6010_v40, %v4295_v2 }
 0x31c   :  { %v4768_v4 = vsel %vm4512_vm0, %v6005_v63, %v4640_v41  ;;  %vm4514_vm2 = vcmp.gt.f32.partialorder %v6009_v26, 0.0  ;;  %v4642_v44 = vmul.f32 0.01, %v6009_v26 }
 0x31d   :  { %v4769_v21 = vsel %vm4513_vm1, %v6007_v20, %v4641_v54  ;;  %vm4515_vm3 = vcmp.gt.f32.partialorder %v6011_v27, 0.0  ;;  %v4643_v33 = vmul.f32 0.01, %v6011_v27  ;;  %v3593_v34 = vpop.f32.mrb[68].mxu1 }
 0x31e   :  { %v4299_v22 = vpop.f32.mrb[68].mxu0  ;;  %v5812_v0 = vpack.c.bf16 %v4769_v21, %v4768_v4  ;;  %v4770_v29 = vsel %vm4514_vm2, %v6009_v26, %v4642_v44  ;;  %v6012_v3 = vadd.f32 %v3593_v34, %v8708_v49  ;;  %v3595_v37 = vpop.f32.mrb[69].mxu1 }
 0x31f   :  { %v4301_v30 = vpop.f32.mrb[69].mxu0  ;;  %v4771_v7 = vsel %vm4515_vm3, %v6011_v27, %v4643_v33  ;;  %v6014_v46 = vadd.f32 %v3595_v37, %v8712_v28  ;;  %v3597_v5 = vpop.f32.mrb[70].mxu1 }
 0x320   :  { %v4303_v35 = vpop.f32.mrb[70].mxu0  ;;  %5248 = vst [vmem:[%s9148_s3 + $0x100] sm:$0xff] %v5812_v0  ;;  %v5813_v55 = vpack.c.bf16 %v4771_v7, %v4770_v29  ;;  %v6013_v43 = vadd.f32 %v6012_v3, %v4299_v22  ;;  %v6016_v6 = vadd.f32 %v3597_v5, %v8708_v49  ;;  %v3599_v23 = vpop.f32.mrb[71].mxu1 }
 0x321   :  { %v4305_v9 = vpop.f32.mrb[71].mxu0  ;;  %v6015_v56 = vadd.f32 %v6014_v46, %v4301_v30  ;;  %v6018_v24 = vadd.f32 %v3599_v23, %v8712_v28 }
 0x322   :  { %5249 = vst [vmem:[%s9148_s3 + $0x108] sm:$0xff] %v5813_v55  ;;  %vm4516_vm4 = vcmp.gt.f32.partialorder %v6013_v43, 0.0  ;;  %v4644_v59 = vmul.f32 0.01, %v6013_v43  ;;  %v6017_v58 = vadd.f32 %v6016_v6, %v4303_v35 }
 0x323   :  { %vm4517_vm5 = vcmp.gt.f32.partialorder %v6015_v56, 0.0  ;;  %v4645_v36 = vmul.f32 0.01, %v6015_v56  ;;  %v6019_v42 = vadd.f32 %v6018_v24, %v4305_v9 }
 0x324   :  { %v4772_v39 = vsel %vm4516_vm4, %v6013_v43, %v4644_v59  ;;  %vm4518_vm6 = vcmp.gt.f32.partialorder %v6017_v58, 0.0  ;;  %v4646_v38 = vmul.f32 0.01, %v6017_v58 }
 0x325   :  { %v4773_v11 = vsel %vm4517_vm5, %v6015_v56, %v4645_v36  ;;  %vm4519_vm7 = vcmp.gt.f32.partialorder %v6019_v42, 0.0  ;;  %v4647_v45 = vmul.f32 0.01, %v6019_v42  ;;  %v3603_v25 = vpop.f32.mrb[72].mxu1 }
 0x326   :  { %v4309_v32 = vpop.f32.mrb[72].mxu0  ;;  %v5814_v8 = vpack.c.bf16 %v4773_v11, %v4772_v39  ;;  %v4774_v61 = vsel %vm4518_vm6, %v6017_v58, %v4646_v38  ;;  %v6020_v17 = vadd.f32 %v3603_v25, %v8708_v49  ;;  %v3605_v14 = vpop.f32.mrb[73].mxu1 }
 0x327   :  { %v4311_v51 = vpop.f32.mrb[73].mxu0  ;;  %v4775_v31 = vsel %vm4519_vm7, %v6019_v42, %v4647_v45  ;;  %v6022_v47 = vadd.f32 %v3605_v14, %v8712_v28  ;;  %v3607_v48 = vpop.f32.mrb[74].mxu1 }
 0x328   :  { %v4313_v12 = vpop.f32.mrb[74].mxu0  ;;  %5250 = vst [vmem:[%s9148_s3 + $0x110] sm:$0xff] %v5814_v8  ;;  %v5815_v50 = vpack.c.bf16 %v4775_v31, %v4774_v61  ;;  %v6021_v19 = vadd.f32 %v6020_v17, %v4309_v32  ;;  %v6024_v13 = vadd.f32 %v3607_v48, %v8708_v49  ;;  %v3609_v52 = vpop.f32.mrb[75].mxu1 }
 0x329   :  { %v4315_v16 = vpop.f32.mrb[75].mxu0  ;;  %v6023_v15 = vadd.f32 %v6022_v47, %v4311_v51  ;;  %v6026_v62 = vadd.f32 %v3609_v52, %v8712_v28 }
 0x32a   :  { %5251 = vst [vmem:[%s9148_s3 + $0x118] sm:$0xff] %v5815_v50  ;;  %vm4520_vm8 = vcmp.gt.f32.partialorder %v6021_v19, 0.0  ;;  %v4648_v53 = vmul.f32 0.01, %v6021_v19  ;;  %v6025_v60 = vadd.f32 %v6024_v13, %v4313_v12 }
 0x32b   :  { %vm4521_vm9 = vcmp.gt.f32.partialorder %v6023_v15, 0.0  ;;  %v4649_v10 = vmul.f32 0.01, %v6023_v15  ;;  %v6027_v57 = vadd.f32 %v6026_v62, %v4315_v16 }
 0x32c   :  { %v4776_v63 = vsel %vm4520_vm8, %v6021_v19, %v4648_v53  ;;  %vm4522_vm10 = vcmp.gt.f32.partialorder %v6025_v60, 0.0  ;;  %v4650_v1 = vmul.f32 0.01, %v6025_v60 }
 0x32d   :  { %v4777_v18 = vsel %vm4521_vm9, %v6023_v15, %v4649_v10  ;;  %vm4523_vm11 = vcmp.gt.f32.partialorder %v6027_v57, 0.0  ;;  %v4651_v2 = vmul.f32 0.01, %v6027_v57  ;;  %v3613_v20 = vpop.f32.mrb[76].mxu1 }
 0x32e   :  { %v4319_v40 = vpop.f32.mrb[76].mxu0  ;;  %v5816_v41 = vpack.c.bf16 %v4777_v18, %v4776_v63  ;;  %v4778_v26 = vsel %vm4522_vm10, %v6025_v60, %v4650_v1  ;;  %v6028_v54 = vadd.f32 %v3613_v20, %v8708_v49  ;;  %v3615_v27 = vpop.f32.mrb[77].mxu1 }
 0x32f   :  { %v4321_v4 = vpop.f32.mrb[77].mxu0  ;;  %v4779_v44 = vsel %vm4523_vm11, %v6027_v57, %v4651_v2  ;;  %v6030_v21 = vadd.f32 %v3615_v27, %v8712_v28  ;;  %v3617_v33 = vpop.f32.mrb[78].mxu1 }
 0x330   :  { %v4323_v34 = vpop.f32.mrb[78].mxu0  ;;  %5252 = vst [vmem:[%s9148_s3 + $0x120] sm:$0xff] %v5816_v41  ;;  %v5817_v22 = vpack.c.bf16 %v4779_v44, %v4778_v26  ;;  %v6029_v0 = vadd.f32 %v6028_v54, %v4319_v40  ;;  %v6032_v29 = vadd.f32 %v3617_v33, %v8708_v49  ;;  %v3619_v3 = vpop.f32.mrb[79].mxu1 }
 0x331   :  { %v4325_v37 = vpop.f32.mrb[79].mxu0  ;;  %v6031_v30 = vadd.f32 %v6030_v21, %v4321_v4  ;;  %v6034_v7 = vadd.f32 %v3619_v3, %v8712_v28 }
 0x332   :  { %5253 = vst [vmem:[%s9148_s3 + $0x128] sm:$0xff] %v5817_v22  ;;  %vm4524_vm12 = vcmp.gt.f32.partialorder %v6029_v0, 0.0  ;;  %v4652_v46 = vmul.f32 0.01, %v6029_v0  ;;  %v6033_v5 = vadd.f32 %v6032_v29, %v4323_v34 }
 0x333   :  { %vm4525_vm13 = vcmp.gt.f32.partialorder %v6031_v30, 0.0  ;;  %v4653_v35 = vmul.f32 0.01, %v6031_v30  ;;  %v6035_v55 = vadd.f32 %v6034_v7, %v4325_v37 }
 0x334   :  { %v4780_v43 = vsel %vm4524_vm12, %v6029_v0, %v4652_v46  ;;  %vm4526_vm14 = vcmp.gt.f32.partialorder %v6033_v5, 0.0  ;;  %v4654_v6 = vmul.f32 0.01, %v6033_v5 }
 0x335   :  { %v4781_v23 = vsel %vm4525_vm13, %v6031_v30, %v4653_v35  ;;  %vm4527_vm15 = vcmp.gt.f32.partialorder %v6035_v55, 0.0  ;;  %v4655_v9 = vmul.f32 0.01, %v6035_v55  ;;  %v3623_v56 = vpop.f32.mrb[80].mxu1 }
 0x336   :  { %v4329_v24 = vpop.f32.mrb[80].mxu0  ;;  %v5818_v59 = vpack.c.bf16 %v4781_v23, %v4780_v43  ;;  %v4782_v58 = vsel %vm4526_vm14, %v6033_v5, %v4654_v6  ;;  %v6036_v36 = vadd.f32 %v3623_v56, %v8708_v49  ;;  %v3625_v42 = vpop.f32.mrb[81].mxu1 }
 0x337   :  { %v4331_v39 = vpop.f32.mrb[81].mxu0  ;;  %v4783_v38 = vsel %vm4527_vm15, %v6035_v55, %v4655_v9  ;;  %v6038_v11 = vadd.f32 %v3625_v42, %v8712_v28  ;;  %v3627_v45 = vpop.f32.mrb[82].mxu1 }
 0x338   :  { %v4333_v25 = vpop.f32.mrb[82].mxu0  ;;  %5254 = vst [vmem:[%s9148_s3 + $0x130] sm:$0xff] %v5818_v59  ;;  %v5819_v32 = vpack.c.bf16 %v4783_v38, %v4782_v58  ;;  %v6037_v8 = vadd.f32 %v6036_v36, %v4329_v24  ;;  %v6040_v61 = vadd.f32 %v3627_v45, %v8708_v49  ;;  %v3629_v17 = vpop.f32.mrb[83].mxu1 }
 0x339   :  { %v4335_v14 = vpop.f32.mrb[83].mxu0  ;;  %v6039_v51 = vadd.f32 %v6038_v11, %v4331_v39  ;;  %v6042_v31 = vadd.f32 %v3629_v17, %v8712_v28 }
 0x33a   :  { %5255 = vst [vmem:[%s9148_s3 + $0x138] sm:$0xff] %v5819_v32  ;;  %vm4528_vm0 = vcmp.gt.f32.partialorder %v6037_v8, 0.0  ;;  %v4656_v47 = vmul.f32 0.01, %v6037_v8  ;;  %v6041_v48 = vadd.f32 %v6040_v61, %v4333_v25 }
 0x33b   :  { %vm4529_vm1 = vcmp.gt.f32.partialorder %v6039_v51, 0.0  ;;  %v4657_v12 = vmul.f32 0.01, %v6039_v51  ;;  %v6043_v50 = vadd.f32 %v6042_v31, %v4335_v14 }
 0x33c   :  { %v4784_v19 = vsel %vm4528_vm0, %v6037_v8, %v4656_v47  ;;  %vm4530_vm2 = vcmp.gt.f32.partialorder %v6041_v48, 0.0  ;;  %v4658_v13 = vmul.f32 0.01, %v6041_v48 }
 0x33d   :  { %v4785_v52 = vsel %vm4529_vm1, %v6039_v51, %v4657_v12  ;;  %vm4531_vm3 = vcmp.gt.f32.partialorder %v6043_v50, 0.0  ;;  %v4659_v16 = vmul.f32 0.01, %v6043_v50  ;;  %v3633_v15 = vpop.f32.mrb[84].mxu1 }
 0x33e   :  { %v4339_v62 = vpop.f32.mrb[84].mxu0  ;;  %v5820_v53 = vpack.c.bf16 %v4785_v52, %v4784_v19  ;;  %v4786_v60 = vsel %vm4530_vm2, %v6041_v48, %v4658_v13  ;;  %v6044_v10 = vadd.f32 %v3633_v15, %v8708_v49  ;;  %v3635_v57 = vpop.f32.mrb[85].mxu1 }
 0x33f   :  { %v4341_v63 = vpop.f32.mrb[85].mxu0  ;;  %v4787_v1 = vsel %vm4531_vm3, %v6043_v50, %v4659_v16  ;;  %v6046_v18 = vadd.f32 %v3635_v57, %v8712_v28  ;;  %v3637_v2 = vpop.f32.mrb[86].mxu1 }
 0x340   :  { %v4343_v20 = vpop.f32.mrb[86].mxu0  ;;  %5256 = vst [vmem:[%s9148_s3 + $0x140] sm:$0xff] %v5820_v53  ;;  %v5821_v40 = vpack.c.bf16 %v4787_v1, %v4786_v60  ;;  %v6045_v41 = vadd.f32 %v6044_v10, %v4339_v62  ;;  %v6048_v26 = vadd.f32 %v3637_v2, %v8708_v49  ;;  %v3639_v54 = vpop.f32.mrb[87].mxu1 }
 0x341   :  { %v4345_v27 = vpop.f32.mrb[87].mxu0  ;;  %v6047_v4 = vadd.f32 %v6046_v18, %v4341_v63  ;;  %v6050_v44 = vadd.f32 %v3639_v54, %v8712_v28 }
 0x342   :  { %5257 = vst [vmem:[%s9148_s3 + $0x148] sm:$0xff] %v5821_v40  ;;  %vm4532_vm4 = vcmp.gt.f32.partialorder %v6045_v41, 0.0  ;;  %v4660_v21 = vmul.f32 0.01, %v6045_v41  ;;  %v6049_v33 = vadd.f32 %v6048_v26, %v4343_v20 }
 0x343   :  { %vm4533_vm5 = vcmp.gt.f32.partialorder %v6047_v4, 0.0  ;;  %v4661_v34 = vmul.f32 0.01, %v6047_v4  ;;  %v6051_v22 = vadd.f32 %v6050_v44, %v4345_v27 }
 0x344   :  { %v4788_v0 = vsel %vm4532_vm4, %v6045_v41, %v4660_v21  ;;  %vm4534_vm6 = vcmp.gt.f32.partialorder %v6049_v33, 0.0  ;;  %v4662_v29 = vmul.f32 0.01, %v6049_v33 }
 0x345   :  { %v4789_v3 = vsel %vm4533_vm5, %v6047_v4, %v4661_v34  ;;  %vm4535_vm7 = vcmp.gt.f32.partialorder %v6051_v22, 0.0  ;;  %v4663_v37 = vmul.f32 0.01, %v6051_v22  ;;  %v3643_v30 = vpop.f32.mrb[88].mxu1 }
 0x346   :  { %v4349_v7 = vpop.f32.mrb[88].mxu0  ;;  %v5822_v46 = vpack.c.bf16 %v4789_v3, %v4788_v0  ;;  %v4790_v5 = vsel %vm4534_vm6, %v6049_v33, %v4662_v29  ;;  %v6052_v35 = vadd.f32 %v3643_v30, %v8708_v49  ;;  %v3645_v55 = vpop.f32.mrb[89].mxu1 }
 0x347   :  { %v4351_v43 = vpop.f32.mrb[89].mxu0  ;;  %v4791_v6 = vsel %vm4535_vm7, %v6051_v22, %v4663_v37  ;;  %v6054_v23 = vadd.f32 %v3645_v55, %v8712_v28  ;;  %v3647_v9 = vpop.f32.mrb[90].mxu1 }
 0x348   :  { %v4353_v56 = vpop.f32.mrb[90].mxu0  ;;  %5258 = vst [vmem:[%s9148_s3 + $0x150] sm:$0xff] %v5822_v46  ;;  %v5823_v24 = vpack.c.bf16 %v4791_v6, %v4790_v5  ;;  %v6053_v59 = vadd.f32 %v6052_v35, %v4349_v7  ;;  %v6056_v58 = vadd.f32 %v3647_v9, %v8708_v49  ;;  %v3649_v36 = vpop.f32.mrb[91].mxu1 }
 0x349   :  { %v4355_v42 = vpop.f32.mrb[91].mxu0  ;;  %v6055_v39 = vadd.f32 %v6054_v23, %v4351_v43  ;;  %v6058_v38 = vadd.f32 %v3649_v36, %v8712_v28 }
 0x34a   :  { %5259 = vst [vmem:[%s9148_s3 + $0x158] sm:$0xff] %v5823_v24  ;;  %vm4536_vm8 = vcmp.gt.f32.partialorder %v6053_v59, 0.0  ;;  %v4664_v11 = vmul.f32 0.01, %v6053_v59  ;;  %v6057_v45 = vadd.f32 %v6056_v58, %v4353_v56 }
 0x34b   :  { %vm4537_vm9 = vcmp.gt.f32.partialorder %v6055_v39, 0.0  ;;  %v4665_v25 = vmul.f32 0.01, %v6055_v39  ;;  %v6059_v32 = vadd.f32 %v6058_v38, %v4355_v42 }
 0x34c   :  { %v4792_v8 = vsel %vm4536_vm8, %v6053_v59, %v4664_v11  ;;  %vm4538_vm10 = vcmp.gt.f32.partialorder %v6057_v45, 0.0  ;;  %v4666_v61 = vmul.f32 0.01, %v6057_v45 }
 0x34d   :  { %v4793_v17 = vsel %vm4537_vm9, %v6055_v39, %v4665_v25  ;;  %vm4539_vm11 = vcmp.gt.f32.partialorder %v6059_v32, 0.0  ;;  %v4667_v14 = vmul.f32 0.01, %v6059_v32  ;;  %v3653_v51 = vpop.f32.mrb[92].mxu1 }
 0x34e   :  { %v4359_v31 = vpop.f32.mrb[92].mxu0  ;;  %v5824_v47 = vpack.c.bf16 %v4793_v17, %v4792_v8  ;;  %v4794_v48 = vsel %vm4538_vm10, %v6057_v45, %v4666_v61  ;;  %v6060_v12 = vadd.f32 %v3653_v51, %v8708_v49  ;;  %v3655_v50 = vpop.f32.mrb[93].mxu1 }
 0x34f   :  { %v4361_v19 = vpop.f32.mrb[93].mxu0  ;;  %v4795_v13 = vsel %vm4539_vm11, %v6059_v32, %v4667_v14  ;;  %v6062_v52 = vadd.f32 %v3655_v50, %v8712_v28  ;;  %v3657_v16 = vpop.f32.mrb[94].mxu1 }
 0x350   :  { %v4363_v15 = vpop.f32.mrb[94].mxu0  ;;  %5260 = vst [vmem:[%s9148_s3 + $0x160] sm:$0xff] %v5824_v47  ;;  %v5825_v62 = vpack.c.bf16 %v4795_v13, %v4794_v48  ;;  %v6061_v53 = vadd.f32 %v6060_v12, %v4359_v31  ;;  %v6064_v60 = vadd.f32 %v3657_v16, %v8708_v49  ;;  %v3659_v10 = vpop.f32.mrb[95].mxu1 }
 0x351   :  { %v4365_v57 = vpop.f32.mrb[95].mxu0  ;;  %v6063_v63 = vadd.f32 %v6062_v52, %v4361_v19  ;;  %v6066_v1 = vadd.f32 %v3659_v10, %v8712_v28 }
 0x352   :  { %5261 = vst [vmem:[%s9148_s3 + $0x168] sm:$0xff] %v5825_v62  ;;  %vm4540_vm12 = vcmp.gt.f32.partialorder %v6061_v53, 0.0  ;;  %v4668_v18 = vmul.f32 0.01, %v6061_v53  ;;  %v6065_v2 = vadd.f32 %v6064_v60, %v4363_v15 }
 0x353   :  { %vm4541_vm13 = vcmp.gt.f32.partialorder %v6063_v63, 0.0  ;;  %v4669_v20 = vmul.f32 0.01, %v6063_v63  ;;  %v6067_v40 = vadd.f32 %v6066_v1, %v4365_v57 }
 0x354   :  { %v4796_v41 = vsel %vm4540_vm12, %v6061_v53, %v4668_v18  ;;  %vm4542_vm14 = vcmp.gt.f32.partialorder %v6065_v2, 0.0  ;;  %v4670_v26 = vmul.f32 0.01, %v6065_v2 }
 0x355   :  { %v4797_v54 = vsel %vm4541_vm13, %v6063_v63, %v4669_v20  ;;  %vm4543_vm15 = vcmp.gt.f32.partialorder %v6067_v40, 0.0  ;;  %v4671_v27 = vmul.f32 0.01, %v6067_v40  ;;  %v3663_v4 = vpop.f32.mrb[96].mxu1 }
 0x356   :  { %v4369_v44 = vpop.f32.mrb[96].mxu0  ;;  %v5826_v21 = vpack.c.bf16 %v4797_v54, %v4796_v41  ;;  %v4798_v33 = vsel %vm4542_vm14, %v6065_v2, %v4670_v26  ;;  %v6068_v34 = vadd.f32 %v3663_v4, %v8708_v49  ;;  %v3665_v22 = vpop.f32.mrb[97].mxu1 }
 0x357   :  { %v4371_v0 = vpop.f32.mrb[97].mxu0  ;;  %v4799_v29 = vsel %vm4543_vm15, %v6067_v40, %v4671_v27  ;;  %v6070_v3 = vadd.f32 %v3665_v22, %v8712_v28  ;;  %v3667_v37 = vpop.f32.mrb[98].mxu1 }
 0x358   :  { %v4373_v30 = vpop.f32.mrb[98].mxu0  ;;  %5262 = vst [vmem:[%s9148_s3 + $0x170] sm:$0xff] %v5826_v21  ;;  %v5827_v7 = vpack.c.bf16 %v4799_v29, %v4798_v33  ;;  %v6069_v46 = vadd.f32 %v6068_v34, %v4369_v44  ;;  %v6072_v5 = vadd.f32 %v3667_v37, %v8708_v49  ;;  %v3669_v35 = vpop.f32.mrb[99].mxu1 }
 0x359   :  { %v4375_v55 = vpop.f32.mrb[99].mxu0  ;;  %v6071_v43 = vadd.f32 %v6070_v3, %v4371_v0  ;;  %v6074_v6 = vadd.f32 %v3669_v35, %v8712_v28 }
 0x35a   :  { %5263 = vst [vmem:[%s9148_s3 + $0x178] sm:$0xff] %v5827_v7  ;;  %vm4544_vm0 = vcmp.gt.f32.partialorder %v6069_v46, 0.0  ;;  %v4672_v23 = vmul.f32 0.01, %v6069_v46  ;;  %v6073_v9 = vadd.f32 %v6072_v5, %v4373_v30 }
 0x35b   :  { %vm4545_vm1 = vcmp.gt.f32.partialorder %v6071_v43, 0.0  ;;  %v4673_v56 = vmul.f32 0.01, %v6071_v43  ;;  %v6075_v24 = vadd.f32 %v6074_v6, %v4375_v55 }
 0x35c   :  { %v4800_v59 = vsel %vm4544_vm0, %v6069_v46, %v4672_v23  ;;  %vm4546_vm2 = vcmp.gt.f32.partialorder %v6073_v9, 0.0  ;;  %v4674_v58 = vmul.f32 0.01, %v6073_v9 }
 0x35d   :  { %v4801_v36 = vsel %vm4545_vm1, %v6071_v43, %v4673_v56  ;;  %vm4547_vm3 = vcmp.gt.f32.partialorder %v6075_v24, 0.0  ;;  %v4675_v42 = vmul.f32 0.01, %v6075_v24  ;;  %v3673_v39 = vpop.f32.mrb[100].mxu1 }
 0x35e   :  { %v4379_v38 = vpop.f32.mrb[100].mxu0  ;;  %v5828_v11 = vpack.c.bf16 %v4801_v36, %v4800_v59  ;;  %v4802_v45 = vsel %vm4546_vm2, %v6073_v9, %v4674_v58  ;;  %v6076_v25 = vadd.f32 %v3673_v39, %v8708_v49  ;;  %v3675_v32 = vpop.f32.mrb[101].mxu1 }
 0x35f   :  { %v4381_v8 = vpop.f32.mrb[101].mxu0  ;;  %v4803_v61 = vsel %vm4547_vm3, %v6075_v24, %v4675_v42  ;;  %v6078_v17 = vadd.f32 %v3675_v32, %v8712_v28  ;;  %v3677_v14 = vpop.f32.mrb[102].mxu1 }
 0x360   :  { %v4383_v51 = vpop.f32.mrb[102].mxu0  ;;  %5264 = vst [vmem:[%s9148_s3 + $0x180] sm:$0xff] %v5828_v11  ;;  %v5829_v31 = vpack.c.bf16 %v4803_v61, %v4802_v45  ;;  %v6077_v47 = vadd.f32 %v6076_v25, %v4379_v38  ;;  %v6080_v48 = vadd.f32 %v3677_v14, %v8708_v49  ;;  %v3679_v12 = vpop.f32.mrb[103].mxu1 }
 0x361   :  { %v4385_v50 = vpop.f32.mrb[103].mxu0  ;;  %v6079_v19 = vadd.f32 %v6078_v17, %v4381_v8  ;;  %v6082_v13 = vadd.f32 %v3679_v12, %v8712_v28 }
 0x362   :  { %5265 = vst [vmem:[%s9148_s3 + $0x188] sm:$0xff] %v5829_v31  ;;  %vm4548_vm4 = vcmp.gt.f32.partialorder %v6077_v47, 0.0  ;;  %v4676_v52 = vmul.f32 0.01, %v6077_v47  ;;  %v6081_v16 = vadd.f32 %v6080_v48, %v4383_v51 }
 0x363   :  { %vm4549_vm5 = vcmp.gt.f32.partialorder %v6079_v19, 0.0  ;;  %v4677_v15 = vmul.f32 0.01, %v6079_v19  ;;  %v6083_v62 = vadd.f32 %v6082_v13, %v4385_v50 }
 0x364   :  { %v4804_v53 = vsel %vm4548_vm4, %v6077_v47, %v4676_v52  ;;  %vm4550_vm6 = vcmp.gt.f32.partialorder %v6081_v16, 0.0  ;;  %v4678_v60 = vmul.f32 0.01, %v6081_v16 }
 0x365   :  { %v4805_v10 = vsel %vm4549_vm5, %v6079_v19, %v4677_v15  ;;  %vm4551_vm7 = vcmp.gt.f32.partialorder %v6083_v62, 0.0  ;;  %v4679_v57 = vmul.f32 0.01, %v6083_v62  ;;  %v3683_v63 = vpop.f32.mrb[104].mxu1 }
 0x366   :  { %v4389_v1 = vpop.f32.mrb[104].mxu0  ;;  %v5830_v18 = vpack.c.bf16 %v4805_v10, %v4804_v53  ;;  %v4806_v2 = vsel %vm4550_vm6, %v6081_v16, %v4678_v60  ;;  %v6084_v20 = vadd.f32 %v3683_v63, %v8708_v49  ;;  %v3685_v40 = vpop.f32.mrb[105].mxu1 }
 0x367   :  { %v4391_v41 = vpop.f32.mrb[105].mxu0  ;;  %v4807_v26 = vsel %vm4551_vm7, %v6083_v62, %v4679_v57  ;;  %v6086_v54 = vadd.f32 %v3685_v40, %v8712_v28  ;;  %v3687_v27 = vpop.f32.mrb[106].mxu1 }
 0x368   :  { %v4393_v4 = vpop.f32.mrb[106].mxu0  ;;  %5266 = vst [vmem:[%s9148_s3 + $0x190] sm:$0xff] %v5830_v18  ;;  %v5831_v44 = vpack.c.bf16 %v4807_v26, %v4806_v2  ;;  %v6085_v21 = vadd.f32 %v6084_v20, %v4389_v1  ;;  %v6088_v33 = vadd.f32 %v3687_v27, %v8708_v49  ;;  %v3689_v34 = vpop.f32.mrb[107].mxu1 }
 0x369   :  { %v4395_v22 = vpop.f32.mrb[107].mxu0  ;;  %v6087_v0 = vadd.f32 %v6086_v54, %v4391_v41  ;;  %v6090_v29 = vadd.f32 %v3689_v34, %v8712_v28 }
 0x36a   :  { %5267 = vst [vmem:[%s9148_s3 + $0x198] sm:$0xff] %v5831_v44  ;;  %vm4552_vm8 = vcmp.gt.f32.partialorder %v6085_v21, 0.0  ;;  %v4680_v3 = vmul.f32 0.01, %v6085_v21  ;;  %v6089_v37 = vadd.f32 %v6088_v33, %v4393_v4 }
 0x36b   :  { %vm4553_vm9 = vcmp.gt.f32.partialorder %v6087_v0, 0.0  ;;  %v4681_v30 = vmul.f32 0.01, %v6087_v0  ;;  %v6091_v7 = vadd.f32 %v6090_v29, %v4395_v22 }
 0x36c   :  { %v4808_v46 = vsel %vm4552_vm8, %v6085_v21, %v4680_v3  ;;  %vm4554_vm10 = vcmp.gt.f32.partialorder %v6089_v37, 0.0  ;;  %v4682_v5 = vmul.f32 0.01, %v6089_v37 }
 0x36d   :  { %v4809_v35 = vsel %vm4553_vm9, %v6087_v0, %v4681_v30  ;;  %vm4555_vm11 = vcmp.gt.f32.partialorder %v6091_v7, 0.0  ;;  %v4683_v55 = vmul.f32 0.01, %v6091_v7  ;;  %v3693_v43 = vpop.f32.mrb[108].mxu1 }
 0x36e   :  { %v4399_v6 = vpop.f32.mrb[108].mxu0  ;;  %v5832_v23 = vpack.c.bf16 %v4809_v35, %v4808_v46  ;;  %v4810_v9 = vsel %vm4554_vm10, %v6089_v37, %v4682_v5  ;;  %v6092_v56 = vadd.f32 %v3693_v43, %v8708_v49  ;;  %v3695_v24 = vpop.f32.mrb[109].mxu1 }
 0x36f   :  { %v4401_v59 = vpop.f32.mrb[109].mxu0  ;;  %v4811_v58 = vsel %vm4555_vm11, %v6091_v7, %v4683_v55  ;;  %v6094_v36 = vadd.f32 %v3695_v24, %v8712_v28  ;;  %v3697_v42 = vpop.f32.mrb[110].mxu1 }
 0x370   :  { %v4403_v39 = vpop.f32.mrb[110].mxu0  ;;  %5268 = vst [vmem:[%s9148_s3 + $0x1a0] sm:$0xff] %v5832_v23  ;;  %v5833_v38 = vpack.c.bf16 %v4811_v58, %v4810_v9  ;;  %v6093_v11 = vadd.f32 %v6092_v56, %v4399_v6  ;;  %v6096_v45 = vadd.f32 %v3697_v42, %v8708_v49  ;;  %v3699_v25 = vpop.f32.mrb[111].mxu1 }
 0x371   :  { %v4405_v32 = vpop.f32.mrb[111].mxu0  ;;  %v6095_v8 = vadd.f32 %v6094_v36, %v4401_v59  ;;  %v6098_v61 = vadd.f32 %v3699_v25, %v8712_v28 }
 0x372   :  { %5269 = vst [vmem:[%s9148_s3 + $0x1a8] sm:$0xff] %v5833_v38  ;;  %vm4556_vm12 = vcmp.gt.f32.partialorder %v6093_v11, 0.0  ;;  %v4684_v17 = vmul.f32 0.01, %v6093_v11  ;;  %v6097_v14 = vadd.f32 %v6096_v45, %v4403_v39 }
 0x373   :  { %vm4557_vm13 = vcmp.gt.f32.partialorder %v6095_v8, 0.0  ;;  %v4685_v51 = vmul.f32 0.01, %v6095_v8  ;;  %v6099_v31 = vadd.f32 %v6098_v61, %v4405_v32 }
 0x374   :  { %v4812_v47 = vsel %vm4556_vm12, %v6093_v11, %v4684_v17  ;;  %vm4558_vm14 = vcmp.gt.f32.partialorder %v6097_v14, 0.0  ;;  %v4686_v48 = vmul.f32 0.01, %v6097_v14 }
 0x375   :  { %v4813_v12 = vsel %vm4557_vm13, %v6095_v8, %v4685_v51  ;;  %vm4559_vm15 = vcmp.gt.f32.partialorder %v6099_v31, 0.0  ;;  %v4687_v50 = vmul.f32 0.01, %v6099_v31  ;;  %v3703_v19 = vpop.f32.mrb[112].mxu1 }
 0x376   :  { %v4409_v13 = vpop.f32.mrb[112].mxu0  ;;  %v5834_v52 = vpack.c.bf16 %v4813_v12, %v4812_v47  ;;  %v4814_v16 = vsel %vm4558_vm14, %v6097_v14, %v4686_v48  ;;  %v6100_v15 = vadd.f32 %v3703_v19, %v8708_v49  ;;  %v3705_v62 = vpop.f32.mrb[113].mxu1 }
 0x377   :  { %v4411_v53 = vpop.f32.mrb[113].mxu0  ;;  %v4815_v60 = vsel %vm4559_vm15, %v6099_v31, %v4687_v50  ;;  %v6102_v10 = vadd.f32 %v3705_v62, %v8712_v28  ;;  %v3707_v57 = vpop.f32.mrb[114].mxu1 }
 0x378   :  { %v4413_v63 = vpop.f32.mrb[114].mxu0  ;;  %5270 = vst [vmem:[%s9148_s3 + $0x1b0] sm:$0xff] %v5834_v52  ;;  %v5835_v1 = vpack.c.bf16 %v4815_v60, %v4814_v16  ;;  %v6101_v18 = vadd.f32 %v6100_v15, %v4409_v13  ;;  %v6104_v2 = vadd.f32 %v3707_v57, %v8708_v49  ;;  %v3709_v20 = vpop.f32.mrb[115].mxu1 }
 0x379   :  { %v4415_v40 = vpop.f32.mrb[115].mxu0  ;;  %v6103_v41 = vadd.f32 %v6102_v10, %v4411_v53  ;;  %v6106_v26 = vadd.f32 %v3709_v20, %v8712_v28 }
 0x37a   :  { %5271 = vst [vmem:[%s9148_s3 + $0x1b8] sm:$0xff] %v5835_v1  ;;  %vm4560_vm0 = vcmp.gt.f32.partialorder %v6101_v18, 0.0  ;;  %v4688_v54 = vmul.f32 0.01, %v6101_v18  ;;  %v6105_v27 = vadd.f32 %v6104_v2, %v4413_v63 }
 0x37b   :  { %vm4561_vm1 = vcmp.gt.f32.partialorder %v6103_v41, 0.0  ;;  %v4689_v4 = vmul.f32 0.01, %v6103_v41  ;;  %v6107_v44 = vadd.f32 %v6106_v26, %v4415_v40 }
 0x37c   :  { %v4816_v21 = vsel %vm4560_vm0, %v6101_v18, %v4688_v54  ;;  %vm4562_vm2 = vcmp.gt.f32.partialorder %v6105_v27, 0.0  ;;  %v4690_v33 = vmul.f32 0.01, %v6105_v27 }
 0x37d   :  { %v4817_v34 = vsel %vm4561_vm1, %v6103_v41, %v4689_v4  ;;  %vm4563_vm3 = vcmp.gt.f32.partialorder %v6107_v44, 0.0  ;;  %v4691_v22 = vmul.f32 0.01, %v6107_v44  ;;  %v3713_v0 = vpop.f32.mrb[116].mxu1 }
 0x37e   :  { %v4419_v29 = vpop.f32.mrb[116].mxu0  ;;  %v5836_v3 = vpack.c.bf16 %v4817_v34, %v4816_v21  ;;  %v4818_v37 = vsel %vm4562_vm2, %v6105_v27, %v4690_v33  ;;  %v6108_v30 = vadd.f32 %v3713_v0, %v8708_v49  ;;  %v3715_v7 = vpop.f32.mrb[117].mxu1 }
 0x37f   :  { %v4421_v46 = vpop.f32.mrb[117].mxu0  ;;  %v4819_v5 = vsel %vm4563_vm3, %v6107_v44, %v4691_v22  ;;  %v6110_v35 = vadd.f32 %v3715_v7, %v8712_v28  ;;  %v3717_v55 = vpop.f32.mrb[118].mxu1 }
 0x380   :  { %v4423_v43 = vpop.f32.mrb[118].mxu0  ;;  %5272 = vst [vmem:[%s9148_s3 + $0x1c0] sm:$0xff] %v5836_v3  ;;  %v5837_v6 = vpack.c.bf16 %v4819_v5, %v4818_v37  ;;  %v6109_v23 = vadd.f32 %v6108_v30, %v4419_v29  ;;  %v6112_v9 = vadd.f32 %v3717_v55, %v8708_v49  ;;  %v3719_v56 = vpop.f32.mrb[119].mxu1 }
 0x381   :  { %v4425_v24 = vpop.f32.mrb[119].mxu0  ;;  %v6111_v59 = vadd.f32 %v6110_v35, %v4421_v46  ;;  %v6114_v58 = vadd.f32 %v3719_v56, %v8712_v28 }
 0x382   :  { %5273 = vst [vmem:[%s9148_s3 + $0x1c8] sm:$0xff] %v5837_v6  ;;  %vm4564_vm4 = vcmp.gt.f32.partialorder %v6109_v23, 0.0  ;;  %v4692_v36 = vmul.f32 0.01, %v6109_v23  ;;  %v6113_v42 = vadd.f32 %v6112_v9, %v4423_v43 }
 0x383   :  { %vm4565_vm5 = vcmp.gt.f32.partialorder %v6111_v59, 0.0  ;;  %v4693_v39 = vmul.f32 0.01, %v6111_v59  ;;  %v6115_v38 = vadd.f32 %v6114_v58, %v4425_v24 }
 0x384   :  { %v4820_v11 = vsel %vm4564_vm4, %v6109_v23, %v4692_v36  ;;  %vm4566_vm6 = vcmp.gt.f32.partialorder %v6113_v42, 0.0  ;;  %v4694_v45 = vmul.f32 0.01, %v6113_v42 }
 0x385   :  { %v4821_v25 = vsel %vm4565_vm5, %v6111_v59, %v4693_v39  ;;  %vm4567_vm7 = vcmp.gt.f32.partialorder %v6115_v38, 0.0  ;;  %v4695_v32 = vmul.f32 0.01, %v6115_v38  ;;  %v3723_v8 = vpop.f32.mrb[120].mxu1 }
 0x386   :  { %v4429_v61 = vpop.f32.mrb[120].mxu0  ;;  %v5838_v17 = vpack.c.bf16 %v4821_v25, %v4820_v11  ;;  %v4822_v14 = vsel %vm4566_vm6, %v6113_v42, %v4694_v45  ;;  %v6116_v51 = vadd.f32 %v3723_v8, %v8708_v49  ;;  %v3725_v31 = vpop.f32.mrb[121].mxu1 }
 0x387   :  { %v4431_v47 = vpop.f32.mrb[121].mxu0  ;;  %v4823_v48 = vsel %vm4567_vm7, %v6115_v38, %v4695_v32  ;;  %v6118_v12 = vadd.f32 %v3725_v31, %v8712_v28  ;;  %v3727_v50 = vpop.f32.mrb[122].mxu1 }
 0x388   :  { %v4433_v19 = vpop.f32.mrb[122].mxu0  ;;  %5274 = vst [vmem:[%s9148_s3 + $0x1d0] sm:$0xff] %v5838_v17  ;;  %v5839_v13 = vpack.c.bf16 %v4823_v48, %v4822_v14  ;;  %v6117_v52 = vadd.f32 %v6116_v51, %v4429_v61  ;;  %v6120_v16 = vadd.f32 %v3727_v50, %v8708_v49  ;;  %v3729_v15 = vpop.f32.mrb[123].mxu1 }
 0x389   :  { %v4435_v62 = vpop.f32.mrb[123].mxu0  ;;  %v6119_v53 = vadd.f32 %v6118_v12, %v4431_v47  ;;  %v6122_v60 = vadd.f32 %v3729_v15, %v8712_v28 }
 0x38a   :  { %5275 = vst [vmem:[%s9148_s3 + $0x1d8] sm:$0xff] %v5839_v13  ;;  %vm4568_vm8 = vcmp.gt.f32.partialorder %v6117_v52, 0.0  ;;  %v4696_v10 = vmul.f32 0.01, %v6117_v52  ;;  %v6121_v57 = vadd.f32 %v6120_v16, %v4433_v19 }
 0x38b   :  { %vm4569_vm9 = vcmp.gt.f32.partialorder %v6119_v53, 0.0  ;;  %v4697_v63 = vmul.f32 0.01, %v6119_v53  ;;  %v6123_v1 = vadd.f32 %v6122_v60, %v4435_v62 }
 0x38c   :  { %v4824_v18 = vsel %vm4568_vm8, %v6117_v52, %v4696_v10  ;;  %vm4570_vm10 = vcmp.gt.f32.partialorder %v6121_v57, 0.0  ;;  %v4698_v2 = vmul.f32 0.01, %v6121_v57 }
 0x38d   :  { %v4825_v20 = vsel %vm4569_vm9, %v6119_v53, %v4697_v63  ;;  %vm4571_vm11 = vcmp.gt.f32.partialorder %v6123_v1, 0.0  ;;  %v4699_v40 = vmul.f32 0.01, %v6123_v1  ;;  %v3733_v41 = vpop.f32.mrb[124].mxu1 }
 0x38e   :  { %v4439_v26 = vpop.f32.mrb[124].mxu0  ;;  %v5840_v54 = vpack.c.bf16 %v4825_v20, %v4824_v18  ;;  %v4826_v27 = vsel %vm4570_vm10, %v6121_v57, %v4698_v2  ;;  %v6124_v4 = vadd.f32 %v3733_v41, %v8708_v49  ;;  %v3735_v44 = vpop.f32.mrb[125].mxu1 }
 0x38f   :  { %v4441_v21 = vpop.f32.mrb[125].mxu0  ;;  %v4827_v33 = vsel %vm4571_vm11, %v6123_v1, %v4699_v40  ;;  %v6126_v34 = vadd.f32 %v3735_v44, %v8712_v28  ;;  %v3737_v22 = vpop.f32.mrb[126].mxu1 }
 0x390   :  { %v4443_v0 = vpop.f32.mrb[126].mxu0  ;;  %5276 = vst [vmem:[%s9148_s3 + $0x1e0] sm:$0xff] %v5840_v54  ;;  %v5841_v29 = vpack.c.bf16 %v4827_v33, %v4826_v27  ;;  %v6125_v3 = vadd.f32 %v6124_v4, %v4439_v26  ;;  %v6128_v37 = vadd.f32 %v3737_v22, %v8708_v49  ;;  %v3739_v30 = vpop.f32.mrb[127].mxu1 }
 0x391   :  { %v4445_v7 = vpop.f32.mrb[127].mxu0  ;;  %v6127_v46 = vadd.f32 %v6126_v34, %v4441_v21  ;;  %v6130_v5 = vadd.f32 %v3739_v30, %v8712_v28 }
 0x392   :  { %5277 = vst [vmem:[%s9148_s3 + $0x1e8] sm:$0xff] %v5841_v29  ;;  %vm4572_vm12 = vcmp.gt.f32.partialorder %v6125_v3, 0.0  ;;  %v4700_v35 = vmul.f32 0.01, %v6125_v3  ;;  %v6129_v55 = vadd.f32 %v6128_v37, %v4443_v0 }
 0x393   :  { %vm4573_vm13 = vcmp.gt.f32.partialorder %v6127_v46, 0.0  ;;  %v4701_v43 = vmul.f32 0.01, %v6127_v46  ;;  %v6131_v6 = vadd.f32 %v6130_v5, %v4445_v7 }
 0x394   :  { %v4828_v23 = vsel %vm4572_vm12, %v6125_v3, %v4700_v35  ;;  %vm4574_vm14 = vcmp.gt.f32.partialorder %v6129_v55, 0.0  ;;  %v4702_v9 = vmul.f32 0.01, %v6129_v55 }
 0x395   :  { %v4829_v56 = vsel %vm4573_vm13, %v6127_v46, %v4701_v43  ;;  %vm4575_vm15 = vcmp.gt.f32.partialorder %v6131_v6, 0.0  ;;  %v4703_v49 = vmul.f32 0.01, %v6131_v6 }
 0x396   :  { %v5842_v24 = vpack.c.bf16 %v4829_v56, %v4828_v23  ;;  %v4830_v59 = vsel %vm4574_vm14, %v6129_v55, %v4702_v9 }
 0x397   :  { %v4831_v58 = vsel %vm4575_vm15, %v6131_v6, %v4703_v49 }
 0x398   :  { %5278 = vst [vmem:[%s9148_s3 + $0x1f0] sm:$0xff] %v5842_v24  ;;  %v5843_v28 = vpack.c.bf16 %v4831_v58, %v4830_v59 }
 0x39a   :  { %5279 = vst [vmem:[%s9148_s3 + $0x1f8] sm:$0xff] %v5843_v28 }

// kernel: descriptor_forward.7
= control target key start
LH: loop header
LB: loop body
LE: loop exit
PB: predicated region body
PF: predicated region fallthrough
CT: control target
= control target key end

     0   :  { %s18347_s1 = inlined_call_operand.vmem [shape: bf16[16384,128], index: 1, kind: input, shape index: {}]   ;;  %s18348_s0 = inlined_call_operand.vmem [shape: bf16[8,16384], index: 0, kind: input, shape index: {}]   ;;  %s18349_s2 = inlined_call_operand.vmem [shape: f32[8,128], index: 2, kind: output, shape index: {}]  }
   0x1   :  { %v13841_v0 = vld [vmem:[%s18347_s1 + $0x40] sm:$0xff]   ;;  %v13845_v4 = vld [vmem:[%s18347_s1 + $0x48] sm:$0xff]   ;;  %v13849_v8 = vld [vmem:[%s18347_s1 + $0x50] sm:$0xff]  }
   0x2   :  { %v13842_v1 = vld [vmem:[%s18347_s1 + $0xc0] sm:$0xff]   ;;  %12433 = vmatprep.subr.bf16.mxu0 %v13841_v0  ;;  %v13846_v5 = vld [vmem:[%s18347_s1 + $0xc8] sm:$0xff]   ;;  %v13850_v9 = vld [vmem:[%s18347_s1 + $0xd0] sm:$0xff]  }
   0x3   :  { %v13843_v2 = vld [vmem:[%s18347_s1] sm:$0xff]   ;;  %12455 = vmatprep.subr.bf16.mxu1 %v13842_v1  ;;  %v13847_v6 = vld [vmem:[%s18347_s1 + $0x8] sm:$0xff]   ;;  %v13851_v10 = vld [vmem:[%s18347_s1 + $0x10] sm:$0xff]  }
   0x4   :  { %v13844_v3 = vld [vmem:[%s18347_s1 + $0x80] sm:$0xff]   ;;  %12434 = vmatpush3.bf16.msra.mxu0 %v13843_v2  ;;  %v13848_v7 = vld [vmem:[%s18347_s1 + $0x88] sm:$0xff]   ;;  %v13852_v11 = vld [vmem:[%s18347_s1 + $0x90] sm:$0xff]  }
   0x5   :  { %12456 = vmatpush3.bf16.msra.mxu1 %v13844_v3  ;;  %12435 = vmatprep.subr.bf16.mxu0 %v13845_v4  ;;  %v13853_v12 = vld [vmem:[%s18347_s1 + $0x58] sm:$0xff]   ;;  %v13857_v16 = vld [vmem:[%s18347_s1 + $0x60] sm:$0xff]   ;;  %v13861_v20 = vld [vmem:[%s18347_s1 + $0x68] sm:$0xff]  }
   0x6   :  { %12457 = vmatprep.subr.bf16.mxu1 %v13846_v5  ;;  %v13854_v13 = vld [vmem:[%s18347_s1 + $0xd8] sm:$0xff]   ;;  %v13858_v17 = vld [vmem:[%s18347_s1 + $0xe0] sm:$0xff]   ;;  %v13862_v21 = vld [vmem:[%s18347_s1 + $0xe8] sm:$0xff]  }
   0x7   :  { %v13855_v14 = vld [vmem:[%s18347_s1 + $0x18] sm:$0xff]   ;;  %v13859_v18 = vld [vmem:[%s18347_s1 + $0x20] sm:$0xff]   ;;  %v13863_v22 = vld [vmem:[%s18347_s1 + $0x28] sm:$0xff]  }
   0x8   :  { %12436 = vmatpush3.bf16.msra.mxu0 %v13847_v6  ;;  %v13856_v15 = vld [vmem:[%s18347_s1 + $0x98] sm:$0xff]   ;;  %v13860_v19 = vld [vmem:[%s18347_s1 + $0xa0] sm:$0xff]   ;;  %v13864_v23 = vld [vmem:[%s18347_s1 + $0xa8] sm:$0xff]  }
   0x9   :  { %12458 = vmatpush3.bf16.msra.mxu1 %v13848_v7  ;;  %12437 = vmatprep.subr.bf16.mxu0 %v13849_v8  ;;  %v13865_v24 = vld [vmem:[%s18347_s1 + $0x70] sm:$0xff]   ;;  %v13869_v28 = vld [vmem:[%s18347_s1 + $0x78] sm:$0xff]   ;;  %v12_v32 = vld [vmem:[%s18348_s0] sm:$0xff] }
   0xa   :  { %12459 = vmatprep.subr.bf16.mxu1 %v13850_v9  ;;  %v13866_v25 = vld [vmem:[%s18347_s1 + $0xf0] sm:$0xff]   ;;  %v13870_v29 = vld [vmem:[%s18347_s1 + $0xf8] sm:$0xff]   ;;  %v13_v33 = vld [vmem:[%s18348_s0 + $0x8] sm:$0xff]  ;;  %v11281_v34 = vcombine.low %v12_v32, %v12_v32  ;;  %v11282_v35 = vcombine.high %v12_v32, %v12_v32 }
   0xb   :  { %v13867_v26 = vld [vmem:[%s18347_s1 + $0x30] sm:$0xff]   ;;  %v13871_v30 = vld [vmem:[%s18347_s1 + $0x38] sm:$0xff]   ;;  %v11283_v36 = vcombine.low %v13_v33, %v13_v33  ;;  %v11284_v37 = vcombine.high %v13_v33, %v13_v33  ;;  %v13877_v38 = vld [vmem:[%s18347_s1 + $0x140] sm:$0xff]  }
   0xc   :  { %12438 = vmatpush3.bf16.msra.mxu0 %v13851_v10  ;;  %v13868_v27 = vld [vmem:[%s18347_s1 + $0xb0] sm:$0xff]   ;;  %v13872_v31 = vld [vmem:[%s18347_s1 + $0xb8] sm:$0xff]   ;;  %v13878_v39 = vld [vmem:[%s18347_s1 + $0x1c0] sm:$0xff]   ;;  %8748 = vmatprep.mubr.bf16.mxu0 %v11282_v35 }
   0xd   :  { %12460 = vmatpush3.bf16.msra.mxu1 %v13852_v11  ;;  %12439 = vmatprep.subr.bf16.mxu0 %v13853_v12  ;;  %v13879_v40 = vld [vmem:[%s18347_s1 + $0x100] sm:$0xff]   ;;  %v13881_v42 = vld [vmem:[%s18347_s1 + $0x148] sm:$0xff]   ;;  %v13885_v46 = vld [vmem:[%s18347_s1 + $0x150] sm:$0xff]  }
   0xe   :  { %12461 = vmatprep.subr.bf16.mxu1 %v13854_v13  ;;  %8788 = vmatprep.mubr.bf16.mxu1 %v11284_v37  ;;  %v13880_v41 = vld [vmem:[%s18347_s1 + $0x180] sm:$0xff]   ;;  %v13882_v43 = vld [vmem:[%s18347_s1 + $0x1c8] sm:$0xff]   ;;  %v13886_v47 = vld [vmem:[%s18347_s1 + $0x1d0] sm:$0xff]  }
   0xf   :  { %v13883_v44 = vld [vmem:[%s18347_s1 + $0x108] sm:$0xff]   ;;  %v13887_v48 = vld [vmem:[%s18347_s1 + $0x110] sm:$0xff]   ;;  %v13889_v50 = vld [vmem:[%s18347_s1 + $0x158] sm:$0xff]  }
  0x10   :  { %12440 = vmatpush3.bf16.msra.mxu0 %v13855_v14  ;;  %v13884_v45 = vld [vmem:[%s18347_s1 + $0x188] sm:$0xff]   ;;  %v13888_v49 = vld [vmem:[%s18347_s1 + $0x190] sm:$0xff]   ;;  %v13890_v51 = vld [vmem:[%s18347_s1 + $0x1d8] sm:$0xff]  }
  0x11   :  { %12462 = vmatpush3.bf16.msra.mxu1 %v13856_v15  ;;  %12441 = vmatprep.subr.bf16.mxu0 %v13857_v16  ;;  %v13891_v52 = vld [vmem:[%s18347_s1 + $0x118] sm:$0xff]   ;;  %v13893_v54 = vld [vmem:[%s18347_s1 + $0x160] sm:$0xff]   ;;  %v13897_v58 = vld [vmem:[%s18347_s1 + $0x168] sm:$0xff]  }
  0x12   :  { %12463 = vmatprep.subr.bf16.mxu1 %v13858_v17  ;;  %v13892_v53 = vld [vmem:[%s18347_s1 + $0x198] sm:$0xff]   ;;  %v13894_v55 = vld [vmem:[%s18347_s1 + $0x1e0] sm:$0xff]   ;;  %v13898_v59 = vld [vmem:[%s18347_s1 + $0x1e8] sm:$0xff]  }
  0x13   :  { %v13895_v56 = vld [vmem:[%s18347_s1 + $0x120] sm:$0xff]   ;;  %v13899_v60 = vld [vmem:[%s18347_s1 + $0x128] sm:$0xff]   ;;  %v13901_v62 = vld [vmem:[%s18347_s1 + $0x170] sm:$0xff]  }
  0x14   :  { %12442 = vmatpush3.bf16.msra.mxu0 %v13859_v18  ;;  %v13896_v57 = vld [vmem:[%s18347_s1 + $0x1a0] sm:$0xff]   ;;  %v13900_v61 = vld [vmem:[%s18347_s1 + $0x1a8] sm:$0xff]   ;;  %v13902_v63 = vld [vmem:[%s18347_s1 + $0x1f0] sm:$0xff]  }
  0x15   :  { %12464 = vmatpush3.bf16.msra.mxu1 %v13860_v19  ;;  %12443 = vmatprep.subr.bf16.mxu0 %v13861_v20  ;;  %v13903_v0 = vld [vmem:[%s18347_s1 + $0x130] sm:$0xff]   ;;  %v13905_v2 = vld [vmem:[%s18347_s1 + $0x178] sm:$0xff]   ;;  %v13913_v12 = vld [vmem:[%s18347_s1 + $0x240] sm:$0xff]  }
  0x16   :  { %12465 = vmatprep.subr.bf16.mxu1 %v13862_v21  ;;  %v13904_v1 = vld [vmem:[%s18347_s1 + $0x1b0] sm:$0xff]   ;;  %v13906_v3 = vld [vmem:[%s18347_s1 + $0x1f8] sm:$0xff]   ;;  %v13914_v13 = vld [vmem:[%s18347_s1 + $0x2c0] sm:$0xff]  }
  0x17   :  { %v13907_v4 = vld [vmem:[%s18347_s1 + $0x138] sm:$0xff]   ;;  %v14_v6 = vld [vmem:[%s18348_s0 + $0x10] sm:$0xff]  ;;  %v13915_v14 = vld [vmem:[%s18347_s1 + $0x200] sm:$0xff]  }
  0x18   :  { %12444 = vmatpush3.bf16.msra.mxu0 %v13863_v22  ;;  %v13908_v5 = vld [vmem:[%s18347_s1 + $0x1b8] sm:$0xff]   ;;  %v11285_v7 = vcombine.low %v14_v6, %v14_v6  ;;  %v11286_v8 = vcombine.high %v14_v6, %v14_v6  ;;  %v13916_v15 = vld [vmem:[%s18347_s1 + $0x280] sm:$0xff]   ;;  %v13917_v16 = vld [vmem:[%s18347_s1 + $0x248] sm:$0xff]  }
  0x19   :  { %12466 = vmatpush3.bf16.msra.mxu1 %v13864_v23  ;;  %12445 = vmatprep.subr.bf16.mxu0 %v13865_v24  ;;  %v15_v9 = vld [vmem:[%s18348_s0 + $0x18] sm:$0xff]  ;;  %v13918_v17 = vld [vmem:[%s18347_s1 + $0x2c8] sm:$0xff]   ;;  %v13921_v20 = vld [vmem:[%s18347_s1 + $0x250] sm:$0xff]  }
  0x1a   :  { %12467 = vmatprep.subr.bf16.mxu1 %v13866_v25  ;;  %v11287_v10 = vcombine.low %v15_v9, %v15_v9  ;;  %v11288_v11 = vcombine.high %v15_v9, %v15_v9  ;;  %v13919_v18 = vld [vmem:[%s18347_s1 + $0x208] sm:$0xff]   ;;  %v13922_v21 = vld [vmem:[%s18347_s1 + $0x2d0] sm:$0xff]   ;;  %v13925_v24 = vld [vmem:[%s18347_s1 + $0x258] sm:$0xff]  }
  0x1b   :  { %v13920_v19 = vld [vmem:[%s18347_s1 + $0x288] sm:$0xff]   ;;  %v13923_v22 = vld [vmem:[%s18347_s1 + $0x210] sm:$0xff]   ;;  %v13926_v25 = vld [vmem:[%s18347_s1 + $0x2d8] sm:$0xff]  }
  0x1c   :  { %12446 = vmatpush3.bf16.msra.mxu0 %v13867_v26  ;;  %v13924_v23 = vld [vmem:[%s18347_s1 + $0x290] sm:$0xff]   ;;  %v13927_v26 = vld [vmem:[%s18347_s1 + $0x218] sm:$0xff]   ;;  %v13933_v32 = vld [vmem:[%s18347_s1 + $0x268] sm:$0xff]  }
  0x1d   :  { %12468 = vmatpush3.bf16.msra.mxu1 %v13868_v27  ;;  %12447 = vmatprep.subr.bf16.mxu0 %v13869_v28  ;;  %v13928_v27 = vld [vmem:[%s18347_s1 + $0x298] sm:$0xff]   ;;  %v13929_v28 = vld [vmem:[%s18347_s1 + $0x260] sm:$0xff]   ;;  %v13934_v33 = vld [vmem:[%s18347_s1 + $0x2e8] sm:$0xff]  }
  0x1e   :  { %12469 = vmatprep.subr.bf16.mxu1 %v13870_v29  ;;  %v13930_v29 = vld [vmem:[%s18347_s1 + $0x2e0] sm:$0xff]   ;;  %v13936_v35 = vld [vmem:[%s18347_s1 + $0x2a8] sm:$0xff]   ;;  %v13938_v37 = vld [vmem:[%s18347_s1 + $0x2f0] sm:$0xff]  }
  0x1f   :  { %v13969_v6 = vld [vmem:[%s18347_s1 + $0x368] sm:$0xff]  }
  0x20   :  { %12448 = vmatpush3.bf16.msra.mxu0 %v13871_v30  ;;  %v13931_v30 = vld [vmem:[%s18347_s1 + $0x220] sm:$0xff]   ;;  %v13972_v9 = vld [vmem:[%s18347_s1 + $0x3a8] sm:$0xff]  }
  0x21   :  { %12470 = vmatpush3.bf16.msra.mxu1 %v13872_v31  ;;  %12477 = vmatprep.subr.bf16.mxu0 %v13877_v38  ;;  %v13932_v31 = vld [vmem:[%s18347_s1 + $0x2a0] sm:$0xff]   ;;  %v13939_v38 = vld [vmem:[%s18347_s1 + $0x230] sm:$0xff]  }
  0x22   :  { %12499 = vmatprep.subr.bf16.mxu1 %v13878_v39  ;;  %v13940_v39 = vld [vmem:[%s18347_s1 + $0x2b0] sm:$0xff]  }
  0x23   :  { %8749 = vmatmul.mubr.bf16.vlgmr.msra.gmra.mrb[0].mxu0 %v11281_v34  ;;  %v13935_v34 = vld [vmem:[%s18347_s1 + $0x228] sm:$0xff]  }
  0x24   :  { %8789 = vmatmul.mubr.bf16.vlgmr.msra.gmra.mrb[0].mxu1 %v11283_v36  ;;  %12478 = vmatpush3.bf16.msra.mxu0 %v13879_v40  ;;  %v13937_v36 = vld [vmem:[%s18347_s1 + $0x270] sm:$0xff]   ;;  %v13941_v40 = vld [vmem:[%s18347_s1 + $0x278] sm:$0xff]  }
  0x25   :  { %12500 = vmatpush3.bf16.msra.mxu1 %v13880_v41  ;;  %12479 = vmatprep.subr.bf16.mxu0 %v13881_v42  ;;  %v13942_v41 = vld [vmem:[%s18347_s1 + $0x2f8] sm:$0xff]  }
  0x26   :  { %12501 = vmatprep.subr.bf16.mxu1 %v13882_v43  ;;  %8828 = vmatprep.mubr.bf16.mxu0 %v11286_v8  ;;  %v13943_v42 = vld [vmem:[%s18347_s1 + $0x238] sm:$0xff]   ;;  %v13971_v8 = vld [vmem:[%s18347_s1 + $0x328] sm:$0xff]  }
  0x27   :  { %8868 = vmatprep.mubr.bf16.mxu1 %v11288_v11  ;;  %v13944_v43 = vld [vmem:[%s18347_s1 + $0x2b8] sm:$0xff]   ;;  %v13974_v11 = vld [vmem:[%s18347_s1 + $0x3f0] sm:$0xff]  }
  0x28   :  { %12480 = vmatpush3.bf16.msra.mxu0 %v13883_v44  ;;  %v16_v44 = vld [vmem:[%s18348_s0 + $0x20] sm:$0xff] }
  0x29   :  { %12502 = vmatpush3.bf16.msra.mxu1 %v13884_v45  ;;  %12481 = vmatprep.subr.bf16.mxu0 %v13885_v46  ;;  %v17_v45 = vld [vmem:[%s18348_s0 + $0x28] sm:$0xff]  ;;  %v11289_v46 = vcombine.low %v16_v44, %v16_v44 }
  0x2a   :  { %12503 = vmatprep.subr.bf16.mxu1 %v13886_v47  ;;  %v11290_v47 = vcombine.high %v16_v44, %v16_v44  ;;  %v14005_v44 = vld [vmem:[%s18347_s1 + $0x468] sm:$0xff]  }
  0x2c   :  { %12482 = vmatpush3.bf16.msra.mxu0 %v13887_v48  ;;  %v11291_v48 = vcombine.low %v17_v45, %v17_v45 }
  0x2d   :  { %12504 = vmatpush3.bf16.msra.mxu1 %v13888_v49  ;;  %12483 = vmatprep.subr.bf16.mxu0 %v13889_v50  ;;  %v11292_v49 = vcombine.high %v17_v45, %v17_v45  ;;  %v13949_v50 = vld [vmem:[%s18347_s1 + $0x340] sm:$0xff]   ;;  %v14006_v45 = vld [vmem:[%s18347_s1 + $0x4e8] sm:$0xff]  }
  0x2e   :  { %12505 = vmatprep.subr.bf16.mxu1 %v13890_v51  ;;  %v13950_v51 = vld [vmem:[%s18347_s1 + $0x3c0] sm:$0xff]  }
  0x30   :  { %12484 = vmatpush3.bf16.msra.mxu0 %v13891_v52  ;;  %v13951_v52 = vld [vmem:[%s18347_s1 + $0x300] sm:$0xff]  }
  0x31   :  { %12506 = vmatpush3.bf16.msra.mxu1 %v13892_v53  ;;  %12485 = vmatprep.subr.bf16.mxu0 %v13893_v54  ;;  %v13952_v53 = vld [vmem:[%s18347_s1 + $0x380] sm:$0xff]   ;;  %v13953_v54 = vld [vmem:[%s18347_s1 + $0x348] sm:$0xff]  }
  0x32   :  { %12507 = vmatprep.subr.bf16.mxu1 %v13894_v55  ;;  %v13954_v55 = vld [vmem:[%s18347_s1 + $0x3c8] sm:$0xff]  }
  0x34   :  { %12486 = vmatpush3.bf16.msra.mxu0 %v13895_v56  ;;  %v13955_v56 = vld [vmem:[%s18347_s1 + $0x308] sm:$0xff]  }
  0x35   :  { %12508 = vmatpush3.bf16.msra.mxu1 %v13896_v57  ;;  %12487 = vmatprep.subr.bf16.mxu0 %v13897_v58  ;;  %v13956_v57 = vld [vmem:[%s18347_s1 + $0x388] sm:$0xff]   ;;  %v13957_v58 = vld [vmem:[%s18347_s1 + $0x350] sm:$0xff]  }
  0x36   :  { %12509 = vmatprep.subr.bf16.mxu1 %v13898_v59  ;;  %v13958_v59 = vld [vmem:[%s18347_s1 + $0x3d0] sm:$0xff]  }
  0x38   :  { %12488 = vmatpush3.bf16.msra.mxu0 %v13899_v60  ;;  %v13959_v60 = vld [vmem:[%s18347_s1 + $0x310] sm:$0xff]  }
  0x39   :  { %12510 = vmatpush3.bf16.msra.mxu1 %v13900_v61  ;;  %12489 = vmatprep.subr.bf16.mxu0 %v13901_v62  ;;  %v13960_v61 = vld [vmem:[%s18347_s1 + $0x390] sm:$0xff]   ;;  %v13961_v62 = vld [vmem:[%s18347_s1 + $0x358] sm:$0xff]  }
  0x3a   :  { %12511 = vmatprep.subr.bf16.mxu1 %v13902_v63  ;;  %v13962_v63 = vld [vmem:[%s18347_s1 + $0x3d8] sm:$0xff]  }
  0x3c   :  { %12490 = vmatpush3.bf16.msra.mxu0 %v13903_v0  ;;  %v13963_v0 = vld [vmem:[%s18347_s1 + $0x318] sm:$0xff]  }
  0x3d   :  { %12512 = vmatpush3.bf16.msra.mxu1 %v13904_v1  ;;  %12491 = vmatprep.subr.bf16.mxu0 %v13905_v2  ;;  %v13964_v1 = vld [vmem:[%s18347_s1 + $0x398] sm:$0xff]   ;;  %v13965_v2 = vld [vmem:[%s18347_s1 + $0x360] sm:$0xff]  }
  0x3e   :  { %12513 = vmatprep.subr.bf16.mxu1 %v13906_v3  ;;  %v13966_v3 = vld [vmem:[%s18347_s1 + $0x3e0] sm:$0xff]  }
  0x40   :  { %12492 = vmatpush3.bf16.msra.mxu0 %v13907_v4  ;;  %v13967_v4 = vld [vmem:[%s18347_s1 + $0x320] sm:$0xff]  }
  0x41   :  { %12514 = vmatpush3.bf16.msra.mxu1 %v13908_v5  ;;  %12521 = vmatprep.subr.bf16.mxu0 %v13913_v12  ;;  %v13968_v5 = vld [vmem:[%s18347_s1 + $0x3a0] sm:$0xff]   ;;  %v13975_v12 = vld [vmem:[%s18347_s1 + $0x330] sm:$0xff]  }
  0x42   :  { %12543 = vmatprep.subr.bf16.mxu1 %v13914_v13  ;;  %v13976_v13 = vld [vmem:[%s18347_s1 + $0x3b0] sm:$0xff]  }
  0x43   :  { %8829 = vmatmul.mubr.bf16.vlgmr.msra.gmra.mrb[4].mxu0 %v11285_v7  ;;  %v13970_v7 = vld [vmem:[%s18347_s1 + $0x3e8] sm:$0xff]  }
  0x44   :  { %8869 = vmatmul.mubr.bf16.vlgmr.msra.gmra.mrb[4].mxu1 %v11287_v10  ;;  %12522 = vmatpush3.bf16.msra.mxu0 %v13915_v14  ;;  %v13973_v10 = vld [vmem:[%s18347_s1 + $0x370] sm:$0xff]   ;;  %v13977_v14 = vld [vmem:[%s18347_s1 + $0x378] sm:$0xff]  }
  0x45   :  { %12544 = vmatpush3.bf16.msra.mxu1 %v13916_v15  ;;  %12523 = vmatprep.subr.bf16.mxu0 %v13917_v16  ;;  %v13978_v15 = vld [vmem:[%s18347_s1 + $0x3f8] sm:$0xff]  }
  0x46   :  { %12545 = vmatprep.subr.bf16.mxu1 %v13918_v17  ;;  %8908 = vmatprep.mubr.bf16.mxu0 %v11290_v47  ;;  %v13979_v16 = vld [vmem:[%s18347_s1 + $0x338] sm:$0xff]   ;;  %v14008_v47 = vld [vmem:[%s18347_s1 + $0x4a8] sm:$0xff]  }
  0x47   :  { %8948 = vmatprep.mubr.bf16.mxu1 %v11292_v49  ;;  %v13980_v17 = vld [vmem:[%s18347_s1 + $0x3b8] sm:$0xff]   ;;  %v14010_v49 = vld [vmem:[%s18347_s1 + $0x4f0] sm:$0xff]  }
  0x48   :  { %12524 = vmatpush3.bf16.msra.mxu0 %v13919_v18  ;;  %v18_v18 = vld [vmem:[%s18348_s0 + $0x30] sm:$0xff] }
  0x49   :  { %12546 = vmatpush3.bf16.msra.mxu1 %v13920_v19  ;;  %12525 = vmatprep.subr.bf16.mxu0 %v13921_v20  ;;  %v19_v19 = vld [vmem:[%s18348_s0 + $0x38] sm:$0xff]  ;;  %v11293_v20 = vcombine.low %v18_v18, %v18_v18 }
  0x4a   :  { %12547 = vmatprep.subr.bf16.mxu1 %v13922_v21  ;;  %v11294_v21 = vcombine.high %v18_v18, %v18_v18  ;;  %v14041_v18 = vld [vmem:[%s18347_s1 + $0x568] sm:$0xff]  }
  0x4c   :  { %12526 = vmatpush3.bf16.msra.mxu0 %v13923_v22  ;;  %v11295_v22 = vcombine.low %v19_v19, %v19_v19 }
  0x4d   :  { %12548 = vmatpush3.bf16.msra.mxu1 %v13924_v23  ;;  %12527 = vmatprep.subr.bf16.mxu0 %v13925_v24  ;;  %v13985_v23 = vld [vmem:[%s18347_s1 + $0x440] sm:$0xff]   ;;  %v11296_v24 = vcombine.high %v19_v19, %v19_v19  ;;  %v14042_v19 = vld [vmem:[%s18347_s1 + $0x5e8] sm:$0xff]  }
  0x4e   :  { %12549 = vmatprep.subr.bf16.mxu1 %v13926_v25  ;;  %v13986_v25 = vld [vmem:[%s18347_s1 + $0x4c0] sm:$0xff]  }
  0x50   :  { %12528 = vmatpush3.bf16.msra.mxu0 %v13927_v26  ;;  %v13987_v26 = vld [vmem:[%s18347_s1 + $0x400] sm:$0xff]  }
  0x51   :  { %12550 = vmatpush3.bf16.msra.mxu1 %v13928_v27  ;;  %12529 = vmatprep.subr.bf16.mxu0 %v13929_v28  ;;  %v13988_v27 = vld [vmem:[%s18347_s1 + $0x480] sm:$0xff]   ;;  %v13989_v28 = vld [vmem:[%s18347_s1 + $0x448] sm:$0xff]  }
  0x52   :  { %12551 = vmatprep.subr.bf16.mxu1 %v13930_v29  ;;  %v13990_v29 = vld [vmem:[%s18347_s1 + $0x4c8] sm:$0xff]  }
  0x54   :  { %12530 = vmatpush3.bf16.msra.mxu0 %v13931_v30  ;;  %v13991_v30 = vld [vmem:[%s18347_s1 + $0x408] sm:$0xff]  }
  0x55   :  { %12552 = vmatpush3.bf16.msra.mxu1 %v13932_v31  ;;  %12531 = vmatprep.subr.bf16.mxu0 %v13933_v32  ;;  %v13992_v31 = vld [vmem:[%s18347_s1 + $0x488] sm:$0xff]   ;;  %v13993_v32 = vld [vmem:[%s18347_s1 + $0x450] sm:$0xff]  }
  0x56   :  { %12553 = vmatprep.subr.bf16.mxu1 %v13934_v33  ;;  %v13994_v33 = vld [vmem:[%s18347_s1 + $0x4d0] sm:$0xff]  }
  0x58   :  { %12532 = vmatpush3.bf16.msra.mxu0 %v13935_v34  ;;  %v13995_v34 = vld [vmem:[%s18347_s1 + $0x410] sm:$0xff]  }
  0x59   :  { %12554 = vmatpush3.bf16.msra.mxu1 %v13936_v35  ;;  %12533 = vmatprep.subr.bf16.mxu0 %v13937_v36  ;;  %v13996_v35 = vld [vmem:[%s18347_s1 + $0x490] sm:$0xff]   ;;  %v13997_v36 = vld [vmem:[%s18347_s1 + $0x458] sm:$0xff]  }
  0x5a   :  { %12555 = vmatprep.subr.bf16.mxu1 %v13938_v37  ;;  %v13998_v37 = vld [vmem:[%s18347_s1 + $0x4d8] sm:$0xff]  }
  0x5c   :  { %12534 = vmatpush3.bf16.msra.mxu0 %v13939_v38  ;;  %v13999_v38 = vld [vmem:[%s18347_s1 + $0x418] sm:$0xff]  }
  0x5d   :  { %12556 = vmatpush3.bf16.msra.mxu1 %v13940_v39  ;;  %12535 = vmatprep.subr.bf16.mxu0 %v13941_v40  ;;  %v14000_v39 = vld [vmem:[%s18347_s1 + $0x498] sm:$0xff]   ;;  %v14001_v40 = vld [vmem:[%s18347_s1 + $0x460] sm:$0xff]  }
  0x5e   :  { %12557 = vmatprep.subr.bf16.mxu1 %v13942_v41  ;;  %v14002_v41 = vld [vmem:[%s18347_s1 + $0x4e0] sm:$0xff]  }
  0x60   :  { %12536 = vmatpush3.bf16.msra.mxu0 %v13943_v42  ;;  %v14003_v42 = vld [vmem:[%s18347_s1 + $0x420] sm:$0xff]  }
  0x61   :  { %12558 = vmatpush3.bf16.msra.mxu1 %v13944_v43  ;;  %12565 = vmatprep.subr.bf16.mxu0 %v13949_v50  ;;  %v14004_v43 = vld [vmem:[%s18347_s1 + $0x4a0] sm:$0xff]   ;;  %v14011_v50 = vld [vmem:[%s18347_s1 + $0x430] sm:$0xff]  }
  0x62   :  { %12587 = vmatprep.subr.bf16.mxu1 %v13950_v51  ;;  %v14012_v51 = vld [vmem:[%s18347_s1 + $0x4b0] sm:$0xff]  }
  0x63   :  { %8909 = vmatmul.mubr.bf16.vlgmr.msra.gmra.mrb[8].mxu0 %v11289_v46  ;;  %v14007_v46 = vld [vmem:[%s18347_s1 + $0x428] sm:$0xff]  }
  0x64   :  { %8949 = vmatmul.mubr.bf16.vlgmr.msra.gmra.mrb[8].mxu1 %v11291_v48  ;;  %12566 = vmatpush3.bf16.msra.mxu0 %v13951_v52  ;;  %v14009_v48 = vld [vmem:[%s18347_s1 + $0x470] sm:$0xff]   ;;  %v14013_v52 = vld [vmem:[%s18347_s1 + $0x478] sm:$0xff]  }
  0x65   :  { %12588 = vmatpush3.bf16.msra.mxu1 %v13952_v53  ;;  %12567 = vmatprep.subr.bf16.mxu0 %v13953_v54  ;;  %v14014_v53 = vld [vmem:[%s18347_s1 + $0x4f8] sm:$0xff]  }
  0x66   :  { %12589 = vmatprep.subr.bf16.mxu1 %v13954_v55  ;;  %8988 = vmatprep.mubr.bf16.mxu0 %v11294_v21  ;;  %v14015_v54 = vld [vmem:[%s18347_s1 + $0x438] sm:$0xff]   ;;  %v14044_v21 = vld [vmem:[%s18347_s1 + $0x5a8] sm:$0xff]  }
  0x67   :  { %9028 = vmatprep.mubr.bf16.mxu1 %v11296_v24  ;;  %v14016_v55 = vld [vmem:[%s18347_s1 + $0x4b8] sm:$0xff]   ;;  %v14047_v24 = vld [vmem:[%s18347_s1 + $0x530] sm:$0xff]  }
  0x68   :  { %12568 = vmatpush3.bf16.msra.mxu0 %v13955_v56  ;;  %v20_v56 = vld [vmem:[%s18348_s0 + $0x40] sm:$0xff] }
  0x69   :  { %12590 = vmatpush3.bf16.msra.mxu1 %v13956_v57  ;;  %12569 = vmatprep.subr.bf16.mxu0 %v13957_v58  ;;  %v11297_v57 = vcombine.low %v20_v56, %v20_v56  ;;  %v11298_v58 = vcombine.high %v20_v56, %v20_v56  ;;  %v14077_v56 = vld [vmem:[%s18347_s1 + $0x668] sm:$0xff]  }
  0x6a   :  { %12591 = vmatprep.subr.bf16.mxu1 %v13958_v59  ;;  %v21_v59 = vld [vmem:[%s18348_s0 + $0x48] sm:$0xff] }
  0x6c   :  { %12570 = vmatpush3.bf16.msra.mxu0 %v13959_v60  ;;  %v11299_v60 = vcombine.low %v21_v59, %v21_v59 }
  0x6d   :  { %12592 = vmatpush3.bf16.msra.mxu1 %v13960_v61  ;;  %12571 = vmatprep.subr.bf16.mxu0 %v13961_v62  ;;  %v11300_v61 = vcombine.high %v21_v59, %v21_v59  ;;  %v14021_v62 = vld [vmem:[%s18347_s1 + $0x540] sm:$0xff]   ;;  %v14080_v59 = vld [vmem:[%s18347_s1 + $0x6a8] sm:$0xff]  }
  0x6e   :  { %12593 = vmatprep.subr.bf16.mxu1 %v13962_v63  ;;  %v14022_v63 = vld [vmem:[%s18347_s1 + $0x5c0] sm:$0xff]  }
  0x70   :  { %12572 = vmatpush3.bf16.msra.mxu0 %v13963_v0  ;;  %v14023_v0 = vld [vmem:[%s18347_s1 + $0x500] sm:$0xff]  }
  0x71   :  { %12594 = vmatpush3.bf16.msra.mxu1 %v13964_v1  ;;  %12573 = vmatprep.subr.bf16.mxu0 %v13965_v2  ;;  %v14024_v1 = vld [vmem:[%s18347_s1 + $0x580] sm:$0xff]   ;;  %v14025_v2 = vld [vmem:[%s18347_s1 + $0x548] sm:$0xff]  }
  0x72   :  { %12595 = vmatprep.subr.bf16.mxu1 %v13966_v3  ;;  %v14026_v3 = vld [vmem:[%s18347_s1 + $0x5c8] sm:$0xff]  }
  0x74   :  { %12574 = vmatpush3.bf16.msra.mxu0 %v13967_v4  ;;  %v14027_v4 = vld [vmem:[%s18347_s1 + $0x508] sm:$0xff]  }
  0x75   :  { %12596 = vmatpush3.bf16.msra.mxu1 %v13968_v5  ;;  %12575 = vmatprep.subr.bf16.mxu0 %v13969_v6  ;;  %v14028_v5 = vld [vmem:[%s18347_s1 + $0x588] sm:$0xff]   ;;  %v14029_v6 = vld [vmem:[%s18347_s1 + $0x550] sm:$0xff]  }
  0x76   :  { %12597 = vmatprep.subr.bf16.mxu1 %v13970_v7  ;;  %v14030_v7 = vld [vmem:[%s18347_s1 + $0x5d0] sm:$0xff]  }
  0x78   :  { %12576 = vmatpush3.bf16.msra.mxu0 %v13971_v8  ;;  %v14031_v8 = vld [vmem:[%s18347_s1 + $0x510] sm:$0xff]  }
  0x79   :  { %12598 = vmatpush3.bf16.msra.mxu1 %v13972_v9  ;;  %12577 = vmatprep.subr.bf16.mxu0 %v13973_v10  ;;  %v14032_v9 = vld [vmem:[%s18347_s1 + $0x590] sm:$0xff]   ;;  %v14033_v10 = vld [vmem:[%s18347_s1 + $0x558] sm:$0xff]  }
  0x7a   :  { %12599 = vmatprep.subr.bf16.mxu1 %v13974_v11  ;;  %v14034_v11 = vld [vmem:[%s18347_s1 + $0x5d8] sm:$0xff]  }
  0x7c   :  { %12578 = vmatpush3.bf16.msra.mxu0 %v13975_v12  ;;  %v14035_v12 = vld [vmem:[%s18347_s1 + $0x518] sm:$0xff]  }
  0x7d   :  { %12600 = vmatpush3.bf16.msra.mxu1 %v13976_v13  ;;  %12579 = vmatprep.subr.bf16.mxu0 %v13977_v14  ;;  %v14036_v13 = vld [vmem:[%s18347_s1 + $0x598] sm:$0xff]   ;;  %v14037_v14 = vld [vmem:[%s18347_s1 + $0x560] sm:$0xff]  }
  0x7e   :  { %12601 = vmatprep.subr.bf16.mxu1 %v13978_v15  ;;  %v14038_v15 = vld [vmem:[%s18347_s1 + $0x5e0] sm:$0xff]  }
  0x80   :  { %12580 = vmatpush3.bf16.msra.mxu0 %v13979_v16  ;;  %v14039_v16 = vld [vmem:[%s18347_s1 + $0x520] sm:$0xff]  }
  0x81   :  { %12602 = vmatpush3.bf16.msra.mxu1 %v13980_v17  ;;  %12609 = vmatprep.subr.bf16.mxu0 %v13985_v23  ;;  %v14040_v17 = vld [vmem:[%s18347_s1 + $0x5a0] sm:$0xff]   ;;  %v14046_v23 = vld [vmem:[%s18347_s1 + $0x5f0] sm:$0xff]  }
  0x82   :  { %12631 = vmatprep.subr.bf16.mxu1 %v13986_v25  ;;  %v14048_v25 = vld [vmem:[%s18347_s1 + $0x5b0] sm:$0xff]  }
  0x83   :  { %8989 = vmatmul.mubr.bf16.vlgmr.msra.gmra.mrb[12].mxu0 %v11293_v20  ;;  %v14043_v20 = vld [vmem:[%s18347_s1 + $0x528] sm:$0xff]  }
  0x84   :  { %9029 = vmatmul.mubr.bf16.vlgmr.msra.gmra.mrb[12].mxu1 %v11295_v22  ;;  %12610 = vmatpush3.bf16.msra.mxu0 %v13987_v26  ;;  %v14045_v22 = vld [vmem:[%s18347_s1 + $0x570] sm:$0xff]   ;;  %v14049_v26 = vld [vmem:[%s18347_s1 + $0x578] sm:$0xff]  }
  0x85   :  { %12632 = vmatpush3.bf16.msra.mxu1 %v13988_v27  ;;  %12611 = vmatprep.subr.bf16.mxu0 %v13989_v28  ;;  %v14050_v27 = vld [vmem:[%s18347_s1 + $0x5f8] sm:$0xff]  }
  0x86   :  { %12633 = vmatprep.subr.bf16.mxu1 %v13990_v29  ;;  %9068 = vmatprep.mubr.bf16.mxu0 %v11298_v58  ;;  %v14051_v28 = vld [vmem:[%s18347_s1 + $0x538] sm:$0xff]   ;;  %v14079_v58 = vld [vmem:[%s18347_s1 + $0x628] sm:$0xff]  }
  0x87   :  { %9108 = vmatprep.mubr.bf16.mxu1 %v11300_v61  ;;  %v14052_v29 = vld [vmem:[%s18347_s1 + $0x5b8] sm:$0xff]   ;;  %v14082_v61 = vld [vmem:[%s18347_s1 + $0x6f0] sm:$0xff]  }
  0x88   :  { %12612 = vmatpush3.bf16.msra.mxu0 %v13991_v30  ;;  %v22_v30 = vld [vmem:[%s18348_s0 + $0x50] sm:$0xff] }
  0x89   :  { %12634 = vmatpush3.bf16.msra.mxu1 %v13992_v31  ;;  %12613 = vmatprep.subr.bf16.mxu0 %v13993_v32  ;;  %v23_v31 = vld [vmem:[%s18348_s0 + $0x58] sm:$0xff]  ;;  %v11301_v32 = vcombine.low %v22_v30, %v22_v30 }
  0x8a   :  { %12635 = vmatprep.subr.bf16.mxu1 %v13994_v33  ;;  %v11302_v33 = vcombine.high %v22_v30, %v22_v30  ;;  %v14112_v30 = vld [vmem:[%s18347_s1 + $0x7a0] sm:$0xff]  }
  0x8c   :  { %12614 = vmatpush3.bf16.msra.mxu0 %v13995_v34  ;;  %v11303_v34 = vcombine.low %v23_v31, %v23_v31 }
  0x8d   :  { %12636 = vmatpush3.bf16.msra.mxu1 %v13996_v35  ;;  %12615 = vmatprep.subr.bf16.mxu0 %v13997_v36  ;;  %v11304_v35 = vcombine.high %v23_v31, %v23_v31  ;;  %v14057_v36 = vld [vmem:[%s18347_s1 + $0x640] sm:$0xff]  }
  0x8e   :  { %12637 = vmatprep.subr.bf16.mxu1 %v13998_v37  ;;  %v14058_v37 = vld [vmem:[%s18347_s1 + $0x6c0] sm:$0xff]  }
  0x90   :  { %12616 = vmatpush3.bf16.msra.mxu0 %v13999_v38  ;;  %v14059_v38 = vld [vmem:[%s18347_s1 + $0x600] sm:$0xff]  }
  0x91   :  { %12638 = vmatpush3.bf16.msra.mxu1 %v14000_v39  ;;  %12617 = vmatprep.subr.bf16.mxu0 %v14001_v40  ;;  %v14060_v39 = vld [vmem:[%s18347_s1 + $0x680] sm:$0xff]   ;;  %v14061_v40 = vld [vmem:[%s18347_s1 + $0x648] sm:$0xff]  }
  0x92   :  { %12639 = vmatprep.subr.bf16.mxu1 %v14002_v41  ;;  %v14062_v41 = vld [vmem:[%s18347_s1 + $0x6c8] sm:$0xff]  }
  0x94   :  { %12618 = vmatpush3.bf16.msra.mxu0 %v14003_v42  ;;  %v14063_v42 = vld [vmem:[%s18347_s1 + $0x608] sm:$0xff]  }
  0x95   :  { %12640 = vmatpush3.bf16.msra.mxu1 %v14004_v43  ;;  %12619 = vmatprep.subr.bf16.mxu0 %v14005_v44  ;;  %v14064_v43 = vld [vmem:[%s18347_s1 + $0x688] sm:$0xff]   ;;  %v14065_v44 = vld [vmem:[%s18347_s1 + $0x650] sm:$0xff]  }
  0x96   :  { %12641 = vmatprep.subr.bf16.mxu1 %v14006_v45  ;;  %v14066_v45 = vld [vmem:[%s18347_s1 + $0x6d0] sm:$0xff]  }
  0x98   :  { %12620 = vmatpush3.bf16.msra.mxu0 %v14007_v46  ;;  %v14067_v46 = vld [vmem:[%s18347_s1 + $0x610] sm:$0xff]  }
  0x99   :  { %12642 = vmatpush3.bf16.msra.mxu1 %v14008_v47  ;;  %12621 = vmatprep.subr.bf16.mxu0 %v14009_v48  ;;  %v14068_v47 = vld [vmem:[%s18347_s1 + $0x690] sm:$0xff]   ;;  %v14069_v48 = vld [vmem:[%s18347_s1 + $0x658] sm:$0xff]  }
  0x9a   :  { %12643 = vmatprep.subr.bf16.mxu1 %v14010_v49  ;;  %v14070_v49 = vld [vmem:[%s18347_s1 + $0x6d8] sm:$0xff]  }
  0x9c   :  { %12622 = vmatpush3.bf16.msra.mxu0 %v14011_v50  ;;  %v14071_v50 = vld [vmem:[%s18347_s1 + $0x618] sm:$0xff]  }
  0x9d   :  { %12644 = vmatpush3.bf16.msra.mxu1 %v14012_v51  ;;  %12623 = vmatprep.subr.bf16.mxu0 %v14013_v52  ;;  %v14072_v51 = vld [vmem:[%s18347_s1 + $0x698] sm:$0xff]   ;;  %v14073_v52 = vld [vmem:[%s18347_s1 + $0x660] sm:$0xff]  }
  0x9e   :  { %12645 = vmatprep.subr.bf16.mxu1 %v14014_v53  ;;  %v14074_v53 = vld [vmem:[%s18347_s1 + $0x6e0] sm:$0xff]  }
  0xa0   :  { %12624 = vmatpush3.bf16.msra.mxu0 %v14015_v54  ;;  %v14075_v54 = vld [vmem:[%s18347_s1 + $0x620] sm:$0xff]  }
  0xa1   :  { %12646 = vmatpush3.bf16.msra.mxu1 %v14016_v55  ;;  %12653 = vmatprep.subr.bf16.mxu0 %v14021_v62  ;;  %v14076_v55 = vld [vmem:[%s18347_s1 + $0x6a0] sm:$0xff]   ;;  %v14083_v62 = vld [vmem:[%s18347_s1 + $0x630] sm:$0xff]  }
  0xa2   :  { %12675 = vmatprep.subr.bf16.mxu1 %v14022_v63  ;;  %v14084_v63 = vld [vmem:[%s18347_s1 + $0x6b0] sm:$0xff]  }
  0xa3   :  { %9069 = vmatmul.mubr.bf16.vlgmr.msra.gmra.mrb[16].mxu0 %v11297_v57  ;;  %v14078_v57 = vld [vmem:[%s18347_s1 + $0x6e8] sm:$0xff]  }
  0xa4   :  { %9109 = vmatmul.mubr.bf16.vlgmr.msra.gmra.mrb[16].mxu1 %v11299_v60  ;;  %12654 = vmatpush3.bf16.msra.mxu0 %v14023_v0  ;;  %v14081_v60 = vld [vmem:[%s18347_s1 + $0x670] sm:$0xff]   ;;  %v14085_v0 = vld [vmem:[%s18347_s1 + $0x678] sm:$0xff]  }
  0xa5   :  { %12676 = vmatpush3.bf16.msra.mxu1 %v14024_v1  ;;  %12655 = vmatprep.subr.bf16.mxu0 %v14025_v2  ;;  %v14086_v1 = vld [vmem:[%s18347_s1 + $0x6f8] sm:$0xff]  }
  0xa6   :  { %12677 = vmatprep.subr.bf16.mxu1 %v14026_v3  ;;  %9148 = vmatprep.mubr.bf16.mxu0 %v11302_v33  ;;  %v14087_v2 = vld [vmem:[%s18347_s1 + $0x638] sm:$0xff]   ;;  %v14113_v33 = vld [vmem:[%s18347_s1 + $0x768] sm:$0xff]  }
  0xa7   :  { %9188 = vmatprep.mubr.bf16.mxu1 %v11304_v35  ;;  %v14088_v3 = vld [vmem:[%s18347_s1 + $0x6b8] sm:$0xff]  }
  0xa8   :  { %12656 = vmatpush3.bf16.msra.mxu0 %v14027_v4  ;;  %v24_v4 = vld [vmem:[%s18348_s0 + $0x60] sm:$0xff] }
  0xa9   :  { %12678 = vmatpush3.bf16.msra.mxu1 %v14028_v5  ;;  %12657 = vmatprep.subr.bf16.mxu0 %v14029_v6  ;;  %v25_v5 = vld [vmem:[%s18348_s0 + $0x68] sm:$0xff]  ;;  %v11305_v6 = vcombine.low %v24_v4, %v24_v4 }
  0xaa   :  { %12679 = vmatprep.subr.bf16.mxu1 %v14030_v7  ;;  %v11306_v7 = vcombine.high %v24_v4, %v24_v4  ;;  %v14138_v4 = vld [vmem:[%s18347_s1 + $0x8d0] sm:$0xff]  }
  0xac   :  { %12658 = vmatpush3.bf16.msra.mxu0 %v14031_v8  ;;  %v11307_v8 = vcombine.low %v25_v5, %v25_v5 }
  0xad   :  { %12680 = vmatpush3.bf16.msra.mxu1 %v14032_v9  ;;  %12659 = vmatprep.subr.bf16.mxu0 %v14033_v10  ;;  %v14093_v9 = vld [vmem:[%s18347_s1 + $0x740] sm:$0xff]   ;;  %v11308_v10 = vcombine.high %v25_v5, %v25_v5  ;;  %v14139_v5 = vld [vmem:[%s18347_s1 + $0x810] sm:$0xff]  }
  0xae   :  { %12681 = vmatprep.subr.bf16.mxu1 %v14034_v11  ;;  %v14094_v11 = vld [vmem:[%s18347_s1 + $0x7c0] sm:$0xff]  }
  0xb0   :  { %12660 = vmatpush3.bf16.msra.mxu0 %v14035_v12  ;;  %v14095_v12 = vld [vmem:[%s18347_s1 + $0x700] sm:$0xff]  }
  0xb1   :  { %12682 = vmatpush3.bf16.msra.mxu1 %v14036_v13  ;;  %12661 = vmatprep.subr.bf16.mxu0 %v14037_v14  ;;  %v14096_v13 = vld [vmem:[%s18347_s1 + $0x780] sm:$0xff]   ;;  %v14097_v14 = vld [vmem:[%s18347_s1 + $0x748] sm:$0xff]  }
  0xb2   :  { %12683 = vmatprep.subr.bf16.mxu1 %v14038_v15  ;;  %v14098_v15 = vld [vmem:[%s18347_s1 + $0x7c8] sm:$0xff]  }
  0xb4   :  { %12662 = vmatpush3.bf16.msra.mxu0 %v14039_v16  ;;  %v14099_v16 = vld [vmem:[%s18347_s1 + $0x708] sm:$0xff]  }
  0xb5   :  { %12684 = vmatpush3.bf16.msra.mxu1 %v14040_v17  ;;  %12663 = vmatprep.subr.bf16.mxu0 %v14041_v18  ;;  %v14100_v17 = vld [vmem:[%s18347_s1 + $0x788] sm:$0xff]   ;;  %v14101_v18 = vld [vmem:[%s18347_s1 + $0x750] sm:$0xff]  }
  0xb6   :  { %12685 = vmatprep.subr.bf16.mxu1 %v14042_v19  ;;  %v14102_v19 = vld [vmem:[%s18347_s1 + $0x7d0] sm:$0xff]  }
  0xb8   :  { %12664 = vmatpush3.bf16.msra.mxu0 %v14043_v20  ;;  %v14103_v20 = vld [vmem:[%s18347_s1 + $0x710] sm:$0xff]  }
  0xb9   :  { %12686 = vmatpush3.bf16.msra.mxu1 %v14044_v21  ;;  %12665 = vmatprep.subr.bf16.mxu0 %v14045_v22  ;;  %v14104_v21 = vld [vmem:[%s18347_s1 + $0x790] sm:$0xff]   ;;  %v14105_v22 = vld [vmem:[%s18347_s1 + $0x758] sm:$0xff]  }
  0xba   :  { %12687 = vmatprep.subr.bf16.mxu1 %v14046_v23  ;;  %v14106_v23 = vld [vmem:[%s18347_s1 + $0x7d8] sm:$0xff]  }
  0xbc   :  { %12666 = vmatpush3.bf16.msra.mxu0 %v14047_v24  ;;  %v14107_v24 = vld [vmem:[%s18347_s1 + $0x718] sm:$0xff]  }
  0xbd   :  { %12688 = vmatpush3.bf16.msra.mxu1 %v14048_v25  ;;  %12667 = vmatprep.subr.bf16.mxu0 %v14049_v26  ;;  %v14108_v25 = vld [vmem:[%s18347_s1 + $0x798] sm:$0xff]   ;;  %v14109_v26 = vld [vmem:[%s18347_s1 + $0x760] sm:$0xff]  }
  0xbe   :  { %12689 = vmatprep.subr.bf16.mxu1 %v14050_v27  ;;  %v14110_v27 = vld [vmem:[%s18347_s1 + $0x7e0] sm:$0xff]  }
  0xc0   :  { %12668 = vmatpush3.bf16.msra.mxu0 %v14051_v28  ;;  %v14111_v28 = vld [vmem:[%s18347_s1 + $0x720] sm:$0xff]  }
  0xc1   :  { %12690 = vmatpush3.bf16.msra.mxu1 %v14052_v29  ;;  %12697 = vmatprep.subr.bf16.mxu0 %v14057_v36  ;;  %v14114_v36 = vld [vmem:[%s18347_s1 + $0x7e8] sm:$0xff]  }
  0xc2   :  { %12719 = vmatprep.subr.bf16.mxu1 %v14058_v37 }
  0xc3   :  { %9149 = vmatmul.mubr.bf16.vlgmr.msra.gmra.mrb[20].mxu0 %v11301_v32 }
  0xc4   :  { %9189 = vmatmul.mubr.bf16.vlgmr.msra.gmra.mrb[20].mxu1 %v11303_v34  ;;  %12698 = vmatpush3.bf16.msra.mxu0 %v14059_v38 }
  0xc5   :  { %12720 = vmatpush3.bf16.msra.mxu1 %v14060_v39  ;;  %12699 = vmatprep.subr.bf16.mxu0 %v14061_v40  ;;  %v14115_v40 = vld [vmem:[%s18347_s1 + $0x728] sm:$0xff]  }
  0xc6   :  { %12721 = vmatprep.subr.bf16.mxu1 %v14062_v41  ;;  %9228 = vmatprep.mubr.bf16.mxu0 %v11306_v7  ;;  %v14141_v7 = vld [vmem:[%s18347_s1 + $0x858] sm:$0xff]  }
  0xc7   :  { %9268 = vmatprep.mubr.bf16.mxu1 %v11308_v10  ;;  %v14144_v10 = vld [vmem:[%s18347_s1 + $0x898] sm:$0xff]  }
  0xc8   :  { %12700 = vmatpush3.bf16.msra.mxu0 %v14063_v42 }
  0xc9   :  { %12722 = vmatpush3.bf16.msra.mxu1 %v14064_v43  ;;  %12701 = vmatprep.subr.bf16.mxu0 %v14065_v44  ;;  %v14116_v43 = vld [vmem:[%s18347_s1 + $0x7a8] sm:$0xff]  }
  0xca   :  { %12723 = vmatprep.subr.bf16.mxu1 %v14066_v45  ;;  %v14117_v45 = vld [vmem:[%s18347_s1 + $0x770] sm:$0xff]  }
  0xcc   :  { %12702 = vmatpush3.bf16.msra.mxu0 %v14067_v46  ;;  %v14118_v46 = vld [vmem:[%s18347_s1 + $0x7f0] sm:$0xff]  }
  0xcd   :  { %12724 = vmatpush3.bf16.msra.mxu1 %v14068_v47  ;;  %12703 = vmatprep.subr.bf16.mxu0 %v14069_v48  ;;  %v14119_v47 = vld [vmem:[%s18347_s1 + $0x730] sm:$0xff]  }
  0xce   :  { %12725 = vmatprep.subr.bf16.mxu1 %v14070_v49  ;;  %v14120_v48 = vld [vmem:[%s18347_s1 + $0x7b0] sm:$0xff]   ;;  %v14121_v49 = vld [vmem:[%s18347_s1 + $0x778] sm:$0xff]  }
  0xd0   :  { %12704 = vmatpush3.bf16.msra.mxu0 %v14071_v50  ;;  %v14122_v50 = vld [vmem:[%s18347_s1 + $0x7f8] sm:$0xff]  }
  0xd1   :  { %12726 = vmatpush3.bf16.msra.mxu1 %v14072_v51  ;;  %12705 = vmatprep.subr.bf16.mxu0 %v14073_v52  ;;  %v14123_v51 = vld [vmem:[%s18347_s1 + $0x738] sm:$0xff]  }
  0xd2   :  { %12727 = vmatprep.subr.bf16.mxu1 %v14074_v53  ;;  %v14124_v52 = vld [vmem:[%s18347_s1 + $0x7b8] sm:$0xff]   ;;  %v26_v53 = vld [vmem:[%s18348_s0 + $0x70] sm:$0xff] }
  0xd4   :  { %12706 = vmatpush3.bf16.msra.mxu0 %v14075_v54  ;;  %v27_v54 = vld [vmem:[%s18348_s0 + $0x78] sm:$0xff] }
  0xd5   :  { %12728 = vmatpush3.bf16.msra.mxu1 %v14076_v55  ;;  %12707 = vmatprep.subr.bf16.mxu0 %v14077_v56  ;;  %v11309_v55 = vcombine.low %v26_v53, %v26_v53  ;;  %v11310_v56 = vcombine.high %v26_v53, %v26_v53  ;;  %v14173_v53 = vld [vmem:[%s18347_s1 + $0x950] sm:$0xff]  }
  0xd6   :  { %12729 = vmatprep.subr.bf16.mxu1 %v14078_v57  ;;  %v11311_v57 = vcombine.low %v27_v54, %v27_v54 }
  0xd8   :  { %12708 = vmatpush3.bf16.msra.mxu0 %v14079_v58  ;;  %v14129_v58 = vld [vmem:[%s18347_s1 + $0x840] sm:$0xff]  }
  0xd9   :  { %12730 = vmatpush3.bf16.msra.mxu1 %v14080_v59  ;;  %12709 = vmatprep.subr.bf16.mxu0 %v14081_v60  ;;  %v11312_v59 = vcombine.high %v27_v54, %v27_v54  ;;  %v14130_v60 = vld [vmem:[%s18347_s1 + $0x8c0] sm:$0xff]   ;;  %v14174_v54 = vld [vmem:[%s18347_s1 + $0x9d0] sm:$0xff]  }
  0xda   :  { %12731 = vmatprep.subr.bf16.mxu1 %v14082_v61  ;;  %v14131_v61 = vld [vmem:[%s18347_s1 + $0x800] sm:$0xff]  }
  0xdc   :  { %12710 = vmatpush3.bf16.msra.mxu0 %v14083_v62  ;;  %v14132_v62 = vld [vmem:[%s18347_s1 + $0x880] sm:$0xff]  }
  0xdd   :  { %12732 = vmatpush3.bf16.msra.mxu1 %v14084_v63  ;;  %12711 = vmatprep.subr.bf16.mxu0 %v14085_v0  ;;  %v14133_v63 = vld [vmem:[%s18347_s1 + $0x848] sm:$0xff]  }
  0xde   :  { %12733 = vmatprep.subr.bf16.mxu1 %v14086_v1  ;;  %v14134_v0 = vld [vmem:[%s18347_s1 + $0x8c8] sm:$0xff]  }
  0xdf   :  { %v14135_v1 = vld [vmem:[%s18347_s1 + $0x808] sm:$0xff]  }
  0xe0   :  { %12712 = vmatpush3.bf16.msra.mxu0 %v14087_v2  ;;  %v14136_v2 = vld [vmem:[%s18347_s1 + $0x888] sm:$0xff]  }
  0xe1   :  { %12734 = vmatpush3.bf16.msra.mxu1 %v14088_v3  ;;  %12741 = vmatprep.subr.bf16.mxu0 %v14093_v9  ;;  %v14137_v3 = vld [vmem:[%s18347_s1 + $0x850] sm:$0xff]   ;;  %v14143_v9 = vld [vmem:[%s18347_s1 + $0x818] sm:$0xff]  }
  0xe2   :  { %12763 = vmatprep.subr.bf16.mxu1 %v14094_v11  ;;  %v14145_v11 = vld [vmem:[%s18347_s1 + $0x860] sm:$0xff]  }
  0xe3   :  { %9229 = vmatmul.mubr.bf16.vlgmr.msra.gmra.mrb[24].mxu0 %v11305_v6  ;;  %v14140_v6 = vld [vmem:[%s18347_s1 + $0x890] sm:$0xff]  }
  0xe4   :  { %9269 = vmatmul.mubr.bf16.vlgmr.msra.gmra.mrb[24].mxu1 %v11307_v8  ;;  %12742 = vmatpush3.bf16.msra.mxu0 %v14095_v12  ;;  %v14142_v8 = vld [vmem:[%s18347_s1 + $0x8d8] sm:$0xff]   ;;  %v14146_v12 = vld [vmem:[%s18347_s1 + $0x8e0] sm:$0xff]  }
  0xe5   :  { %12764 = vmatpush3.bf16.msra.mxu1 %v14096_v13  ;;  %12743 = vmatprep.subr.bf16.mxu0 %v14097_v14  ;;  %v14147_v13 = vld [vmem:[%s18347_s1 + $0x820] sm:$0xff]  }
  0xe6   :  { %12765 = vmatprep.subr.bf16.mxu1 %v14098_v15  ;;  %9308 = vmatprep.mubr.bf16.mxu0 %v11310_v56  ;;  %v14148_v15 = vld [vmem:[%s18347_s1 + $0x8a0] sm:$0xff]   ;;  %v14176_v56 = vld [vmem:[%s18347_s1 + $0x990] sm:$0xff]  }
  0xe7   :  { %9348 = vmatprep.mubr.bf16.mxu1 %v11312_v59  ;;  %v14179_v59 = vld [vmem:[%s18347_s1 + $0x918] sm:$0xff]  }
  0xe8   :  { %12744 = vmatpush3.bf16.msra.mxu0 %v14099_v16 }
  0xe9   :  { %12766 = vmatpush3.bf16.msra.mxu1 %v14100_v17  ;;  %12745 = vmatprep.subr.bf16.mxu0 %v14101_v18  ;;  %v14149_v18 = vld [vmem:[%s18347_s1 + $0x868] sm:$0xff]  }
  0xea   :  { %12767 = vmatprep.subr.bf16.mxu1 %v14102_v19 }
  0xec   :  { %12746 = vmatpush3.bf16.msra.mxu0 %v14103_v20 }
  0xed   :  { %12768 = vmatpush3.bf16.msra.mxu1 %v14104_v21  ;;  %12747 = vmatprep.subr.bf16.mxu0 %v14105_v22  ;;  %v14150_v21 = vld [vmem:[%s18347_s1 + $0x8e8] sm:$0xff]  }
  0xee   :  { %12769 = vmatprep.subr.bf16.mxu1 %v14106_v23 }
  0xf0   :  { %12748 = vmatpush3.bf16.msra.mxu0 %v14107_v24 }
  0xf1   :  { %12770 = vmatpush3.bf16.msra.mxu1 %v14108_v25  ;;  %12749 = vmatprep.subr.bf16.mxu0 %v14109_v26  ;;  %v14151_v26 = vld [vmem:[%s18347_s1 + $0x828] sm:$0xff]  }
  0xf2   :  { %12771 = vmatprep.subr.bf16.mxu1 %v14110_v27 }
  0xf4   :  { %12750 = vmatpush3.bf16.msra.mxu0 %v14111_v28  ;;  %v14152_v28 = vld [vmem:[%s18347_s1 + $0x8a8] sm:$0xff]  }
  0xf5   :  { %12772 = vmatpush3.bf16.msra.mxu1 %v14112_v30  ;;  %12751 = vmatprep.subr.bf16.mxu0 %v14113_v33  ;;  %v14155_v33 = vld [vmem:[%s18347_s1 + $0x830] sm:$0xff]  }
  0xf6   :  { %v12449_v29 = vpop.f32.mrb[0].mxu0  ;;  %12773 = vmatprep.subr.bf16.mxu1 %v14114_v36  ;;  %v14158_v36 = vld [vmem:[%s18347_s1 + $0x8f8] sm:$0xff]  }
  0xf7   :  { %v12471_v31 = vpop.f32.mrb[0].mxu1  ;;  %v12450_v32 = vpop.f32.mrb[1].mxu0 }
  0xf8   :  { %v12451_v34 = vadd.f32 %v12450_v32, %v12449_v29  ;;  %v12472_v35 = vpop.f32.mrb[1].mxu1  ;;  %v12452_v38 = vpop.f32.mrb[2].mxu0  ;;  %12752 = vmatpush3.bf16.msra.mxu0 %v14115_v40  ;;  %v14154_v32 = vld [vmem:[%s18347_s1 + $0x8f0] sm:$0xff]   ;;  %v29_v40 = vld [vmem:[%s18348_s0 + $0x88] sm:$0xff] }
  0xf9   :  { %v12473_v37 = vadd.f32 %v12472_v35, %v12471_v31  ;;  %v12474_v39 = vpop.f32.mrb[2].mxu1  ;;  %v12453_v41 = vpop.f32.mrb[3].mxu0  ;;  %12774 = vmatpush3.bf16.msra.mxu1 %v14116_v43  ;;  %12753 = vmatprep.subr.bf16.mxu0 %v14117_v45  ;;  %v14153_v31 = vld [vmem:[%s18347_s1 + $0x870] sm:$0xff]   ;;  %v14157_v35 = vld [vmem:[%s18347_s1 + $0x878] sm:$0xff]   ;;  %v11315_v43 = vcombine.low %v29_v40, %v29_v40  ;;  %v11316_v45 = vcombine.high %v29_v40, %v29_v40 }
  0xfa   :  { %v12475_v44 = vpop.f32.mrb[3].mxu1  ;;  %12775 = vmatprep.subr.bf16.mxu1 %v14118_v46  ;;  %v14160_v38 = vld [vmem:[%s18347_s1 + $0x8b8] sm:$0xff]   ;;  %v28_v39 = vld [vmem:[%s18348_s0 + $0x80] sm:$0xff]  ;;  %v14210_v40 = vld [vmem:[%s18347_s1 + $0xad0] sm:$0xff]  }
  0xfb   :  { %v15791_v42 = vadd.f32 %v12473_v37, %v12451_v34  ;;  %v14156_v34 = vld [vmem:[%s18347_s1 + $0x8b0] sm:$0xff]   ;;  %v14159_v37 = vld [vmem:[%s18347_s1 + $0x838] sm:$0xff]   ;;  %v11313_v41 = vcombine.low %v28_v39, %v28_v39  ;;  %v14165_v44 = vld [vmem:[%s18347_s1 + $0x940] sm:$0xff]  }
  0xfc   :  { %12754 = vmatpush3.bf16.msra.mxu0 %v14119_v47  ;;  %v14166_v46 = vld [vmem:[%s18347_s1 + $0x9c0] sm:$0xff]  }
  0xfd   :  { %12776 = vmatpush3.bf16.msra.mxu1 %v14120_v48  ;;  %12755 = vmatprep.subr.bf16.mxu0 %v14121_v49  ;;  %v14167_v47 = vld [vmem:[%s18347_s1 + $0x900] sm:$0xff]   ;;  %v14169_v49 = vld [vmem:[%s18347_s1 + $0x948] sm:$0xff]  }
  0xfe   :  { %12777 = vmatprep.subr.bf16.mxu1 %v14122_v50  ;;  %v14168_v48 = vld [vmem:[%s18347_s1 + $0x980] sm:$0xff]   ;;  %v14170_v50 = vld [vmem:[%s18347_s1 + $0x9c8] sm:$0xff]  }
 0x100   :  { %12756 = vmatpush3.bf16.msra.mxu0 %v14123_v51  ;;  %v14171_v51 = vld [vmem:[%s18347_s1 + $0x908] sm:$0xff]  }
 0x101   :  { %12778 = vmatpush3.bf16.msra.mxu1 %v14124_v52  ;;  %12785 = vmatprep.subr.bf16.mxu0 %v14129_v58  ;;  %v14172_v52 = vld [vmem:[%s18347_s1 + $0x988] sm:$0xff]   ;;  %v14178_v58 = vld [vmem:[%s18347_s1 + $0x9d8] sm:$0xff]  }
 0x102   :  { %12807 = vmatprep.subr.bf16.mxu1 %v14130_v60  ;;  %v14180_v60 = vld [vmem:[%s18347_s1 + $0x998] sm:$0xff]  }
 0x103   :  { %9309 = vmatmul.mubr.bf16.vlgmr.msra.gmra.mrb[28].mxu0 %v11309_v55  ;;  %v14175_v55 = vld [vmem:[%s18347_s1 + $0x910] sm:$0xff]  }
 0x104   :  { %9349 = vmatmul.mubr.bf16.vlgmr.msra.gmra.mrb[28].mxu1 %v11311_v57  ;;  %12786 = vmatpush3.bf16.msra.mxu0 %v14131_v61  ;;  %v14177_v57 = vld [vmem:[%s18347_s1 + $0x958] sm:$0xff]   ;;  %v14181_v61 = vld [vmem:[%s18347_s1 + $0x960] sm:$0xff]  }
 0x105   :  { %12808 = vmatpush3.bf16.msra.mxu1 %v14132_v62  ;;  %12787 = vmatprep.subr.bf16.mxu0 %v14133_v63  ;;  %v14182_v62 = vld [vmem:[%s18347_s1 + $0x9e0] sm:$0xff]  }
 0x106   :  { %12809 = vmatprep.subr.bf16.mxu1 %v14134_v0  ;;  %9428 = vmatprep.mubr.bf16.mxu1 %v11316_v45  ;;  %v14183_v0 = vld [vmem:[%s18347_s1 + $0x920] sm:$0xff]   ;;  %v14215_v45 = vld [vmem:[%s18347_s1 + $0xa18] sm:$0xff]  }
 0x108   :  { %12788 = vmatpush3.bf16.msra.mxu0 %v14135_v1 }
 0x109   :  { %12810 = vmatpush3.bf16.msra.mxu1 %v14136_v2  ;;  %12789 = vmatprep.subr.bf16.mxu0 %v14137_v3  ;;  %v14184_v2 = vld [vmem:[%s18347_s1 + $0x9a0] sm:$0xff]  }
 0x10a   :  { %12811 = vmatprep.subr.bf16.mxu1 %v14138_v4 }
 0x10c   :  { %12790 = vmatpush3.bf16.msra.mxu0 %v14139_v5  ;;  %v14185_v5 = vld [vmem:[%s18347_s1 + $0x968] sm:$0xff]  }
 0x10d   :  { %12812 = vmatpush3.bf16.msra.mxu1 %v14140_v6  ;;  %12791 = vmatprep.subr.bf16.mxu0 %v14141_v7 }
 0x10e   :  { %12813 = vmatprep.subr.bf16.mxu1 %v14142_v8  ;;  %v14186_v8 = vld [vmem:[%s18347_s1 + $0x9e8] sm:$0xff]  }
 0x110   :  { %12792 = vmatpush3.bf16.msra.mxu0 %v14143_v9 }
 0x111   :  { %12814 = vmatpush3.bf16.msra.mxu1 %v14144_v10  ;;  %12793 = vmatprep.subr.bf16.mxu0 %v14145_v11  ;;  %v14187_v11 = vld [vmem:[%s18347_s1 + $0x928] sm:$0xff]  }
 0x112   :  { %12815 = vmatprep.subr.bf16.mxu1 %v14146_v12 }
 0x114   :  { %12794 = vmatpush3.bf16.msra.mxu0 %v14147_v13  ;;  %v14188_v13 = vld [vmem:[%s18347_s1 + $0x9a8] sm:$0xff]  }
 0x115   :  { %12816 = vmatpush3.bf16.msra.mxu1 %v14148_v15  ;;  %12795 = vmatprep.subr.bf16.mxu0 %v14149_v18  ;;  %v14190_v18 = vld [vmem:[%s18347_s1 + $0x9f0] sm:$0xff]  }
 0x116   :  { %v12493_v14 = vpop.f32.mrb[4].mxu0  ;;  %12817 = vmatprep.subr.bf16.mxu1 %v14150_v21  ;;  %v14193_v21 = vld [vmem:[%s18347_s1 + $0x978] sm:$0xff]  }
 0x117   :  { %v12515_v16 = vpop.f32.mrb[4].mxu1  ;;  %v12494_v17 = vpop.f32.mrb[5].mxu0 }
 0x118   :  { %v12495_v19 = vadd.f32 %v12494_v17, %v12493_v14  ;;  %v12516_v20 = vpop.f32.mrb[5].mxu1  ;;  %v12496_v23 = vpop.f32.mrb[6].mxu0  ;;  %12796 = vmatpush3.bf16.msra.mxu0 %v14151_v26 }
 0x119   :  { %v12517_v22 = vadd.f32 %v12516_v20, %v12515_v16  ;;  %v12518_v24 = vpop.f32.mrb[6].mxu1  ;;  %v12497_v27 = vpop.f32.mrb[7].mxu0  ;;  %12818 = vmatpush3.bf16.msra.mxu1 %v14152_v28  ;;  %12797 = vmatprep.subr.bf16.mxu0 %v14153_v31  ;;  %v14189_v16 = vld [vmem:[%s18347_s1 + $0x970] sm:$0xff]   ;;  %v14195_v23 = vld [vmem:[%s18347_s1 + $0x938] sm:$0xff]   ;;  %v14201_v31 = vld [vmem:[%s18347_s1 + $0xa40] sm:$0xff]  }
 0x11a   :  { %v8831_v25 = vadd.f32 %v12495_v19, %v15791_v42  ;;  %v12519_v29 = vpop.f32.mrb[7].mxu1  ;;  %12819 = vmatprep.subr.bf16.mxu1 %v14154_v32  ;;  %v11314_v42 = vcombine.high %v28_v39, %v28_v39  ;;  %v14191_v19 = vld [vmem:[%s18347_s1 + $0x930] sm:$0xff]   ;;  %v14196_v24 = vld [vmem:[%s18347_s1 + $0x9b8] sm:$0xff]   ;;  %v14202_v32 = vld [vmem:[%s18347_s1 + $0xac0] sm:$0xff]  }
 0x11b   :  { %v14192_v20 = vld [vmem:[%s18347_s1 + $0x9b0] sm:$0xff]   ;;  %v31_v28 = vld [vmem:[%s18348_s0 + $0x98] sm:$0xff] }
 0x11c   :  { %v15899_v30 = vadd.f32 %v12517_v22, %v8831_v25  ;;  %12798 = vmatpush3.bf16.msra.mxu0 %v14155_v33  ;;  %9388 = vmatprep.mubr.bf16.mxu0 %v11314_v42  ;;  %v14194_v22 = vld [vmem:[%s18347_s1 + $0x9f8] sm:$0xff]   ;;  %v30_v25 = vld [vmem:[%s18348_s0 + $0x90] sm:$0xff]  ;;  %v11319_v29 = vcombine.low %v31_v28, %v31_v28  ;;  %v14203_v33 = vld [vmem:[%s18347_s1 + $0xa00] sm:$0xff]  }
 0x11d   :  { %12820 = vmatpush3.bf16.msra.mxu1 %v14156_v34  ;;  %12799 = vmatprep.subr.bf16.mxu0 %v14157_v35  ;;  %v11317_v26 = vcombine.low %v30_v25, %v30_v25  ;;  %v11318_v27 = vcombine.high %v30_v25, %v30_v25  ;;  %v14204_v34 = vld [vmem:[%s18347_s1 + $0xa80] sm:$0xff]   ;;  %v14205_v35 = vld [vmem:[%s18347_s1 + $0xa48] sm:$0xff]   ;;  %v14209_v39 = vld [vmem:[%s18347_s1 + $0xa50] sm:$0xff]  }
 0x11e   :  { %12821 = vmatprep.subr.bf16.mxu1 %v14158_v36  ;;  %v14206_v36 = vld [vmem:[%s18347_s1 + $0xac8] sm:$0xff]   ;;  %v14212_v42 = vld [vmem:[%s18347_s1 + $0xa90] sm:$0xff]  }
 0x11f   :  { %v14245_v25 = vld [vmem:[%s18347_s1 + $0xb50] sm:$0xff]  }
 0x120   :  { %12800 = vmatpush3.bf16.msra.mxu0 %v14159_v37  ;;  %v14207_v37 = vld [vmem:[%s18347_s1 + $0xa08] sm:$0xff]  }
 0x121   :  { %12822 = vmatpush3.bf16.msra.mxu1 %v14160_v38  ;;  %12829 = vmatprep.subr.bf16.mxu0 %v14165_v44  ;;  %v14208_v38 = vld [vmem:[%s18347_s1 + $0xa88] sm:$0xff]   ;;  %v14214_v44 = vld [vmem:[%s18347_s1 + $0xad8] sm:$0xff]  }
 0x122   :  { %12851 = vmatprep.subr.bf16.mxu1 %v14166_v46  ;;  %v14216_v46 = vld [vmem:[%s18347_s1 + $0xa98] sm:$0xff]  }
 0x123   :  { %9389 = vmatmul.mubr.bf16.vlgmr.msra.gmra.mrb[32].mxu0 %v11313_v41  ;;  %v14211_v41 = vld [vmem:[%s18347_s1 + $0xa10] sm:$0xff]  }
 0x124   :  { %9429 = vmatmul.mubr.bf16.vlgmr.msra.gmra.mrb[32].mxu1 %v11315_v43  ;;  %12830 = vmatpush3.bf16.msra.mxu0 %v14167_v47  ;;  %v14213_v43 = vld [vmem:[%s18347_s1 + $0xa58] sm:$0xff]   ;;  %v14217_v47 = vld [vmem:[%s18347_s1 + $0xa60] sm:$0xff]  }
 0x125   :  { %12852 = vmatpush3.bf16.msra.mxu1 %v14168_v48  ;;  %12831 = vmatprep.subr.bf16.mxu0 %v14169_v49  ;;  %v14218_v48 = vld [vmem:[%s18347_s1 + $0xae0] sm:$0xff]  }
 0x126   :  { %12853 = vmatprep.subr.bf16.mxu1 %v14170_v50  ;;  %9468 = vmatprep.mubr.bf16.mxu0 %v11318_v27  ;;  %v14219_v50 = vld [vmem:[%s18347_s1 + $0xa20] sm:$0xff]   ;;  %v14247_v27 = vld [vmem:[%s18347_s1 + $0xb10] sm:$0xff]  }
 0x128   :  { %12832 = vmatpush3.bf16.msra.mxu0 %v14171_v51 }
 0x129   :  { %12854 = vmatpush3.bf16.msra.mxu1 %v14172_v52  ;;  %12833 = vmatprep.subr.bf16.mxu0 %v14173_v53  ;;  %v14220_v52 = vld [vmem:[%s18347_s1 + $0xaa0] sm:$0xff]  }
 0x12a   :  { %12855 = vmatprep.subr.bf16.mxu1 %v14174_v54 }
 0x12c   :  { %12834 = vmatpush3.bf16.msra.mxu0 %v14175_v55  ;;  %v14221_v55 = vld [vmem:[%s18347_s1 + $0xa68] sm:$0xff]  }
 0x12d   :  { %12856 = vmatpush3.bf16.msra.mxu1 %v14176_v56  ;;  %12835 = vmatprep.subr.bf16.mxu0 %v14177_v57 }
 0x12e   :  { %12857 = vmatprep.subr.bf16.mxu1 %v14178_v58  ;;  %v14222_v58 = vld [vmem:[%s18347_s1 + $0xae8] sm:$0xff]  }
 0x130   :  { %12836 = vmatpush3.bf16.msra.mxu0 %v14179_v59 }
 0x131   :  { %12858 = vmatpush3.bf16.msra.mxu1 %v14180_v60  ;;  %12837 = vmatprep.subr.bf16.mxu0 %v14181_v61  ;;  %v14223_v61 = vld [vmem:[%s18347_s1 + $0xa28] sm:$0xff]  }
 0x132   :  { %12859 = vmatprep.subr.bf16.mxu1 %v14182_v62 }
 0x134   :  { %12838 = vmatpush3.bf16.msra.mxu0 %v14183_v0 }
 0x135   :  { %12860 = vmatpush3.bf16.msra.mxu1 %v14184_v2  ;;  %12839 = vmatprep.subr.bf16.mxu0 %v14185_v5  ;;  %v14225_v2 = vld [vmem:[%s18347_s1 + $0xa70] sm:$0xff]  }
 0x136   :  { %v12537_v63 = vpop.f32.mrb[8].mxu0  ;;  %12861 = vmatprep.subr.bf16.mxu1 %v14186_v8  ;;  %v14227_v5 = vld [vmem:[%s18347_s1 + $0xa30] sm:$0xff]   ;;  %v14230_v8 = vld [vmem:[%s18347_s1 + $0xaf8] sm:$0xff]  }
 0x137   :  { %v12559_v1 = vpop.f32.mrb[8].mxu1  ;;  %v12538_v3 = vpop.f32.mrb[9].mxu0 }
 0x138   :  { %v12560_v4 = vpop.f32.mrb[9].mxu1  ;;  %v12539_v6 = vadd.f32 %v12538_v3, %v12537_v63  ;;  %v12540_v9 = vpop.f32.mrb[10].mxu0  ;;  %12840 = vmatpush3.bf16.msra.mxu0 %v14187_v11  ;;  %v14224_v63 = vld [vmem:[%s18347_s1 + $0xaa8] sm:$0xff]   ;;  %v32_v11 = vld [vmem:[%s18348_s0 + $0xa0] sm:$0xff] }
 0x139   :  { %v12561_v7 = vadd.f32 %v12560_v4, %v12559_v1  ;;  %v12562_v10 = vpop.f32.mrb[10].mxu1  ;;  %v12541_v14 = vpop.f32.mrb[11].mxu0  ;;  %12862 = vmatpush3.bf16.msra.mxu1 %v14188_v13  ;;  %12841 = vmatprep.subr.bf16.mxu0 %v14189_v16  ;;  %v14226_v4 = vld [vmem:[%s18347_s1 + $0xaf0] sm:$0xff]   ;;  %v14231_v9 = vld [vmem:[%s18347_s1 + $0xa38] sm:$0xff]   ;;  %v11321_v13 = vcombine.low %v32_v11, %v32_v11 }
 0x13a   :  { %v8911_v12 = vadd.f32 %v12539_v6, %v15899_v30  ;;  %v12563_v15 = vpop.f32.mrb[11].mxu1  ;;  %12863 = vmatprep.subr.bf16.mxu1 %v14190_v18  ;;  %v11320_v30 = vcombine.high %v31_v28, %v31_v28  ;;  %v14228_v6 = vld [vmem:[%s18347_s1 + $0xab0] sm:$0xff]   ;;  %v14232_v10 = vld [vmem:[%s18347_s1 + $0xab8] sm:$0xff]   ;;  %v11322_v14 = vcombine.high %v32_v11, %v32_v11  ;;  %v14238_v18 = vld [vmem:[%s18347_s1 + $0xbc0] sm:$0xff]  }
 0x13b   :  { %v14248_v28 = vld [vmem:[%s18347_s1 + $0xb90] sm:$0xff]  }
 0x13c   :  { %v16007_v17 = vadd.f32 %v12561_v7, %v8911_v12  ;;  %12842 = vmatpush3.bf16.msra.mxu0 %v14191_v19  ;;  %9508 = vmatprep.mubr.bf16.mxu1 %v11320_v30  ;;  %v14229_v7 = vld [vmem:[%s18347_s1 + $0xa78] sm:$0xff]   ;;  %v33_v12 = vld [vmem:[%s18348_s0 + $0xa8] sm:$0xff]  ;;  %v14239_v19 = vld [vmem:[%s18347_s1 + $0xb00] sm:$0xff]  }
 0x13d   :  { %12864 = vmatpush3.bf16.msra.mxu1 %v14192_v20  ;;  %12843 = vmatprep.subr.bf16.mxu0 %v14193_v21  ;;  %v11323_v15 = vcombine.low %v33_v12, %v33_v12  ;;  %v11324_v16 = vcombine.high %v33_v12, %v33_v12  ;;  %v14240_v20 = vld [vmem:[%s18347_s1 + $0xb80] sm:$0xff]   ;;  %v14241_v21 = vld [vmem:[%s18347_s1 + $0xb48] sm:$0xff]   ;;  %v14250_v30 = vld [vmem:[%s18347_s1 + $0xbd8] sm:$0xff]  }
 0x13e   :  { %12865 = vmatprep.subr.bf16.mxu1 %v14194_v22  ;;  %v14242_v22 = vld [vmem:[%s18347_s1 + $0xbc8] sm:$0xff]   ;;  %v14281_v11 = vld [vmem:[%s18347_s1 + $0xc50] sm:$0xff]  }
 0x13f   :  { %v14282_v12 = vld [vmem:[%s18347_s1 + $0xcd0] sm:$0xff]  }
 0x140   :  { %12844 = vmatpush3.bf16.msra.mxu0 %v14195_v23  ;;  %v14243_v23 = vld [vmem:[%s18347_s1 + $0xb08] sm:$0xff]  }
 0x141   :  { %12866 = vmatpush3.bf16.msra.mxu1 %v14196_v24  ;;  %12873 = vmatprep.subr.bf16.mxu0 %v14201_v31  ;;  %v14244_v24 = vld [vmem:[%s18347_s1 + $0xb88] sm:$0xff]   ;;  %v14251_v31 = vld [vmem:[%s18347_s1 + $0xb18] sm:$0xff]  }
 0x142   :  { %12895 = vmatprep.subr.bf16.mxu1 %v14202_v32  ;;  %v14252_v32 = vld [vmem:[%s18347_s1 + $0xb98] sm:$0xff]  }
 0x143   :  { %9469 = vmatmul.mubr.bf16.vlgmr.msra.gmra.mrb[36].mxu0 %v11317_v26  ;;  %v14246_v26 = vld [vmem:[%s18347_s1 + $0xbd0] sm:$0xff]  }
 0x144   :  { %9509 = vmatmul.mubr.bf16.vlgmr.msra.gmra.mrb[36].mxu1 %v11319_v29  ;;  %12874 = vmatpush3.bf16.msra.mxu0 %v14203_v33  ;;  %v14249_v29 = vld [vmem:[%s18347_s1 + $0xb58] sm:$0xff]   ;;  %v14253_v33 = vld [vmem:[%s18347_s1 + $0xb60] sm:$0xff]  }
 0x145   :  { %12896 = vmatpush3.bf16.msra.mxu1 %v14204_v34  ;;  %12875 = vmatprep.subr.bf16.mxu0 %v14205_v35  ;;  %v14254_v34 = vld [vmem:[%s18347_s1 + $0xbe0] sm:$0xff]  }
 0x146   :  { %12897 = vmatprep.subr.bf16.mxu1 %v14206_v36  ;;  %9548 = vmatprep.mubr.bf16.mxu0 %v11322_v14  ;;  %v14255_v35 = vld [vmem:[%s18347_s1 + $0xb20] sm:$0xff]   ;;  %v14284_v14 = vld [vmem:[%s18347_s1 + $0xc90] sm:$0xff]  }
 0x147   :  { %9588 = vmatprep.mubr.bf16.mxu1 %v11324_v16  ;;  %v14286_v16 = vld [vmem:[%s18347_s1 + $0xcd8] sm:$0xff]  }
 0x148   :  { %12876 = vmatpush3.bf16.msra.mxu0 %v14207_v37  ;;  %v14256_v37 = vld [vmem:[%s18347_s1 + $0xba0] sm:$0xff]  }
 0x149   :  { %12898 = vmatpush3.bf16.msra.mxu1 %v14208_v38  ;;  %12877 = vmatprep.subr.bf16.mxu0 %v14209_v39 }
 0x14a   :  { %12899 = vmatprep.subr.bf16.mxu1 %v14210_v40 }
 0x14c   :  { %12878 = vmatpush3.bf16.msra.mxu0 %v14211_v41 }
 0x14d   :  { %12900 = vmatpush3.bf16.msra.mxu1 %v14212_v42  ;;  %12879 = vmatprep.subr.bf16.mxu0 %v14213_v43  ;;  %v14257_v43 = vld [vmem:[%s18347_s1 + $0xb68] sm:$0xff]  }
 0x14e   :  { %12901 = vmatprep.subr.bf16.mxu1 %v14214_v44 }
 0x150   :  { %12880 = vmatpush3.bf16.msra.mxu0 %v14215_v45  ;;  %v14258_v45 = vld [vmem:[%s18347_s1 + $0xbe8] sm:$0xff]  }
 0x151   :  { %12902 = vmatpush3.bf16.msra.mxu1 %v14216_v46  ;;  %12881 = vmatprep.subr.bf16.mxu0 %v14217_v47 }
 0x152   :  { %12903 = vmatprep.subr.bf16.mxu1 %v14218_v48  ;;  %v14259_v48 = vld [vmem:[%s18347_s1 + $0xb28] sm:$0xff]  }
 0x154   :  { %12882 = vmatpush3.bf16.msra.mxu0 %v14219_v50  ;;  %v14260_v50 = vld [vmem:[%s18347_s1 + $0xba8] sm:$0xff]  }
 0x155   :  { %12904 = vmatpush3.bf16.msra.mxu1 %v14220_v52  ;;  %12883 = vmatprep.subr.bf16.mxu0 %v14221_v55  ;;  %v14263_v55 = vld [vmem:[%s18347_s1 + $0xb30] sm:$0xff]  }
 0x156   :  { %v12581_v49 = vpop.f32.mrb[12].mxu0  ;;  %12905 = vmatprep.subr.bf16.mxu1 %v14222_v58  ;;  %v14266_v58 = vld [vmem:[%s18347_s1 + $0xbf8] sm:$0xff]  }
 0x157   :  { %v12603_v51 = vpop.f32.mrb[12].mxu1  ;;  %v12582_v53 = vpop.f32.mrb[13].mxu0 }
 0x158   :  { %v12604_v54 = vpop.f32.mrb[13].mxu1  ;;  %v12583_v56 = vadd.f32 %v12582_v53, %v12581_v49  ;;  %v12584_v59 = vpop.f32.mrb[14].mxu0  ;;  %12884 = vmatpush3.bf16.msra.mxu0 %v14223_v61  ;;  %v14261_v53 = vld [vmem:[%s18347_s1 + $0xb70] sm:$0xff]  }
 0x159   :  { %v12605_v57 = vadd.f32 %v12604_v54, %v12603_v51  ;;  %v12606_v60 = vpop.f32.mrb[14].mxu1  ;;  %v12585_v0 = vpop.f32.mrb[15].mxu0  ;;  %12906 = vmatpush3.bf16.msra.mxu1 %v14224_v63  ;;  %12885 = vmatprep.subr.bf16.mxu0 %v14225_v2  ;;  %v14262_v54 = vld [vmem:[%s18347_s1 + $0xbf0] sm:$0xff]   ;;  %v14267_v59 = vld [vmem:[%s18347_s1 + $0xb38] sm:$0xff]  }
 0x15a   :  { %v8991_v62 = vadd.f32 %v12583_v56, %v16007_v17  ;;  %v12607_v1 = vpop.f32.mrb[15].mxu1  ;;  %12907 = vmatprep.subr.bf16.mxu1 %v14226_v4  ;;  %v14237_v17 = vld [vmem:[%s18347_s1 + $0xb40] sm:$0xff]   ;;  %v14264_v56 = vld [vmem:[%s18347_s1 + $0xbb0] sm:$0xff]   ;;  %v14268_v60 = vld [vmem:[%s18347_s1 + $0xbb8] sm:$0xff]  }
 0x15b   :  { %v34_v61 = vld [vmem:[%s18348_s0 + $0xb0] sm:$0xff]  ;;  %v14274_v4 = vld [vmem:[%s18347_s1 + $0xcc0] sm:$0xff]  }
 0x15c   :  { %v16112_v3 = vadd.f32 %v12605_v57, %v8991_v62  ;;  %12886 = vmatpush3.bf16.msra.mxu0 %v14227_v5  ;;  %v14265_v57 = vld [vmem:[%s18347_s1 + $0xb78] sm:$0xff]   ;;  %v11325_v63 = vcombine.low %v34_v61, %v34_v61  ;;  %v11326_v0 = vcombine.high %v34_v61, %v34_v61  ;;  %v14275_v5 = vld [vmem:[%s18347_s1 + $0xc00] sm:$0xff]   ;;  %v14317_v61 = vld [vmem:[%s18347_s1 + $0xd50] sm:$0xff]  }
 0x15d   :  { %12908 = vmatpush3.bf16.msra.mxu1 %v14228_v6  ;;  %12887 = vmatprep.subr.bf16.mxu0 %v14229_v7  ;;  %v35_v62 = vld [vmem:[%s18348_s0 + $0xb8] sm:$0xff]  ;;  %v14276_v6 = vld [vmem:[%s18347_s1 + $0xc80] sm:$0xff]   ;;  %v14277_v7 = vld [vmem:[%s18347_s1 + $0xc48] sm:$0xff]  }
 0x15e   :  { %12909 = vmatprep.subr.bf16.mxu1 %v14230_v8  ;;  %v11327_v1 = vcombine.low %v35_v62, %v35_v62  ;;  %v11328_v2 = vcombine.high %v35_v62, %v35_v62  ;;  %v14278_v8 = vld [vmem:[%s18347_s1 + $0xcc8] sm:$0xff]   ;;  %v14318_v62 = vld [vmem:[%s18347_s1 + $0xdd0] sm:$0xff]  }
 0x160   :  { %12888 = vmatpush3.bf16.msra.mxu0 %v14231_v9  ;;  %v14279_v9 = vld [vmem:[%s18347_s1 + $0xc08] sm:$0xff]  }
 0x161   :  { %12910 = vmatpush3.bf16.msra.mxu1 %v14232_v10  ;;  %12917 = vmatprep.subr.bf16.mxu0 %v14237_v17  ;;  %v14280_v10 = vld [vmem:[%s18347_s1 + $0xc88] sm:$0xff]   ;;  %v14287_v17 = vld [vmem:[%s18347_s1 + $0xc18] sm:$0xff]  }
 0x162   :  { %12939 = vmatprep.subr.bf16.mxu1 %v14238_v18  ;;  %v14288_v18 = vld [vmem:[%s18347_s1 + $0xc98] sm:$0xff]  }
 0x163   :  { %9549 = vmatmul.mubr.bf16.vlgmr.msra.gmra.mrb[40].mxu0 %v11321_v13  ;;  %v14283_v13 = vld [vmem:[%s18347_s1 + $0xc10] sm:$0xff]  }
 0x164   :  { %9589 = vmatmul.mubr.bf16.vlgmr.msra.gmra.mrb[40].mxu1 %v11323_v15  ;;  %12918 = vmatpush3.bf16.msra.mxu0 %v14239_v19  ;;  %v14285_v15 = vld [vmem:[%s18347_s1 + $0xc58] sm:$0xff]   ;;  %v14289_v19 = vld [vmem:[%s18347_s1 + $0xc60] sm:$0xff]  }
 0x165   :  { %12940 = vmatpush3.bf16.msra.mxu1 %v14240_v20  ;;  %12919 = vmatprep.subr.bf16.mxu0 %v14241_v21  ;;  %v14290_v20 = vld [vmem:[%s18347_s1 + $0xce0] sm:$0xff]  }
 0x166   :  { %12941 = vmatprep.subr.bf16.mxu1 %v14242_v22  ;;  %9628 = vmatprep.mubr.bf16.mxu0 %v11326_v0  ;;  %v14291_v22 = vld [vmem:[%s18347_s1 + $0xc20] sm:$0xff]   ;;  %v14320_v0 = vld [vmem:[%s18347_s1 + $0xd90] sm:$0xff]  }
 0x167   :  { %9668 = vmatprep.mubr.bf16.mxu1 %v11328_v2  ;;  %v14322_v2 = vld [vmem:[%s18347_s1 + $0xdd8] sm:$0xff]  }
 0x168   :  { %12920 = vmatpush3.bf16.msra.mxu0 %v14243_v23 }
 0x169   :  { %12942 = vmatpush3.bf16.msra.mxu1 %v14244_v24  ;;  %12921 = vmatprep.subr.bf16.mxu0 %v14245_v25  ;;  %v14292_v24 = vld [vmem:[%s18347_s1 + $0xca0] sm:$0xff]  }
 0x16a   :  { %12943 = vmatprep.subr.bf16.mxu1 %v14246_v26 }
 0x16c   :  { %12922 = vmatpush3.bf16.msra.mxu0 %v14247_v27 }
 0x16d   :  { %12944 = vmatpush3.bf16.msra.mxu1 %v14248_v28  ;;  %12923 = vmatprep.subr.bf16.mxu0 %v14249_v29  ;;  %v14293_v28 = vld [vmem:[%s18347_s1 + $0xc68] sm:$0xff]  }
 0x16e   :  { %12945 = vmatprep.subr.bf16.mxu1 %v14250_v30  ;;  %v14294_v30 = vld [vmem:[%s18347_s1 + $0xce8] sm:$0xff]  }
 0x170   :  { %12924 = vmatpush3.bf16.msra.mxu0 %v14251_v31 }
 0x171   :  { %12946 = vmatpush3.bf16.msra.mxu1 %v14252_v32  ;;  %12925 = vmatprep.subr.bf16.mxu0 %v14253_v33 }
 0x172   :  { %12947 = vmatprep.subr.bf16.mxu1 %v14254_v34  ;;  %v14295_v34 = vld [vmem:[%s18347_s1 + $0xc28] sm:$0xff]  }
 0x174   :  { %12926 = vmatpush3.bf16.msra.mxu0 %v14255_v35  ;;  %v14296_v35 = vld [vmem:[%s18347_s1 + $0xca8] sm:$0xff]  }
 0x175   :  { %12948 = vmatpush3.bf16.msra.mxu1 %v14256_v37  ;;  %12927 = vmatprep.subr.bf16.mxu0 %v14257_v43  ;;  %v14301_v43 = vld [vmem:[%s18347_s1 + $0xc78] sm:$0xff]  }
 0x176   :  { %v12625_v36 = vpop.f32.mrb[16].mxu0  ;;  %12949 = vmatprep.subr.bf16.mxu1 %v14258_v45  ;;  %v14303_v45 = vld [vmem:[%s18347_s1 + $0xc38] sm:$0xff]  }
 0x177   :  { %v12647_v38 = vpop.f32.mrb[16].mxu1  ;;  %v12626_v39 = vpop.f32.mrb[17].mxu0 }
 0x178   :  { %v12648_v40 = vpop.f32.mrb[17].mxu1  ;;  %v12627_v41 = vadd.f32 %v12626_v39, %v12625_v36  ;;  %v12628_v44 = vpop.f32.mrb[18].mxu0  ;;  %12928 = vmatpush3.bf16.msra.mxu0 %v14259_v48  ;;  %v14297_v39 = vld [vmem:[%s18347_s1 + $0xc70] sm:$0xff]   ;;  %v37_v48 = vld [vmem:[%s18348_s0 + $0xc8] sm:$0xff] }
 0x179   :  { %v12649_v42 = vadd.f32 %v12648_v40, %v12647_v38  ;;  %v12650_v46 = vpop.f32.mrb[18].mxu1  ;;  %v12629_v49 = vpop.f32.mrb[19].mxu0  ;;  %12950 = vmatpush3.bf16.msra.mxu1 %v14260_v50  ;;  %12929 = vmatprep.subr.bf16.mxu0 %v14261_v53  ;;  %v14298_v40 = vld [vmem:[%s18347_s1 + $0xcf0] sm:$0xff]   ;;  %v14302_v44 = vld [vmem:[%s18347_s1 + $0xcf8] sm:$0xff]   ;;  %v11332_v53 = vcombine.high %v37_v48, %v37_v48 }
 0x17a   :  { %v9071_v47 = vadd.f32 %v12627_v41, %v16112_v3  ;;  %v12651_v51 = vpop.f32.mrb[19].mxu1  ;;  %12951 = vmatprep.subr.bf16.mxu1 %v14262_v54  ;;  %v14273_v3 = vld [vmem:[%s18347_s1 + $0xc40] sm:$0xff]   ;;  %v14299_v41 = vld [vmem:[%s18347_s1 + $0xc30] sm:$0xff]   ;;  %v14304_v46 = vld [vmem:[%s18347_s1 + $0xcb8] sm:$0xff]  }
 0x17b   :  { %v11331_v51 = vcombine.low %v37_v48, %v37_v48  ;;  %v14310_v54 = vld [vmem:[%s18347_s1 + $0xdc0] sm:$0xff]   ;;  %v14354_v48 = vld [vmem:[%s18347_s1 + $0xed0] sm:$0xff]  }
 0x17c   :  { %v16214_v52 = vadd.f32 %v12649_v42, %v9071_v47  ;;  %12930 = vmatpush3.bf16.msra.mxu0 %v14263_v55  ;;  %v14300_v42 = vld [vmem:[%s18347_s1 + $0xcb0] sm:$0xff]   ;;  %v36_v47 = vld [vmem:[%s18348_s0 + $0xc0] sm:$0xff] }
 0x17d   :  { %12952 = vmatpush3.bf16.msra.mxu1 %v14264_v56  ;;  %12931 = vmatprep.subr.bf16.mxu0 %v14265_v57  ;;  %v11329_v49 = vcombine.low %v36_v47, %v36_v47  ;;  %v11330_v50 = vcombine.high %v36_v47, %v36_v47  ;;  %v14311_v55 = vld [vmem:[%s18347_s1 + $0xd00] sm:$0xff]   ;;  %v14313_v57 = vld [vmem:[%s18347_s1 + $0xd48] sm:$0xff]   ;;  %v14353_v47 = vld [vmem:[%s18347_s1 + $0xe50] sm:$0xff]  }
 0x17e   :  { %12953 = vmatprep.subr.bf16.mxu1 %v14266_v58  ;;  %v14312_v56 = vld [vmem:[%s18347_s1 + $0xd80] sm:$0xff]   ;;  %v14314_v58 = vld [vmem:[%s18347_s1 + $0xdc8] sm:$0xff]  }
 0x180   :  { %12932 = vmatpush3.bf16.msra.mxu0 %v14267_v59  ;;  %v14315_v59 = vld [vmem:[%s18347_s1 + $0xd08] sm:$0xff]  }
 0x181   :  { %12954 = vmatpush3.bf16.msra.mxu1 %v14268_v60  ;;  %12961 = vmatprep.subr.bf16.mxu0 %v14273_v3  ;;  %v14316_v60 = vld [vmem:[%s18347_s1 + $0xd88] sm:$0xff]   ;;  %v14323_v3 = vld [vmem:[%s18347_s1 + $0xd18] sm:$0xff]  }
 0x182   :  { %12983 = vmatprep.subr.bf16.mxu1 %v14274_v4  ;;  %v14324_v4 = vld [vmem:[%s18347_s1 + $0xd98] sm:$0xff]  }
 0x183   :  { %9629 = vmatmul.mubr.bf16.vlgmr.msra.gmra.mrb[44].mxu0 %v11325_v63  ;;  %v14319_v63 = vld [vmem:[%s18347_s1 + $0xd10] sm:$0xff]  }
 0x184   :  { %9669 = vmatmul.mubr.bf16.vlgmr.msra.gmra.mrb[44].mxu1 %v11327_v1  ;;  %12962 = vmatpush3.bf16.msra.mxu0 %v14275_v5  ;;  %v14321_v1 = vld [vmem:[%s18347_s1 + $0xd58] sm:$0xff]   ;;  %v14325_v5 = vld [vmem:[%s18347_s1 + $0xd60] sm:$0xff]  }
 0x185   :  { %12984 = vmatpush3.bf16.msra.mxu1 %v14276_v6  ;;  %12963 = vmatprep.subr.bf16.mxu0 %v14277_v7  ;;  %v14326_v6 = vld [vmem:[%s18347_s1 + $0xde0] sm:$0xff]  }
 0x186   :  { %12985 = vmatprep.subr.bf16.mxu1 %v14278_v8  ;;  %9708 = vmatprep.mubr.bf16.mxu0 %v11330_v50  ;;  %v14327_v8 = vld [vmem:[%s18347_s1 + $0xd20] sm:$0xff]   ;;  %v14356_v50 = vld [vmem:[%s18347_s1 + $0xe90] sm:$0xff]  }
 0x187   :  { %9748 = vmatprep.mubr.bf16.mxu1 %v11332_v53  ;;  %v14359_v53 = vld [vmem:[%s18347_s1 + $0xe18] sm:$0xff]  }
 0x188   :  { %12964 = vmatpush3.bf16.msra.mxu0 %v14279_v9 }
 0x189   :  { %12986 = vmatpush3.bf16.msra.mxu1 %v14280_v10  ;;  %12965 = vmatprep.subr.bf16.mxu0 %v14281_v11  ;;  %v14328_v10 = vld [vmem:[%s18347_s1 + $0xda0] sm:$0xff]  }
 0x18a   :  { %12987 = vmatprep.subr.bf16.mxu1 %v14282_v12 }
 0x18c   :  { %12966 = vmatpush3.bf16.msra.mxu0 %v14283_v13  ;;  %v14329_v13 = vld [vmem:[%s18347_s1 + $0xd68] sm:$0xff]  }
 0x18d   :  { %12988 = vmatpush3.bf16.msra.mxu1 %v14284_v14  ;;  %12967 = vmatprep.subr.bf16.mxu0 %v14285_v15 }
 0x18e   :  { %12989 = vmatprep.subr.bf16.mxu1 %v14286_v16  ;;  %v14330_v16 = vld [vmem:[%s18347_s1 + $0xde8] sm:$0xff]  }
 0x190   :  { %12968 = vmatpush3.bf16.msra.mxu0 %v14287_v17 }
 0x191   :  { %12990 = vmatpush3.bf16.msra.mxu1 %v14288_v18  ;;  %12969 = vmatprep.subr.bf16.mxu0 %v14289_v19  ;;  %v14331_v19 = vld [vmem:[%s18347_s1 + $0xd28] sm:$0xff]  }
 0x192   :  { %12991 = vmatprep.subr.bf16.mxu1 %v14290_v20 }
 0x194   :  { %12970 = vmatpush3.bf16.msra.mxu0 %v14291_v22 }
 0x195   :  { %12992 = vmatpush3.bf16.msra.mxu1 %v14292_v24  ;;  %12971 = vmatprep.subr.bf16.mxu0 %v14293_v28  ;;  %v14333_v24 = vld [vmem:[%s18347_s1 + $0xd70] sm:$0xff]  }
 0x196   :  { %v12669_v21 = vpop.f32.mrb[20].mxu0  ;;  %12993 = vmatprep.subr.bf16.mxu1 %v14294_v30  ;;  %v14336_v28 = vld [vmem:[%s18347_s1 + $0xdb0] sm:$0xff]   ;;  %v14338_v30 = vld [vmem:[%s18347_s1 + $0xdf8] sm:$0xff]  }
 0x197   :  { %v12691_v23 = vpop.f32.mrb[20].mxu1  ;;  %v12670_v25 = vpop.f32.mrb[21].mxu0 }
 0x198   :  { %v12671_v26 = vadd.f32 %v12670_v25, %v12669_v21  ;;  %v12692_v27 = vpop.f32.mrb[21].mxu1  ;;  %v12672_v31 = vpop.f32.mrb[22].mxu0  ;;  %12972 = vmatpush3.bf16.msra.mxu0 %v14295_v34  ;;  %v14332_v21 = vld [vmem:[%s18347_s1 + $0xda8] sm:$0xff]  }
 0x199   :  { %v12693_v29 = vadd.f32 %v12692_v27, %v12691_v23  ;;  %v12694_v33 = vpop.f32.mrb[22].mxu1  ;;  %v12673_v36 = vpop.f32.mrb[23].mxu0  ;;  %12994 = vmatpush3.bf16.msra.mxu1 %v14296_v35  ;;  %12973 = vmatprep.subr.bf16.mxu0 %v14297_v39  ;;  %v14335_v27 = vld [vmem:[%s18347_s1 + $0xd30] sm:$0xff]   ;;  %v14339_v31 = vld [vmem:[%s18347_s1 + $0xd38] sm:$0xff]   ;;  %v14345_v39 = vld [vmem:[%s18347_s1 + $0xe40] sm:$0xff]  }
 0x19a   :  { %v9151_v32 = vadd.f32 %v12671_v26, %v16214_v52  ;;  %v12695_v38 = vpop.f32.mrb[23].mxu1  ;;  %12995 = vmatprep.subr.bf16.mxu1 %v14298_v40  ;;  %v14309_v52 = vld [vmem:[%s18347_s1 + $0xd40] sm:$0xff]   ;;  %v14334_v26 = vld [vmem:[%s18347_s1 + $0xdf0] sm:$0xff]   ;;  %v39_v36 = vld [vmem:[%s18348_s0 + $0xd8] sm:$0xff] }
 0x19b   :  { %v38_v33 = vld [vmem:[%s18348_s0 + $0xd0] sm:$0xff]  ;;  %v11336_v38 = vcombine.high %v39_v36, %v39_v36  ;;  %v14346_v40 = vld [vmem:[%s18347_s1 + $0xec0] sm:$0xff]  }
 0x19c   :  { %v16319_v37 = vadd.f32 %v12693_v29, %v9151_v32  ;;  %12974 = vmatpush3.bf16.msra.mxu0 %v14299_v41  ;;  %v14337_v29 = vld [vmem:[%s18347_s1 + $0xd78] sm:$0xff]   ;;  %v11333_v34 = vcombine.low %v38_v33, %v38_v33  ;;  %v11334_v35 = vcombine.high %v38_v33, %v38_v33  ;;  %v14347_v41 = vld [vmem:[%s18347_s1 + $0xe00] sm:$0xff]   ;;  %v14389_v33 = vld [vmem:[%s18347_s1 + $0xf50] sm:$0xff]  }
 0x19d   :  { %12996 = vmatpush3.bf16.msra.mxu1 %v14300_v42  ;;  %12975 = vmatprep.subr.bf16.mxu0 %v14301_v43  ;;  %v14340_v32 = vld [vmem:[%s18347_s1 + $0xdb8] sm:$0xff]   ;;  %v14348_v42 = vld [vmem:[%s18347_s1 + $0xe80] sm:$0xff]   ;;  %v14349_v43 = vld [vmem:[%s18347_s1 + $0xe48] sm:$0xff]  }
 0x19e   :  { %12997 = vmatprep.subr.bf16.mxu1 %v14302_v44  ;;  %v14350_v44 = vld [vmem:[%s18347_s1 + $0xec8] sm:$0xff]  }
 0x1a0   :  { %12976 = vmatpush3.bf16.msra.mxu0 %v14303_v45  ;;  %v14351_v45 = vld [vmem:[%s18347_s1 + $0xe08] sm:$0xff]  }
 0x1a1   :  { %12998 = vmatpush3.bf16.msra.mxu1 %v14304_v46  ;;  %13005 = vmatprep.subr.bf16.mxu0 %v14309_v52  ;;  %v14352_v46 = vld [vmem:[%s18347_s1 + $0xe88] sm:$0xff]   ;;  %v14358_v52 = vld [vmem:[%s18347_s1 + $0xed8] sm:$0xff]  }
 0x1a2   :  { %13027 = vmatprep.subr.bf16.mxu1 %v14310_v54  ;;  %v14360_v54 = vld [vmem:[%s18347_s1 + $0xe98] sm:$0xff]  }
 0x1a3   :  { %9709 = vmatmul.mubr.bf16.vlgmr.msra.gmra.mrb[48].mxu0 %v11329_v49  ;;  %v14355_v49 = vld [vmem:[%s18347_s1 + $0xe10] sm:$0xff]  }
 0x1a4   :  { %9749 = vmatmul.mubr.bf16.vlgmr.msra.gmra.mrb[48].mxu1 %v11331_v51  ;;  %13006 = vmatpush3.bf16.msra.mxu0 %v14311_v55  ;;  %v14357_v51 = vld [vmem:[%s18347_s1 + $0xe58] sm:$0xff]   ;;  %v14361_v55 = vld [vmem:[%s18347_s1 + $0xe60] sm:$0xff]  }
 0x1a5   :  { %13028 = vmatpush3.bf16.msra.mxu1 %v14312_v56  ;;  %13007 = vmatprep.subr.bf16.mxu0 %v14313_v57  ;;  %v14362_v56 = vld [vmem:[%s18347_s1 + $0xee0] sm:$0xff]  }
 0x1a6   :  { %13029 = vmatprep.subr.bf16.mxu1 %v14314_v58  ;;  %9788 = vmatprep.mubr.bf16.mxu0 %v11334_v35  ;;  %v14363_v58 = vld [vmem:[%s18347_s1 + $0xe20] sm:$0xff]   ;;  %v14391_v35 = vld [vmem:[%s18347_s1 + $0xf10] sm:$0xff]  }
 0x1a7   :  { %9828 = vmatprep.mubr.bf16.mxu1 %v11336_v38  ;;  %v14394_v38 = vld [vmem:[%s18347_s1 + $0xfd8] sm:$0xff]  }
 0x1a8   :  { %13008 = vmatpush3.bf16.msra.mxu0 %v14315_v59 }
 0x1a9   :  { %13030 = vmatpush3.bf16.msra.mxu1 %v14316_v60  ;;  %13009 = vmatprep.subr.bf16.mxu0 %v14317_v61  ;;  %v14364_v60 = vld [vmem:[%s18347_s1 + $0xea0] sm:$0xff]  }
 0x1aa   :  { %13031 = vmatprep.subr.bf16.mxu1 %v14318_v62 }
 0x1ac   :  { %13010 = vmatpush3.bf16.msra.mxu0 %v14319_v63  ;;  %v14365_v63 = vld [vmem:[%s18347_s1 + $0xe68] sm:$0xff]  }
 0x1ad   :  { %13032 = vmatpush3.bf16.msra.mxu1 %v14320_v0  ;;  %13011 = vmatprep.subr.bf16.mxu0 %v14321_v1 }
 0x1ae   :  { %13033 = vmatprep.subr.bf16.mxu1 %v14322_v2  ;;  %v14366_v2 = vld [vmem:[%s18347_s1 + $0xee8] sm:$0xff]  }
 0x1b0   :  { %13012 = vmatpush3.bf16.msra.mxu0 %v14323_v3 }
 0x1b1   :  { %13034 = vmatpush3.bf16.msra.mxu1 %v14324_v4  ;;  %13013 = vmatprep.subr.bf16.mxu0 %v14325_v5  ;;  %v14367_v5 = vld [vmem:[%s18347_s1 + $0xe28] sm:$0xff]  }
 0x1b2   :  { %13035 = vmatprep.subr.bf16.mxu1 %v14326_v6 }
 0x1b4   :  { %13014 = vmatpush3.bf16.msra.mxu0 %v14327_v8 }
 0x1b5   :  { %13036 = vmatpush3.bf16.msra.mxu1 %v14328_v10  ;;  %13015 = vmatprep.subr.bf16.mxu0 %v14329_v13  ;;  %v14369_v10 = vld [vmem:[%s18347_s1 + $0xe70] sm:$0xff]  }
 0x1b6   :  { %v12713_v7 = vpop.f32.mrb[24].mxu0  ;;  %13037 = vmatprep.subr.bf16.mxu1 %v14330_v16  ;;  %v14371_v13 = vld [vmem:[%s18347_s1 + $0xe30] sm:$0xff]   ;;  %v14374_v16 = vld [vmem:[%s18347_s1 + $0xef8] sm:$0xff]  }
 0x1b7   :  { %v12735_v9 = vpop.f32.mrb[24].mxu1  ;;  %v12714_v11 = vpop.f32.mrb[25].mxu0 }
 0x1b8   :  { %v12736_v12 = vpop.f32.mrb[25].mxu1  ;;  %v12715_v14 = vadd.f32 %v12714_v11, %v12713_v7  ;;  %v12716_v17 = vpop.f32.mrb[26].mxu0  ;;  %13016 = vmatpush3.bf16.msra.mxu0 %v14331_v19  ;;  %v14368_v7 = vld [vmem:[%s18347_s1 + $0xea8] sm:$0xff]   ;;  %v40_v19 = vld [vmem:[%s18348_s0 + $0xe0] sm:$0xff] }
 0x1b9   :  { %v12737_v15 = vadd.f32 %v12736_v12, %v12735_v9  ;;  %v12738_v18 = vpop.f32.mrb[26].mxu1  ;;  %v12717_v22 = vpop.f32.mrb[27].mxu0  ;;  %13038 = vmatpush3.bf16.msra.mxu1 %v14332_v21  ;;  %13017 = vmatprep.subr.bf16.mxu0 %v14333_v24  ;;  %v14370_v12 = vld [vmem:[%s18347_s1 + $0xef0] sm:$0xff]   ;;  %v14375_v17 = vld [vmem:[%s18347_s1 + $0xe38] sm:$0xff]   ;;  %v11337_v21 = vcombine.low %v40_v19, %v40_v19 }
 0x1ba   :  { %v9231_v20 = vadd.f32 %v12715_v14, %v16319_v37  ;;  %v12739_v23 = vpop.f32.mrb[27].mxu1  ;;  %13039 = vmatprep.subr.bf16.mxu1 %v14334_v26  ;;  %v11335_v37 = vcombine.low %v39_v36, %v39_v36  ;;  %v14372_v14 = vld [vmem:[%s18347_s1 + $0xeb0] sm:$0xff]   ;;  %v14376_v18 = vld [vmem:[%s18347_s1 + $0xeb8] sm:$0xff]   ;;  %v11338_v22 = vcombine.high %v40_v19, %v40_v19  ;;  %v14382_v26 = vld [vmem:[%s18347_s1 + $0xfc0] sm:$0xff]  }
 0x1bb   :  { %v14392_v36 = vld [vmem:[%s18347_s1 + $0xf90] sm:$0xff]  }
 0x1bc   :  { %v16427_v25 = vadd.f32 %v12737_v15, %v9231_v20  ;;  %13018 = vmatpush3.bf16.msra.mxu0 %v14335_v27  ;;  %v14373_v15 = vld [vmem:[%s18347_s1 + $0xe78] sm:$0xff]   ;;  %v41_v20 = vld [vmem:[%s18348_s0 + $0xe8] sm:$0xff]  ;;  %v14383_v27 = vld [vmem:[%s18347_s1 + $0xf00] sm:$0xff]  }
 0x1bd   :  { %13040 = vmatpush3.bf16.msra.mxu1 %v14336_v28  ;;  %13019 = vmatprep.subr.bf16.mxu0 %v14337_v29  ;;  %v11339_v23 = vcombine.low %v41_v20, %v41_v20  ;;  %v11340_v24 = vcombine.high %v41_v20, %v41_v20  ;;  %v14384_v28 = vld [vmem:[%s18347_s1 + $0xf80] sm:$0xff]   ;;  %v14385_v29 = vld [vmem:[%s18347_s1 + $0xf48] sm:$0xff]   ;;  %v14425_v19 = vld [vmem:[%s18347_s1 + $0x1050] sm:$0xff]  }
 0x1be   :  { %13041 = vmatprep.subr.bf16.mxu1 %v14338_v30  ;;  %v14386_v30 = vld [vmem:[%s18347_s1 + $0xfc8] sm:$0xff]   ;;  %v14426_v20 = vld [vmem:[%s18347_s1 + $0x10d0] sm:$0xff]  }
 0x1c0   :  { %13020 = vmatpush3.bf16.msra.mxu0 %v14339_v31  ;;  %v14387_v31 = vld [vmem:[%s18347_s1 + $0xf08] sm:$0xff]  }
 0x1c1   :  { %13042 = vmatpush3.bf16.msra.mxu1 %v14340_v32  ;;  %13049 = vmatprep.subr.bf16.mxu0 %v14345_v39  ;;  %v14388_v32 = vld [vmem:[%s18347_s1 + $0xf88] sm:$0xff]   ;;  %v14395_v39 = vld [vmem:[%s18347_s1 + $0xf18] sm:$0xff]  }
 0x1c2   :  { %13071 = vmatprep.subr.bf16.mxu1 %v14346_v40  ;;  %v14396_v40 = vld [vmem:[%s18347_s1 + $0xf98] sm:$0xff]  }
 0x1c3   :  { %9789 = vmatmul.mubr.bf16.vlgmr.msra.gmra.mrb[52].mxu0 %v11333_v34  ;;  %v14390_v34 = vld [vmem:[%s18347_s1 + $0xfd0] sm:$0xff]  }
 0x1c4   :  { %9829 = vmatmul.mubr.bf16.vlgmr.msra.gmra.mrb[52].mxu1 %v11335_v37  ;;  %13050 = vmatpush3.bf16.msra.mxu0 %v14347_v41  ;;  %v14393_v37 = vld [vmem:[%s18347_s1 + $0xf58] sm:$0xff]   ;;  %v14397_v41 = vld [vmem:[%s18347_s1 + $0xf60] sm:$0xff]  }
 0x1c5   :  { %13072 = vmatpush3.bf16.msra.mxu1 %v14348_v42  ;;  %13051 = vmatprep.subr.bf16.mxu0 %v14349_v43  ;;  %v14398_v42 = vld [vmem:[%s18347_s1 + $0xfe0] sm:$0xff]  }
 0x1c6   :  { %13073 = vmatprep.subr.bf16.mxu1 %v14350_v44  ;;  %9868 = vmatprep.mubr.bf16.mxu0 %v11338_v22  ;;  %v14399_v43 = vld [vmem:[%s18347_s1 + $0xf20] sm:$0xff]   ;;  %v14428_v22 = vld [vmem:[%s18347_s1 + $0x1090] sm:$0xff]  }
 0x1c7   :  { %9908 = vmatprep.mubr.bf16.mxu1 %v11340_v24  ;;  %v14430_v24 = vld [vmem:[%s18347_s1 + $0x10d8] sm:$0xff]  }
 0x1c8   :  { %13052 = vmatpush3.bf16.msra.mxu0 %v14351_v45  ;;  %v14400_v45 = vld [vmem:[%s18347_s1 + $0xfa0] sm:$0xff]  }
 0x1c9   :  { %13074 = vmatpush3.bf16.msra.mxu1 %v14352_v46  ;;  %13053 = vmatprep.subr.bf16.mxu0 %v14353_v47 }
 0x1ca   :  { %13075 = vmatprep.subr.bf16.mxu1 %v14354_v48 }
 0x1cc   :  { %13054 = vmatpush3.bf16.msra.mxu0 %v14355_v49 }
 0x1cd   :  { %13076 = vmatpush3.bf16.msra.mxu1 %v14356_v50  ;;  %13055 = vmatprep.subr.bf16.mxu0 %v14357_v51  ;;  %v14401_v51 = vld [vmem:[%s18347_s1 + $0xf68] sm:$0xff]  }
 0x1ce   :  { %13077 = vmatprep.subr.bf16.mxu1 %v14358_v52 }
 0x1d0   :  { %13056 = vmatpush3.bf16.msra.mxu0 %v14359_v53  ;;  %v14402_v53 = vld [vmem:[%s18347_s1 + $0xfe8] sm:$0xff]  }
 0x1d1   :  { %13078 = vmatpush3.bf16.msra.mxu1 %v14360_v54  ;;  %13057 = vmatprep.subr.bf16.mxu0 %v14361_v55 }
 0x1d2   :  { %13079 = vmatprep.subr.bf16.mxu1 %v14362_v56  ;;  %v14403_v56 = vld [vmem:[%s18347_s1 + $0xf28] sm:$0xff]  }
 0x1d4   :  { %13058 = vmatpush3.bf16.msra.mxu0 %v14363_v58  ;;  %v14404_v58 = vld [vmem:[%s18347_s1 + $0xfa8] sm:$0xff]  }
 0x1d5   :  { %13080 = vmatpush3.bf16.msra.mxu1 %v14364_v60  ;;  %13059 = vmatprep.subr.bf16.mxu0 %v14365_v63  ;;  %v14407_v63 = vld [vmem:[%s18347_s1 + $0xf30] sm:$0xff]  }
 0x1d6   :  { %v12757_v57 = vpop.f32.mrb[28].mxu0  ;;  %13081 = vmatprep.subr.bf16.mxu1 %v14366_v2  ;;  %v14410_v2 = vld [vmem:[%s18347_s1 + $0xff8] sm:$0xff]  }
 0x1d7   :  { %v12779_v59 = vpop.f32.mrb[28].mxu1  ;;  %v12758_v61 = vpop.f32.mrb[29].mxu0 }
 0x1d8   :  { %v12780_v62 = vpop.f32.mrb[29].mxu1  ;;  %v12759_v0 = vadd.f32 %v12758_v61, %v12757_v57  ;;  %v12760_v3 = vpop.f32.mrb[30].mxu0  ;;  %13060 = vmatpush3.bf16.msra.mxu0 %v14367_v5  ;;  %v14405_v61 = vld [vmem:[%s18347_s1 + $0xf70] sm:$0xff]  }
 0x1d9   :  { %v12781_v1 = vadd.f32 %v12780_v62, %v12779_v59  ;;  %v12782_v4 = vpop.f32.mrb[30].mxu1  ;;  %v12761_v8 = vpop.f32.mrb[31].mxu0  ;;  %13082 = vmatpush3.bf16.msra.mxu1 %v14368_v7  ;;  %13061 = vmatprep.subr.bf16.mxu0 %v14369_v10  ;;  %v14406_v62 = vld [vmem:[%s18347_s1 + $0xff0] sm:$0xff]   ;;  %v14411_v3 = vld [vmem:[%s18347_s1 + $0xf38] sm:$0xff]  }
 0x1da   :  { %v9311_v6 = vadd.f32 %v12759_v0, %v16427_v25  ;;  %v12783_v9 = vpop.f32.mrb[31].mxu1  ;;  %13083 = vmatprep.subr.bf16.mxu1 %v14370_v12  ;;  %v14381_v25 = vld [vmem:[%s18347_s1 + $0xf40] sm:$0xff]   ;;  %v14408_v0 = vld [vmem:[%s18347_s1 + $0xfb0] sm:$0xff]   ;;  %v14412_v4 = vld [vmem:[%s18347_s1 + $0xfb8] sm:$0xff]  }
 0x1db   :  { %v42_v5 = vld [vmem:[%s18348_s0 + $0xf0] sm:$0xff]  ;;  %v14418_v12 = vld [vmem:[%s18347_s1 + $0x10c0] sm:$0xff]  }
 0x1dc   :  { %v16532_v11 = vadd.f32 %v12781_v1, %v9311_v6  ;;  %13062 = vmatpush3.bf16.msra.mxu0 %v14371_v13  ;;  %v14409_v1 = vld [vmem:[%s18347_s1 + $0xf78] sm:$0xff]   ;;  %v11341_v7 = vcombine.low %v42_v5, %v42_v5  ;;  %v11342_v8 = vcombine.high %v42_v5, %v42_v5  ;;  %v14419_v13 = vld [vmem:[%s18347_s1 + $0x1000] sm:$0xff]   ;;  %v14461_v5 = vld [vmem:[%s18347_s1 + $0x1150] sm:$0xff]  }
 0x1dd   :  { %13084 = vmatpush3.bf16.msra.mxu1 %v14372_v14  ;;  %13063 = vmatprep.subr.bf16.mxu0 %v14373_v15  ;;  %v43_v6 = vld [vmem:[%s18348_s0 + $0xf8] sm:$0xff]  ;;  %v14420_v14 = vld [vmem:[%s18347_s1 + $0x1080] sm:$0xff]   ;;  %v14421_v15 = vld [vmem:[%s18347_s1 + $0x1048] sm:$0xff]  }
 0x1de   :  { %13085 = vmatprep.subr.bf16.mxu1 %v14374_v16  ;;  %v11343_v9 = vcombine.low %v43_v6, %v43_v6  ;;  %v11344_v10 = vcombine.high %v43_v6, %v43_v6  ;;  %v14422_v16 = vld [vmem:[%s18347_s1 + $0x10c8] sm:$0xff]   ;;  %v14462_v6 = vld [vmem:[%s18347_s1 + $0x11d0] sm:$0xff]  }
 0x1e0   :  { %13064 = vmatpush3.bf16.msra.mxu0 %v14375_v17  ;;  %v14423_v17 = vld [vmem:[%s18347_s1 + $0x1008] sm:$0xff]  }
 0x1e1   :  { %13086 = vmatpush3.bf16.msra.mxu1 %v14376_v18  ;;  %13093 = vmatprep.subr.bf16.mxu0 %v14381_v25  ;;  %v14424_v18 = vld [vmem:[%s18347_s1 + $0x1088] sm:$0xff]   ;;  %v14431_v25 = vld [vmem:[%s18347_s1 + $0x1018] sm:$0xff]  }
 0x1e2   :  { %13115 = vmatprep.subr.bf16.mxu1 %v14382_v26  ;;  %v14432_v26 = vld [vmem:[%s18347_s1 + $0x1098] sm:$0xff]  }
 0x1e3   :  { %9869 = vmatmul.mubr.bf16.vlgmr.msra.gmra.mrb[56].mxu0 %v11337_v21  ;;  %v14427_v21 = vld [vmem:[%s18347_s1 + $0x1010] sm:$0xff]  }
 0x1e4   :  { %9909 = vmatmul.mubr.bf16.vlgmr.msra.gmra.mrb[56].mxu1 %v11339_v23  ;;  %13094 = vmatpush3.bf16.msra.mxu0 %v14383_v27  ;;  %v14429_v23 = vld [vmem:[%s18347_s1 + $0x1058] sm:$0xff]   ;;  %v14433_v27 = vld [vmem:[%s18347_s1 + $0x1060] sm:$0xff]  }
 0x1e5   :  { %13116 = vmatpush3.bf16.msra.mxu1 %v14384_v28  ;;  %13095 = vmatprep.subr.bf16.mxu0 %v14385_v29  ;;  %v14434_v28 = vld [vmem:[%s18347_s1 + $0x10e0] sm:$0xff]  }
 0x1e6   :  { %13117 = vmatprep.subr.bf16.mxu1 %v14386_v30  ;;  %9948 = vmatprep.mubr.bf16.mxu0 %v11342_v8  ;;  %v14435_v29 = vld [vmem:[%s18347_s1 + $0x1020] sm:$0xff]   ;;  %v14464_v8 = vld [vmem:[%s18347_s1 + $0x1190] sm:$0xff]  }
 0x1e7   :  { %9988 = vmatprep.mubr.bf16.mxu1 %v11344_v10  ;;  %v14466_v10 = vld [vmem:[%s18347_s1 + $0x11d8] sm:$0xff]  }
 0x1e8   :  { %13096 = vmatpush3.bf16.msra.mxu0 %v14387_v31  ;;  %v14436_v31 = vld [vmem:[%s18347_s1 + $0x10a0] sm:$0xff]  }
 0x1e9   :  { %13118 = vmatpush3.bf16.msra.mxu1 %v14388_v32  ;;  %13097 = vmatprep.subr.bf16.mxu0 %v14389_v33 }
 0x1ea   :  { %13119 = vmatprep.subr.bf16.mxu1 %v14390_v34 }
 0x1ec   :  { %13098 = vmatpush3.bf16.msra.mxu0 %v14391_v35 }
 0x1ed   :  { %13120 = vmatpush3.bf16.msra.mxu1 %v14392_v36  ;;  %13099 = vmatprep.subr.bf16.mxu0 %v14393_v37  ;;  %v14437_v37 = vld [vmem:[%s18347_s1 + $0x1068] sm:$0xff]  }
 0x1ee   :  { %13121 = vmatprep.subr.bf16.mxu1 %v14394_v38 }
 0x1f0   :  { %13100 = vmatpush3.bf16.msra.mxu0 %v14395_v39  ;;  %v14438_v39 = vld [vmem:[%s18347_s1 + $0x10e8] sm:$0xff]  }
 0x1f1   :  { %13122 = vmatpush3.bf16.msra.mxu1 %v14396_v40  ;;  %13101 = vmatprep.subr.bf16.mxu0 %v14397_v41 }
 0x1f2   :  { %13123 = vmatprep.subr.bf16.mxu1 %v14398_v42  ;;  %v14439_v42 = vld [vmem:[%s18347_s1 + $0x1028] sm:$0xff]  }
 0x1f4   :  { %13102 = vmatpush3.bf16.msra.mxu0 %v14399_v43 }
 0x1f5   :  { %13124 = vmatpush3.bf16.msra.mxu1 %v14400_v45  ;;  %13103 = vmatprep.subr.bf16.mxu0 %v14401_v51  ;;  %v14445_v51 = vld [vmem:[%s18347_s1 + $0x1078] sm:$0xff]  }
 0x1f6   :  { %v12801_v44 = vpop.f32.mrb[32].mxu0  ;;  %13125 = vmatprep.subr.bf16.mxu1 %v14402_v53  ;;  %v14447_v53 = vld [vmem:[%s18347_s1 + $0x1038] sm:$0xff]  }
 0x1f7   :  { %v12823_v46 = vpop.f32.mrb[32].mxu1  ;;  %v12802_v47 = vpop.f32.mrb[33].mxu0 }
 0x1f8   :  { %v12824_v48 = vpop.f32.mrb[33].mxu1  ;;  %v12803_v49 = vadd.f32 %v12802_v47, %v12801_v44  ;;  %v12804_v52 = vpop.f32.mrb[34].mxu0  ;;  %13104 = vmatpush3.bf16.msra.mxu0 %v14403_v56  ;;  %v14440_v44 = vld [vmem:[%s18347_s1 + $0x10a8] sm:$0xff]   ;;  %v14441_v47 = vld [vmem:[%s18347_s1 + $0x1070] sm:$0xff]  }
 0x1f9   :  { %v12825_v50 = vadd.f32 %v12824_v48, %v12823_v46  ;;  %v12826_v54 = vpop.f32.mrb[34].mxu1  ;;  %v12805_v57 = vpop.f32.mrb[35].mxu0  ;;  %13126 = vmatpush3.bf16.msra.mxu1 %v14404_v58  ;;  %13105 = vmatprep.subr.bf16.mxu0 %v14405_v61  ;;  %v14442_v48 = vld [vmem:[%s18347_s1 + $0x10f0] sm:$0xff]   ;;  %v14446_v52 = vld [vmem:[%s18347_s1 + $0x10f8] sm:$0xff]   ;;  %v45_v56 = vld [vmem:[%s18348_s0 + $0x108] sm:$0xff] }
 0x1fa   :  { %v9391_v55 = vadd.f32 %v12803_v49, %v16532_v11  ;;  %v12827_v59 = vpop.f32.mrb[35].mxu1  ;;  %13127 = vmatprep.subr.bf16.mxu1 %v14406_v62  ;;  %v14417_v11 = vld [vmem:[%s18347_s1 + $0x1040] sm:$0xff]   ;;  %v14443_v49 = vld [vmem:[%s18347_s1 + $0x1030] sm:$0xff]   ;;  %v14448_v54 = vld [vmem:[%s18347_s1 + $0x10b8] sm:$0xff]  }
 0x1fb   :  { %v11347_v59 = vcombine.low %v45_v56, %v45_v56  ;;  %v14453_v61 = vld [vmem:[%s18347_s1 + $0x1140] sm:$0xff]  }
 0x1fc   :  { %v16634_v60 = vadd.f32 %v12825_v50, %v9391_v55  ;;  %13106 = vmatpush3.bf16.msra.mxu0 %v14407_v63  ;;  %v14444_v50 = vld [vmem:[%s18347_s1 + $0x10b0] sm:$0xff]   ;;  %v44_v55 = vld [vmem:[%s18348_s0 + $0x100] sm:$0xff] }
 0x1fd   :  { %13128 = vmatpush3.bf16.msra.mxu1 %v14408_v0  ;;  %13107 = vmatprep.subr.bf16.mxu0 %v14409_v1  ;;  %v11345_v57 = vcombine.low %v44_v55, %v44_v55  ;;  %v11346_v58 = vcombine.high %v44_v55, %v44_v55  ;;  %v14454_v62 = vld [vmem:[%s18347_s1 + $0x11c0] sm:$0xff]   ;;  %v14457_v1 = vld [vmem:[%s18347_s1 + $0x1148] sm:$0xff]   ;;  %v14497_v55 = vld [vmem:[%s18347_s1 + $0x1250] sm:$0xff]  }
 0x1fe   :  { %13129 = vmatprep.subr.bf16.mxu1 %v14410_v2  ;;  %v14455_v63 = vld [vmem:[%s18347_s1 + $0x1100] sm:$0xff]   ;;  %v14458_v2 = vld [vmem:[%s18347_s1 + $0x11c8] sm:$0xff]  }
 0x1ff   :  { %v14456_v0 = vld [vmem:[%s18347_s1 + $0x1180] sm:$0xff]  }
 0x200   :  { %13108 = vmatpush3.bf16.msra.mxu0 %v14411_v3  ;;  %v14459_v3 = vld [vmem:[%s18347_s1 + $0x1108] sm:$0xff]  }
 0x201   :  { %13130 = vmatpush3.bf16.msra.mxu1 %v14412_v4  ;;  %13137 = vmatprep.subr.bf16.mxu0 %v14417_v11  ;;  %v14460_v4 = vld [vmem:[%s18347_s1 + $0x1188] sm:$0xff]   ;;  %v14467_v11 = vld [vmem:[%s18347_s1 + $0x1118] sm:$0xff]  }
 0x202   :  { %13159 = vmatprep.subr.bf16.mxu1 %v14418_v12  ;;  %v14468_v12 = vld [vmem:[%s18347_s1 + $0x1198] sm:$0xff]  }
 0x203   :  { %9949 = vmatmul.mubr.bf16.vlgmr.msra.gmra.mrb[60].mxu0 %v11341_v7  ;;  %v14463_v7 = vld [vmem:[%s18347_s1 + $0x1110] sm:$0xff]  }
 0x204   :  { %9989 = vmatmul.mubr.bf16.vlgmr.msra.gmra.mrb[60].mxu1 %v11343_v9  ;;  %13138 = vmatpush3.bf16.msra.mxu0 %v14419_v13  ;;  %v14465_v9 = vld [vmem:[%s18347_s1 + $0x1158] sm:$0xff]   ;;  %v14469_v13 = vld [vmem:[%s18347_s1 + $0x1160] sm:$0xff]  }
 0x205   :  { %13160 = vmatpush3.bf16.msra.mxu1 %v14420_v14  ;;  %13139 = vmatprep.subr.bf16.mxu0 %v14421_v15  ;;  %v14470_v14 = vld [vmem:[%s18347_s1 + $0x11e0] sm:$0xff]  }
 0x206   :  { %13161 = vmatprep.subr.bf16.mxu1 %v14422_v16  ;;  %10028 = vmatprep.mubr.bf16.mxu0 %v11346_v58  ;;  %v14471_v16 = vld [vmem:[%s18347_s1 + $0x1120] sm:$0xff]   ;;  %v14500_v58 = vld [vmem:[%s18347_s1 + $0x1290] sm:$0xff]  }
 0x208   :  { %13140 = vmatpush3.bf16.msra.mxu0 %v14423_v17 }
 0x209   :  { %13162 = vmatpush3.bf16.msra.mxu1 %v14424_v18  ;;  %13141 = vmatprep.subr.bf16.mxu0 %v14425_v19  ;;  %v14472_v18 = vld [vmem:[%s18347_s1 + $0x11a0] sm:$0xff]  }
 0x20a   :  { %13163 = vmatprep.subr.bf16.mxu1 %v14426_v20 }
 0x20c   :  { %13142 = vmatpush3.bf16.msra.mxu0 %v14427_v21 }
 0x20d   :  { %13164 = vmatpush3.bf16.msra.mxu1 %v14428_v22  ;;  %13143 = vmatprep.subr.bf16.mxu0 %v14429_v23  ;;  %v14473_v22 = vld [vmem:[%s18347_s1 + $0x1168] sm:$0xff]  }
 0x20e   :  { %13165 = vmatprep.subr.bf16.mxu1 %v14430_v24  ;;  %v14474_v24 = vld [vmem:[%s18347_s1 + $0x11e8] sm:$0xff]  }
 0x210   :  { %13144 = vmatpush3.bf16.msra.mxu0 %v14431_v25 }
 0x211   :  { %13166 = vmatpush3.bf16.msra.mxu1 %v14432_v26  ;;  %13145 = vmatprep.subr.bf16.mxu0 %v14433_v27 }
 0x212   :  { %13167 = vmatprep.subr.bf16.mxu1 %v14434_v28  ;;  %v14475_v28 = vld [vmem:[%s18347_s1 + $0x1128] sm:$0xff]  }
 0x214   :  { %13146 = vmatpush3.bf16.msra.mxu0 %v14435_v29  ;;  %v14476_v29 = vld [vmem:[%s18347_s1 + $0x11a8] sm:$0xff]  }
 0x215   :  { %13168 = vmatpush3.bf16.msra.mxu1 %v14436_v31  ;;  %13147 = vmatprep.subr.bf16.mxu0 %v14437_v37  ;;  %v14481_v37 = vld [vmem:[%s18347_s1 + $0x1178] sm:$0xff]  }
 0x216   :  { %v12845_v30 = vpop.f32.mrb[36].mxu0  ;;  %13169 = vmatprep.subr.bf16.mxu1 %v14438_v39  ;;  %v14483_v39 = vld [vmem:[%s18347_s1 + $0x1138] sm:$0xff]  }
 0x217   :  { %v12867_v32 = vpop.f32.mrb[36].mxu1  ;;  %v12846_v33 = vpop.f32.mrb[37].mxu0 }
 0x218   :  { %v12868_v34 = vpop.f32.mrb[37].mxu1  ;;  %v12847_v35 = vadd.f32 %v12846_v33, %v12845_v30  ;;  %v12848_v38 = vpop.f32.mrb[38].mxu0  ;;  %13148 = vmatpush3.bf16.msra.mxu0 %v14439_v42  ;;  %v14477_v33 = vld [vmem:[%s18347_s1 + $0x1170] sm:$0xff]   ;;  %v47_v42 = vld [vmem:[%s18348_s0 + $0x118] sm:$0xff] }
 0x219   :  { %v12869_v36 = vadd.f32 %v12868_v34, %v12867_v32  ;;  %v12870_v40 = vpop.f32.mrb[38].mxu1  ;;  %v12849_v43 = vpop.f32.mrb[39].mxu0  ;;  %13170 = vmatpush3.bf16.msra.mxu1 %v14440_v44  ;;  %13149 = vmatprep.subr.bf16.mxu0 %v14441_v47  ;;  %v14478_v34 = vld [vmem:[%s18347_s1 + $0x11f0] sm:$0xff]   ;;  %v14482_v38 = vld [vmem:[%s18347_s1 + $0x11f8] sm:$0xff]   ;;  %v11352_v47 = vcombine.high %v47_v42, %v47_v42 }
 0x21a   :  { %v9471_v41 = vadd.f32 %v12847_v35, %v16634_v60  ;;  %v12871_v45 = vpop.f32.mrb[39].mxu1  ;;  %13171 = vmatprep.subr.bf16.mxu1 %v14442_v48  ;;  %v11348_v60 = vcombine.high %v45_v56, %v45_v56  ;;  %v14479_v35 = vld [vmem:[%s18347_s1 + $0x1130] sm:$0xff]   ;;  %v14484_v40 = vld [vmem:[%s18347_s1 + $0x11b8] sm:$0xff]   ;;  %v14490_v48 = vld [vmem:[%s18347_s1 + $0x12c0] sm:$0xff]  }
 0x21b   :  { %v11351_v45 = vcombine.low %v47_v42, %v47_v42  ;;  %v14498_v56 = vld [vmem:[%s18347_s1 + $0x12d0] sm:$0xff]  }
 0x21c   :  { %v16739_v46 = vadd.f32 %v12869_v36, %v9471_v41  ;;  %13150 = vmatpush3.bf16.msra.mxu0 %v14443_v49  ;;  %10068 = vmatprep.mubr.bf16.mxu1 %v11348_v60  ;;  %v14480_v36 = vld [vmem:[%s18347_s1 + $0x11b0] sm:$0xff]   ;;  %v14491_v49 = vld [vmem:[%s18347_s1 + $0x1200] sm:$0xff]   ;;  %v14502_v60 = vld [vmem:[%s18347_s1 + $0x12d8] sm:$0xff]  }
 0x21d   :  { %13172 = vmatpush3.bf16.msra.mxu1 %v14444_v50  ;;  %13151 = vmatprep.subr.bf16.mxu0 %v14445_v51  ;;  %v46_v41 = vld [vmem:[%s18348_s0 + $0x110] sm:$0xff]  ;;  %v14492_v50 = vld [vmem:[%s18347_s1 + $0x1280] sm:$0xff]   ;;  %v14493_v51 = vld [vmem:[%s18347_s1 + $0x1248] sm:$0xff]  }
 0x21e   :  { %13173 = vmatprep.subr.bf16.mxu1 %v14446_v52  ;;  %v11349_v43 = vcombine.low %v46_v41, %v46_v41  ;;  %v11350_v44 = vcombine.high %v46_v41, %v46_v41  ;;  %v14494_v52 = vld [vmem:[%s18347_s1 + $0x12c8] sm:$0xff]   ;;  %v14533_v41 = vld [vmem:[%s18347_s1 + $0x1350] sm:$0xff]  }
 0x21f   :  { %v14534_v42 = vld [vmem:[%s18347_s1 + $0x13d0] sm:$0xff]  }
 0x220   :  { %13152 = vmatpush3.bf16.msra.mxu0 %v14447_v53  ;;  %v14495_v53 = vld [vmem:[%s18347_s1 + $0x1208] sm:$0xff]  }
 0x221   :  { %13174 = vmatpush3.bf16.msra.mxu1 %v14448_v54  ;;  %13181 = vmatprep.subr.bf16.mxu0 %v14453_v61  ;;  %v14496_v54 = vld [vmem:[%s18347_s1 + $0x1288] sm:$0xff]   ;;  %v14503_v61 = vld [vmem:[%s18347_s1 + $0x1218] sm:$0xff]  }
 0x222   :  { %13203 = vmatprep.subr.bf16.mxu1 %v14454_v62  ;;  %v14504_v62 = vld [vmem:[%s18347_s1 + $0x1298] sm:$0xff]  }
 0x223   :  { %10029 = vmatmul.mubr.bf16.vlgmr.msra.gmra.mrb[64].mxu0 %v11345_v57  ;;  %v14499_v57 = vld [vmem:[%s18347_s1 + $0x1210] sm:$0xff]  }
 0x224   :  { %10069 = vmatmul.mubr.bf16.vlgmr.msra.gmra.mrb[64].mxu1 %v11347_v59  ;;  %13182 = vmatpush3.bf16.msra.mxu0 %v14455_v63  ;;  %v14501_v59 = vld [vmem:[%s18347_s1 + $0x1258] sm:$0xff]   ;;  %v14505_v63 = vld [vmem:[%s18347_s1 + $0x1260] sm:$0xff]  }
 0x225   :  { %13204 = vmatpush3.bf16.msra.mxu1 %v14456_v0  ;;  %13183 = vmatprep.subr.bf16.mxu0 %v14457_v1  ;;  %v14506_v0 = vld [vmem:[%s18347_s1 + $0x12e0] sm:$0xff]  }
 0x226   :  { %13205 = vmatprep.subr.bf16.mxu1 %v14458_v2  ;;  %10108 = vmatprep.mubr.bf16.mxu0 %v11350_v44  ;;  %v14507_v2 = vld [vmem:[%s18347_s1 + $0x1220] sm:$0xff]   ;;  %v14536_v44 = vld [vmem:[%s18347_s1 + $0x1390] sm:$0xff]  }
 0x227   :  { %10148 = vmatprep.mubr.bf16.mxu1 %v11352_v47  ;;  %v14539_v47 = vld [vmem:[%s18347_s1 + $0x1318] sm:$0xff]  }
 0x228   :  { %13184 = vmatpush3.bf16.msra.mxu0 %v14459_v3 }
 0x229   :  { %13206 = vmatpush3.bf16.msra.mxu1 %v14460_v4  ;;  %13185 = vmatprep.subr.bf16.mxu0 %v14461_v5  ;;  %v14508_v4 = vld [vmem:[%s18347_s1 + $0x12a0] sm:$0xff]  }
 0x22a   :  { %13207 = vmatprep.subr.bf16.mxu1 %v14462_v6 }
 0x22c   :  { %13186 = vmatpush3.bf16.msra.mxu0 %v14463_v7  ;;  %v14509_v7 = vld [vmem:[%s18347_s1 + $0x1268] sm:$0xff]  }
 0x22d   :  { %13208 = vmatpush3.bf16.msra.mxu1 %v14464_v8  ;;  %13187 = vmatprep.subr.bf16.mxu0 %v14465_v9 }
 0x22e   :  { %13209 = vmatprep.subr.bf16.mxu1 %v14466_v10  ;;  %v14510_v10 = vld [vmem:[%s18347_s1 + $0x12e8] sm:$0xff]  }
 0x230   :  { %13188 = vmatpush3.bf16.msra.mxu0 %v14467_v11 }
 0x231   :  { %13210 = vmatpush3.bf16.msra.mxu1 %v14468_v12  ;;  %13189 = vmatprep.subr.bf16.mxu0 %v14469_v13  ;;  %v14511_v13 = vld [vmem:[%s18347_s1 + $0x1228] sm:$0xff]  }
 0x232   :  { %13211 = vmatprep.subr.bf16.mxu1 %v14470_v14 }
 0x234   :  { %13190 = vmatpush3.bf16.msra.mxu0 %v14471_v16 }
 0x235   :  { %13212 = vmatpush3.bf16.msra.mxu1 %v14472_v18  ;;  %13191 = vmatprep.subr.bf16.mxu0 %v14473_v22  ;;  %v14513_v18 = vld [vmem:[%s18347_s1 + $0x1270] sm:$0xff]  }
 0x236   :  { %v12889_v15 = vpop.f32.mrb[40].mxu0  ;;  %13213 = vmatprep.subr.bf16.mxu1 %v14474_v24  ;;  %v14516_v22 = vld [vmem:[%s18347_s1 + $0x12b0] sm:$0xff]   ;;  %v14518_v24 = vld [vmem:[%s18347_s1 + $0x12f8] sm:$0xff]  }
 0x237   :  { %v12911_v17 = vpop.f32.mrb[40].mxu1  ;;  %v12890_v19 = vpop.f32.mrb[41].mxu0 }
 0x238   :  { %v12891_v20 = vadd.f32 %v12890_v19, %v12889_v15  ;;  %v12912_v21 = vpop.f32.mrb[41].mxu1  ;;  %v12892_v25 = vpop.f32.mrb[42].mxu0  ;;  %13192 = vmatpush3.bf16.msra.mxu0 %v14475_v28  ;;  %v14512_v15 = vld [vmem:[%s18347_s1 + $0x12a8] sm:$0xff]  }
 0x239   :  { %v12913_v23 = vadd.f32 %v12912_v21, %v12911_v17  ;;  %v12914_v27 = vpop.f32.mrb[42].mxu1  ;;  %v12893_v30 = vpop.f32.mrb[43].mxu0  ;;  %13214 = vmatpush3.bf16.msra.mxu1 %v14476_v29  ;;  %13193 = vmatprep.subr.bf16.mxu0 %v14477_v33  ;;  %v14515_v21 = vld [vmem:[%s18347_s1 + $0x1230] sm:$0xff]   ;;  %v14519_v25 = vld [vmem:[%s18347_s1 + $0x1238] sm:$0xff]   ;;  %v14525_v33 = vld [vmem:[%s18347_s1 + $0x1340] sm:$0xff]  }
 0x23a   :  { %v9551_v26 = vadd.f32 %v12891_v20, %v16739_v46  ;;  %v12915_v32 = vpop.f32.mrb[43].mxu1  ;;  %13215 = vmatprep.subr.bf16.mxu1 %v14478_v34  ;;  %v14489_v46 = vld [vmem:[%s18347_s1 + $0x1240] sm:$0xff]   ;;  %v14514_v20 = vld [vmem:[%s18347_s1 + $0x12f0] sm:$0xff]   ;;  %v49_v30 = vld [vmem:[%s18348_s0 + $0x128] sm:$0xff] }
 0x23b   :  { %v48_v27 = vld [vmem:[%s18348_s0 + $0x120] sm:$0xff]  ;;  %v11356_v32 = vcombine.high %v49_v30, %v49_v30 }
 0x23c   :  { %v16844_v31 = vadd.f32 %v12913_v23, %v9551_v26  ;;  %13194 = vmatpush3.bf16.msra.mxu0 %v14479_v35  ;;  %v14517_v23 = vld [vmem:[%s18347_s1 + $0x1278] sm:$0xff]   ;;  %v11353_v28 = vcombine.low %v48_v27, %v48_v27  ;;  %v11354_v29 = vcombine.high %v48_v27, %v48_v27  ;;  %v14526_v34 = vld [vmem:[%s18347_s1 + $0x13c0] sm:$0xff]   ;;  %v14569_v27 = vld [vmem:[%s18347_s1 + $0x1450] sm:$0xff]  }
 0x23d   :  { %13216 = vmatpush3.bf16.msra.mxu1 %v14480_v36  ;;  %13195 = vmatprep.subr.bf16.mxu0 %v14481_v37  ;;  %v14520_v26 = vld [vmem:[%s18347_s1 + $0x12b8] sm:$0xff]   ;;  %v14527_v35 = vld [vmem:[%s18347_s1 + $0x1300] sm:$0xff]   ;;  %v14529_v37 = vld [vmem:[%s18347_s1 + $0x1348] sm:$0xff]  }
 0x23e   :  { %13217 = vmatprep.subr.bf16.mxu1 %v14482_v38  ;;  %v14528_v36 = vld [vmem:[%s18347_s1 + $0x1380] sm:$0xff]   ;;  %v14530_v38 = vld [vmem:[%s18347_s1 + $0x13c8] sm:$0xff]  }
 0x240   :  { %13196 = vmatpush3.bf16.msra.mxu0 %v14483_v39  ;;  %v14531_v39 = vld [vmem:[%s18347_s1 + $0x1308] sm:$0xff]  }
 0x241   :  { %13218 = vmatpush3.bf16.msra.mxu1 %v14484_v40  ;;  %13225 = vmatprep.subr.bf16.mxu0 %v14489_v46  ;;  %v14532_v40 = vld [vmem:[%s18347_s1 + $0x1388] sm:$0xff]   ;;  %v14538_v46 = vld [vmem:[%s18347_s1 + $0x13d8] sm:$0xff]  }
 0x242   :  { %13247 = vmatprep.subr.bf16.mxu1 %v14490_v48  ;;  %v14540_v48 = vld [vmem:[%s18347_s1 + $0x1398] sm:$0xff]  }
 0x243   :  { %10109 = vmatmul.mubr.bf16.vlgmr.msra.gmra.mrb[68].mxu0 %v11349_v43  ;;  %v14535_v43 = vld [vmem:[%s18347_s1 + $0x1310] sm:$0xff]  }
 0x244   :  { %10149 = vmatmul.mubr.bf16.vlgmr.msra.gmra.mrb[68].mxu1 %v11351_v45  ;;  %13226 = vmatpush3.bf16.msra.mxu0 %v14491_v49  ;;  %v14537_v45 = vld [vmem:[%s18347_s1 + $0x1358] sm:$0xff]   ;;  %v14541_v49 = vld [vmem:[%s18347_s1 + $0x1360] sm:$0xff]  }
 0x245   :  { %13248 = vmatpush3.bf16.msra.mxu1 %v14492_v50  ;;  %13227 = vmatprep.subr.bf16.mxu0 %v14493_v51  ;;  %v14542_v50 = vld [vmem:[%s18347_s1 + $0x13e0] sm:$0xff]  }
 0x246   :  { %13249 = vmatprep.subr.bf16.mxu1 %v14494_v52  ;;  %10188 = vmatprep.mubr.bf16.mxu0 %v11354_v29  ;;  %v14543_v52 = vld [vmem:[%s18347_s1 + $0x1320] sm:$0xff]   ;;  %v14571_v29 = vld [vmem:[%s18347_s1 + $0x1410] sm:$0xff]  }
 0x247   :  { %10228 = vmatprep.mubr.bf16.mxu1 %v11356_v32  ;;  %v14574_v32 = vld [vmem:[%s18347_s1 + $0x14d8] sm:$0xff]  }
 0x248   :  { %13228 = vmatpush3.bf16.msra.mxu0 %v14495_v53 }
 0x249   :  { %13250 = vmatpush3.bf16.msra.mxu1 %v14496_v54  ;;  %13229 = vmatprep.subr.bf16.mxu0 %v14497_v55  ;;  %v14544_v54 = vld [vmem:[%s18347_s1 + $0x13a0] sm:$0xff]  }
 0x24a   :  { %13251 = vmatprep.subr.bf16.mxu1 %v14498_v56 }
 0x24c   :  { %13230 = vmatpush3.bf16.msra.mxu0 %v14499_v57  ;;  %v14545_v57 = vld [vmem:[%s18347_s1 + $0x1368] sm:$0xff]  }
 0x24d   :  { %13252 = vmatpush3.bf16.msra.mxu1 %v14500_v58  ;;  %13231 = vmatprep.subr.bf16.mxu0 %v14501_v59 }
 0x24e   :  { %13253 = vmatprep.subr.bf16.mxu1 %v14502_v60  ;;  %v14546_v60 = vld [vmem:[%s18347_s1 + $0x13e8] sm:$0xff]  }
 0x250   :  { %13232 = vmatpush3.bf16.msra.mxu0 %v14503_v61 }
 0x251   :  { %13254 = vmatpush3.bf16.msra.mxu1 %v14504_v62  ;;  %13233 = vmatprep.subr.bf16.mxu0 %v14505_v63  ;;  %v14547_v63 = vld [vmem:[%s18347_s1 + $0x1328] sm:$0xff]  }
 0x252   :  { %13255 = vmatprep.subr.bf16.mxu1 %v14506_v0 }
 0x254   :  { %13234 = vmatpush3.bf16.msra.mxu0 %v14507_v2 }
 0x255   :  { %13256 = vmatpush3.bf16.msra.mxu1 %v14508_v4  ;;  %13235 = vmatprep.subr.bf16.mxu0 %v14509_v7  ;;  %v14549_v4 = vld [vmem:[%s18347_s1 + $0x1370] sm:$0xff]  }
 0x256   :  { %v12933_v1 = vpop.f32.mrb[44].mxu0  ;;  %13257 = vmatprep.subr.bf16.mxu1 %v14510_v10  ;;  %v14551_v7 = vld [vmem:[%s18347_s1 + $0x1330] sm:$0xff]   ;;  %v14554_v10 = vld [vmem:[%s18347_s1 + $0x13f8] sm:$0xff]  }
 0x257   :  { %v12955_v3 = vpop.f32.mrb[44].mxu1  ;;  %v12934_v5 = vpop.f32.mrb[45].mxu0 }
 0x258   :  { %v12956_v6 = vpop.f32.mrb[45].mxu1  ;;  %v12935_v8 = vadd.f32 %v12934_v5, %v12933_v1  ;;  %v12936_v11 = vpop.f32.mrb[46].mxu0  ;;  %13236 = vmatpush3.bf16.msra.mxu0 %v14511_v13  ;;  %v14548_v1 = vld [vmem:[%s18347_s1 + $0x13a8] sm:$0xff]   ;;  %v50_v13 = vld [vmem:[%s18348_s0 + $0x130] sm:$0xff] }
 0x259   :  { %v12957_v9 = vadd.f32 %v12956_v6, %v12955_v3  ;;  %v12958_v12 = vpop.f32.mrb[46].mxu1  ;;  %v12937_v16 = vpop.f32.mrb[47].mxu0  ;;  %13258 = vmatpush3.bf16.msra.mxu1 %v14512_v15  ;;  %13237 = vmatprep.subr.bf16.mxu0 %v14513_v18  ;;  %v14550_v6 = vld [vmem:[%s18347_s1 + $0x13f0] sm:$0xff]   ;;  %v14555_v11 = vld [vmem:[%s18347_s1 + $0x1338] sm:$0xff]   ;;  %v11357_v15 = vcombine.low %v50_v13, %v50_v13 }
 0x25a   :  { %v9631_v14 = vadd.f32 %v12935_v8, %v16844_v31  ;;  %v12959_v17 = vpop.f32.mrb[47].mxu1  ;;  %13259 = vmatprep.subr.bf16.mxu1 %v14514_v20  ;;  %v11355_v31 = vcombine.low %v49_v30, %v49_v30  ;;  %v14552_v8 = vld [vmem:[%s18347_s1 + $0x13b0] sm:$0xff]   ;;  %v14556_v12 = vld [vmem:[%s18347_s1 + $0x13b8] sm:$0xff]   ;;  %v11358_v16 = vcombine.high %v50_v13, %v50_v13  ;;  %v14562_v20 = vld [vmem:[%s18347_s1 + $0x14c0] sm:$0xff]  }
 0x25b   :  { %v14572_v30 = vld [vmem:[%s18347_s1 + $0x1490] sm:$0xff]  }
 0x25c   :  { %v16952_v19 = vadd.f32 %v12957_v9, %v9631_v14  ;;  %13238 = vmatpush3.bf16.msra.mxu0 %v14515_v21  ;;  %v14553_v9 = vld [vmem:[%s18347_s1 + $0x1378] sm:$0xff]   ;;  %v14563_v21 = vld [vmem:[%s18347_s1 + $0x1400] sm:$0xff]   ;;  %v14605_v13 = vld [vmem:[%s18347_s1 + $0x1550] sm:$0xff]  }
 0x25d   :  { %13260 = vmatpush3.bf16.msra.mxu1 %v14516_v22  ;;  %13239 = vmatprep.subr.bf16.mxu0 %v14517_v23  ;;  %v51_v14 = vld [vmem:[%s18348_s0 + $0x138] sm:$0xff]  ;;  %v14564_v22 = vld [vmem:[%s18347_s1 + $0x1480] sm:$0xff]   ;;  %v14565_v23 = vld [vmem:[%s18347_s1 + $0x1448] sm:$0xff]  }
 0x25e   :  { %13261 = vmatprep.subr.bf16.mxu1 %v14518_v24  ;;  %v11359_v17 = vcombine.low %v51_v14, %v51_v14  ;;  %v11360_v18 = vcombine.high %v51_v14, %v51_v14  ;;  %v14566_v24 = vld [vmem:[%s18347_s1 + $0x14c8] sm:$0xff]   ;;  %v14606_v14 = vld [vmem:[%s18347_s1 + $0x15d0] sm:$0xff]  }
 0x260   :  { %13240 = vmatpush3.bf16.msra.mxu0 %v14519_v25  ;;  %v14567_v25 = vld [vmem:[%s18347_s1 + $0x1408] sm:$0xff]  }
 0x261   :  { %13262 = vmatpush3.bf16.msra.mxu1 %v14520_v26  ;;  %13269 = vmatprep.subr.bf16.mxu0 %v14525_v33  ;;  %v14568_v26 = vld [vmem:[%s18347_s1 + $0x1488] sm:$0xff]   ;;  %v14575_v33 = vld [vmem:[%s18347_s1 + $0x1418] sm:$0xff]  }
 0x262   :  { %13291 = vmatprep.subr.bf16.mxu1 %v14526_v34  ;;  %v14576_v34 = vld [vmem:[%s18347_s1 + $0x1498] sm:$0xff]  }
 0x263   :  { %10189 = vmatmul.mubr.bf16.vlgmr.msra.gmra.mrb[72].mxu0 %v11353_v28  ;;  %v14570_v28 = vld [vmem:[%s18347_s1 + $0x14d0] sm:$0xff]  }
 0x264   :  { %10229 = vmatmul.mubr.bf16.vlgmr.msra.gmra.mrb[72].mxu1 %v11355_v31  ;;  %13270 = vmatpush3.bf16.msra.mxu0 %v14527_v35  ;;  %v14573_v31 = vld [vmem:[%s18347_s1 + $0x1458] sm:$0xff]   ;;  %v14577_v35 = vld [vmem:[%s18347_s1 + $0x1460] sm:$0xff]  }
 0x265   :  { %13292 = vmatpush3.bf16.msra.mxu1 %v14528_v36  ;;  %13271 = vmatprep.subr.bf16.mxu0 %v14529_v37  ;;  %v14578_v36 = vld [vmem:[%s18347_s1 + $0x14e0] sm:$0xff]  }
 0x266   :  { %13293 = vmatprep.subr.bf16.mxu1 %v14530_v38  ;;  %10268 = vmatprep.mubr.bf16.mxu0 %v11358_v16  ;;  %v14579_v37 = vld [vmem:[%s18347_s1 + $0x1420] sm:$0xff]   ;;  %v14608_v16 = vld [vmem:[%s18347_s1 + $0x1590] sm:$0xff]  }
 0x267   :  { %10308 = vmatprep.mubr.bf16.mxu1 %v11360_v18  ;;  %v14610_v18 = vld [vmem:[%s18347_s1 + $0x15d8] sm:$0xff]  }
 0x268   :  { %13272 = vmatpush3.bf16.msra.mxu0 %v14531_v39  ;;  %v14580_v39 = vld [vmem:[%s18347_s1 + $0x14a0] sm:$0xff]  }
 0x269   :  { %13294 = vmatpush3.bf16.msra.mxu1 %v14532_v40  ;;  %13273 = vmatprep.subr.bf16.mxu0 %v14533_v41 }
 0x26a   :  { %13295 = vmatprep.subr.bf16.mxu1 %v14534_v42 }
 0x26c   :  { %13274 = vmatpush3.bf16.msra.mxu0 %v14535_v43 }
 0x26d   :  { %13296 = vmatpush3.bf16.msra.mxu1 %v14536_v44  ;;  %13275 = vmatprep.subr.bf16.mxu0 %v14537_v45  ;;  %v14581_v45 = vld [vmem:[%s18347_s1 + $0x1468] sm:$0xff]  }
 0x26e   :  { %13297 = vmatprep.subr.bf16.mxu1 %v14538_v46 }
 0x270   :  { %13276 = vmatpush3.bf16.msra.mxu0 %v14539_v47  ;;  %v14582_v47 = vld [vmem:[%s18347_s1 + $0x14e8] sm:$0xff]  }
 0x271   :  { %13298 = vmatpush3.bf16.msra.mxu1 %v14540_v48  ;;  %13277 = vmatprep.subr.bf16.mxu0 %v14541_v49 }
 0x272   :  { %13299 = vmatprep.subr.bf16.mxu1 %v14542_v50  ;;  %v14583_v50 = vld [vmem:[%s18347_s1 + $0x1428] sm:$0xff]  }
 0x274   :  { %13278 = vmatpush3.bf16.msra.mxu0 %v14543_v52  ;;  %v14584_v52 = vld [vmem:[%s18347_s1 + $0x14a8] sm:$0xff]  }
 0x275   :  { %13300 = vmatpush3.bf16.msra.mxu1 %v14544_v54  ;;  %13279 = vmatprep.subr.bf16.mxu0 %v14545_v57  ;;  %v14587_v57 = vld [vmem:[%s18347_s1 + $0x1430] sm:$0xff]  }
 0x276   :  { %v12977_v51 = vpop.f32.mrb[48].mxu0  ;;  %13301 = vmatprep.subr.bf16.mxu1 %v14546_v60  ;;  %v14590_v60 = vld [vmem:[%s18347_s1 + $0x14f8] sm:$0xff]  }
 0x277   :  { %v12999_v53 = vpop.f32.mrb[48].mxu1  ;;  %v12978_v55 = vpop.f32.mrb[49].mxu0 }
 0x278   :  { %v13000_v56 = vpop.f32.mrb[49].mxu1  ;;  %v12979_v58 = vadd.f32 %v12978_v55, %v12977_v51  ;;  %v12980_v61 = vpop.f32.mrb[50].mxu0  ;;  %13280 = vmatpush3.bf16.msra.mxu0 %v14547_v63  ;;  %v14585_v55 = vld [vmem:[%s18347_s1 + $0x1470] sm:$0xff]   ;;  %v52_v63 = vld [vmem:[%s18348_s0 + $0x140] sm:$0xff] }
 0x279   :  { %v13001_v59 = vadd.f32 %v13000_v56, %v12999_v53  ;;  %v13002_v62 = vpop.f32.mrb[50].mxu1  ;;  %v12981_v2 = vpop.f32.mrb[51].mxu0  ;;  %13302 = vmatpush3.bf16.msra.mxu1 %v14548_v1  ;;  %13281 = vmatprep.subr.bf16.mxu0 %v14549_v4  ;;  %v14586_v56 = vld [vmem:[%s18347_s1 + $0x14f0] sm:$0xff]   ;;  %v14591_v61 = vld [vmem:[%s18347_s1 + $0x1438] sm:$0xff]   ;;  %v11361_v1 = vcombine.low %v52_v63, %v52_v63 }
 0x27a   :  { %v9711_v0 = vadd.f32 %v12979_v58, %v16952_v19  ;;  %v13003_v3 = vpop.f32.mrb[51].mxu1  ;;  %13303 = vmatprep.subr.bf16.mxu1 %v14550_v6  ;;  %v14561_v19 = vld [vmem:[%s18347_s1 + $0x1440] sm:$0xff]   ;;  %v14588_v58 = vld [vmem:[%s18347_s1 + $0x14b0] sm:$0xff]   ;;  %v14592_v62 = vld [vmem:[%s18347_s1 + $0x14b8] sm:$0xff]   ;;  %v11362_v2 = vcombine.high %v52_v63, %v52_v63 }
 0x27b   :  { %v14598_v6 = vld [vmem:[%s18347_s1 + $0x15c0] sm:$0xff]   ;;  %v14641_v63 = vld [vmem:[%s18347_s1 + $0x1650] sm:$0xff]  }
 0x27c   :  { %v17057_v5 = vadd.f32 %v13001_v59, %v9711_v0  ;;  %13282 = vmatpush3.bf16.msra.mxu0 %v14551_v7  ;;  %v14589_v59 = vld [vmem:[%s18347_s1 + $0x1478] sm:$0xff]   ;;  %v53_v0 = vld [vmem:[%s18348_s0 + $0x148] sm:$0xff]  ;;  %v14599_v7 = vld [vmem:[%s18347_s1 + $0x1500] sm:$0xff]  }
 0x27d   :  { %13304 = vmatpush3.bf16.msra.mxu1 %v14552_v8  ;;  %13283 = vmatprep.subr.bf16.mxu0 %v14553_v9  ;;  %v11363_v3 = vcombine.low %v53_v0, %v53_v0  ;;  %v11364_v4 = vcombine.high %v53_v0, %v53_v0  ;;  %v14600_v8 = vld [vmem:[%s18347_s1 + $0x1580] sm:$0xff]   ;;  %v14601_v9 = vld [vmem:[%s18347_s1 + $0x1548] sm:$0xff]   ;;  %v14642_v0 = vld [vmem:[%s18347_s1 + $0x16d0] sm:$0xff]  }
 0x27e   :  { %13305 = vmatprep.subr.bf16.mxu1 %v14554_v10  ;;  %v14602_v10 = vld [vmem:[%s18347_s1 + $0x15c8] sm:$0xff]  }
 0x280   :  { %13284 = vmatpush3.bf16.msra.mxu0 %v14555_v11  ;;  %v14603_v11 = vld [vmem:[%s18347_s1 + $0x1508] sm:$0xff]  }
 0x281   :  { %13306 = vmatpush3.bf16.msra.mxu1 %v14556_v12  ;;  %13313 = vmatprep.subr.bf16.mxu0 %v14561_v19  ;;  %v14604_v12 = vld [vmem:[%s18347_s1 + $0x1588] sm:$0xff]   ;;  %v14611_v19 = vld [vmem:[%s18347_s1 + $0x1518] sm:$0xff]  }
 0x282   :  { %13335 = vmatprep.subr.bf16.mxu1 %v14562_v20  ;;  %v14612_v20 = vld [vmem:[%s18347_s1 + $0x1598] sm:$0xff]  }
 0x283   :  { %10269 = vmatmul.mubr.bf16.vlgmr.msra.gmra.mrb[76].mxu0 %v11357_v15  ;;  %v14607_v15 = vld [vmem:[%s18347_s1 + $0x1510] sm:$0xff]  }
 0x284   :  { %10309 = vmatmul.mubr.bf16.vlgmr.msra.gmra.mrb[76].mxu1 %v11359_v17  ;;  %13314 = vmatpush3.bf16.msra.mxu0 %v14563_v21  ;;  %v14609_v17 = vld [vmem:[%s18347_s1 + $0x1558] sm:$0xff]   ;;  %v14613_v21 = vld [vmem:[%s18347_s1 + $0x1560] sm:$0xff]  }
 0x285   :  { %13336 = vmatpush3.bf16.msra.mxu1 %v14564_v22  ;;  %13315 = vmatprep.subr.bf16.mxu0 %v14565_v23  ;;  %v14614_v22 = vld [vmem:[%s18347_s1 + $0x15e0] sm:$0xff]  }
 0x286   :  { %13337 = vmatprep.subr.bf16.mxu1 %v14566_v24  ;;  %10348 = vmatprep.mubr.bf16.mxu0 %v11362_v2  ;;  %v14615_v24 = vld [vmem:[%s18347_s1 + $0x1520] sm:$0xff]   ;;  %v14644_v2 = vld [vmem:[%s18347_s1 + $0x1690] sm:$0xff]  }
 0x287   :  { %10388 = vmatprep.mubr.bf16.mxu1 %v11364_v4  ;;  %v14646_v4 = vld [vmem:[%s18347_s1 + $0x16d8] sm:$0xff]  }
 0x288   :  { %13316 = vmatpush3.bf16.msra.mxu0 %v14567_v25 }
 0x289   :  { %13338 = vmatpush3.bf16.msra.mxu1 %v14568_v26  ;;  %13317 = vmatprep.subr.bf16.mxu0 %v14569_v27  ;;  %v14616_v26 = vld [vmem:[%s18347_s1 + $0x15a0] sm:$0xff]  }
 0x28a   :  { %13339 = vmatprep.subr.bf16.mxu1 %v14570_v28 }
 0x28c   :  { %13318 = vmatpush3.bf16.msra.mxu0 %v14571_v29 }
 0x28d   :  { %13340 = vmatpush3.bf16.msra.mxu1 %v14572_v30  ;;  %13319 = vmatprep.subr.bf16.mxu0 %v14573_v31  ;;  %v14617_v30 = vld [vmem:[%s18347_s1 + $0x1568] sm:$0xff]  }
 0x28e   :  { %13341 = vmatprep.subr.bf16.mxu1 %v14574_v32  ;;  %v14618_v32 = vld [vmem:[%s18347_s1 + $0x15e8] sm:$0xff]  }
 0x290   :  { %13320 = vmatpush3.bf16.msra.mxu0 %v14575_v33 }
 0x291   :  { %13342 = vmatpush3.bf16.msra.mxu1 %v14576_v34  ;;  %13321 = vmatprep.subr.bf16.mxu0 %v14577_v35 }
 0x292   :  { %13343 = vmatprep.subr.bf16.mxu1 %v14578_v36  ;;  %v14619_v36 = vld [vmem:[%s18347_s1 + $0x1528] sm:$0xff]  }
 0x294   :  { %13322 = vmatpush3.bf16.msra.mxu0 %v14579_v37  ;;  %v14620_v37 = vld [vmem:[%s18347_s1 + $0x15a8] sm:$0xff]  }
 0x295   :  { %13344 = vmatpush3.bf16.msra.mxu1 %v14580_v39  ;;  %13323 = vmatprep.subr.bf16.mxu0 %v14581_v45  ;;  %v14625_v45 = vld [vmem:[%s18347_s1 + $0x1578] sm:$0xff]  }
 0x296   :  { %v13021_v38 = vpop.f32.mrb[52].mxu0  ;;  %13345 = vmatprep.subr.bf16.mxu1 %v14582_v47  ;;  %v14627_v47 = vld [vmem:[%s18347_s1 + $0x1538] sm:$0xff]  }
 0x297   :  { %v13043_v40 = vpop.f32.mrb[52].mxu1  ;;  %v13022_v41 = vpop.f32.mrb[53].mxu0 }
 0x298   :  { %v13044_v42 = vpop.f32.mrb[53].mxu1  ;;  %v13023_v43 = vadd.f32 %v13022_v41, %v13021_v38  ;;  %v13024_v46 = vpop.f32.mrb[54].mxu0  ;;  %13324 = vmatpush3.bf16.msra.mxu0 %v14583_v50  ;;  %v14621_v41 = vld [vmem:[%s18347_s1 + $0x1570] sm:$0xff]   ;;  %v55_v50 = vld [vmem:[%s18348_s0 + $0x158] sm:$0xff] }
 0x299   :  { %v13045_v44 = vadd.f32 %v13044_v42, %v13043_v40  ;;  %v13046_v48 = vpop.f32.mrb[54].mxu1  ;;  %v13025_v51 = vpop.f32.mrb[55].mxu0  ;;  %13346 = vmatpush3.bf16.msra.mxu1 %v14584_v52  ;;  %13325 = vmatprep.subr.bf16.mxu0 %v14585_v55  ;;  %v14622_v42 = vld [vmem:[%s18347_s1 + $0x15f0] sm:$0xff]   ;;  %v14626_v46 = vld [vmem:[%s18347_s1 + $0x15f8] sm:$0xff]   ;;  %v11368_v55 = vcombine.high %v55_v50, %v55_v50 }
 0x29a   :  { %v9791_v49 = vadd.f32 %v13023_v43, %v17057_v5  ;;  %v13047_v53 = vpop.f32.mrb[55].mxu1  ;;  %13347 = vmatprep.subr.bf16.mxu1 %v14586_v56  ;;  %v14597_v5 = vld [vmem:[%s18347_s1 + $0x1540] sm:$0xff]   ;;  %v14623_v43 = vld [vmem:[%s18347_s1 + $0x1530] sm:$0xff]   ;;  %v14628_v48 = vld [vmem:[%s18347_s1 + $0x15b8] sm:$0xff]  }
 0x29b   :  { %v11367_v53 = vcombine.low %v55_v50, %v55_v50  ;;  %v14634_v56 = vld [vmem:[%s18347_s1 + $0x16c0] sm:$0xff]   ;;  %v14678_v50 = vld [vmem:[%s18347_s1 + $0x17d0] sm:$0xff]  }
 0x29c   :  { %v17159_v54 = vadd.f32 %v13045_v44, %v9791_v49  ;;  %13326 = vmatpush3.bf16.msra.mxu0 %v14587_v57  ;;  %v14624_v44 = vld [vmem:[%s18347_s1 + $0x15b0] sm:$0xff]   ;;  %v14635_v57 = vld [vmem:[%s18347_s1 + $0x1600] sm:$0xff]  }
 0x29d   :  { %13348 = vmatpush3.bf16.msra.mxu1 %v14588_v58  ;;  %13327 = vmatprep.subr.bf16.mxu0 %v14589_v59  ;;  %v54_v49 = vld [vmem:[%s18348_s0 + $0x150] sm:$0xff]  ;;  %v14636_v58 = vld [vmem:[%s18347_s1 + $0x1680] sm:$0xff]   ;;  %v14637_v59 = vld [vmem:[%s18347_s1 + $0x1648] sm:$0xff]  }
 0x29e   :  { %13349 = vmatprep.subr.bf16.mxu1 %v14590_v60  ;;  %v11365_v51 = vcombine.low %v54_v49, %v54_v49  ;;  %v11366_v52 = vcombine.high %v54_v49, %v54_v49  ;;  %v14638_v60 = vld [vmem:[%s18347_s1 + $0x16c8] sm:$0xff]   ;;  %v14677_v49 = vld [vmem:[%s18347_s1 + $0x1750] sm:$0xff]  }
 0x2a0   :  { %13328 = vmatpush3.bf16.msra.mxu0 %v14591_v61  ;;  %v14639_v61 = vld [vmem:[%s18347_s1 + $0x1608] sm:$0xff]  }
 0x2a1   :  { %13350 = vmatpush3.bf16.msra.mxu1 %v14592_v62  ;;  %13357 = vmatprep.subr.bf16.mxu0 %v14597_v5  ;;  %v14640_v62 = vld [vmem:[%s18347_s1 + $0x1688] sm:$0xff]   ;;  %v14647_v5 = vld [vmem:[%s18347_s1 + $0x1618] sm:$0xff]  }
 0x2a2   :  { %13379 = vmatprep.subr.bf16.mxu1 %v14598_v6  ;;  %v14648_v6 = vld [vmem:[%s18347_s1 + $0x1698] sm:$0xff]  }
 0x2a3   :  { %10349 = vmatmul.mubr.bf16.vlgmr.msra.gmra.mrb[80].mxu0 %v11361_v1  ;;  %v14643_v1 = vld [vmem:[%s18347_s1 + $0x1610] sm:$0xff]  }
 0x2a4   :  { %10389 = vmatmul.mubr.bf16.vlgmr.msra.gmra.mrb[80].mxu1 %v11363_v3  ;;  %13358 = vmatpush3.bf16.msra.mxu0 %v14599_v7  ;;  %v14645_v3 = vld [vmem:[%s18347_s1 + $0x1658] sm:$0xff]   ;;  %v14649_v7 = vld [vmem:[%s18347_s1 + $0x1660] sm:$0xff]  }
 0x2a5   :  { %13380 = vmatpush3.bf16.msra.mxu1 %v14600_v8  ;;  %13359 = vmatprep.subr.bf16.mxu0 %v14601_v9  ;;  %v14650_v8 = vld [vmem:[%s18347_s1 + $0x16e0] sm:$0xff]  }
 0x2a6   :  { %13381 = vmatprep.subr.bf16.mxu1 %v14602_v10  ;;  %10428 = vmatprep.mubr.bf16.mxu0 %v11366_v52  ;;  %v14651_v10 = vld [vmem:[%s18347_s1 + $0x1620] sm:$0xff]   ;;  %v14680_v52 = vld [vmem:[%s18347_s1 + $0x1790] sm:$0xff]  }
 0x2a7   :  { %10468 = vmatprep.mubr.bf16.mxu1 %v11368_v55  ;;  %v14683_v55 = vld [vmem:[%s18347_s1 + $0x1718] sm:$0xff]  }
 0x2a8   :  { %13360 = vmatpush3.bf16.msra.mxu0 %v14603_v11 }
 0x2a9   :  { %13382 = vmatpush3.bf16.msra.mxu1 %v14604_v12  ;;  %13361 = vmatprep.subr.bf16.mxu0 %v14605_v13  ;;  %v14652_v12 = vld [vmem:[%s18347_s1 + $0x16a0] sm:$0xff]  }
 0x2aa   :  { %13383 = vmatprep.subr.bf16.mxu1 %v14606_v14 }
 0x2ac   :  { %13362 = vmatpush3.bf16.msra.mxu0 %v14607_v15  ;;  %v14653_v15 = vld [vmem:[%s18347_s1 + $0x1668] sm:$0xff]  }
 0x2ad   :  { %13384 = vmatpush3.bf16.msra.mxu1 %v14608_v16  ;;  %13363 = vmatprep.subr.bf16.mxu0 %v14609_v17 }
 0x2ae   :  { %13385 = vmatprep.subr.bf16.mxu1 %v14610_v18  ;;  %v14654_v18 = vld [vmem:[%s18347_s1 + $0x16e8] sm:$0xff]  }
 0x2b0   :  { %13364 = vmatpush3.bf16.msra.mxu0 %v14611_v19 }
 0x2b1   :  { %13386 = vmatpush3.bf16.msra.mxu1 %v14612_v20  ;;  %13365 = vmatprep.subr.bf16.mxu0 %v14613_v21  ;;  %v14655_v21 = vld [vmem:[%s18347_s1 + $0x1628] sm:$0xff]  }
 0x2b2   :  { %13387 = vmatprep.subr.bf16.mxu1 %v14614_v22 }
 0x2b4   :  { %13366 = vmatpush3.bf16.msra.mxu0 %v14615_v24 }
 0x2b5   :  { %13388 = vmatpush3.bf16.msra.mxu1 %v14616_v26  ;;  %13367 = vmatprep.subr.bf16.mxu0 %v14617_v30  ;;  %v14657_v26 = vld [vmem:[%s18347_s1 + $0x1670] sm:$0xff]  }
 0x2b6   :  { %v13065_v23 = vpop.f32.mrb[56].mxu0  ;;  %13389 = vmatprep.subr.bf16.mxu1 %v14618_v32  ;;  %v14660_v30 = vld [vmem:[%s18347_s1 + $0x16b0] sm:$0xff]   ;;  %v14662_v32 = vld [vmem:[%s18347_s1 + $0x16f8] sm:$0xff]  }
 0x2b7   :  { %v13087_v25 = vpop.f32.mrb[56].mxu1  ;;  %v13066_v27 = vpop.f32.mrb[57].mxu0 }
 0x2b8   :  { %v13067_v28 = vadd.f32 %v13066_v27, %v13065_v23  ;;  %v13088_v29 = vpop.f32.mrb[57].mxu1  ;;  %v13068_v33 = vpop.f32.mrb[58].mxu0  ;;  %13368 = vmatpush3.bf16.msra.mxu0 %v14619_v36  ;;  %v14656_v23 = vld [vmem:[%s18347_s1 + $0x16a8] sm:$0xff]  }
 0x2b9   :  { %v13089_v31 = vadd.f32 %v13088_v29, %v13087_v25  ;;  %v13090_v35 = vpop.f32.mrb[58].mxu1  ;;  %v13069_v38 = vpop.f32.mrb[59].mxu0  ;;  %13390 = vmatpush3.bf16.msra.mxu1 %v14620_v37  ;;  %13369 = vmatprep.subr.bf16.mxu0 %v14621_v41  ;;  %v14659_v29 = vld [vmem:[%s18347_s1 + $0x1630] sm:$0xff]   ;;  %v14663_v33 = vld [vmem:[%s18347_s1 + $0x1638] sm:$0xff]   ;;  %v14669_v41 = vld [vmem:[%s18347_s1 + $0x1740] sm:$0xff]  }
 0x2ba   :  { %v9871_v34 = vadd.f32 %v13067_v28, %v17159_v54  ;;  %v13091_v40 = vpop.f32.mrb[59].mxu1  ;;  %13391 = vmatprep.subr.bf16.mxu1 %v14622_v42  ;;  %v14633_v54 = vld [vmem:[%s18347_s1 + $0x1640] sm:$0xff]   ;;  %v14658_v28 = vld [vmem:[%s18347_s1 + $0x16f0] sm:$0xff]   ;;  %v57_v38 = vld [vmem:[%s18348_s0 + $0x168] sm:$0xff] }
 0x2bb   :  { %v56_v35 = vld [vmem:[%s18348_s0 + $0x160] sm:$0xff]  ;;  %v11372_v40 = vcombine.high %v57_v38, %v57_v38 }
 0x2bc   :  { %v17264_v39 = vadd.f32 %v13089_v31, %v9871_v34  ;;  %13370 = vmatpush3.bf16.msra.mxu0 %v14623_v43  ;;  %v14661_v31 = vld [vmem:[%s18347_s1 + $0x1678] sm:$0xff]   ;;  %v11369_v36 = vcombine.low %v56_v35, %v56_v35  ;;  %v11370_v37 = vcombine.high %v56_v35, %v56_v35  ;;  %v14670_v42 = vld [vmem:[%s18347_s1 + $0x17c0] sm:$0xff]   ;;  %v14713_v35 = vld [vmem:[%s18347_s1 + $0x1850] sm:$0xff]  }
 0x2bd   :  { %13392 = vmatpush3.bf16.msra.mxu1 %v14624_v44  ;;  %13371 = vmatprep.subr.bf16.mxu0 %v14625_v45  ;;  %v14664_v34 = vld [vmem:[%s18347_s1 + $0x16b8] sm:$0xff]   ;;  %v14671_v43 = vld [vmem:[%s18347_s1 + $0x1700] sm:$0xff]   ;;  %v14673_v45 = vld [vmem:[%s18347_s1 + $0x1748] sm:$0xff]  }
 0x2be   :  { %13393 = vmatprep.subr.bf16.mxu1 %v14626_v46  ;;  %v14672_v44 = vld [vmem:[%s18347_s1 + $0x1780] sm:$0xff]   ;;  %v14674_v46 = vld [vmem:[%s18347_s1 + $0x17c8] sm:$0xff]  }
 0x2c0   :  { %13372 = vmatpush3.bf16.msra.mxu0 %v14627_v47  ;;  %v14675_v47 = vld [vmem:[%s18347_s1 + $0x1708] sm:$0xff]  }
 0x2c1   :  { %13394 = vmatpush3.bf16.msra.mxu1 %v14628_v48  ;;  %13401 = vmatprep.subr.bf16.mxu0 %v14633_v54  ;;  %v14676_v48 = vld [vmem:[%s18347_s1 + $0x1788] sm:$0xff]   ;;  %v14682_v54 = vld [vmem:[%s18347_s1 + $0x17d8] sm:$0xff]  }
 0x2c2   :  { %13423 = vmatprep.subr.bf16.mxu1 %v14634_v56  ;;  %v14684_v56 = vld [vmem:[%s18347_s1 + $0x1798] sm:$0xff]  }
 0x2c3   :  { %10429 = vmatmul.mubr.bf16.vlgmr.msra.gmra.mrb[84].mxu0 %v11365_v51  ;;  %v14679_v51 = vld [vmem:[%s18347_s1 + $0x1710] sm:$0xff]  }
 0x2c4   :  { %10469 = vmatmul.mubr.bf16.vlgmr.msra.gmra.mrb[84].mxu1 %v11367_v53  ;;  %13402 = vmatpush3.bf16.msra.mxu0 %v14635_v57  ;;  %v14681_v53 = vld [vmem:[%s18347_s1 + $0x1758] sm:$0xff]   ;;  %v14685_v57 = vld [vmem:[%s18347_s1 + $0x1760] sm:$0xff]  }
 0x2c5   :  { %13424 = vmatpush3.bf16.msra.mxu1 %v14636_v58  ;;  %13403 = vmatprep.subr.bf16.mxu0 %v14637_v59  ;;  %v14686_v58 = vld [vmem:[%s18347_s1 + $0x17e0] sm:$0xff]  }
 0x2c6   :  { %13425 = vmatprep.subr.bf16.mxu1 %v14638_v60  ;;  %10508 = vmatprep.mubr.bf16.mxu0 %v11370_v37  ;;  %v14687_v60 = vld [vmem:[%s18347_s1 + $0x1720] sm:$0xff]   ;;  %v14715_v37 = vld [vmem:[%s18347_s1 + $0x1810] sm:$0xff]  }
 0x2c7   :  { %10548 = vmatprep.mubr.bf16.mxu1 %v11372_v40  ;;  %v14718_v40 = vld [vmem:[%s18347_s1 + $0x18d8] sm:$0xff]  }
 0x2c8   :  { %13404 = vmatpush3.bf16.msra.mxu0 %v14639_v61 }
 0x2c9   :  { %13426 = vmatpush3.bf16.msra.mxu1 %v14640_v62  ;;  %13405 = vmatprep.subr.bf16.mxu0 %v14641_v63  ;;  %v14688_v62 = vld [vmem:[%s18347_s1 + $0x17a0] sm:$0xff]  }
 0x2ca   :  { %13427 = vmatprep.subr.bf16.mxu1 %v14642_v0 }
 0x2cc   :  { %13406 = vmatpush3.bf16.msra.mxu0 %v14643_v1  ;;  %v14689_v1 = vld [vmem:[%s18347_s1 + $0x1768] sm:$0xff]  }
 0x2cd   :  { %13428 = vmatpush3.bf16.msra.mxu1 %v14644_v2  ;;  %13407 = vmatprep.subr.bf16.mxu0 %v14645_v3 }
 0x2ce   :  { %13429 = vmatprep.subr.bf16.mxu1 %v14646_v4  ;;  %v14690_v4 = vld [vmem:[%s18347_s1 + $0x17e8] sm:$0xff]  }
 0x2d0   :  { %13408 = vmatpush3.bf16.msra.mxu0 %v14647_v5 }
 0x2d1   :  { %13430 = vmatpush3.bf16.msra.mxu1 %v14648_v6  ;;  %13409 = vmatprep.subr.bf16.mxu0 %v14649_v7  ;;  %v14691_v7 = vld [vmem:[%s18347_s1 + $0x1728] sm:$0xff]  }
 0x2d2   :  { %13431 = vmatprep.subr.bf16.mxu1 %v14650_v8 }
 0x2d4   :  { %13410 = vmatpush3.bf16.msra.mxu0 %v14651_v10 }
 0x2d5   :  { %13432 = vmatpush3.bf16.msra.mxu1 %v14652_v12  ;;  %13411 = vmatprep.subr.bf16.mxu0 %v14653_v15  ;;  %v14693_v12 = vld [vmem:[%s18347_s1 + $0x1770] sm:$0xff]  }
 0x2d6   :  { %v13109_v9 = vpop.f32.mrb[60].mxu0  ;;  %13433 = vmatprep.subr.bf16.mxu1 %v14654_v18  ;;  %v14695_v15 = vld [vmem:[%s18347_s1 + $0x1730] sm:$0xff]   ;;  %v14698_v18 = vld [vmem:[%s18347_s1 + $0x17f8] sm:$0xff]  }
 0x2d7   :  { %v13131_v11 = vpop.f32.mrb[60].mxu1  ;;  %v13110_v13 = vpop.f32.mrb[61].mxu0 }
 0x2d8   :  { %v13132_v14 = vpop.f32.mrb[61].mxu1  ;;  %v13111_v16 = vadd.f32 %v13110_v13, %v13109_v9  ;;  %v13112_v19 = vpop.f32.mrb[62].mxu0  ;;  %13412 = vmatpush3.bf16.msra.mxu0 %v14655_v21  ;;  %v14692_v9 = vld [vmem:[%s18347_s1 + $0x17a8] sm:$0xff]   ;;  %v58_v21 = vld [vmem:[%s18348_s0 + $0x170] sm:$0xff] }
 0x2d9   :  { %v13133_v17 = vadd.f32 %v13132_v14, %v13131_v11  ;;  %v13134_v20 = vpop.f32.mrb[62].mxu1  ;;  %v13113_v24 = vpop.f32.mrb[63].mxu0  ;;  %13434 = vmatpush3.bf16.msra.mxu1 %v14656_v23  ;;  %13413 = vmatprep.subr.bf16.mxu0 %v14657_v26  ;;  %v14694_v14 = vld [vmem:[%s18347_s1 + $0x17f0] sm:$0xff]   ;;  %v14699_v19 = vld [vmem:[%s18347_s1 + $0x1738] sm:$0xff]   ;;  %v11373_v23 = vcombine.low %v58_v21, %v58_v21 }
 0x2da   :  { %v9951_v22 = vadd.f32 %v13111_v16, %v17264_v39  ;;  %v13135_v25 = vpop.f32.mrb[63].mxu1  ;;  %13435 = vmatprep.subr.bf16.mxu1 %v14658_v28  ;;  %v11371_v39 = vcombine.low %v57_v38, %v57_v38  ;;  %v14696_v16 = vld [vmem:[%s18347_s1 + $0x17b0] sm:$0xff]   ;;  %v14700_v20 = vld [vmem:[%s18347_s1 + $0x17b8] sm:$0xff]   ;;  %v11374_v24 = vcombine.high %v58_v21, %v58_v21  ;;  %v14706_v28 = vld [vmem:[%s18347_s1 + $0x18c0] sm:$0xff]  }
 0x2db   :  { %v14716_v38 = vld [vmem:[%s18347_s1 + $0x1890] sm:$0xff]  }
 0x2dc   :  { %v17372_v27 = vadd.f32 %v13133_v17, %v9951_v22  ;;  %13414 = vmatpush3.bf16.msra.mxu0 %v14659_v29  ;;  %v14697_v17 = vld [vmem:[%s18347_s1 + $0x1778] sm:$0xff]   ;;  %v14707_v29 = vld [vmem:[%s18347_s1 + $0x1800] sm:$0xff]   ;;  %v14749_v21 = vld [vmem:[%s18347_s1 + $0x1950] sm:$0xff]  }
 0x2dd   :  { %13436 = vmatpush3.bf16.msra.mxu1 %v14660_v30  ;;  %13415 = vmatprep.subr.bf16.mxu0 %v14661_v31  ;;  %v59_v22 = vld [vmem:[%s18348_s0 + $0x178] sm:$0xff]  ;;  %v14708_v30 = vld [vmem:[%s18347_s1 + $0x1880] sm:$0xff]   ;;  %v14709_v31 = vld [vmem:[%s18347_s1 + $0x1848] sm:$0xff]  }
 0x2de   :  { %13437 = vmatprep.subr.bf16.mxu1 %v14662_v32  ;;  %v11375_v25 = vcombine.low %v59_v22, %v59_v22  ;;  %v11376_v26 = vcombine.high %v59_v22, %v59_v22  ;;  %v14710_v32 = vld [vmem:[%s18347_s1 + $0x18c8] sm:$0xff]   ;;  %v14750_v22 = vld [vmem:[%s18347_s1 + $0x19d0] sm:$0xff]  }
 0x2e0   :  { %13416 = vmatpush3.bf16.msra.mxu0 %v14663_v33  ;;  %v14711_v33 = vld [vmem:[%s18347_s1 + $0x1808] sm:$0xff]  }
 0x2e1   :  { %13438 = vmatpush3.bf16.msra.mxu1 %v14664_v34  ;;  %13445 = vmatprep.subr.bf16.mxu0 %v14669_v41  ;;  %v14712_v34 = vld [vmem:[%s18347_s1 + $0x1888] sm:$0xff]   ;;  %v14719_v41 = vld [vmem:[%s18347_s1 + $0x1818] sm:$0xff]  }
 0x2e2   :  { %13467 = vmatprep.subr.bf16.mxu1 %v14670_v42  ;;  %v14720_v42 = vld [vmem:[%s18347_s1 + $0x1898] sm:$0xff]  }
 0x2e3   :  { %10509 = vmatmul.mubr.bf16.vlgmr.msra.gmra.mrb[88].mxu0 %v11369_v36  ;;  %v14714_v36 = vld [vmem:[%s18347_s1 + $0x18d0] sm:$0xff]  }
 0x2e4   :  { %10549 = vmatmul.mubr.bf16.vlgmr.msra.gmra.mrb[88].mxu1 %v11371_v39  ;;  %13446 = vmatpush3.bf16.msra.mxu0 %v14671_v43  ;;  %v14717_v39 = vld [vmem:[%s18347_s1 + $0x1858] sm:$0xff]   ;;  %v14721_v43 = vld [vmem:[%s18347_s1 + $0x1860] sm:$0xff]  }
 0x2e5   :  { %13468 = vmatpush3.bf16.msra.mxu1 %v14672_v44  ;;  %13447 = vmatprep.subr.bf16.mxu0 %v14673_v45  ;;  %v14722_v44 = vld [vmem:[%s18347_s1 + $0x18e0] sm:$0xff]  }
 0x2e6   :  { %13469 = vmatprep.subr.bf16.mxu1 %v14674_v46  ;;  %10588 = vmatprep.mubr.bf16.mxu0 %v11374_v24  ;;  %v14723_v45 = vld [vmem:[%s18347_s1 + $0x1820] sm:$0xff]   ;;  %v14752_v24 = vld [vmem:[%s18347_s1 + $0x1990] sm:$0xff]  }
 0x2e7   :  { %10628 = vmatprep.mubr.bf16.mxu1 %v11376_v26  ;;  %v14754_v26 = vld [vmem:[%s18347_s1 + $0x19d8] sm:$0xff]  }
 0x2e8   :  { %13448 = vmatpush3.bf16.msra.mxu0 %v14675_v47  ;;  %v14724_v47 = vld [vmem:[%s18347_s1 + $0x18a0] sm:$0xff]  }
 0x2e9   :  { %13470 = vmatpush3.bf16.msra.mxu1 %v14676_v48  ;;  %13449 = vmatprep.subr.bf16.mxu0 %v14677_v49 }
 0x2ea   :  { %13471 = vmatprep.subr.bf16.mxu1 %v14678_v50 }
 0x2ec   :  { %13450 = vmatpush3.bf16.msra.mxu0 %v14679_v51 }
 0x2ed   :  { %13472 = vmatpush3.bf16.msra.mxu1 %v14680_v52  ;;  %13451 = vmatprep.subr.bf16.mxu0 %v14681_v53  ;;  %v14725_v53 = vld [vmem:[%s18347_s1 + $0x1868] sm:$0xff]  }
 0x2ee   :  { %13473 = vmatprep.subr.bf16.mxu1 %v14682_v54 }
 0x2f0   :  { %13452 = vmatpush3.bf16.msra.mxu0 %v14683_v55  ;;  %v14726_v55 = vld [vmem:[%s18347_s1 + $0x18e8] sm:$0xff]  }
 0x2f1   :  { %13474 = vmatpush3.bf16.msra.mxu1 %v14684_v56  ;;  %13453 = vmatprep.subr.bf16.mxu0 %v14685_v57 }
 0x2f2   :  { %13475 = vmatprep.subr.bf16.mxu1 %v14686_v58  ;;  %v14727_v58 = vld [vmem:[%s18347_s1 + $0x1828] sm:$0xff]  }
 0x2f4   :  { %13454 = vmatpush3.bf16.msra.mxu0 %v14687_v60  ;;  %v14728_v60 = vld [vmem:[%s18347_s1 + $0x18a8] sm:$0xff]  }
 0x2f5   :  { %13476 = vmatpush3.bf16.msra.mxu1 %v14688_v62  ;;  %13455 = vmatprep.subr.bf16.mxu0 %v14689_v1  ;;  %v14731_v1 = vld [vmem:[%s18347_s1 + $0x1830] sm:$0xff]  }
 0x2f6   :  { %v13153_v59 = vpop.f32.mrb[64].mxu0  ;;  %13477 = vmatprep.subr.bf16.mxu1 %v14690_v4  ;;  %v14734_v4 = vld [vmem:[%s18347_s1 + $0x18f8] sm:$0xff]  }
 0x2f7   :  { %v13175_v61 = vpop.f32.mrb[64].mxu1  ;;  %v13154_v63 = vpop.f32.mrb[65].mxu0 }
 0x2f8   :  { %v13176_v0 = vpop.f32.mrb[65].mxu1  ;;  %v13155_v2 = vadd.f32 %v13154_v63, %v13153_v59  ;;  %v13156_v5 = vpop.f32.mrb[66].mxu0  ;;  %13456 = vmatpush3.bf16.msra.mxu0 %v14691_v7  ;;  %v14729_v63 = vld [vmem:[%s18347_s1 + $0x1870] sm:$0xff]   ;;  %v60_v7 = vld [vmem:[%s18348_s0 + $0x180] sm:$0xff] }
 0x2f9   :  { %v13177_v3 = vadd.f32 %v13176_v0, %v13175_v61  ;;  %v13178_v6 = vpop.f32.mrb[66].mxu1  ;;  %v13157_v10 = vpop.f32.mrb[67].mxu0  ;;  %13478 = vmatpush3.bf16.msra.mxu1 %v14692_v9  ;;  %13457 = vmatprep.subr.bf16.mxu0 %v14693_v12  ;;  %v14730_v0 = vld [vmem:[%s18347_s1 + $0x18f0] sm:$0xff]   ;;  %v14735_v5 = vld [vmem:[%s18347_s1 + $0x1838] sm:$0xff]   ;;  %v11377_v9 = vcombine.low %v60_v7, %v60_v7 }
 0x2fa   :  { %v10031_v8 = vadd.f32 %v13155_v2, %v17372_v27  ;;  %v13179_v11 = vpop.f32.mrb[67].mxu1  ;;  %13479 = vmatprep.subr.bf16.mxu1 %v14694_v14  ;;  %v14705_v27 = vld [vmem:[%s18347_s1 + $0x1840] sm:$0xff]   ;;  %v14732_v2 = vld [vmem:[%s18347_s1 + $0x18b0] sm:$0xff]   ;;  %v14736_v6 = vld [vmem:[%s18347_s1 + $0x18b8] sm:$0xff]   ;;  %v11378_v10 = vcombine.high %v60_v7, %v60_v7 }
 0x2fb   :  { %v14742_v14 = vld [vmem:[%s18347_s1 + $0x19c0] sm:$0xff]   ;;  %v14785_v7 = vld [vmem:[%s18347_s1 + $0x1a50] sm:$0xff]  }
 0x2fc   :  { %v17477_v13 = vadd.f32 %v13177_v3, %v10031_v8  ;;  %13458 = vmatpush3.bf16.msra.mxu0 %v14695_v15  ;;  %v14733_v3 = vld [vmem:[%s18347_s1 + $0x1878] sm:$0xff]   ;;  %v61_v8 = vld [vmem:[%s18348_s0 + $0x188] sm:$0xff]  ;;  %v14743_v15 = vld [vmem:[%s18347_s1 + $0x1900] sm:$0xff]  }
 0x2fd   :  { %13480 = vmatpush3.bf16.msra.mxu1 %v14696_v16  ;;  %13459 = vmatprep.subr.bf16.mxu0 %v14697_v17  ;;  %v11379_v11 = vcombine.low %v61_v8, %v61_v8  ;;  %v11380_v12 = vcombine.high %v61_v8, %v61_v8  ;;  %v14744_v16 = vld [vmem:[%s18347_s1 + $0x1980] sm:$0xff]   ;;  %v14745_v17 = vld [vmem:[%s18347_s1 + $0x1948] sm:$0xff]   ;;  %v14786_v8 = vld [vmem:[%s18347_s1 + $0x1ad0] sm:$0xff]  }
 0x2fe   :  { %13481 = vmatprep.subr.bf16.mxu1 %v14698_v18  ;;  %v14746_v18 = vld [vmem:[%s18347_s1 + $0x19c8] sm:$0xff]  }
 0x300   :  { %13460 = vmatpush3.bf16.msra.mxu0 %v14699_v19  ;;  %v14747_v19 = vld [vmem:[%s18347_s1 + $0x1908] sm:$0xff]  }
 0x301   :  { %13482 = vmatpush3.bf16.msra.mxu1 %v14700_v20  ;;  %13489 = vmatprep.subr.bf16.mxu0 %v14705_v27  ;;  %v14748_v20 = vld [vmem:[%s18347_s1 + $0x1988] sm:$0xff]   ;;  %v14755_v27 = vld [vmem:[%s18347_s1 + $0x1918] sm:$0xff]  }
 0x302   :  { %13511 = vmatprep.subr.bf16.mxu1 %v14706_v28  ;;  %v14756_v28 = vld [vmem:[%s18347_s1 + $0x1998] sm:$0xff]  }
 0x303   :  { %10589 = vmatmul.mubr.bf16.vlgmr.msra.gmra.mrb[92].mxu0 %v11373_v23  ;;  %v14751_v23 = vld [vmem:[%s18347_s1 + $0x1910] sm:$0xff]  }
 0x304   :  { %10629 = vmatmul.mubr.bf16.vlgmr.msra.gmra.mrb[92].mxu1 %v11375_v25  ;;  %13490 = vmatpush3.bf16.msra.mxu0 %v14707_v29  ;;  %v14753_v25 = vld [vmem:[%s18347_s1 + $0x1958] sm:$0xff]   ;;  %v14757_v29 = vld [vmem:[%s18347_s1 + $0x1960] sm:$0xff]  }
 0x305   :  { %13512 = vmatpush3.bf16.msra.mxu1 %v14708_v30  ;;  %13491 = vmatprep.subr.bf16.mxu0 %v14709_v31  ;;  %v14758_v30 = vld [vmem:[%s18347_s1 + $0x19e0] sm:$0xff]  }
 0x306   :  { %13513 = vmatprep.subr.bf16.mxu1 %v14710_v32  ;;  %10668 = vmatprep.mubr.bf16.mxu0 %v11378_v10  ;;  %v14759_v31 = vld [vmem:[%s18347_s1 + $0x1920] sm:$0xff]   ;;  %v14788_v10 = vld [vmem:[%s18347_s1 + $0x1a90] sm:$0xff]  }
 0x307   :  { %10708 = vmatprep.mubr.bf16.mxu1 %v11380_v12  ;;  %v14790_v12 = vld [vmem:[%s18347_s1 + $0x1ad8] sm:$0xff]  }
 0x308   :  { %13492 = vmatpush3.bf16.msra.mxu0 %v14711_v33  ;;  %v14760_v33 = vld [vmem:[%s18347_s1 + $0x19a0] sm:$0xff]  }
 0x309   :  { %13514 = vmatpush3.bf16.msra.mxu1 %v14712_v34  ;;  %13493 = vmatprep.subr.bf16.mxu0 %v14713_v35 }
 0x30a   :  { %13515 = vmatprep.subr.bf16.mxu1 %v14714_v36 }
 0x30c   :  { %13494 = vmatpush3.bf16.msra.mxu0 %v14715_v37 }
 0x30d   :  { %13516 = vmatpush3.bf16.msra.mxu1 %v14716_v38  ;;  %13495 = vmatprep.subr.bf16.mxu0 %v14717_v39  ;;  %v14761_v39 = vld [vmem:[%s18347_s1 + $0x1968] sm:$0xff]  }
 0x30e   :  { %13517 = vmatprep.subr.bf16.mxu1 %v14718_v40 }
 0x310   :  { %13496 = vmatpush3.bf16.msra.mxu0 %v14719_v41  ;;  %v14762_v41 = vld [vmem:[%s18347_s1 + $0x19e8] sm:$0xff]  }
 0x311   :  { %13518 = vmatpush3.bf16.msra.mxu1 %v14720_v42  ;;  %13497 = vmatprep.subr.bf16.mxu0 %v14721_v43 }
 0x312   :  { %13519 = vmatprep.subr.bf16.mxu1 %v14722_v44  ;;  %v14763_v44 = vld [vmem:[%s18347_s1 + $0x1928] sm:$0xff]  }
 0x314   :  { %13498 = vmatpush3.bf16.msra.mxu0 %v14723_v45 }
 0x315   :  { %13520 = vmatpush3.bf16.msra.mxu1 %v14724_v47  ;;  %13499 = vmatprep.subr.bf16.mxu0 %v14725_v53  ;;  %v14769_v53 = vld [vmem:[%s18347_s1 + $0x1978] sm:$0xff]  }
 0x316   :  { %v13197_v46 = vpop.f32.mrb[68].mxu0  ;;  %13521 = vmatprep.subr.bf16.mxu1 %v14726_v55  ;;  %v14771_v55 = vld [vmem:[%s18347_s1 + $0x1938] sm:$0xff]  }
 0x317   :  { %v13219_v48 = vpop.f32.mrb[68].mxu1  ;;  %v13198_v49 = vpop.f32.mrb[69].mxu0 }
 0x318   :  { %v13220_v50 = vpop.f32.mrb[69].mxu1  ;;  %v13199_v51 = vadd.f32 %v13198_v49, %v13197_v46  ;;  %v13200_v54 = vpop.f32.mrb[70].mxu0  ;;  %13500 = vmatpush3.bf16.msra.mxu0 %v14727_v58  ;;  %v14764_v46 = vld [vmem:[%s18347_s1 + $0x19a8] sm:$0xff]   ;;  %v14765_v49 = vld [vmem:[%s18347_s1 + $0x1970] sm:$0xff]   ;;  %v63_v58 = vld [vmem:[%s18348_s0 + $0x198] sm:$0xff] }
 0x319   :  { %v13221_v52 = vadd.f32 %v13220_v50, %v13219_v48  ;;  %v13222_v56 = vpop.f32.mrb[70].mxu1  ;;  %v13201_v59 = vpop.f32.mrb[71].mxu0  ;;  %13522 = vmatpush3.bf16.msra.mxu1 %v14728_v60  ;;  %13501 = vmatprep.subr.bf16.mxu0 %v14729_v63  ;;  %v14766_v50 = vld [vmem:[%s18347_s1 + $0x19f0] sm:$0xff]   ;;  %v14770_v54 = vld [vmem:[%s18347_s1 + $0x19f8] sm:$0xff]   ;;  %v14777_v63 = vld [vmem:[%s18347_s1 + $0x1a40] sm:$0xff]  }
 0x31a   :  { %v10111_v57 = vadd.f32 %v13199_v51, %v17477_v13  ;;  %v13223_v61 = vpop.f32.mrb[71].mxu1  ;;  %13523 = vmatprep.subr.bf16.mxu1 %v14730_v0  ;;  %v14741_v13 = vld [vmem:[%s18347_s1 + $0x1940] sm:$0xff]   ;;  %v14767_v51 = vld [vmem:[%s18347_s1 + $0x1930] sm:$0xff]   ;;  %v14772_v56 = vld [vmem:[%s18347_s1 + $0x19b8] sm:$0xff]  }
 0x31b   :  { %v11383_v61 = vcombine.low %v63_v58, %v63_v58  ;;  %v14778_v0 = vld [vmem:[%s18347_s1 + $0x1ac0] sm:$0xff]  }
 0x31c   :  { %v17579_v62 = vadd.f32 %v13221_v52, %v10111_v57  ;;  %13502 = vmatpush3.bf16.msra.mxu0 %v14731_v1  ;;  %v14768_v52 = vld [vmem:[%s18347_s1 + $0x19b0] sm:$0xff]   ;;  %v14779_v1 = vld [vmem:[%s18347_s1 + $0x1a00] sm:$0xff]  }
 0x31d   :  { %13524 = vmatpush3.bf16.msra.mxu1 %v14732_v2  ;;  %13503 = vmatprep.subr.bf16.mxu0 %v14733_v3  ;;  %v62_v57 = vld [vmem:[%s18348_s0 + $0x190] sm:$0xff]  ;;  %v14780_v2 = vld [vmem:[%s18347_s1 + $0x1a80] sm:$0xff]   ;;  %v14781_v3 = vld [vmem:[%s18347_s1 + $0x1a48] sm:$0xff]  }
 0x31e   :  { %13525 = vmatprep.subr.bf16.mxu1 %v14734_v4  ;;  %v11381_v59 = vcombine.low %v62_v57, %v62_v57  ;;  %v11382_v60 = vcombine.high %v62_v57, %v62_v57  ;;  %v14782_v4 = vld [vmem:[%s18347_s1 + $0x1ac8] sm:$0xff]   ;;  %v14821_v57 = vld [vmem:[%s18347_s1 + $0x1b50] sm:$0xff]  }
 0x320   :  { %13504 = vmatpush3.bf16.msra.mxu0 %v14735_v5  ;;  %v14783_v5 = vld [vmem:[%s18347_s1 + $0x1a08] sm:$0xff]  }
 0x321   :  { %13526 = vmatpush3.bf16.msra.mxu1 %v14736_v6  ;;  %13533 = vmatprep.subr.bf16.mxu0 %v14741_v13  ;;  %v14784_v6 = vld [vmem:[%s18347_s1 + $0x1a88] sm:$0xff]   ;;  %v14791_v13 = vld [vmem:[%s18347_s1 + $0x1a18] sm:$0xff]  }
 0x322   :  { %13555 = vmatprep.subr.bf16.mxu1 %v14742_v14  ;;  %v14792_v14 = vld [vmem:[%s18347_s1 + $0x1a98] sm:$0xff]  }
 0x323   :  { %10669 = vmatmul.mubr.bf16.vlgmr.msra.gmra.mrb[96].mxu0 %v11377_v9  ;;  %v14787_v9 = vld [vmem:[%s18347_s1 + $0x1a10] sm:$0xff]  }
 0x324   :  { %10709 = vmatmul.mubr.bf16.vlgmr.msra.gmra.mrb[96].mxu1 %v11379_v11  ;;  %13534 = vmatpush3.bf16.msra.mxu0 %v14743_v15  ;;  %v14789_v11 = vld [vmem:[%s18347_s1 + $0x1a58] sm:$0xff]   ;;  %v14793_v15 = vld [vmem:[%s18347_s1 + $0x1a60] sm:$0xff]  }
 0x325   :  { %13556 = vmatpush3.bf16.msra.mxu1 %v14744_v16  ;;  %13535 = vmatprep.subr.bf16.mxu0 %v14745_v17  ;;  %v14794_v16 = vld [vmem:[%s18347_s1 + $0x1ae0] sm:$0xff]  }
 0x326   :  { %13557 = vmatprep.subr.bf16.mxu1 %v14746_v18  ;;  %10748 = vmatprep.mubr.bf16.mxu0 %v11382_v60  ;;  %v14795_v18 = vld [vmem:[%s18347_s1 + $0x1a20] sm:$0xff]   ;;  %v14824_v60 = vld [vmem:[%s18347_s1 + $0x1b90] sm:$0xff]  }
 0x328   :  { %13536 = vmatpush3.bf16.msra.mxu0 %v14747_v19 }
 0x329   :  { %13558 = vmatpush3.bf16.msra.mxu1 %v14748_v20  ;;  %13537 = vmatprep.subr.bf16.mxu0 %v14749_v21  ;;  %v14796_v20 = vld [vmem:[%s18347_s1 + $0x1aa0] sm:$0xff]  }
 0x32a   :  { %13559 = vmatprep.subr.bf16.mxu1 %v14750_v22 }
 0x32c   :  { %13538 = vmatpush3.bf16.msra.mxu0 %v14751_v23 }
 0x32d   :  { %13560 = vmatpush3.bf16.msra.mxu1 %v14752_v24  ;;  %13539 = vmatprep.subr.bf16.mxu0 %v14753_v25  ;;  %v14797_v24 = vld [vmem:[%s18347_s1 + $0x1a68] sm:$0xff]  }
 0x32e   :  { %13561 = vmatprep.subr.bf16.mxu1 %v14754_v26  ;;  %v14798_v26 = vld [vmem:[%s18347_s1 + $0x1ae8] sm:$0xff]  }
 0x330   :  { %13540 = vmatpush3.bf16.msra.mxu0 %v14755_v27 }
 0x331   :  { %13562 = vmatpush3.bf16.msra.mxu1 %v14756_v28  ;;  %13541 = vmatprep.subr.bf16.mxu0 %v14757_v29 }
 0x332   :  { %13563 = vmatprep.subr.bf16.mxu1 %v14758_v30  ;;  %v14799_v30 = vld [vmem:[%s18347_s1 + $0x1a28] sm:$0xff]  }
 0x334   :  { %13542 = vmatpush3.bf16.msra.mxu0 %v14759_v31  ;;  %v14800_v31 = vld [vmem:[%s18347_s1 + $0x1aa8] sm:$0xff]  }
 0x335   :  { %13564 = vmatpush3.bf16.msra.mxu1 %v14760_v33  ;;  %13543 = vmatprep.subr.bf16.mxu0 %v14761_v39  ;;  %v14805_v39 = vld [vmem:[%s18347_s1 + $0x1a78] sm:$0xff]  }
 0x336   :  { %v13241_v32 = vpop.f32.mrb[72].mxu0  ;;  %13565 = vmatprep.subr.bf16.mxu1 %v14762_v41  ;;  %v14807_v41 = vld [vmem:[%s18347_s1 + $0x1a38] sm:$0xff]  }
 0x337   :  { %v13263_v34 = vpop.f32.mrb[72].mxu1  ;;  %v13242_v35 = vpop.f32.mrb[73].mxu0 }
 0x338   :  { %v13264_v36 = vpop.f32.mrb[73].mxu1  ;;  %v13243_v37 = vadd.f32 %v13242_v35, %v13241_v32  ;;  %v13244_v40 = vpop.f32.mrb[74].mxu0  ;;  %13544 = vmatpush3.bf16.msra.mxu0 %v14763_v44  ;;  %v14801_v35 = vld [vmem:[%s18347_s1 + $0x1a70] sm:$0xff]   ;;  %v65_v44 = vld [vmem:[%s18348_s0 + $0x1a8] sm:$0xff] }
 0x339   :  { %v13265_v38 = vadd.f32 %v13264_v36, %v13263_v34  ;;  %v13266_v42 = vpop.f32.mrb[74].mxu1  ;;  %v13245_v45 = vpop.f32.mrb[75].mxu0  ;;  %13566 = vmatpush3.bf16.msra.mxu1 %v14764_v46  ;;  %13545 = vmatprep.subr.bf16.mxu0 %v14765_v49  ;;  %v14802_v36 = vld [vmem:[%s18347_s1 + $0x1af0] sm:$0xff]   ;;  %v14806_v40 = vld [vmem:[%s18347_s1 + $0x1af8] sm:$0xff]   ;;  %v11388_v49 = vcombine.high %v65_v44, %v65_v44 }
 0x33a   :  { %v10191_v43 = vadd.f32 %v13243_v37, %v17579_v62  ;;  %v13267_v47 = vpop.f32.mrb[75].mxu1  ;;  %13567 = vmatprep.subr.bf16.mxu1 %v14766_v50  ;;  %v11384_v62 = vcombine.high %v63_v58, %v63_v58  ;;  %v14803_v37 = vld [vmem:[%s18347_s1 + $0x1a30] sm:$0xff]   ;;  %v14808_v42 = vld [vmem:[%s18347_s1 + $0x1ab8] sm:$0xff]   ;;  %v14814_v50 = vld [vmem:[%s18347_s1 + $0x1bc0] sm:$0xff]  }
 0x33b   :  { %v11387_v47 = vcombine.low %v65_v44, %v65_v44  ;;  %v14822_v58 = vld [vmem:[%s18347_s1 + $0x1bd0] sm:$0xff]  }
 0x33c   :  { %v17684_v48 = vadd.f32 %v13265_v38, %v10191_v43  ;;  %13546 = vmatpush3.bf16.msra.mxu0 %v14767_v51  ;;  %10788 = vmatprep.mubr.bf16.mxu1 %v11384_v62  ;;  %v14804_v38 = vld [vmem:[%s18347_s1 + $0x1ab0] sm:$0xff]   ;;  %v64_v43 = vld [vmem:[%s18348_s0 + $0x1a0] sm:$0xff]  ;;  %v14826_v62 = vld [vmem:[%s18347_s1 + $0x1bd8] sm:$0xff]  }
 0x33d   :  { %13568 = vmatpush3.bf16.msra.mxu1 %v14768_v52  ;;  %13547 = vmatprep.subr.bf16.mxu0 %v14769_v53  ;;  %v11385_v45 = vcombine.low %v64_v43, %v64_v43  ;;  %v11386_v46 = vcombine.high %v64_v43, %v64_v43  ;;  %v14815_v51 = vld [vmem:[%s18347_s1 + $0x1b00] sm:$0xff]   ;;  %v14817_v53 = vld [vmem:[%s18347_s1 + $0x1b48] sm:$0xff]   ;;  %v14857_v43 = vld [vmem:[%s18347_s1 + $0x1c50] sm:$0xff]  }
 0x33e   :  { %13569 = vmatprep.subr.bf16.mxu1 %v14770_v54  ;;  %v14816_v52 = vld [vmem:[%s18347_s1 + $0x1b80] sm:$0xff]   ;;  %v14818_v54 = vld [vmem:[%s18347_s1 + $0x1bc8] sm:$0xff]   ;;  %v14858_v44 = vld [vmem:[%s18347_s1 + $0x1cd0] sm:$0xff]  }
 0x340   :  { %13548 = vmatpush3.bf16.msra.mxu0 %v14771_v55  ;;  %v14819_v55 = vld [vmem:[%s18347_s1 + $0x1b08] sm:$0xff]  }
 0x341   :  { %13570 = vmatpush3.bf16.msra.mxu1 %v14772_v56  ;;  %13577 = vmatprep.subr.bf16.mxu0 %v14777_v63  ;;  %v14820_v56 = vld [vmem:[%s18347_s1 + $0x1b88] sm:$0xff]   ;;  %v14827_v63 = vld [vmem:[%s18347_s1 + $0x1b18] sm:$0xff]  }
 0x342   :  { %13599 = vmatprep.subr.bf16.mxu1 %v14778_v0  ;;  %v14828_v0 = vld [vmem:[%s18347_s1 + $0x1b98] sm:$0xff]  }
 0x343   :  { %10749 = vmatmul.mubr.bf16.vlgmr.msra.gmra.mrb[100].mxu0 %v11381_v59  ;;  %v14823_v59 = vld [vmem:[%s18347_s1 + $0x1b10] sm:$0xff]  }
 0x344   :  { %10789 = vmatmul.mubr.bf16.vlgmr.msra.gmra.mrb[100].mxu1 %v11383_v61  ;;  %13578 = vmatpush3.bf16.msra.mxu0 %v14779_v1  ;;  %v14825_v61 = vld [vmem:[%s18347_s1 + $0x1b58] sm:$0xff]   ;;  %v14829_v1 = vld [vmem:[%s18347_s1 + $0x1b60] sm:$0xff]  }
 0x345   :  { %13600 = vmatpush3.bf16.msra.mxu1 %v14780_v2  ;;  %13579 = vmatprep.subr.bf16.mxu0 %v14781_v3  ;;  %v14830_v2 = vld [vmem:[%s18347_s1 + $0x1be0] sm:$0xff]  }
 0x346   :  { %13601 = vmatprep.subr.bf16.mxu1 %v14782_v4  ;;  %10828 = vmatprep.mubr.bf16.mxu0 %v11386_v46  ;;  %v14831_v4 = vld [vmem:[%s18347_s1 + $0x1b20] sm:$0xff]   ;;  %v14860_v46 = vld [vmem:[%s18347_s1 + $0x1c90] sm:$0xff]  }
 0x347   :  { %10868 = vmatprep.mubr.bf16.mxu1 %v11388_v49  ;;  %v14863_v49 = vld [vmem:[%s18347_s1 + $0x1c18] sm:$0xff]  }
 0x348   :  { %13580 = vmatpush3.bf16.msra.mxu0 %v14783_v5 }
 0x349   :  { %13602 = vmatpush3.bf16.msra.mxu1 %v14784_v6  ;;  %13581 = vmatprep.subr.bf16.mxu0 %v14785_v7  ;;  %v14832_v6 = vld [vmem:[%s18347_s1 + $0x1ba0] sm:$0xff]  }
 0x34a   :  { %13603 = vmatprep.subr.bf16.mxu1 %v14786_v8 }
 0x34c   :  { %13582 = vmatpush3.bf16.msra.mxu0 %v14787_v9  ;;  %v14833_v9 = vld [vmem:[%s18347_s1 + $0x1b68] sm:$0xff]  }
 0x34d   :  { %13604 = vmatpush3.bf16.msra.mxu1 %v14788_v10  ;;  %13583 = vmatprep.subr.bf16.mxu0 %v14789_v11 }
 0x34e   :  { %13605 = vmatprep.subr.bf16.mxu1 %v14790_v12  ;;  %v14834_v12 = vld [vmem:[%s18347_s1 + $0x1be8] sm:$0xff]  }
 0x350   :  { %13584 = vmatpush3.bf16.msra.mxu0 %v14791_v13 }
 0x351   :  { %13606 = vmatpush3.bf16.msra.mxu1 %v14792_v14  ;;  %13585 = vmatprep.subr.bf16.mxu0 %v14793_v15  ;;  %v14835_v15 = vld [vmem:[%s18347_s1 + $0x1b28] sm:$0xff]  }
 0x352   :  { %13607 = vmatprep.subr.bf16.mxu1 %v14794_v16 }
 0x354   :  { %13586 = vmatpush3.bf16.msra.mxu0 %v14795_v18 }
 0x355   :  { %13608 = vmatpush3.bf16.msra.mxu1 %v14796_v20  ;;  %13587 = vmatprep.subr.bf16.mxu0 %v14797_v24  ;;  %v14837_v20 = vld [vmem:[%s18347_s1 + $0x1b70] sm:$0xff]  }
 0x356   :  { %v13285_v17 = vpop.f32.mrb[76].mxu0  ;;  %13609 = vmatprep.subr.bf16.mxu1 %v14798_v26  ;;  %v14840_v24 = vld [vmem:[%s18347_s1 + $0x1bb0] sm:$0xff]   ;;  %v14842_v26 = vld [vmem:[%s18347_s1 + $0x1bf8] sm:$0xff]  }
 0x357   :  { %v13307_v19 = vpop.f32.mrb[76].mxu1  ;;  %v13286_v21 = vpop.f32.mrb[77].mxu0 }
 0x358   :  { %v13287_v22 = vadd.f32 %v13286_v21, %v13285_v17  ;;  %v13308_v23 = vpop.f32.mrb[77].mxu1  ;;  %v13288_v27 = vpop.f32.mrb[78].mxu0  ;;  %13588 = vmatpush3.bf16.msra.mxu0 %v14799_v30  ;;  %v14836_v17 = vld [vmem:[%s18347_s1 + $0x1ba8] sm:$0xff]  }
 0x359   :  { %v13309_v25 = vadd.f32 %v13308_v23, %v13307_v19  ;;  %v13310_v29 = vpop.f32.mrb[78].mxu1  ;;  %v13289_v32 = vpop.f32.mrb[79].mxu0  ;;  %13610 = vmatpush3.bf16.msra.mxu1 %v14800_v31  ;;  %13589 = vmatprep.subr.bf16.mxu0 %v14801_v35  ;;  %v14839_v23 = vld [vmem:[%s18347_s1 + $0x1b30] sm:$0xff]   ;;  %v14843_v27 = vld [vmem:[%s18347_s1 + $0x1b38] sm:$0xff]   ;;  %v14849_v35 = vld [vmem:[%s18347_s1 + $0x1c40] sm:$0xff]  }
 0x35a   :  { %v10271_v28 = vadd.f32 %v13287_v22, %v17684_v48  ;;  %v13311_v34 = vpop.f32.mrb[79].mxu1  ;;  %13611 = vmatprep.subr.bf16.mxu1 %v14802_v36  ;;  %v14813_v48 = vld [vmem:[%s18347_s1 + $0x1b40] sm:$0xff]   ;;  %v14838_v22 = vld [vmem:[%s18347_s1 + $0x1bf0] sm:$0xff]   ;;  %v67_v32 = vld [vmem:[%s18348_s0 + $0x1b8] sm:$0xff] }
 0x35b   :  { %v66_v29 = vld [vmem:[%s18348_s0 + $0x1b0] sm:$0xff]  ;;  %v11392_v34 = vcombine.high %v67_v32, %v67_v32  ;;  %v14850_v36 = vld [vmem:[%s18347_s1 + $0x1cc0] sm:$0xff]  }
 0x35c   :  { %v17789_v33 = vadd.f32 %v13309_v25, %v10271_v28  ;;  %13590 = vmatpush3.bf16.msra.mxu0 %v14803_v37  ;;  %v14841_v25 = vld [vmem:[%s18347_s1 + $0x1b78] sm:$0xff]   ;;  %v11389_v30 = vcombine.low %v66_v29, %v66_v29  ;;  %v11390_v31 = vcombine.high %v66_v29, %v66_v29  ;;  %v14851_v37 = vld [vmem:[%s18347_s1 + $0x1c00] sm:$0xff]   ;;  %v14893_v29 = vld [vmem:[%s18347_s1 + $0x1d50] sm:$0xff]  }
 0x35d   :  { %13612 = vmatpush3.bf16.msra.mxu1 %v14804_v38  ;;  %13591 = vmatprep.subr.bf16.mxu0 %v14805_v39  ;;  %v14844_v28 = vld [vmem:[%s18347_s1 + $0x1bb8] sm:$0xff]   ;;  %v14852_v38 = vld [vmem:[%s18347_s1 + $0x1c80] sm:$0xff]   ;;  %v14853_v39 = vld [vmem:[%s18347_s1 + $0x1c48] sm:$0xff]  }
 0x35e   :  { %13613 = vmatprep.subr.bf16.mxu1 %v14806_v40  ;;  %v14854_v40 = vld [vmem:[%s18347_s1 + $0x1cc8] sm:$0xff]  }
 0x360   :  { %13592 = vmatpush3.bf16.msra.mxu0 %v14807_v41  ;;  %v14855_v41 = vld [vmem:[%s18347_s1 + $0x1c08] sm:$0xff]  }
 0x361   :  { %13614 = vmatpush3.bf16.msra.mxu1 %v14808_v42  ;;  %13621 = vmatprep.subr.bf16.mxu0 %v14813_v48  ;;  %v14856_v42 = vld [vmem:[%s18347_s1 + $0x1c88] sm:$0xff]   ;;  %v14862_v48 = vld [vmem:[%s18347_s1 + $0x1cd8] sm:$0xff]  }
 0x362   :  { %13643 = vmatprep.subr.bf16.mxu1 %v14814_v50  ;;  %v14864_v50 = vld [vmem:[%s18347_s1 + $0x1c98] sm:$0xff]  }
 0x363   :  { %10829 = vmatmul.mubr.bf16.vlgmr.msra.gmra.mrb[104].mxu0 %v11385_v45  ;;  %v14859_v45 = vld [vmem:[%s18347_s1 + $0x1c10] sm:$0xff]  }
 0x364   :  { %10869 = vmatmul.mubr.bf16.vlgmr.msra.gmra.mrb[104].mxu1 %v11387_v47  ;;  %13622 = vmatpush3.bf16.msra.mxu0 %v14815_v51  ;;  %v14861_v47 = vld [vmem:[%s18347_s1 + $0x1c58] sm:$0xff]   ;;  %v14865_v51 = vld [vmem:[%s18347_s1 + $0x1c60] sm:$0xff]  }
 0x365   :  { %13644 = vmatpush3.bf16.msra.mxu1 %v14816_v52  ;;  %13623 = vmatprep.subr.bf16.mxu0 %v14817_v53  ;;  %v14866_v52 = vld [vmem:[%s18347_s1 + $0x1ce0] sm:$0xff]  }
 0x366   :  { %13645 = vmatprep.subr.bf16.mxu1 %v14818_v54  ;;  %10908 = vmatprep.mubr.bf16.mxu0 %v11390_v31  ;;  %v14867_v54 = vld [vmem:[%s18347_s1 + $0x1c20] sm:$0xff]   ;;  %v14895_v31 = vld [vmem:[%s18347_s1 + $0x1d10] sm:$0xff]  }
 0x367   :  { %10948 = vmatprep.mubr.bf16.mxu1 %v11392_v34  ;;  %v14898_v34 = vld [vmem:[%s18347_s1 + $0x1dd8] sm:$0xff]  }
 0x368   :  { %13624 = vmatpush3.bf16.msra.mxu0 %v14819_v55 }
 0x369   :  { %13646 = vmatpush3.bf16.msra.mxu1 %v14820_v56  ;;  %13625 = vmatprep.subr.bf16.mxu0 %v14821_v57  ;;  %v14868_v56 = vld [vmem:[%s18347_s1 + $0x1ca0] sm:$0xff]  }
 0x36a   :  { %13647 = vmatprep.subr.bf16.mxu1 %v14822_v58 }
 0x36c   :  { %13626 = vmatpush3.bf16.msra.mxu0 %v14823_v59  ;;  %v14869_v59 = vld [vmem:[%s18347_s1 + $0x1c68] sm:$0xff]  }
 0x36d   :  { %13648 = vmatpush3.bf16.msra.mxu1 %v14824_v60  ;;  %13627 = vmatprep.subr.bf16.mxu0 %v14825_v61 }
 0x36e   :  { %13649 = vmatprep.subr.bf16.mxu1 %v14826_v62  ;;  %v14870_v62 = vld [vmem:[%s18347_s1 + $0x1ce8] sm:$0xff]  }
 0x370   :  { %13628 = vmatpush3.bf16.msra.mxu0 %v14827_v63 }
 0x371   :  { %13650 = vmatpush3.bf16.msra.mxu1 %v14828_v0  ;;  %13629 = vmatprep.subr.bf16.mxu0 %v14829_v1  ;;  %v14871_v1 = vld [vmem:[%s18347_s1 + $0x1c28] sm:$0xff]  }
 0x372   :  { %13651 = vmatprep.subr.bf16.mxu1 %v14830_v2 }
 0x374   :  { %13630 = vmatpush3.bf16.msra.mxu0 %v14831_v4 }
 0x375   :  { %13652 = vmatpush3.bf16.msra.mxu1 %v14832_v6  ;;  %13631 = vmatprep.subr.bf16.mxu0 %v14833_v9  ;;  %v14873_v6 = vld [vmem:[%s18347_s1 + $0x1c70] sm:$0xff]  }
 0x376   :  { %v13329_v3 = vpop.f32.mrb[80].mxu0  ;;  %13653 = vmatprep.subr.bf16.mxu1 %v14834_v12  ;;  %v14875_v9 = vld [vmem:[%s18347_s1 + $0x1c30] sm:$0xff]   ;;  %v14878_v12 = vld [vmem:[%s18347_s1 + $0x1cf8] sm:$0xff]  }
 0x377   :  { %v13351_v5 = vpop.f32.mrb[80].mxu1  ;;  %v13330_v7 = vpop.f32.mrb[81].mxu0 }
 0x378   :  { %v13352_v8 = vpop.f32.mrb[81].mxu1  ;;  %v13331_v10 = vadd.f32 %v13330_v7, %v13329_v3  ;;  %v13332_v13 = vpop.f32.mrb[82].mxu0  ;;  %13632 = vmatpush3.bf16.msra.mxu0 %v14835_v15  ;;  %v14872_v3 = vld [vmem:[%s18347_s1 + $0x1ca8] sm:$0xff]   ;;  %v68_v15 = vld [vmem:[%s18348_s0 + $0x1c0] sm:$0xff] }
 0x379   :  { %v13353_v11 = vadd.f32 %v13352_v8, %v13351_v5  ;;  %v13354_v14 = vpop.f32.mrb[82].mxu1  ;;  %v13333_v18 = vpop.f32.mrb[83].mxu0  ;;  %13654 = vmatpush3.bf16.msra.mxu1 %v14836_v17  ;;  %13633 = vmatprep.subr.bf16.mxu0 %v14837_v20  ;;  %v14874_v8 = vld [vmem:[%s18347_s1 + $0x1cf0] sm:$0xff]   ;;  %v14879_v13 = vld [vmem:[%s18347_s1 + $0x1c38] sm:$0xff]   ;;  %v11393_v17 = vcombine.low %v68_v15, %v68_v15 }
 0x37a   :  { %v10351_v16 = vadd.f32 %v13331_v10, %v17789_v33  ;;  %v13355_v19 = vpop.f32.mrb[83].mxu1  ;;  %13655 = vmatprep.subr.bf16.mxu1 %v14838_v22  ;;  %v11391_v33 = vcombine.low %v67_v32, %v67_v32  ;;  %v14876_v10 = vld [vmem:[%s18347_s1 + $0x1cb0] sm:$0xff]   ;;  %v14880_v14 = vld [vmem:[%s18347_s1 + $0x1cb8] sm:$0xff]   ;;  %v11394_v18 = vcombine.high %v68_v15, %v68_v15  ;;  %v14886_v22 = vld [vmem:[%s18347_s1 + $0x1dc0] sm:$0xff]  }
 0x37b   :  { %v14896_v32 = vld [vmem:[%s18347_s1 + $0x1d90] sm:$0xff]  }
 0x37c   :  { %v17897_v21 = vadd.f32 %v13353_v11, %v10351_v16  ;;  %13634 = vmatpush3.bf16.msra.mxu0 %v14839_v23  ;;  %v14877_v11 = vld [vmem:[%s18347_s1 + $0x1c78] sm:$0xff]   ;;  %v69_v16 = vld [vmem:[%s18348_s0 + $0x1c8] sm:$0xff]  ;;  %v14887_v23 = vld [vmem:[%s18347_s1 + $0x1d00] sm:$0xff]  }
 0x37d   :  { %13656 = vmatpush3.bf16.msra.mxu1 %v14840_v24  ;;  %13635 = vmatprep.subr.bf16.mxu0 %v14841_v25  ;;  %v11395_v19 = vcombine.low %v69_v16, %v69_v16  ;;  %v11396_v20 = vcombine.high %v69_v16, %v69_v16  ;;  %v14888_v24 = vld [vmem:[%s18347_s1 + $0x1d80] sm:$0xff]   ;;  %v14889_v25 = vld [vmem:[%s18347_s1 + $0x1d48] sm:$0xff]   ;;  %v14929_v15 = vld [vmem:[%s18347_s1 + $0x1e50] sm:$0xff]  }
 0x37e   :  { %13657 = vmatprep.subr.bf16.mxu1 %v14842_v26  ;;  %v14890_v26 = vld [vmem:[%s18347_s1 + $0x1dc8] sm:$0xff]   ;;  %v14930_v16 = vld [vmem:[%s18347_s1 + $0x1ed0] sm:$0xff]  }
 0x380   :  { %13636 = vmatpush3.bf16.msra.mxu0 %v14843_v27  ;;  %v14891_v27 = vld [vmem:[%s18347_s1 + $0x1d08] sm:$0xff]  }
 0x381   :  { %13658 = vmatpush3.bf16.msra.mxu1 %v14844_v28  ;;  %13665 = vmatprep.subr.bf16.mxu0 %v14849_v35  ;;  %v14892_v28 = vld [vmem:[%s18347_s1 + $0x1d88] sm:$0xff]   ;;  %v14899_v35 = vld [vmem:[%s18347_s1 + $0x1d18] sm:$0xff]  }
 0x382   :  { %13687 = vmatprep.subr.bf16.mxu1 %v14850_v36  ;;  %v14900_v36 = vld [vmem:[%s18347_s1 + $0x1d98] sm:$0xff]  }
 0x383   :  { %10909 = vmatmul.mubr.bf16.vlgmr.msra.gmra.mrb[108].mxu0 %v11389_v30  ;;  %v14894_v30 = vld [vmem:[%s18347_s1 + $0x1dd0] sm:$0xff]  }
 0x384   :  { %10949 = vmatmul.mubr.bf16.vlgmr.msra.gmra.mrb[108].mxu1 %v11391_v33  ;;  %13666 = vmatpush3.bf16.msra.mxu0 %v14851_v37  ;;  %v14897_v33 = vld [vmem:[%s18347_s1 + $0x1d58] sm:$0xff]   ;;  %v14901_v37 = vld [vmem:[%s18347_s1 + $0x1d60] sm:$0xff]  }
 0x385   :  { %13688 = vmatpush3.bf16.msra.mxu1 %v14852_v38  ;;  %13667 = vmatprep.subr.bf16.mxu0 %v14853_v39  ;;  %v14902_v38 = vld [vmem:[%s18347_s1 + $0x1de0] sm:$0xff]  }
 0x386   :  { %13689 = vmatprep.subr.bf16.mxu1 %v14854_v40  ;;  %10988 = vmatprep.mubr.bf16.mxu0 %v11394_v18  ;;  %v14903_v39 = vld [vmem:[%s18347_s1 + $0x1d20] sm:$0xff]   ;;  %v14932_v18 = vld [vmem:[%s18347_s1 + $0x1e90] sm:$0xff]  }
 0x387   :  { %11028 = vmatprep.mubr.bf16.mxu1 %v11396_v20  ;;  %v14934_v20 = vld [vmem:[%s18347_s1 + $0x1ed8] sm:$0xff]  }
 0x388   :  { %13668 = vmatpush3.bf16.msra.mxu0 %v14855_v41  ;;  %v14904_v41 = vld [vmem:[%s18347_s1 + $0x1da0] sm:$0xff]  }
 0x389   :  { %13690 = vmatpush3.bf16.msra.mxu1 %v14856_v42  ;;  %13669 = vmatprep.subr.bf16.mxu0 %v14857_v43 }
 0x38a   :  { %13691 = vmatprep.subr.bf16.mxu1 %v14858_v44 }
 0x38c   :  { %13670 = vmatpush3.bf16.msra.mxu0 %v14859_v45 }
 0x38d   :  { %13692 = vmatpush3.bf16.msra.mxu1 %v14860_v46  ;;  %13671 = vmatprep.subr.bf16.mxu0 %v14861_v47  ;;  %v14905_v47 = vld [vmem:[%s18347_s1 + $0x1d68] sm:$0xff]  }
 0x38e   :  { %13693 = vmatprep.subr.bf16.mxu1 %v14862_v48 }
 0x390   :  { %13672 = vmatpush3.bf16.msra.mxu0 %v14863_v49  ;;  %v14906_v49 = vld [vmem:[%s18347_s1 + $0x1de8] sm:$0xff]  }
 0x391   :  { %13694 = vmatpush3.bf16.msra.mxu1 %v14864_v50  ;;  %13673 = vmatprep.subr.bf16.mxu0 %v14865_v51 }
 0x392   :  { %13695 = vmatprep.subr.bf16.mxu1 %v14866_v52  ;;  %v14907_v52 = vld [vmem:[%s18347_s1 + $0x1d28] sm:$0xff]  }
 0x394   :  { %13674 = vmatpush3.bf16.msra.mxu0 %v14867_v54  ;;  %v14908_v54 = vld [vmem:[%s18347_s1 + $0x1da8] sm:$0xff]  }
 0x395   :  { %13696 = vmatpush3.bf16.msra.mxu1 %v14868_v56  ;;  %13675 = vmatprep.subr.bf16.mxu0 %v14869_v59  ;;  %v14911_v59 = vld [vmem:[%s18347_s1 + $0x1d30] sm:$0xff]  }
 0x396   :  { %v13373_v53 = vpop.f32.mrb[84].mxu0  ;;  %13697 = vmatprep.subr.bf16.mxu1 %v14870_v62  ;;  %v14914_v62 = vld [vmem:[%s18347_s1 + $0x1df8] sm:$0xff]  }
 0x397   :  { %v13395_v55 = vpop.f32.mrb[84].mxu1  ;;  %v13374_v57 = vpop.f32.mrb[85].mxu0 }
 0x398   :  { %v13396_v58 = vpop.f32.mrb[85].mxu1  ;;  %v13375_v60 = vadd.f32 %v13374_v57, %v13373_v53  ;;  %v13376_v63 = vpop.f32.mrb[86].mxu0  ;;  %13676 = vmatpush3.bf16.msra.mxu0 %v14871_v1  ;;  %v14909_v57 = vld [vmem:[%s18347_s1 + $0x1d70] sm:$0xff]  }
 0x399   :  { %v13397_v61 = vadd.f32 %v13396_v58, %v13395_v55  ;;  %v13398_v0 = vpop.f32.mrb[86].mxu1  ;;  %v13377_v4 = vpop.f32.mrb[87].mxu0  ;;  %13698 = vmatpush3.bf16.msra.mxu1 %v14872_v3  ;;  %13677 = vmatprep.subr.bf16.mxu0 %v14873_v6  ;;  %v14910_v58 = vld [vmem:[%s18347_s1 + $0x1df0] sm:$0xff]   ;;  %v14915_v63 = vld [vmem:[%s18347_s1 + $0x1d38] sm:$0xff]  }
 0x39a   :  { %v10431_v2 = vadd.f32 %v13375_v60, %v17897_v21  ;;  %v13399_v5 = vpop.f32.mrb[87].mxu1  ;;  %13699 = vmatprep.subr.bf16.mxu1 %v14874_v8  ;;  %v14885_v21 = vld [vmem:[%s18347_s1 + $0x1d40] sm:$0xff]   ;;  %v14912_v60 = vld [vmem:[%s18347_s1 + $0x1db0] sm:$0xff]   ;;  %v14916_v0 = vld [vmem:[%s18347_s1 + $0x1db8] sm:$0xff]  }
 0x39b   :  { %v70_v1 = vld [vmem:[%s18348_s0 + $0x1d0] sm:$0xff]  ;;  %v14922_v8 = vld [vmem:[%s18347_s1 + $0x1ec0] sm:$0xff]  }
 0x39c   :  { %v18002_v7 = vadd.f32 %v13397_v61, %v10431_v2  ;;  %13678 = vmatpush3.bf16.msra.mxu0 %v14875_v9  ;;  %v14913_v61 = vld [vmem:[%s18347_s1 + $0x1d78] sm:$0xff]   ;;  %v11397_v3 = vcombine.low %v70_v1, %v70_v1  ;;  %v11398_v4 = vcombine.high %v70_v1, %v70_v1  ;;  %v14923_v9 = vld [vmem:[%s18347_s1 + $0x1e00] sm:$0xff]   ;;  %v14965_v1 = vld [vmem:[%s18347_s1 + $0x1f50] sm:$0xff]  }
 0x39d   :  { %13700 = vmatpush3.bf16.msra.mxu1 %v14876_v10  ;;  %13679 = vmatprep.subr.bf16.mxu0 %v14877_v11  ;;  %v71_v2 = vld [vmem:[%s18348_s0 + $0x1d8] sm:$0xff]  ;;  %v14924_v10 = vld [vmem:[%s18347_s1 + $0x1e80] sm:$0xff]   ;;  %v14925_v11 = vld [vmem:[%s18347_s1 + $0x1e48] sm:$0xff]  }
 0x39e   :  { %13701 = vmatprep.subr.bf16.mxu1 %v14878_v12  ;;  %v11399_v5 = vcombine.low %v71_v2, %v71_v2  ;;  %v11400_v6 = vcombine.high %v71_v2, %v71_v2  ;;  %v14926_v12 = vld [vmem:[%s18347_s1 + $0x1ec8] sm:$0xff]   ;;  %v14966_v2 = vld [vmem:[%s18347_s1 + $0x1fd0] sm:$0xff]  }
 0x3a0   :  { %13680 = vmatpush3.bf16.msra.mxu0 %v14879_v13  ;;  %v14927_v13 = vld [vmem:[%s18347_s1 + $0x1e08] sm:$0xff]  }
 0x3a1   :  { %13702 = vmatpush3.bf16.msra.mxu1 %v14880_v14  ;;  %13709 = vmatprep.subr.bf16.mxu0 %v14885_v21  ;;  %v14928_v14 = vld [vmem:[%s18347_s1 + $0x1e88] sm:$0xff]   ;;  %v14935_v21 = vld [vmem:[%s18347_s1 + $0x1e18] sm:$0xff]  }
 0x3a2   :  { %13731 = vmatprep.subr.bf16.mxu1 %v14886_v22  ;;  %v14936_v22 = vld [vmem:[%s18347_s1 + $0x1e98] sm:$0xff]  }
 0x3a3   :  { %10989 = vmatmul.mubr.bf16.vlgmr.msra.gmra.mrb[112].mxu0 %v11393_v17  ;;  %v14931_v17 = vld [vmem:[%s18347_s1 + $0x1e10] sm:$0xff]  }
 0x3a4   :  { %11029 = vmatmul.mubr.bf16.vlgmr.msra.gmra.mrb[112].mxu1 %v11395_v19  ;;  %13710 = vmatpush3.bf16.msra.mxu0 %v14887_v23  ;;  %v14933_v19 = vld [vmem:[%s18347_s1 + $0x1e58] sm:$0xff]   ;;  %v14937_v23 = vld [vmem:[%s18347_s1 + $0x1e60] sm:$0xff]  }
 0x3a5   :  { %13732 = vmatpush3.bf16.msra.mxu1 %v14888_v24  ;;  %13711 = vmatprep.subr.bf16.mxu0 %v14889_v25  ;;  %v14938_v24 = vld [vmem:[%s18347_s1 + $0x1ee0] sm:$0xff]  }
 0x3a6   :  { %13733 = vmatprep.subr.bf16.mxu1 %v14890_v26  ;;  %11068 = vmatprep.mubr.bf16.mxu0 %v11398_v4  ;;  %v14939_v26 = vld [vmem:[%s18347_s1 + $0x1e20] sm:$0xff]   ;;  %v14968_v4 = vld [vmem:[%s18347_s1 + $0x1f90] sm:$0xff]  }
 0x3a7   :  { %11108 = vmatprep.mubr.bf16.mxu1 %v11400_v6  ;;  %v14970_v6 = vld [vmem:[%s18347_s1 + $0x1fd8] sm:$0xff]  }
 0x3a8   :  { %13712 = vmatpush3.bf16.msra.mxu0 %v14891_v27 }
 0x3a9   :  { %13734 = vmatpush3.bf16.msra.mxu1 %v14892_v28  ;;  %13713 = vmatprep.subr.bf16.mxu0 %v14893_v29  ;;  %v14940_v28 = vld [vmem:[%s18347_s1 + $0x1ea0] sm:$0xff]  }
 0x3aa   :  { %13735 = vmatprep.subr.bf16.mxu1 %v14894_v30 }
 0x3ac   :  { %13714 = vmatpush3.bf16.msra.mxu0 %v14895_v31 }
 0x3ad   :  { %13736 = vmatpush3.bf16.msra.mxu1 %v14896_v32  ;;  %13715 = vmatprep.subr.bf16.mxu0 %v14897_v33  ;;  %v14941_v32 = vld [vmem:[%s18347_s1 + $0x1e68] sm:$0xff]  }
 0x3ae   :  { %13737 = vmatprep.subr.bf16.mxu1 %v14898_v34  ;;  %v14942_v34 = vld [vmem:[%s18347_s1 + $0x1ee8] sm:$0xff]  }
 0x3b0   :  { %13716 = vmatpush3.bf16.msra.mxu0 %v14899_v35 }
 0x3b1   :  { %13738 = vmatpush3.bf16.msra.mxu1 %v14900_v36  ;;  %13717 = vmatprep.subr.bf16.mxu0 %v14901_v37 }
 0x3b2   :  { %13739 = vmatprep.subr.bf16.mxu1 %v14902_v38  ;;  %v14943_v38 = vld [vmem:[%s18347_s1 + $0x1e28] sm:$0xff]  }
 0x3b4   :  { %13718 = vmatpush3.bf16.msra.mxu0 %v14903_v39  ;;  %v14944_v39 = vld [vmem:[%s18347_s1 + $0x1ea8] sm:$0xff]  }
 0x3b5   :  { %13740 = vmatpush3.bf16.msra.mxu1 %v14904_v41  ;;  %13719 = vmatprep.subr.bf16.mxu0 %v14905_v47  ;;  %v14949_v47 = vld [vmem:[%s18347_s1 + $0x1e78] sm:$0xff]  }
 0x3b6   :  { %v13417_v40 = vpop.f32.mrb[88].mxu0  ;;  %13741 = vmatprep.subr.bf16.mxu1 %v14906_v49  ;;  %v14951_v49 = vld [vmem:[%s18347_s1 + $0x1e38] sm:$0xff]  }
 0x3b7   :  { %v13439_v42 = vpop.f32.mrb[88].mxu1  ;;  %v13418_v43 = vpop.f32.mrb[89].mxu0 }
 0x3b8   :  { %v13440_v44 = vpop.f32.mrb[89].mxu1  ;;  %v13419_v45 = vadd.f32 %v13418_v43, %v13417_v40  ;;  %v13420_v48 = vpop.f32.mrb[90].mxu0  ;;  %13720 = vmatpush3.bf16.msra.mxu0 %v14907_v52  ;;  %v14945_v43 = vld [vmem:[%s18347_s1 + $0x1e70] sm:$0xff]   ;;  %v73_v52 = vld [vmem:[%s18348_s0 + $0x1e8] sm:$0xff] }
 0x3b9   :  { %v13441_v46 = vadd.f32 %v13440_v44, %v13439_v42  ;;  %v13442_v50 = vpop.f32.mrb[90].mxu1  ;;  %v13421_v53 = vpop.f32.mrb[91].mxu0  ;;  %13742 = vmatpush3.bf16.msra.mxu1 %v14908_v54  ;;  %13721 = vmatprep.subr.bf16.mxu0 %v14909_v57  ;;  %v14946_v44 = vld [vmem:[%s18347_s1 + $0x1ef0] sm:$0xff]   ;;  %v14950_v48 = vld [vmem:[%s18347_s1 + $0x1ef8] sm:$0xff]   ;;  %v11404_v57 = vcombine.high %v73_v52, %v73_v52 }
 0x3ba   :  { %v10511_v51 = vadd.f32 %v13419_v45, %v18002_v7  ;;  %v13443_v55 = vpop.f32.mrb[91].mxu1  ;;  %13743 = vmatprep.subr.bf16.mxu1 %v14910_v58  ;;  %v14921_v7 = vld [vmem:[%s18347_s1 + $0x1e40] sm:$0xff]   ;;  %v14947_v45 = vld [vmem:[%s18347_s1 + $0x1e30] sm:$0xff]   ;;  %v14952_v50 = vld [vmem:[%s18347_s1 + $0x1eb8] sm:$0xff]  }
 0x3bb   :  { %v11403_v55 = vcombine.low %v73_v52, %v73_v52  ;;  %v14958_v58 = vld [vmem:[%s18347_s1 + $0x1fc0] sm:$0xff]  }
 0x3bc   :  { %v18104_v56 = vadd.f32 %v13441_v46, %v10511_v51  ;;  %13722 = vmatpush3.bf16.msra.mxu0 %v14911_v59  ;;  %v14948_v46 = vld [vmem:[%s18347_s1 + $0x1eb0] sm:$0xff]   ;;  %v72_v51 = vld [vmem:[%s18348_s0 + $0x1e0] sm:$0xff] }
 0x3bd   :  { %13744 = vmatpush3.bf16.msra.mxu1 %v14912_v60  ;;  %13723 = vmatprep.subr.bf16.mxu0 %v14913_v61  ;;  %v11401_v53 = vcombine.low %v72_v51, %v72_v51  ;;  %v11402_v54 = vcombine.high %v72_v51, %v72_v51  ;;  %v14959_v59 = vld [vmem:[%s18347_s1 + $0x1f00] sm:$0xff]   ;;  %v14961_v61 = vld [vmem:[%s18347_s1 + $0x1f48] sm:$0xff]  }
 0x3be   :  { %13745 = vmatprep.subr.bf16.mxu1 %v14914_v62  ;;  %v14960_v60 = vld [vmem:[%s18347_s1 + $0x1f80] sm:$0xff]   ;;  %v14962_v62 = vld [vmem:[%s18347_s1 + $0x1fc8] sm:$0xff]  }
 0x3c0   :  { %13724 = vmatpush3.bf16.msra.mxu0 %v14915_v63  ;;  %v14963_v63 = vld [vmem:[%s18347_s1 + $0x1f08] sm:$0xff]  }
 0x3c1   :  { %13746 = vmatpush3.bf16.msra.mxu1 %v14916_v0  ;;  %13753 = vmatprep.subr.bf16.mxu0 %v14921_v7  ;;  %v14964_v0 = vld [vmem:[%s18347_s1 + $0x1f88] sm:$0xff]   ;;  %v14971_v7 = vld [vmem:[%s18347_s1 + $0x1f18] sm:$0xff]  }
 0x3c2   :  { %13775 = vmatprep.subr.bf16.mxu1 %v14922_v8  ;;  %v14972_v8 = vld [vmem:[%s18347_s1 + $0x1f98] sm:$0xff]  }
 0x3c3   :  { %11069 = vmatmul.mubr.bf16.vlgmr.msra.gmra.mrb[116].mxu0 %v11397_v3  ;;  %v14967_v3 = vld [vmem:[%s18347_s1 + $0x1f10] sm:$0xff]  }
 0x3c4   :  { %11109 = vmatmul.mubr.bf16.vlgmr.msra.gmra.mrb[116].mxu1 %v11399_v5  ;;  %13754 = vmatpush3.bf16.msra.mxu0 %v14923_v9  ;;  %v14969_v5 = vld [vmem:[%s18347_s1 + $0x1f58] sm:$0xff]   ;;  %v14973_v9 = vld [vmem:[%s18347_s1 + $0x1f60] sm:$0xff]  }
 0x3c5   :  { %13776 = vmatpush3.bf16.msra.mxu1 %v14924_v10  ;;  %13755 = vmatprep.subr.bf16.mxu0 %v14925_v11  ;;  %v14974_v10 = vld [vmem:[%s18347_s1 + $0x1fe0] sm:$0xff]  }
 0x3c6   :  { %13777 = vmatprep.subr.bf16.mxu1 %v14926_v12  ;;  %11148 = vmatprep.mubr.bf16.mxu0 %v11402_v54  ;;  %v14975_v12 = vld [vmem:[%s18347_s1 + $0x1f20] sm:$0xff]  }
 0x3c7   :  { %11188 = vmatprep.mubr.bf16.mxu1 %v11404_v57 }
 0x3c8   :  { %13756 = vmatpush3.bf16.msra.mxu0 %v14927_v13 }
 0x3c9   :  { %13778 = vmatpush3.bf16.msra.mxu1 %v14928_v14  ;;  %13757 = vmatprep.subr.bf16.mxu0 %v14929_v15  ;;  %v14976_v14 = vld [vmem:[%s18347_s1 + $0x1fa0] sm:$0xff]  }
 0x3ca   :  { %13779 = vmatprep.subr.bf16.mxu1 %v14930_v16 }
 0x3cc   :  { %13758 = vmatpush3.bf16.msra.mxu0 %v14931_v17  ;;  %v14977_v17 = vld [vmem:[%s18347_s1 + $0x1f68] sm:$0xff]  }
 0x3cd   :  { %13780 = vmatpush3.bf16.msra.mxu1 %v14932_v18  ;;  %13759 = vmatprep.subr.bf16.mxu0 %v14933_v19 }
 0x3ce   :  { %13781 = vmatprep.subr.bf16.mxu1 %v14934_v20  ;;  %v14978_v20 = vld [vmem:[%s18347_s1 + $0x1fe8] sm:$0xff]  }
 0x3d0   :  { %13760 = vmatpush3.bf16.msra.mxu0 %v14935_v21 }
 0x3d1   :  { %13782 = vmatpush3.bf16.msra.mxu1 %v14936_v22  ;;  %13761 = vmatprep.subr.bf16.mxu0 %v14937_v23  ;;  %v14979_v23 = vld [vmem:[%s18347_s1 + $0x1f28] sm:$0xff]  }
 0x3d2   :  { %13783 = vmatprep.subr.bf16.mxu1 %v14938_v24 }
 0x3d4   :  { %13762 = vmatpush3.bf16.msra.mxu0 %v14939_v26 }
 0x3d5   :  { %13784 = vmatpush3.bf16.msra.mxu1 %v14940_v28  ;;  %13763 = vmatprep.subr.bf16.mxu0 %v14941_v32  ;;  %v14981_v28 = vld [vmem:[%s18347_s1 + $0x1f70] sm:$0xff]  }
 0x3d6   :  { %v13461_v25 = vpop.f32.mrb[92].mxu0  ;;  %13785 = vmatprep.subr.bf16.mxu1 %v14942_v34  ;;  %v14984_v32 = vld [vmem:[%s18347_s1 + $0x1fb0] sm:$0xff]   ;;  %v14986_v34 = vld [vmem:[%s18347_s1 + $0x1ff8] sm:$0xff]  }
 0x3d7   :  { %v13483_v27 = vpop.f32.mrb[92].mxu1  ;;  %v13462_v29 = vpop.f32.mrb[93].mxu0 }
 0x3d8   :  { %v13463_v30 = vadd.f32 %v13462_v29, %v13461_v25  ;;  %v13484_v31 = vpop.f32.mrb[93].mxu1  ;;  %v13464_v35 = vpop.f32.mrb[94].mxu0  ;;  %13764 = vmatpush3.bf16.msra.mxu0 %v14943_v38  ;;  %v14980_v25 = vld [vmem:[%s18347_s1 + $0x1fa8] sm:$0xff]  }
 0x3d9   :  { %v13485_v33 = vadd.f32 %v13484_v31, %v13483_v27  ;;  %v13486_v37 = vpop.f32.mrb[94].mxu1  ;;  %v13465_v40 = vpop.f32.mrb[95].mxu0  ;;  %13786 = vmatpush3.bf16.msra.mxu1 %v14944_v39  ;;  %13765 = vmatprep.subr.bf16.mxu0 %v14945_v43  ;;  %v14983_v31 = vld [vmem:[%s18347_s1 + $0x1f30] sm:$0xff]   ;;  %v14987_v35 = vld [vmem:[%s18347_s1 + $0x1f38] sm:$0xff]  }
 0x3da   :  { %v10591_v36 = vadd.f32 %v13463_v30, %v18104_v56  ;;  %v13487_v42 = vpop.f32.mrb[95].mxu1  ;;  %13787 = vmatprep.subr.bf16.mxu1 %v14946_v44  ;;  %v14957_v56 = vld [vmem:[%s18347_s1 + $0x1f40] sm:$0xff]   ;;  %v14982_v30 = vld [vmem:[%s18347_s1 + $0x1ff0] sm:$0xff]   ;;  %v75_v40 = vld [vmem:[%s18348_s0 + $0x1f8] sm:$0xff] }
 0x3db   :  { %v74_v37 = vld [vmem:[%s18348_s0 + $0x1f0] sm:$0xff]  ;;  %v11408_v42 = vcombine.high %v75_v40, %v75_v40 }
 0x3dc   :  { %v18209_v41 = vadd.f32 %v13485_v33, %v10591_v36  ;;  %13766 = vmatpush3.bf16.msra.mxu0 %v14947_v45  ;;  %v14985_v33 = vld [vmem:[%s18347_s1 + $0x1f78] sm:$0xff]   ;;  %v11405_v38 = vcombine.low %v74_v37, %v74_v37  ;;  %v11406_v39 = vcombine.high %v74_v37, %v74_v37 }
 0x3dd   :  { %13788 = vmatpush3.bf16.msra.mxu1 %v14948_v46  ;;  %13767 = vmatprep.subr.bf16.mxu0 %v14949_v47  ;;  %v14988_v36 = vld [vmem:[%s18347_s1 + $0x1fb8] sm:$0xff]  }
 0x3de   :  { %13789 = vmatprep.subr.bf16.mxu1 %v14950_v48 }
 0x3e0   :  { %13768 = vmatpush3.bf16.msra.mxu0 %v14951_v49 }
 0x3e1   :  { %13790 = vmatpush3.bf16.msra.mxu1 %v14952_v50  ;;  %13797 = vmatprep.subr.bf16.mxu0 %v14957_v56 }
 0x3e2   :  { %13819 = vmatprep.subr.bf16.mxu1 %v14958_v58 }
 0x3e3   :  { %11149 = vmatmul.mubr.bf16.vlgmr.msra.gmra.mrb[120].mxu0 %v11401_v53 }
 0x3e4   :  { %11189 = vmatmul.mubr.bf16.vlgmr.msra.gmra.mrb[120].mxu1 %v11403_v55  ;;  %13798 = vmatpush3.bf16.msra.mxu0 %v14959_v59 }
 0x3e5   :  { %13820 = vmatpush3.bf16.msra.mxu1 %v14960_v60  ;;  %13799 = vmatprep.subr.bf16.mxu0 %v14961_v61 }
 0x3e6   :  { %13821 = vmatprep.subr.bf16.mxu1 %v14962_v62  ;;  %11228 = vmatprep.mubr.bf16.mxu0 %v11406_v39 }
 0x3e7   :  { %11268 = vmatprep.mubr.bf16.mxu1 %v11408_v42 }
 0x3e8   :  { %13800 = vmatpush3.bf16.msra.mxu0 %v14963_v63 }
 0x3e9   :  { %13822 = vmatpush3.bf16.msra.mxu1 %v14964_v0  ;;  %13801 = vmatprep.subr.bf16.mxu0 %v14965_v1 }
 0x3ea   :  { %13823 = vmatprep.subr.bf16.mxu1 %v14966_v2 }
 0x3ec   :  { %13802 = vmatpush3.bf16.msra.mxu0 %v14967_v3 }
 0x3ed   :  { %13824 = vmatpush3.bf16.msra.mxu1 %v14968_v4  ;;  %13803 = vmatprep.subr.bf16.mxu0 %v14969_v5 }
 0x3ee   :  { %13825 = vmatprep.subr.bf16.mxu1 %v14970_v6 }
 0x3f0   :  { %13804 = vmatpush3.bf16.msra.mxu0 %v14971_v7 }
 0x3f1   :  { %13826 = vmatpush3.bf16.msra.mxu1 %v14972_v8  ;;  %13805 = vmatprep.subr.bf16.mxu0 %v14973_v9 }
 0x3f2   :  { %13827 = vmatprep.subr.bf16.mxu1 %v14974_v10 }
 0x3f4   :  { %13806 = vmatpush3.bf16.msra.mxu0 %v14975_v12 }
 0x3f5   :  { %13828 = vmatpush3.bf16.msra.mxu1 %v14976_v14  ;;  %13807 = vmatprep.subr.bf16.mxu0 %v14977_v17 }
 0x3f6   :  { %v13505_v11 = vpop.f32.mrb[96].mxu0  ;;  %13829 = vmatprep.subr.bf16.mxu1 %v14978_v20 }
 0x3f7   :  { %v13527_v13 = vpop.f32.mrb[96].mxu1  ;;  %v13506_v15 = vpop.f32.mrb[97].mxu0 }
 0x3f8   :  { %v13528_v16 = vpop.f32.mrb[97].mxu1  ;;  %v13507_v18 = vadd.f32 %v13506_v15, %v13505_v11  ;;  %v13508_v21 = vpop.f32.mrb[98].mxu0  ;;  %13808 = vmatpush3.bf16.msra.mxu0 %v14979_v23 }
 0x3f9   :  { %v13529_v19 = vadd.f32 %v13528_v16, %v13527_v13  ;;  %v13530_v22 = vpop.f32.mrb[98].mxu1  ;;  %v13509_v26 = vpop.f32.mrb[99].mxu0  ;;  %13830 = vmatpush3.bf16.msra.mxu1 %v14980_v25  ;;  %13809 = vmatprep.subr.bf16.mxu0 %v14981_v28 }
 0x3fa   :  { %v10671_v24 = vadd.f32 %v13507_v18, %v18209_v41  ;;  %v13531_v27 = vpop.f32.mrb[99].mxu1  ;;  %13831 = vmatprep.subr.bf16.mxu1 %v14982_v30  ;;  %v11407_v41 = vcombine.low %v75_v40, %v75_v40 }
 0x3fc   :  { %v10711_v29 = vadd.f32 %v13529_v19, %v10671_v24  ;;  %13810 = vmatpush3.bf16.msra.mxu0 %v14983_v31 }
 0x3fd   :  { %13832 = vmatpush3.bf16.msra.mxu1 %v14984_v32  ;;  %13811 = vmatprep.subr.bf16.mxu0 %v14985_v33 }
 0x3fe   :  { %13833 = vmatprep.subr.bf16.mxu1 %v14986_v34 }
 0x400   :  { %13812 = vmatpush3.bf16.msra.mxu0 %v14987_v35 }
 0x401   :  { %13834 = vmatpush3.bf16.msra.mxu1 %v14988_v36 }
 0x403   :  { %11229 = vmatmul.mubr.bf16.vlgmr.msra.gmra.mrb[124].mxu0 %v11405_v38 }
 0x404   :  { %11269 = vmatmul.mubr.bf16.vlgmr.msra.gmra.mrb[124].mxu1 %v11407_v41 }
 0x416   :  { %v13549_v43 = vpop.f32.mrb[100].mxu0 }
 0x417   :  { %v13571_v44 = vpop.f32.mrb[100].mxu1  ;;  %v13550_v45 = vpop.f32.mrb[101].mxu0 }
 0x418   :  { %v13551_v46 = vadd.f32 %v13550_v45, %v13549_v43  ;;  %v13572_v47 = vpop.f32.mrb[101].mxu1  ;;  %v13552_v48 = vpop.f32.mrb[102].mxu0 }
 0x419   :  { %v13573_v49 = vadd.f32 %v13572_v47, %v13571_v44  ;;  %v13574_v50 = vpop.f32.mrb[102].mxu1  ;;  %v13553_v51 = vpop.f32.mrb[103].mxu0 }
 0x41a   :  { %v10751_v52 = vadd.f32 %v13551_v46, %v10711_v29  ;;  %v13575_v53 = vpop.f32.mrb[103].mxu1 }
 0x41c   :  { %v10791_v54 = vadd.f32 %v13573_v49, %v10751_v52 }
 0x436   :  { %v13593_v55 = vpop.f32.mrb[104].mxu0 }
 0x437   :  { %v13615_v56 = vpop.f32.mrb[104].mxu1  ;;  %v13594_v57 = vpop.f32.mrb[105].mxu0 }
 0x438   :  { %v13595_v58 = vadd.f32 %v13594_v57, %v13593_v55  ;;  %v13616_v59 = vpop.f32.mrb[105].mxu1  ;;  %v13596_v60 = vpop.f32.mrb[106].mxu0 }
 0x439   :  { %v13617_v61 = vadd.f32 %v13616_v59, %v13615_v56  ;;  %v13618_v62 = vpop.f32.mrb[106].mxu1  ;;  %v13597_v63 = vpop.f32.mrb[107].mxu0 }
 0x43a   :  { %v10831_v0 = vadd.f32 %v13595_v58, %v10791_v54  ;;  %v13619_v1 = vpop.f32.mrb[107].mxu1 }
 0x43c   :  { %v10871_v2 = vadd.f32 %v13617_v61, %v10831_v0 }
 0x456   :  { %v13637_v3 = vpop.f32.mrb[108].mxu0 }
 0x457   :  { %v13659_v4 = vpop.f32.mrb[108].mxu1  ;;  %v13638_v5 = vpop.f32.mrb[109].mxu0 }
 0x458   :  { %v13660_v6 = vpop.f32.mrb[109].mxu1  ;;  %v13639_v7 = vadd.f32 %v13638_v5, %v13637_v3  ;;  %v13640_v9 = vpop.f32.mrb[110].mxu0 }
 0x459   :  { %v13661_v8 = vadd.f32 %v13660_v6, %v13659_v4  ;;  %v13662_v10 = vpop.f32.mrb[110].mxu1  ;;  %v13641_v11 = vpop.f32.mrb[111].mxu0 }
 0x45a   :  { %v13663_v12 = vpop.f32.mrb[111].mxu1  ;;  %v10911_v13 = vadd.f32 %v13639_v7, %v10871_v2 }
 0x45c   :  { %v10951_v14 = vadd.f32 %v13661_v8, %v10911_v13 }
 0x476   :  { %v13681_v15 = vpop.f32.mrb[112].mxu0 }
 0x477   :  { %v13703_v16 = vpop.f32.mrb[112].mxu1  ;;  %v13682_v17 = vpop.f32.mrb[113].mxu0 }
 0x478   :  { %v13683_v18 = vadd.f32 %v13682_v17, %v13681_v15  ;;  %v13704_v19 = vpop.f32.mrb[113].mxu1  ;;  %v13684_v20 = vpop.f32.mrb[114].mxu0 }
 0x479   :  { %v13705_v21 = vadd.f32 %v13704_v19, %v13703_v16  ;;  %v13706_v22 = vpop.f32.mrb[114].mxu1  ;;  %v13685_v23 = vpop.f32.mrb[115].mxu0 }
 0x47a   :  { %v10991_v24 = vadd.f32 %v13683_v18, %v10951_v14  ;;  %v13707_v25 = vpop.f32.mrb[115].mxu1 }
 0x47c   :  { %v11031_v26 = vadd.f32 %v13705_v21, %v10991_v24 }
 0x496   :  { %v13725_v27 = vpop.f32.mrb[116].mxu0 }
 0x497   :  { %v13747_v28 = vpop.f32.mrb[116].mxu1  ;;  %v13726_v29 = vpop.f32.mrb[117].mxu0 }
 0x498   :  { %v13727_v30 = vadd.f32 %v13726_v29, %v13725_v27  ;;  %v13748_v31 = vpop.f32.mrb[117].mxu1  ;;  %v13728_v32 = vpop.f32.mrb[118].mxu0 }
 0x499   :  { %v13749_v33 = vadd.f32 %v13748_v31, %v13747_v28  ;;  %v13750_v34 = vpop.f32.mrb[118].mxu1  ;;  %v13729_v35 = vpop.f32.mrb[119].mxu0 }
 0x49a   :  { %v11071_v36 = vadd.f32 %v13727_v30, %v11031_v26  ;;  %v13751_v37 = vpop.f32.mrb[119].mxu1 }
 0x49c   :  { %v11111_v38 = vadd.f32 %v13749_v33, %v11071_v36 }
 0x4b6   :  { %v13769_v39 = vpop.f32.mrb[120].mxu0 }
 0x4b7   :  { %v13791_v40 = vpop.f32.mrb[120].mxu1  ;;  %v13770_v41 = vpop.f32.mrb[121].mxu0 }
 0x4b8   :  { %v13771_v42 = vadd.f32 %v13770_v41, %v13769_v39  ;;  %v13792_v43 = vpop.f32.mrb[121].mxu1  ;;  %v13772_v44 = vpop.f32.mrb[122].mxu0 }
 0x4b9   :  { %v13793_v45 = vadd.f32 %v13792_v43, %v13791_v40  ;;  %v13794_v46 = vpop.f32.mrb[122].mxu1  ;;  %v13773_v47 = vpop.f32.mrb[123].mxu0 }
 0x4ba   :  { %v11151_v48 = vadd.f32 %v13771_v42, %v11111_v38  ;;  %v13795_v49 = vpop.f32.mrb[123].mxu1 }
 0x4bc   :  { %v11191_v50 = vadd.f32 %v13793_v45, %v11151_v48 }
 0x4d6   :  { %v13813_v51 = vpop.f32.mrb[124].mxu0 }
 0x4d7   :  { %v13835_v52 = vpop.f32.mrb[124].mxu1  ;;  %v13814_v53 = vpop.f32.mrb[125].mxu0 }
 0x4d8   :  { %v13836_v54 = vpop.f32.mrb[125].mxu1  ;;  %v13815_v55 = vadd.f32 %v13814_v53, %v13813_v51  ;;  %v13816_v57 = vpop.f32.mrb[126].mxu0 }
 0x4d9   :  { %v13837_v56 = vadd.f32 %v13836_v54, %v13835_v52  ;;  %v13838_v58 = vpop.f32.mrb[126].mxu1  ;;  %v13817_v59 = vpop.f32.mrb[127].mxu0 }
 0x4da   :  { %v13839_v60 = vpop.f32.mrb[127].mxu1  ;;  %v11231_v61 = vadd.f32 %v13815_v55, %v11191_v50 }
 0x4dc   :  { %v11271_v62 = vadd.f32 %v13837_v56, %v11231_v61 }
 0x4de   :  { %11276 = vst [vmem:[%s18349_s2] sm:$0xff] %v11271_v62 }

</bundles_post_ra>
